<compile_context>
chip_gen: v6e
topology: v6e:2x2x1
jax: 0.10.0
libtpu: 0.0.40
codegen_flags: <defaults>
</compile_context>

<pallas_src>
import numpy as np
import jax
import jax.numpy as jnp
from jax.experimental import pallas as pl
from jax.experimental.pallas import tpu as pltpu

NUM_INPUT = 6000     # 75 * 80 preprocessed Pong frame
HIDDEN = 512
NUM_ACTION = 2
K_PAD = 6144         # 6000 padded up to a multiple of 128 (zero padding, exact)
ACTION_SPACE = jnp.array([0, 1], dtype=jnp.int32)


def state_to_tensor(I):
    """Karpathy-style Pong preprocessing fused with the kernel's pad + bf16 cast.

    210x160x3 uint8 -> (1, K_PAD) bf16.  Values are binary {0, 1} so the bf16 cast
    is exact; columns [6000:6144] are zero padding (exact, since the matching W1
    rows are zero).  An all-zero frame reproduces the original `I is None` branch.
    """
    I = I[35:185]
    I = I[::2, ::2, 0]
    I = jnp.where((I == 144) | (I == 109), 0, I)
    x = (I != 0).astype(jnp.bfloat16).reshape(1, NUM_INPUT)
    return jnp.pad(x, ((0, 0), (0, K_PAD - NUM_INPUT)))


def mlp_kernel(x_ref, w1_ref, b1_ref, w2_ref, b2_ref, probs_ref):
    """probs = softmax(relu(Linear2(relu(Linear1(x))))) in one kernel invocation.

    Grid-free: the 6.3 MB bf16 W1 is DMA'd into VMEM once per call and the tiny
    compute runs on it directly -- the kernel is purely HBM-bound on the W1 stream,
    so K-tiling / accumulator scratch / pl.when phases were pure overhead.
    x / W1 tiles are bf16 (x is binary, exact); the MXU accumulates in f32.
    """
    h = jnp.dot(x_ref[...], w1_ref[...], preferred_element_type=jnp.float32)
    h = jnp.maximum(h + b1_ref[...], 0.0)                                   # Linear1 + ReLU
    logits = jnp.dot(h, w2_ref[...],
                     preferred_element_type=jnp.float32) + b2_ref[...]      # Linear2
    z = jnp.maximum(logits, 0.0)                                            # F.relu(self.layers(x))
    m = jnp.max(z, axis=-1, keepdims=True)
    e = jnp.exp(z - m)
    # Exact division (not approx reciprocal): probabilities must sum to 1 for sampling.
    probs_ref[...] = e / jnp.sum(e, axis=-1, keepdims=True)                 # F.softmax(..., dim=1)


def reinforce_probs(x, w1p, b1, w2, b2):
    """x: (B, K_PAD) bf16 (binary, zero-padded frames) -> (B, 2) f32 probabilities.

    Works for any small batch B via full-array blocks; batching frames amortizes
    the W1 HBM stream, which is essentially 100% of kernel time.
    """
    B = x.shape[0]
    return pl.pallas_call(
        mlp_kernel,
        out_shape=jax.ShapeDtypeStruct((B, NUM_ACTION), jnp.float32),
        in_specs=[
            pl.BlockSpec((B, K_PAD), lambda: (0, 0)),              # x (bf16)
            pl.BlockSpec((K_PAD, HIDDEN), lambda: (0, 0)),         # W1 (bf16, pre-padded)
            pl.BlockSpec((1, HIDDEN), lambda: (0, 0)),             # b1
            pl.BlockSpec((HIDDEN, NUM_ACTION), lambda: (0, 0)),    # W2
            pl.BlockSpec((1, NUM_ACTION), lambda: (0, 0)),         # b2
        ],
        out_specs=pl.BlockSpec((B, NUM_ACTION), lambda: (0, 0)),
        compiler_params=pltpu.CompilerParams(
            vmem_limit_bytes=32 << 20,   # ~6.5 MB actual footprint; fits v7x's 64 MiB VMEM
        ),
    )(x, w1p, b1.reshape(1, HIDDEN), w2, b2.reshape(1, NUM_ACTION))


@jax.jit
def _policy_step(frame, w1p, b1, w2, b2, action_key):
    """Whole per-frame path in one jit: preprocess -> Pallas MLP -> sample -> log-prob."""
    x = state_to_tensor(frame)
    probs = reinforce_probs(x, w1p, b1, w2, b2)
    p = probs[0]
    # np.random.choice(ACTION_SPACE, p=probs) equivalent, deterministic via a fixed key.
    action = jax.random.choice(action_key, ACTION_SPACE, p=p)
    log_prob_action = jnp.log(p)[action]
    return action, log_prob_action, probs


def reinforce_forward(frame, params, action_key):
    """Full forward matching ReinforceModel.forward (single Pong frame, batch = 1)."""
    w1p, b1, w2, b2 = params
    if frame is None:
        # An all-zero frame preprocesses to the all-zero input, matching state_to_tensor(None).
        frame = jnp.zeros((210, 160, 3), jnp.uint8)
    return _policy_step(frame, w1p, b1, w2, b2, action_key)


def init_params(key):
    """torch.nn.Linear-style init: U(-1/sqrt(fan_in), 1/sqrt(fan_in)).

    W1 is padded to (K_PAD, HIDDEN) with zeros and cast to bf16 ONCE here, so the
    per-call path does no weight padding / casting.
    """
    k1, k2, k3, k4 = jax.random.split(key, 4)
    bound1 = 1.0 / np.sqrt(NUM_INPUT)
    bound2 = 1.0 / np.sqrt(HIDDEN)
    w1 = jax.random.uniform(k1, (NUM_INPUT, HIDDEN), jnp.float32, -bound1, bound1)
    b1 = jax.random.uniform(k2, (HIDDEN,), jnp.float32, -bound1, bound1)
    w2 = jax.random.uniform(k3, (HIDDEN, NUM_ACTION), jnp.float32, -bound2, bound2)
    b2 = jax.random.uniform(k4, (NUM_ACTION,), jnp.float32, -bound2, bound2)
    w1p = jnp.pad(w1, ((0, K_PAD - NUM_INPUT), (0, 0))).astype(jnp.bfloat16)
    return w1p, b1, w2, b2


def reference_probs(x, w1p, b1, w2, b2):
    """Pure-JAX reference (same bf16 W1 values, f32 math) for correctness check."""
    xf = x.astype(jnp.float32)
    w1 = w1p.astype(jnp.float32)
    h = jnp.maximum(xf @ w1 + b1, 0.0)
    z = jnp.maximum(h @ w2 + b2, 0.0)
    return jax.nn.softmax(z, axis=-1)


if __name__ == "__main__":
    key = jax.random.PRNGKey(0)
    pkey, fkey, akey = jax.random.split(key, 3)
    params = init_params(pkey)

    # Deterministic synthetic Atari-Pong frame: (210, 160, 3) uint8.
    frame = jax.random.randint(fkey, (210, 160, 3), 0, 256, dtype=jnp.int32).astype(jnp.uint8)

    action, log_prob_action, probs = reinforce_forward(frame, params, akey)
    probs = jax.block_until_ready(probs)
    log_prob_action = jax.block_until_ready(log_prob_action)

    # Correctness check against pure-JAX reference (same bf16 W1; tolerance covers
    # MXU accumulation-order differences).
    x = state_to_tensor(frame)
    ref = reference_probs(x, *params)
    assert probs.shape == (1, NUM_ACTION)
    assert np.allclose(np.asarray(probs), np.asarray(ref), atol=2e-3, rtol=2e-3)
    assert abs(float(np.asarray(probs).sum()) - 1.0) < 1e-5   # exact-softmax check
    assert np.isfinite(float(log_prob_action))
    assert int(action) in (0, 1)

    # Batched path check (B = 4): one W1 HBM stream serves all 4 frames.
    fkeys = jax.random.split(fkey, 4)
    frames = [jax.random.randint(k, (210, 160, 3), 0, 256, dtype=jnp.int32).astype(jnp.uint8)
              for k in fkeys]
    xb = jnp.concatenate([state_to_tensor(f) for f in frames], axis=0)
    probs_b = jax.block_until_ready(reinforce_probs(xb, *params))
    ref_b = reference_probs(xb, *params)
    assert probs_b.shape == (4, NUM_ACTION)
    assert np.allclose(np.asarray(probs_b), np.asarray(ref_b), atol=2e-3, rtol=2e-3)

    print("KERNEL_OK")
</pallas_src>

<mosaic_0001>
module attributes {stable_mosaic.version = 11 : i64} {
  func.func @mlp_kernel(%arg0: memref<1x6144xbf16, #tpu.memory_space<vmem>>, %arg1: memref<6144x512xbf16, #tpu.memory_space<vmem>>, %arg2: memref<1x512xf32, #tpu.memory_space<vmem>>, %arg3: memref<512x2xf32, #tpu.memory_space<vmem>>, %arg4: memref<1x2xf32, #tpu.memory_space<vmem>>, %arg5: memref<1x2xf32, #tpu.memory_space<vmem>>) attributes {dimension_semantics = [], scalar_prefetch = 0 : i64, scratch_operands = 0 : i64, tpu.core_type = #tpu.core_type<tc>} {
    %c0 = arith.constant 0 : index
    %c0_0 = arith.constant 0 : index
    %0 = vector.load %arg0[%c0, %c0_0] : memref<1x6144xbf16, #tpu.memory_space<vmem>>, vector<1x6144xbf16>
    %c0_1 = arith.constant 0 : index
    %c0_2 = arith.constant 0 : index
    %1 = vector.load %arg1[%c0_1, %c0_2] : memref<6144x512xbf16, #tpu.memory_space<vmem>>, vector<6144x512xbf16>
    %cst = arith.constant dense<0.000000e+00> : vector<1x512xf32>
    %2 = tpu.matmul %0, %1, %cst {dimension_numbers = #tpu.dot_dimension_numbers<[1], [0], [0], [1], [0, 0, 1, 1], [], []>} : vector<1x6144xbf16>, vector<6144x512xbf16>, vector<1x512xf32> -> vector<1x512xf32>
    %c0_3 = arith.constant 0 : index
    %c0_4 = arith.constant 0 : index
    %3 = vector.load %arg2[%c0_3, %c0_4] : memref<1x512xf32, #tpu.memory_space<vmem>>, vector<1x512xf32>
    %4 = arith.addf %2, %3 : vector<1x512xf32>
    %cst_5 = arith.constant 0.000000e+00 : f32
    %5 = vector.broadcast %cst_5 : f32 to vector<1x512xf32>
    %6 = arith.maximumf %4, %5 : vector<1x512xf32>
    %c0_6 = arith.constant 0 : index
    %c0_7 = arith.constant 0 : index
    %7 = vector.load %arg3[%c0_6, %c0_7] : memref<512x2xf32, #tpu.memory_space<vmem>>, vector<512x2xf32>
    %cst_8 = arith.constant dense<0.000000e+00> : vector<1x2xf32>
    %8 = tpu.matmul %6, %7, %cst_8 {dimension_numbers = #tpu.dot_dimension_numbers<[1], [0], [0], [1], [0, 0, 1, 1], [], []>} : vector<1x512xf32>, vector<512x2xf32>, vector<1x2xf32> -> vector<1x2xf32>
    %c0_9 = arith.constant 0 : index
    %c0_10 = arith.constant 0 : index
    %9 = vector.load %arg4[%c0_9, %c0_10] : memref<1x2xf32, #tpu.memory_space<vmem>>, vector<1x2xf32>
    %10 = arith.addf %8, %9 : vector<1x2xf32>
    %cst_11 = arith.constant 0.000000e+00 : f32
    %11 = vector.broadcast %cst_11 : f32 to vector<1x2xf32>
    %12 = arith.maximumf %10, %11 : vector<1x2xf32>
    %cst_12 = arith.constant dense<0xFF800000> : vector<1xf32>
    %13 = vector.multi_reduction <maximumf>, %12, %cst_12 [1] : vector<1x2xf32> to vector<1xf32>
    %14 = vector.shape_cast %13 : vector<1xf32> to vector<1x1xf32>
    %15 = vector.broadcast %14 : vector<1x1xf32> to vector<1x2xf32>
    %16 = arith.subf %12, %15 : vector<1x2xf32>
    %17 = math.exp %16 : vector<1x2xf32>
    %cst_13 = arith.constant dense<0.000000e+00> : vector<1xf32>
    %18 = vector.multi_reduction <add>, %17, %cst_13 [1] : vector<1x2xf32> to vector<1xf32>
    %19 = vector.shape_cast %18 : vector<1xf32> to vector<1x1xf32>
    %20 = vector.broadcast %19 : vector<1x1xf32> to vector<1x2xf32>
    %21 = arith.divf %17, %20 : vector<1x2xf32>
    %c0_14 = arith.constant 0 : index
    %c0_15 = arith.constant 0 : index
    %22 = vector.load %arg5[%c0_14, %c0_15] : memref<1x2xf32, #tpu.memory_space<vmem>>, vector<1x2xf32>
    tpu.vector_store %arg5[%c0_14, %c0_15], %21 {strides = array<i32>} : memref<1x2xf32, #tpu.memory_space<vmem>>, vector<1x2xf32>,
    return
  }
}

</mosaic_0001>

<bundles_post_ra>
// kernel: _policy_step.1
= control target key start
LH: loop header
LB: loop body
LE: loop exit
PB: predicated region body
PF: predicated region fallthrough
CT: control target
= control target key end

     0   :  { %10 = vsyncpa [#allocation3], 0  ;;  %s16586_s0 = inlined_call_operand.vmem [shape: bf16[1,6144], index: 0, kind: input, shape index: {}]   ;;  %s16587_s1 = inlined_call_operand.hbm [shape: bf16[6144,512], index: 1, kind: input, shape index: {}]   ;;  %s16588_s2 = inlined_call_operand.hbm [shape: f32[1,512], index: 2, kind: input, shape index: {}]   ;;  %s16589_s3 = inlined_call_operand.vmem [shape: f32[512,2], index: 3, kind: input, shape index: {}]   ;;  %s16590_s4 = inlined_call_operand.hbm [shape: f32[1,2], index: 4, kind: input, shape index: {}]   ;;  %s16591_s5 = inlined_call_operand.vmem [shape: f32[1,2], index: 5, kind: output, shape index: {}]  }
   0x1   :  { %11 = vsyncpa [#allocation5], 0  ;;  %s15837_s18 = smov [#allocation4]   ;;  %s15838_s20 = smov [#allocation2]  }
   0x2   :  { %s32_s19 = sshll.u32 %s15837_s18, 4  ;;  %s19_s21 = sshll.u32 %s15838_s20, 4  ;;  %s33_s19 = int_to_ptr.vmem [resolvable:$true] %s32_s19  ;;  %s20_s21 = int_to_ptr.vmem [resolvable:$true] %s19_s21 }
   0x3   :  { %s15781_s22 = scalar_lea.vmem %s33_s19, 64  ;;  %p15786_p1 = scmp.lt.s32.totalorder %s33_s19, %s33_s19 }
   0x4   :  { %p15782_p0 = scmp.ne.s32.totalorder %s33_s19, %s15781_s22  ;;  %p15787_p2 = scmp.lt.s32.totalorder %s15781_s22, %s15781_s22 }
   0x6   :  { %p15788_p3 = por %p15787_p2, %p15786_p1 }
   0x8   :  { %p15789_p4 = pnand %p15788_p3, %p15782_p0 }
   0xa   :  { %15792 = shalt.err (!%p15789_p4)
}
   0xb   :  { %35 = dma.hbm_to_vmem [thread:$0]  %s16588_s2, 64, %s33_s19, [#allocation5]  }
   0xc   :  { %s15801_s25 = scalar_lea.vmem %s20_s21, 196608  ;;  %p15806_p6 = scmp.lt.s32.totalorder %s20_s21, %s20_s21 }
   0xd   :  { %p15802_p5 = scmp.ne.s32.totalorder %s20_s21, %s15801_s25  ;;  %p15807_p7 = scmp.lt.s32.totalorder %s15801_s25, %s15801_s25 }
   0xf   :  { %p15808_p8 = por %p15807_p7, %p15806_p6 }
  0x11   :  { %p15809_p9 = pnand %p15808_p8, %p15802_p5 }
  0x13   :  { %15812 = shalt.err (!%p15809_p9)
}
  0x14   :  { %s15839_s26 = smov 256   ;;  %s15840_s27 = smov 16  }
  0x15   :  { %25 = dma.hbm_to_vmem [thread:$0]  %s16587_s1, 196608, %s20_s21, [#allocation3], %s15839_s26, %s15839_s26, %s15840_s27  }
  0x16   :  { %s15841_s30 = smov [#allocation6]  }
  0x17   :  { %s44_s6 = sshll.u32 %s15841_s30, 4  ;;  %s45_s6 = int_to_ptr.vmem [resolvable:$true] %s44_s6 }
  0x18   :  { %s15821_s7 = scalar_lea.vmem %s45_s6, 16  ;;  %s15825_s8 = scalar_lea.vmem %s45_s6, 32 }
  0x19   :  { %p15822_p10 = scmp.ne.s32.totalorder %s45_s6, %s15821_s7  ;;  %p15826_p11 = scmp.lt.s32.totalorder %s45_s6, %s45_s6 }
  0x1a   :  { %p15827_p12 = scmp.lt.s32.totalorder %s15825_s8, %s15821_s7 }
  0x1c   :  { %p15828_p13 = por %p15827_p12, %p15826_p11 }
  0x1e   :  { %p15829_p0 = pnand %p15828_p13, %p15822_p10 }
  0x20   :  { %15832 = shalt.err (!%p15829_p0)
}
  0x21   :  { %47 = dma.hbm_to_vmem [thread:$0]  %s16590_s4, 16, %s45_s6, [#allocation5]  }
  0x22   :  { %15833 = dma.done.wait [#allocation3], 196608  }
  0x23   :  { %15834 = vsyncadd [#allocation3], 4294770688 }
  0x24   :  { %15835 = dma.done.wait [#allocation5], 80  }
  0x25   :  { %15836 = vsyncadd [#allocation5], 4294967216  ;;  %v13458_v0 = vld [vmem:[#allocation2 + $0xe4] ss:$16 sps:$4 sm:$0xff]   ;;  %v13462_v2 = vld [vmem:[#allocation2 + $0xe0] ss:$16 sps:$4 sm:$0xff]   ;;  %v1610_v38 = vlaneseq }
  0x26   :  { %v13460_v1 = vld [vmem:[#allocation2 + $0x2e4] ss:$16 sps:$4 sm:$0xff]   ;;  %9649 = vmatprep.subr.bf16.mxu0 %v13458_v0  ;;  %v13463_v3 = vld [vmem:[#allocation2 + $0x2e0] ss:$16 sps:$4 sm:$0xff]   ;;  %v15842_v36 = vmov 1966171168  }
  0x27   :  { %9690 = vmatprep.subr.bf16.mxu1 %v13460_v1  ;;  %v13464_v4 = vld [vmem:[#allocation2 + $0xc4] ss:$16 sps:$4 sm:$0xff]   ;;  %9650 = vmatpush1.bf16.msra.mxu0 %v13462_v2  ;;  %v13468_v6 = vld [vmem:[#allocation2 + $0xc0] ss:$16 sps:$4 sm:$0xff]   ;;  %v1608_v37 = vunpack.c.l.s4 %v15842_v36  ;;  %v15882_v43 = vshrl.u32 %v1610_v38, 7  ;;  %vm11827_vm0 = vcmask 8192  }
  0x28   :  { %9691 = vmatpush1.bf16.msra.mxu1 %v13463_v3  ;;  %v13466_v5 = vld [vmem:[#allocation2 + $0x2c4] ss:$16 sps:$4 sm:$0xff]   ;;  %9651 = vmatprep.subr.bf16.mxu0 %v13464_v4  ;;  %v13469_v7 = vld [vmem:[#allocation2 + $0x2c0] ss:$16 sps:$4 sm:$0xff]  }
  0x29   :  { %9692 = vmatprep.subr.bf16.mxu1 %v13466_v5  ;;  %v13470_v8 = vld [vmem:[#allocation2 + $0xa4] ss:$16 sps:$4 sm:$0xff]   ;;  %v13474_v10 = vld [vmem:[#allocation2 + $0xa0] ss:$16 sps:$4 sm:$0xff]   ;;  %v1609_v42 = vunpack.c.0.s8 %v1608_v37 }
  0x2a   :  { %v13472_v9 = vld [vmem:[#allocation2 + $0x2a4] ss:$16 sps:$4 sm:$0xff]   ;;  %v13475_v11 = vld [vmem:[#allocation2 + $0x2a0] ss:$16 sps:$4 sm:$0xff]  }
  0x2b   :  { %9652 = vmatpush1.bf16.msra.mxu0 %v13468_v6  ;;  %v13476_v12 = vld [vmem:[#allocation2 + $0x84] ss:$16 sps:$4 sm:$0xff]   ;;  %v13480_v14 = vld [vmem:[#allocation2 + $0x80] ss:$16 sps:$4 sm:$0xff]   ;;  %v15885_v49 = vsub.s32 %v1609_v42, %v15882_v43 }
  0x2c   :  { %9693 = vmatpush1.bf16.msra.mxu1 %v13469_v7  ;;  %9653 = vmatprep.subr.bf16.mxu0 %v13470_v8  ;;  %v13478_v13 = vld [vmem:[#allocation2 + $0x284] ss:$16 sps:$4 sm:$0xff]   ;;  %v13481_v15 = vld [vmem:[#allocation2 + $0x280] ss:$16 sps:$4 sm:$0xff]  }
  0x2d   :  { %9694 = vmatprep.subr.bf16.mxu1 %v13472_v9  ;;  %v13482_v16 = vld [vmem:[#allocation2 + $0x64] ss:$16 sps:$4 sm:$0xff]   ;;  %v13486_v18 = vld [vmem:[#allocation2 + $0x60] ss:$16 sps:$4 sm:$0xff]  }
  0x2e   :  { %v13484_v17 = vld [vmem:[#allocation2 + $0x264] ss:$16 sps:$4 sm:$0xff]   ;;  %v13487_v19 = vld [vmem:[#allocation2 + $0x260] ss:$16 sps:$4 sm:$0xff]  }
  0x2f   :  { %9654 = vmatpush1.bf16.msra.mxu0 %v13474_v10  ;;  %v13488_v20 = vld [vmem:[#allocation2 + $0x44] ss:$16 sps:$4 sm:$0xff]   ;;  %v13492_v22 = vld [vmem:[#allocation2 + $0x40] ss:$16 sps:$4 sm:$0xff]  }
  0x30   :  { %9695 = vmatpush1.bf16.msra.mxu1 %v13475_v11  ;;  %9655 = vmatprep.subr.bf16.mxu0 %v13476_v12  ;;  %v13490_v21 = vld [vmem:[#allocation2 + $0x244] ss:$16 sps:$4 sm:$0xff]   ;;  %v13493_v23 = vld [vmem:[#allocation2 + $0x240] ss:$16 sps:$4 sm:$0xff]  }
  0x31   :  { %9696 = vmatprep.subr.bf16.mxu1 %v13478_v13  ;;  %v13494_v24 = vld [vmem:[#allocation2 + $0x24] ss:$16 sps:$4 sm:$0xff]   ;;  %v13498_v26 = vld [vmem:[#allocation2 + $0x20] ss:$16 sps:$4 sm:$0xff]  }
  0x32   :  { %v13496_v25 = vld [vmem:[#allocation2 + $0x224] ss:$16 sps:$4 sm:$0xff]   ;;  %v13499_v27 = vld [vmem:[#allocation2 + $0x220] ss:$16 sps:$4 sm:$0xff]  }
  0x33   :  { %9656 = vmatpush1.bf16.msra.mxu0 %v13480_v14  ;;  %v13500_v28 = vld [vmem:[#allocation2 + $0x4] ss:$16 sps:$4 sm:$0xff]   ;;  %v13504_v30 = vld [vmem:[#allocation2] ss:$16 sps:$4 sm:$0xff]  }
  0x34   :  { %9697 = vmatpush1.bf16.msra.mxu1 %v13481_v15  ;;  %9657 = vmatprep.subr.bf16.mxu0 %v13482_v16  ;;  %v13502_v29 = vld [vmem:[#allocation2 + $0x204] ss:$16 sps:$4 sm:$0xff]   ;;  %v13505_v31 = vld [vmem:[#allocation2 + $0x200] ss:$16 sps:$4 sm:$0xff]  }
  0x35   :  { %9698 = vmatprep.subr.bf16.mxu1 %v13484_v17  ;;  %v13506_v32 = vld [vmem:[#allocation2 + $0x1e4] ss:$16 sps:$4 sm:$0xff]   ;;  %v13510_v34 = vld [vmem:[#allocation2 + $0x1e0] ss:$16 sps:$4 sm:$0xff]  }
  0x36   :  { %v13508_v33 = vld [vmem:[#allocation2 + $0x3e4] ss:$16 sps:$4 sm:$0xff]   ;;  %v13511_v35 = vld [vmem:[#allocation2 + $0x3e0] ss:$16 sps:$4 sm:$0xff]  }
  0x37   :  { %9658 = vmatpush1.bf16.msra.mxu0 %v13486_v18  ;;  %v13512_v39 = vld [vmem:[#allocation2 + $0x1c4] ss:$16 sps:$4 sm:$0xff]   ;;  %v13516_v41 = vld [vmem:[#allocation2 + $0x1c0] ss:$16 sps:$4 sm:$0xff]  }
  0x38   :  { %9699 = vmatpush1.bf16.msra.mxu1 %v13487_v19  ;;  %9659 = vmatprep.subr.bf16.mxu0 %v13488_v20  ;;  %v13514_v40 = vld [vmem:[#allocation2 + $0x3c4] ss:$16 sps:$4 sm:$0xff]   ;;  %v13517_v44 = vld [vmem:[#allocation2 + $0x3c0] ss:$16 sps:$4 sm:$0xff]  }
  0x39   :  { %9700 = vmatprep.subr.bf16.mxu1 %v13490_v21  ;;  %v13518_v45 = vld [vmem:[#allocation2 + $0x1a4] ss:$16 sps:$4 sm:$0xff]   ;;  %v13522_v47 = vld [vmem:[#allocation2 + $0x1a0] ss:$16 sps:$4 sm:$0xff]  }
  0x3a   :  { %v13520_v46 = vld [vmem:[#allocation2 + $0x3a4] ss:$16 sps:$4 sm:$0xff]   ;;  %v13523_v48 = vld [vmem:[#allocation2 + $0x3a0] ss:$16 sps:$4 sm:$0xff]  }
  0x3b   :  { %9660 = vmatpush1.bf16.msra.mxu0 %v13492_v22  ;;  %v13524_v50 = vld [vmem:[#allocation2 + $0x184] ss:$16 sps:$4 sm:$0xff]   ;;  %v13528_v53 = vld [vmem:[#allocation2 + $0x180] ss:$16 sps:$4 sm:$0xff]  }
  0x3c   :  { %9701 = vmatpush1.bf16.msra.mxu1 %v13493_v23  ;;  %9661 = vmatprep.subr.bf16.mxu0 %v13494_v24  ;;  %v13526_v51 = vld [vmem:[#allocation2 + $0x384] ss:$16 sps:$4 sm:$0xff]   ;;  %v13529_v55 = vld [vmem:[#allocation2 + $0x380] ss:$16 sps:$4 sm:$0xff]  }
  0x3d   :  { %9702 = vmatprep.subr.bf16.mxu1 %v13496_v25  ;;  %v57_v52 = vld [vmem:[%s16586_s0] sm:$0xff] }
  0x3e   :  { %v1613_v54 = vrot.slane %v57_v52, %v15885_v49  ;;  %v13530_v56 = vld [vmem:[#allocation2 + $0x164] ss:$16 sps:$4 sm:$0xff]   ;;  %v13534_v59 = vld [vmem:[#allocation2 + $0x160] ss:$16 sps:$4 sm:$0xff]   ;;  %v1606_v1 = vcombine.high %v57_v52, %v57_v52 }
  0x3f   :  { %9662 = vmatpush1.bf16.msra.mxu0 %v13498_v26  ;;  %v13532_v57 = vld [vmem:[#allocation2 + $0x364] ss:$16 sps:$4 sm:$0xff]   ;;  %v13535_v61 = vld [vmem:[#allocation2 + $0x360] ss:$16 sps:$4 sm:$0xff]  }
  0x40   :  { %9703 = vmatpush1.bf16.msra.mxu1 %v13499_v27  ;;  %9663 = vmatprep.subr.bf16.mxu0 %v13500_v28  ;;  %v1621_v58 = vcombine.high %v1613_v54, %v1613_v54  ;;  %v13536_v62 = vld [vmem:[#allocation2 + $0x144] ss:$16 sps:$4 sm:$0xff]   ;;  %v13540_v2 = vld [vmem:[#allocation2 + $0x140] ss:$16 sps:$4 sm:$0xff]   ;;  %v15901_v6 = vrot.slane %v1606_v1, %v15885_v49  ;;  %v15906_v13 = vrot.slane %v1613_v54, %v15885_v49 }
  0x41   :  { %9704 = vmatprep.subr.bf16.mxu1 %v13502_v29  ;;  %v13538_v63 = vld [vmem:[#allocation2 + $0x344] ss:$16 sps:$4 sm:$0xff]   ;;  %v13541_v3 = vld [vmem:[#allocation2 + $0x340] ss:$16 sps:$4 sm:$0xff]  }
  0x42   :  { %v15892_v60 = vrot.slane %v1621_v58, %v15885_v49  ;;  %v13542_v4 = vld [vmem:[#allocation2 + $0x124] ss:$16 sps:$4 sm:$0xff]   ;;  %v13546_v7 = vld [vmem:[#allocation2 + $0x120] ss:$16 sps:$4 sm:$0xff]   ;;  %v1622_v11 = vcombine.high %v15901_v6, %v15901_v6  ;;  %v15913_v18 = vcombine.high %v15906_v13, %v15906_v13 }
  0x43   :  { %9664 = vmatpush1.bf16.msra.mxu0 %v13504_v30  ;;  %v13544_v5 = vld [vmem:[#allocation2 + $0x324] ss:$16 sps:$4 sm:$0xff]   ;;  %v13547_v8 = vld [vmem:[#allocation2 + $0x320] ss:$16 sps:$4 sm:$0xff]  }
  0x44   :  { %9705 = vmatpush1.bf16.msra.mxu1 %v13505_v31  ;;  %9665 = vmatprep.subr.bf16.mxu0 %v13506_v32  ;;  %v15896_v0 = vcombine.high %v15892_v60, %v15892_v60  ;;  %v13548_v9 = vld [vmem:[#allocation2 + $0x104] ss:$16 sps:$4 sm:$0xff]   ;;  %v13552_v12 = vld [vmem:[#allocation2 + $0x100] ss:$16 sps:$4 sm:$0xff]   ;;  %v15909_v17 = vrot.slane %v1622_v11, %v15885_v49 }
  0x45   :  { %9706 = vmatprep.subr.bf16.mxu1 %v13508_v33  ;;  %9681 = vmatprep.mubr.bf16.mxu0 %v15892_v60  ;;  %v13550_v10 = vld [vmem:[#allocation2 + $0x304] ss:$16 sps:$4 sm:$0xff]   ;;  %v13553_v14 = vld [vmem:[#allocation2 + $0x300] ss:$16 sps:$4 sm:$0xff]  }
  0x46   :  { %9722 = vmatprep.mubr.bf16.mxu1 %v15896_v0  ;;  %v13556_v15 = vld [vmem:[#allocation2 + $0x4e4] ss:$16 sps:$4 sm:$0xff]   ;;  %v13554_v19 = vld [vmem:[#allocation2 + $0x4e0] ss:$16 sps:$4 sm:$0xff]   ;;  %v15917_v23 = vcombine.high %v15909_v17, %v15909_v17 }
  0x47   :  { %9666 = vmatpush2.bf16.msra.mxu0 %v13510_v34  ;;  %v13559_v16 = vld [vmem:[#allocation2 + $0x6e4] ss:$16 sps:$4 sm:$0xff]   ;;  %v13557_v20 = vld [vmem:[#allocation2 + $0x6e0] ss:$16 sps:$4 sm:$0xff]  }
  0x48   :  { %9707 = vmatpush2.bf16.msra.mxu1 %v13511_v35  ;;  %9667 = vmatprep.subr.bf16.mxu0 %v13512_v39  ;;  %v13562_v21 = vld [vmem:[#allocation2 + $0x4c4] ss:$16 sps:$4 sm:$0xff]   ;;  %v13560_v24 = vld [vmem:[#allocation2 + $0x4c0] ss:$16 sps:$4 sm:$0xff]  }
  0x49   :  { %9708 = vmatprep.subr.bf16.mxu1 %v13514_v40  ;;  %v13565_v22 = vld [vmem:[#allocation2 + $0x6c4] ss:$16 sps:$4 sm:$0xff]   ;;  %v13563_v25 = vld [vmem:[#allocation2 + $0x6c0] ss:$16 sps:$4 sm:$0xff]  }
  0x4a   :  { %v13568_v26 = vld [vmem:[#allocation2 + $0x4a4] ss:$16 sps:$4 sm:$0xff]   ;;  %v13566_v28 = vld [vmem:[#allocation2 + $0x4a0] ss:$16 sps:$4 sm:$0xff]  }
  0x4b   :  { %9668 = vmatpush2.bf16.msra.mxu0 %v13516_v41  ;;  %v13571_v27 = vld [vmem:[#allocation2 + $0x6a4] ss:$16 sps:$4 sm:$0xff]   ;;  %v13569_v29 = vld [vmem:[#allocation2 + $0x6a0] ss:$16 sps:$4 sm:$0xff]  }
  0x4c   :  { %9709 = vmatpush2.bf16.msra.mxu1 %v13517_v44  ;;  %9669 = vmatprep.subr.bf16.mxu0 %v13518_v45  ;;  %v13574_v30 = vld [vmem:[#allocation2 + $0x484] ss:$16 sps:$4 sm:$0xff]   ;;  %v13572_v32 = vld [vmem:[#allocation2 + $0x480] ss:$16 sps:$4 sm:$0xff]  }
  0x4d   :  { %9710 = vmatprep.subr.bf16.mxu1 %v13520_v46  ;;  %v13577_v31 = vld [vmem:[#allocation2 + $0x684] ss:$16 sps:$4 sm:$0xff]   ;;  %v13575_v33 = vld [vmem:[#allocation2 + $0x680] ss:$16 sps:$4 sm:$0xff]  }
  0x4e   :  { %v13580_v34 = vld [vmem:[#allocation2 + $0x464] ss:$16 sps:$4 sm:$0xff]   ;;  %v13578_v36 = vld [vmem:[#allocation2 + $0x460] ss:$16 sps:$4 sm:$0xff]  }
  0x4f   :  { %9670 = vmatpush2.bf16.msra.mxu0 %v13522_v47  ;;  %v13583_v35 = vld [vmem:[#allocation2 + $0x664] ss:$16 sps:$4 sm:$0xff]   ;;  %v13581_v37 = vld [vmem:[#allocation2 + $0x660] ss:$16 sps:$4 sm:$0xff]  }
  0x50   :  { %9711 = vmatpush2.bf16.msra.mxu1 %v13523_v48  ;;  %9671 = vmatprep.subr.bf16.mxu0 %v13524_v50  ;;  %v13586_v38 = vld [vmem:[#allocation2 + $0x444] ss:$16 sps:$4 sm:$0xff]   ;;  %v13584_v40 = vld [vmem:[#allocation2 + $0x440] ss:$16 sps:$4 sm:$0xff]  }
  0x51   :  { %9712 = vmatprep.subr.bf16.mxu1 %v13526_v51  ;;  %v13589_v39 = vld [vmem:[#allocation2 + $0x644] ss:$16 sps:$4 sm:$0xff]   ;;  %v13587_v41 = vld [vmem:[#allocation2 + $0x640] ss:$16 sps:$4 sm:$0xff]  }
  0x52   :  { %v13592_v42 = vld [vmem:[#allocation2 + $0x424] ss:$16 sps:$4 sm:$0xff]   ;;  %v13590_v45 = vld [vmem:[#allocation2 + $0x420] ss:$16 sps:$4 sm:$0xff]  }
  0x53   :  { %9672 = vmatpush2.bf16.msra.mxu0 %v13528_v53  ;;  %v13595_v44 = vld [vmem:[#allocation2 + $0x624] ss:$16 sps:$4 sm:$0xff]   ;;  %v13593_v46 = vld [vmem:[#allocation2 + $0x620] ss:$16 sps:$4 sm:$0xff]  }
  0x54   :  { %9713 = vmatpush2.bf16.msra.mxu1 %v13529_v55  ;;  %9673 = vmatprep.subr.bf16.mxu0 %v13530_v56  ;;  %v13598_v47 = vld [vmem:[#allocation2 + $0x404] ss:$16 sps:$4 sm:$0xff]   ;;  %v13596_v50 = vld [vmem:[#allocation2 + $0x400] ss:$16 sps:$4 sm:$0xff]  }
  0x55   :  { %9714 = vmatprep.subr.bf16.mxu1 %v13532_v57  ;;  %v13601_v48 = vld [vmem:[#allocation2 + $0x604] ss:$16 sps:$4 sm:$0xff]   ;;  %v13599_v51 = vld [vmem:[#allocation2 + $0x600] ss:$16 sps:$4 sm:$0xff]  }
  0x56   :  { %v13604_v52 = vld [vmem:[#allocation2 + $0x5e4] ss:$16 sps:$4 sm:$0xff]   ;;  %v13602_v54 = vld [vmem:[#allocation2 + $0x5e0] ss:$16 sps:$4 sm:$0xff]  }
  0x57   :  { %9674 = vmatpush2.bf16.msra.mxu0 %v13534_v59  ;;  %v13607_v53 = vld [vmem:[#allocation2 + $0x7e4] ss:$16 sps:$4 sm:$0xff]   ;;  %v13605_v55 = vld [vmem:[#allocation2 + $0x7e0] ss:$16 sps:$4 sm:$0xff]  }
  0x58   :  { %9715 = vmatpush2.bf16.msra.mxu1 %v13535_v61  ;;  %9675 = vmatprep.subr.bf16.mxu0 %v13536_v62  ;;  %v13610_v56 = vld [vmem:[#allocation2 + $0x5c4] ss:$16 sps:$4 sm:$0xff]   ;;  %v13608_v58 = vld [vmem:[#allocation2 + $0x5c0] ss:$16 sps:$4 sm:$0xff]  }
  0x59   :  { %9716 = vmatprep.subr.bf16.mxu1 %v13538_v63  ;;  %v13613_v57 = vld [vmem:[#allocation2 + $0x7c4] ss:$16 sps:$4 sm:$0xff]   ;;  %v13611_v59 = vld [vmem:[#allocation2 + $0x7c0] ss:$16 sps:$4 sm:$0xff]  }
  0x5a   :  { %v13616_v61 = vld [vmem:[#allocation2 + $0x5a4] ss:$16 sps:$4 sm:$0xff]   ;;  %v13614_v63 = vld [vmem:[#allocation2 + $0x5a0] ss:$16 sps:$4 sm:$0xff]  }
  0x5b   :  { %9676 = vmatpush2.bf16.msra.mxu0 %v13540_v2  ;;  %v13619_v62 = vld [vmem:[#allocation2 + $0x7a4] ss:$16 sps:$4 sm:$0xff]   ;;  %v13617_v1 = vld [vmem:[#allocation2 + $0x7a0] ss:$16 sps:$4 sm:$0xff]  }
  0x5c   :  { %9717 = vmatpush2.bf16.msra.mxu1 %v13541_v3  ;;  %9677 = vmatprep.subr.bf16.mxu0 %v13542_v4  ;;  %v13622_v2 = vld [vmem:[#allocation2 + $0x584] ss:$16 sps:$4 sm:$0xff]   ;;  %v13620_v4 = vld [vmem:[#allocation2 + $0x580] ss:$16 sps:$4 sm:$0xff]  }
  0x5d   :  { %9718 = vmatprep.subr.bf16.mxu1 %v13544_v5  ;;  %v13625_v3 = vld [vmem:[#allocation2 + $0x784] ss:$16 sps:$4 sm:$0xff]   ;;  %v13623_v5 = vld [vmem:[#allocation2 + $0x780] ss:$16 sps:$4 sm:$0xff]  }
  0x5e   :  { %v13634_v11 = vld [vmem:[#allocation2 + $0x544] ss:$16 sps:$4 sm:$0xff]  }
  0x5f   :  { %9678 = vmatpush2.bf16.msra.mxu0 %v13546_v7  ;;  %v13628_v7 = vld [vmem:[#allocation2 + $0x564] ss:$16 sps:$4 sm:$0xff]  }
  0x60   :  { %9719 = vmatpush2.bf16.msra.mxu1 %v13547_v8  ;;  %9679 = vmatprep.subr.bf16.mxu0 %v13548_v9  ;;  %v13631_v8 = vld [vmem:[#allocation2 + $0x764] ss:$16 sps:$4 sm:$0xff]   ;;  %v13626_v9 = vld [vmem:[#allocation2 + $0x560] ss:$16 sps:$4 sm:$0xff]  }
  0x61   :  { %9720 = vmatprep.subr.bf16.mxu1 %v13550_v10  ;;  %v13629_v10 = vld [vmem:[#allocation2 + $0x760] ss:$16 sps:$4 sm:$0xff]  }
  0x63   :  { %9680 = vmatpush2.bf16.msra.mxu0 %v13552_v12  ;;  %v13637_v12 = vld [vmem:[#allocation2 + $0x744] ss:$16 sps:$4 sm:$0xff]  }
  0x64   :  { %9721 = vmatpush2.bf16.msra.mxu1 %v13553_v14  ;;  %9731 = vmatprep.subr.bf16.mxu0 %v13556_v15  ;;  %v13632_v14 = vld [vmem:[#allocation2 + $0x540] ss:$16 sps:$4 sm:$0xff]  }
  0x65   :  { %9772 = vmatprep.subr.bf16.mxu1 %v13559_v16  ;;  %v13635_v15 = vld [vmem:[#allocation2 + $0x740] ss:$16 sps:$4 sm:$0xff]   ;;  %v13640_v16 = vld [vmem:[#allocation2 + $0x524] ss:$16 sps:$4 sm:$0xff]  }
  0x66   :  { %9682 = vmatmul.mubr.bf16.vlgmr.msra.gmra.mxu0 %v15906_v13 }
  0x67   :  { %9723 = vmatmul.mubr.bf16.vlgmr.msra.gmra.mxu1 %v15913_v18  ;;  %9732 = vmatpush1.bf16.msra.mxu0 %v13554_v19  ;;  %v13643_v19 = vld [vmem:[#allocation2 + $0x724] ss:$16 sps:$4 sm:$0xff]  }
  0x68   :  { %9773 = vmatpush1.bf16.msra.mxu1 %v13557_v20  ;;  %9733 = vmatprep.subr.bf16.mxu0 %v13562_v21  ;;  %v13638_v20 = vld [vmem:[#allocation2 + $0x520] ss:$16 sps:$4 sm:$0xff]  }
  0x69   :  { %9774 = vmatprep.subr.bf16.mxu1 %v13565_v22  ;;  %9763 = vmatprep.mubr.bf16.mxu0 %v15909_v17  ;;  %v13641_v21 = vld [vmem:[#allocation2 + $0x720] ss:$16 sps:$4 sm:$0xff]   ;;  %v13646_v22 = vld [vmem:[#allocation2 + $0x504] ss:$16 sps:$4 sm:$0xff]  }
  0x6a   :  { %9804 = vmatprep.mubr.bf16.mxu1 %v15917_v23 }
  0x6b   :  { %9734 = vmatpush1.bf16.msra.mxu0 %v13560_v24  ;;  %v13649_v24 = vld [vmem:[#allocation2 + $0x704] ss:$16 sps:$4 sm:$0xff]  }
  0x6c   :  { %9775 = vmatpush1.bf16.msra.mxu1 %v13563_v25  ;;  %9735 = vmatprep.subr.bf16.mxu0 %v13568_v26  ;;  %v13644_v25 = vld [vmem:[#allocation2 + $0x500] ss:$16 sps:$4 sm:$0xff]   ;;  %v15925_v26 = vrot.slane %v15901_v6, %v15885_v49  ;;  %v15934_v6 = vld [vmem:[%s16586_s0 + $0x8] sm:$0xff] }
  0x6d   :  { %9776 = vmatprep.subr.bf16.mxu1 %v13571_v27  ;;  %v13647_v27 = vld [vmem:[#allocation2 + $0x700] ss:$16 sps:$4 sm:$0xff]  }
  0x6f   :  { %9736 = vmatpush1.bf16.msra.mxu0 %v13566_v28  ;;  %v13653_v28 = vld [vmem:[#allocation2 + $0x8e4] ss:$16 sps:$4 sm:$0xff]  }
  0x70   :  { %9777 = vmatpush1.bf16.msra.mxu1 %v13569_v29  ;;  %9737 = vmatprep.subr.bf16.mxu0 %v13574_v30  ;;  %v13656_v29 = vld [vmem:[#allocation2 + $0xae4] ss:$16 sps:$4 sm:$0xff]   ;;  %v15929_v30 = vcombine.high %v15925_v26, %v15925_v26 }
  0x71   :  { %9778 = vmatprep.subr.bf16.mxu1 %v13577_v31  ;;  %v13651_v31 = vld [vmem:[#allocation2 + $0x8e0] ss:$16 sps:$4 sm:$0xff]  }
  0x73   :  { %9738 = vmatpush1.bf16.msra.mxu0 %v13572_v32  ;;  %v13654_v32 = vld [vmem:[#allocation2 + $0xae0] ss:$16 sps:$4 sm:$0xff]  }
  0x74   :  { %9779 = vmatpush1.bf16.msra.mxu1 %v13575_v33  ;;  %9739 = vmatprep.subr.bf16.mxu0 %v13580_v34  ;;  %v13659_v33 = vld [vmem:[#allocation2 + $0x8c4] ss:$16 sps:$4 sm:$0xff]  }
  0x75   :  { %9780 = vmatprep.subr.bf16.mxu1 %v13583_v35  ;;  %v13662_v34 = vld [vmem:[#allocation2 + $0xac4] ss:$16 sps:$4 sm:$0xff]   ;;  %v15938_v35 = vrot.slane %v15934_v6, %v15885_v49 }
  0x77   :  { %9740 = vmatpush1.bf16.msra.mxu0 %v13578_v36  ;;  %v1670_v36 = vcombine.high %v15938_v35, %v15938_v35 }
  0x78   :  { %9781 = vmatpush1.bf16.msra.mxu1 %v13581_v37  ;;  %9741 = vmatprep.subr.bf16.mxu0 %v13586_v38  ;;  %v13657_v37 = vld [vmem:[#allocation2 + $0x8c0] ss:$16 sps:$4 sm:$0xff]  }
  0x79   :  { %9782 = vmatprep.subr.bf16.mxu1 %v13589_v39  ;;  %v13660_v38 = vld [vmem:[#allocation2 + $0xac0] ss:$16 sps:$4 sm:$0xff]   ;;  %v13665_v39 = vld [vmem:[#allocation2 + $0x8a4] ss:$16 sps:$4 sm:$0xff]  }
  0x7b   :  { %9742 = vmatpush1.bf16.msra.mxu0 %v13584_v40  ;;  %v13668_v40 = vld [vmem:[#allocation2 + $0xaa4] ss:$16 sps:$4 sm:$0xff]  }
  0x7c   :  { %9783 = vmatpush1.bf16.msra.mxu1 %v13587_v41  ;;  %9743 = vmatprep.subr.bf16.mxu0 %v13592_v42  ;;  %v15945_v41 = vrot.slane %v1670_v36, %v15885_v49  ;;  %v13729_v36 = vld [vmem:[#allocation2 + $0x940] ss:$16 sps:$4 sm:$0xff]  }
  0x7d   :  { %9784 = vmatprep.subr.bf16.mxu1 %v13595_v44  ;;  %v13663_v44 = vld [vmem:[#allocation2 + $0x8a0] ss:$16 sps:$4 sm:$0xff]  }
  0x7e   :  { %v15950_v42 = vcombine.high %v15945_v41, %v15945_v41 }
  0x7f   :  { %9744 = vmatpush1.bf16.msra.mxu0 %v13590_v45  ;;  %v13666_v45 = vld [vmem:[#allocation2 + $0xaa0] ss:$16 sps:$4 sm:$0xff]  }
  0x80   :  { %9785 = vmatpush1.bf16.msra.mxu1 %v13593_v46  ;;  %9745 = vmatprep.subr.bf16.mxu0 %v13598_v47  ;;  %v13671_v46 = vld [vmem:[#allocation2 + $0x884] ss:$16 sps:$4 sm:$0xff]  }
  0x81   :  { %9786 = vmatprep.subr.bf16.mxu1 %v13601_v48  ;;  %v13674_v47 = vld [vmem:[#allocation2 + $0xa84] ss:$16 sps:$4 sm:$0xff]   ;;  %v13669_v48 = vld [vmem:[#allocation2 + $0x880] ss:$16 sps:$4 sm:$0xff]  }
  0x83   :  { %9746 = vmatpush1.bf16.msra.mxu0 %v13596_v50  ;;  %v13672_v50 = vld [vmem:[#allocation2 + $0xa80] ss:$16 sps:$4 sm:$0xff]  }
  0x84   :  { %9787 = vmatpush1.bf16.msra.mxu1 %v13599_v51  ;;  %9747 = vmatprep.subr.bf16.mxu0 %v13604_v52  ;;  %v13677_v51 = vld [vmem:[#allocation2 + $0x864] ss:$16 sps:$4 sm:$0xff]  }
  0x85   :  { %9788 = vmatprep.subr.bf16.mxu1 %v13607_v53  ;;  %v13680_v52 = vld [vmem:[#allocation2 + $0xa64] ss:$16 sps:$4 sm:$0xff]   ;;  %v13675_v53 = vld [vmem:[#allocation2 + $0x860] ss:$16 sps:$4 sm:$0xff]  }
  0x87   :  { %9748 = vmatpush2.bf16.msra.mxu0 %v13602_v54  ;;  %v13678_v54 = vld [vmem:[#allocation2 + $0xa60] ss:$16 sps:$4 sm:$0xff]  }
  0x88   :  { %9789 = vmatpush2.bf16.msra.mxu1 %v13605_v55  ;;  %9749 = vmatprep.subr.bf16.mxu0 %v13610_v56  ;;  %v13683_v55 = vld [vmem:[#allocation2 + $0x844] ss:$16 sps:$4 sm:$0xff]  }
  0x89   :  { %9790 = vmatprep.subr.bf16.mxu1 %v13613_v57  ;;  %v13686_v56 = vld [vmem:[#allocation2 + $0xa44] ss:$16 sps:$4 sm:$0xff]   ;;  %v13681_v57 = vld [vmem:[#allocation2 + $0x840] ss:$16 sps:$4 sm:$0xff]  }
  0x8b   :  { %9750 = vmatpush2.bf16.msra.mxu0 %v13608_v58  ;;  %v13684_v58 = vld [vmem:[#allocation2 + $0xa40] ss:$16 sps:$4 sm:$0xff]  }
  0x8c   :  { %9791 = vmatpush2.bf16.msra.mxu1 %v13611_v59  ;;  %9751 = vmatprep.subr.bf16.mxu0 %v13616_v61  ;;  %v13689_v59 = vld [vmem:[#allocation2 + $0x824] ss:$16 sps:$4 sm:$0xff]  }
  0x8d   :  { %9792 = vmatprep.subr.bf16.mxu1 %v13619_v62  ;;  %v13692_v61 = vld [vmem:[#allocation2 + $0xa24] ss:$16 sps:$4 sm:$0xff]   ;;  %v13687_v62 = vld [vmem:[#allocation2 + $0x820] ss:$16 sps:$4 sm:$0xff]  }
  0x8f   :  { %9752 = vmatpush2.bf16.msra.mxu0 %v13614_v63  ;;  %v13690_v63 = vld [vmem:[#allocation2 + $0xa20] ss:$16 sps:$4 sm:$0xff]  }
  0x90   :  { %9793 = vmatpush2.bf16.msra.mxu1 %v13617_v1  ;;  %9753 = vmatprep.subr.bf16.mxu0 %v13622_v2  ;;  %v13695_v1 = vld [vmem:[#allocation2 + $0x804] ss:$16 sps:$4 sm:$0xff]  }
  0x91   :  { %9794 = vmatprep.subr.bf16.mxu1 %v13625_v3  ;;  %v13698_v2 = vld [vmem:[#allocation2 + $0xa04] ss:$16 sps:$4 sm:$0xff]   ;;  %v13693_v3 = vld [vmem:[#allocation2 + $0x800] ss:$16 sps:$4 sm:$0xff]  }
  0x93   :  { %9754 = vmatpush2.bf16.msra.mxu0 %v13620_v4  ;;  %v13696_v4 = vld [vmem:[#allocation2 + $0xa00] ss:$16 sps:$4 sm:$0xff]  }
  0x94   :  { %9795 = vmatpush2.bf16.msra.mxu1 %v13623_v5  ;;  %9755 = vmatprep.subr.bf16.mxu0 %v13628_v7  ;;  %v13701_v5 = vld [vmem:[#allocation2 + $0x9e4] ss:$16 sps:$4 sm:$0xff]  }
  0x95   :  { %9796 = vmatprep.subr.bf16.mxu1 %v13631_v8  ;;  %v13704_v7 = vld [vmem:[#allocation2 + $0xbe4] ss:$16 sps:$4 sm:$0xff]   ;;  %v13699_v8 = vld [vmem:[#allocation2 + $0x9e0] ss:$16 sps:$4 sm:$0xff]  }
  0x97   :  { %9756 = vmatpush2.bf16.msra.mxu0 %v13626_v9  ;;  %v13702_v9 = vld [vmem:[#allocation2 + $0xbe0] ss:$16 sps:$4 sm:$0xff]  }
  0x98   :  { %9797 = vmatpush2.bf16.msra.mxu1 %v13629_v10  ;;  %9757 = vmatprep.subr.bf16.mxu0 %v13634_v11  ;;  %v13707_v10 = vld [vmem:[#allocation2 + $0x9c4] ss:$16 sps:$4 sm:$0xff]  }
  0x99   :  { %9798 = vmatprep.subr.bf16.mxu1 %v13637_v12  ;;  %v13710_v11 = vld [vmem:[#allocation2 + $0xbc4] ss:$16 sps:$4 sm:$0xff]   ;;  %v13705_v12 = vld [vmem:[#allocation2 + $0x9c0] ss:$16 sps:$4 sm:$0xff]  }
  0x9b   :  { %9758 = vmatpush2.bf16.msra.mxu0 %v13632_v14  ;;  %v13708_v14 = vld [vmem:[#allocation2 + $0xbc0] ss:$16 sps:$4 sm:$0xff]  }
  0x9c   :  { %9799 = vmatpush2.bf16.msra.mxu1 %v13635_v15  ;;  %9759 = vmatprep.subr.bf16.mxu0 %v13640_v16  ;;  %v13713_v15 = vld [vmem:[#allocation2 + $0x9a4] ss:$16 sps:$4 sm:$0xff]  }
  0x9d   :  { %9800 = vmatprep.subr.bf16.mxu1 %v13643_v19  ;;  %v13716_v16 = vld [vmem:[#allocation2 + $0xba4] ss:$16 sps:$4 sm:$0xff]   ;;  %v13711_v19 = vld [vmem:[#allocation2 + $0x9a0] ss:$16 sps:$4 sm:$0xff]  }
  0x9f   :  { %9760 = vmatpush2.bf16.msra.mxu0 %v13638_v20  ;;  %v13714_v20 = vld [vmem:[#allocation2 + $0xba0] ss:$16 sps:$4 sm:$0xff]  }
  0xa0   :  { %9801 = vmatpush2.bf16.msra.mxu1 %v13641_v21  ;;  %9761 = vmatprep.subr.bf16.mxu0 %v13646_v22  ;;  %v13719_v21 = vld [vmem:[#allocation2 + $0x984] ss:$16 sps:$4 sm:$0xff]  }
  0xa1   :  { %9802 = vmatprep.subr.bf16.mxu1 %v13649_v24  ;;  %v13722_v22 = vld [vmem:[#allocation2 + $0xb84] ss:$16 sps:$4 sm:$0xff]   ;;  %v13717_v24 = vld [vmem:[#allocation2 + $0x980] ss:$16 sps:$4 sm:$0xff]  }
  0xa3   :  { %9762 = vmatpush2.bf16.msra.mxu0 %v13644_v25  ;;  %v13720_v25 = vld [vmem:[#allocation2 + $0xb80] ss:$16 sps:$4 sm:$0xff]  }
  0xa4   :  { %9803 = vmatpush2.bf16.msra.mxu1 %v13647_v27  ;;  %9813 = vmatprep.subr.bf16.mxu0 %v13653_v28  ;;  %v13725_v27 = vld [vmem:[#allocation2 + $0x964] ss:$16 sps:$4 sm:$0xff]  }
  0xa5   :  { %9854 = vmatprep.subr.bf16.mxu1 %v13656_v29  ;;  %v13728_v28 = vld [vmem:[#allocation2 + $0xb64] ss:$16 sps:$4 sm:$0xff]   ;;  %v13723_v29 = vld [vmem:[#allocation2 + $0x960] ss:$16 sps:$4 sm:$0xff]  }
  0xa6   :  { %9764 = vmatmul.mubr.bf16.vlgmr.msra.gmra.mxu0 %v15925_v26 }
  0xa7   :  { %9805 = vmatmul.mubr.bf16.vlgmr.msra.gmra.mxu1 %v15929_v30  ;;  %9814 = vmatpush1.bf16.msra.mxu0 %v13651_v31  ;;  %v13726_v31 = vld [vmem:[#allocation2 + $0xb60] ss:$16 sps:$4 sm:$0xff]  }
  0xa8   :  { %9855 = vmatpush1.bf16.msra.mxu1 %v13654_v32  ;;  %9815 = vmatprep.subr.bf16.mxu0 %v13659_v33  ;;  %v13731_v32 = vld [vmem:[#allocation2 + $0x944] ss:$16 sps:$4 sm:$0xff]  }
  0xa9   :  { %9856 = vmatprep.subr.bf16.mxu1 %v13662_v34  ;;  %9845 = vmatprep.mubr.bf16.mxu0 %v15945_v41  ;;  %v13734_v33 = vld [vmem:[#allocation2 + $0xb44] ss:$16 sps:$4 sm:$0xff]   ;;  %v1655_v34 = vcombine.high %v15934_v6, %v15934_v6 }
  0xaa   :  { %9886 = vmatprep.mubr.bf16.mxu1 %v15950_v42 }
  0xab   :  { %9816 = vmatpush1.bf16.msra.mxu0 %v13657_v37  ;;  %v13732_v37 = vld [vmem:[#allocation2 + $0xb40] ss:$16 sps:$4 sm:$0xff]  }
  0xac   :  { %9857 = vmatpush1.bf16.msra.mxu1 %v13660_v38  ;;  %9817 = vmatprep.subr.bf16.mxu0 %v13665_v39  ;;  %v13737_v38 = vld [vmem:[#allocation2 + $0x924] ss:$16 sps:$4 sm:$0xff]  }
  0xad   :  { %9858 = vmatprep.subr.bf16.mxu1 %v13668_v40  ;;  %v13740_v39 = vld [vmem:[#allocation2 + $0xb24] ss:$16 sps:$4 sm:$0xff]   ;;  %v15956_v40 = vrot.slane %v1655_v34, %v15885_v49  ;;  %v13798_v34 = vld [vmem:[#allocation2 + $0xfe0] ss:$16 sps:$4 sm:$0xff]  }
  0xaf   :  { %9818 = vmatpush1.bf16.msra.mxu0 %v13663_v44  ;;  %v13735_v44 = vld [vmem:[#allocation2 + $0x920] ss:$16 sps:$4 sm:$0xff]   ;;  %v1671_v6 = vcombine.high %v15956_v40, %v15956_v40 }
  0xb0   :  { %9859 = vmatpush1.bf16.msra.mxu1 %v13666_v45  ;;  %9819 = vmatprep.subr.bf16.mxu0 %v13671_v46  ;;  %v13738_v45 = vld [vmem:[#allocation2 + $0xb20] ss:$16 sps:$4 sm:$0xff]   ;;  %v13743_v46 = vld [vmem:[#allocation2 + $0x904] ss:$16 sps:$4 sm:$0xff]  }
  0xb1   :  { %9860 = vmatprep.subr.bf16.mxu1 %v13674_v47  ;;  %v13746_v47 = vld [vmem:[#allocation2 + $0xb04] ss:$16 sps:$4 sm:$0xff]  }
  0xb3   :  { %9820 = vmatpush1.bf16.msra.mxu0 %v13669_v48  ;;  %v13741_v48 = vld [vmem:[#allocation2 + $0x900] ss:$16 sps:$4 sm:$0xff]  }
  0xb4   :  { %9861 = vmatpush1.bf16.msra.mxu1 %v13672_v50  ;;  %9821 = vmatprep.subr.bf16.mxu0 %v13677_v51  ;;  %v15962_v50 = vrot.slane %v15938_v35, %v15885_v49  ;;  %v13744_v51 = vld [vmem:[#allocation2 + $0xb00] ss:$16 sps:$4 sm:$0xff]   ;;  %v13755_v35 = vld [vmem:[#allocation2 + $0xcc4] ss:$16 sps:$4 sm:$0xff]  }
  0xb5   :  { %9862 = vmatprep.subr.bf16.mxu1 %v13680_v52  ;;  %v13749_v52 = vld [vmem:[#allocation2 + $0xce4] ss:$16 sps:$4 sm:$0xff]  }
  0xb7   :  { %9822 = vmatpush1.bf16.msra.mxu0 %v13675_v53  ;;  %v13752_v53 = vld [vmem:[#allocation2 + $0xee4] ss:$16 sps:$4 sm:$0xff]  }
  0xb8   :  { %9863 = vmatpush1.bf16.msra.mxu1 %v13678_v54  ;;  %9823 = vmatprep.subr.bf16.mxu0 %v13683_v55  ;;  %v15965_v54 = vrot.slane %v1671_v6, %v15885_v49  ;;  %v15969_v55 = vcombine.high %v15962_v50, %v15962_v50  ;;  %v13815_v6 = vld [vmem:[#allocation2 + $0xd84] ss:$16 sps:$4 sm:$0xff]  }
  0xb9   :  { %9864 = vmatprep.subr.bf16.mxu1 %v13686_v56  ;;  %v13747_v56 = vld [vmem:[#allocation2 + $0xce0] ss:$16 sps:$4 sm:$0xff]  }
  0xbb   :  { %9824 = vmatpush1.bf16.msra.mxu0 %v13681_v57  ;;  %v13750_v57 = vld [vmem:[#allocation2 + $0xee0] ss:$16 sps:$4 sm:$0xff]  }
  0xbc   :  { %9865 = vmatpush1.bf16.msra.mxu1 %v13684_v58  ;;  %9825 = vmatprep.subr.bf16.mxu0 %v13689_v59  ;;  %v13758_v58 = vld [vmem:[#allocation2 + $0xec4] ss:$16 sps:$4 sm:$0xff]   ;;  %v15973_v59 = vcombine.high %v15965_v54, %v15965_v54 }
  0xbd   :  { %9866 = vmatprep.subr.bf16.mxu1 %v13692_v61  ;;  %v13753_v61 = vld [vmem:[#allocation2 + $0xcc0] ss:$16 sps:$4 sm:$0xff]  }
  0xbf   :  { %9826 = vmatpush1.bf16.msra.mxu0 %v13687_v62  ;;  %v13756_v62 = vld [vmem:[#allocation2 + $0xec0] ss:$16 sps:$4 sm:$0xff]  }
  0xc0   :  { %9867 = vmatpush1.bf16.msra.mxu1 %v13690_v63  ;;  %9827 = vmatprep.subr.bf16.mxu0 %v13695_v1  ;;  %v13761_v63 = vld [vmem:[#allocation2 + $0xca4] ss:$16 sps:$4 sm:$0xff]  }
  0xc1   :  { %9868 = vmatprep.subr.bf16.mxu1 %v13698_v2  ;;  %v13764_v1 = vld [vmem:[#allocation2 + $0xea4] ss:$16 sps:$4 sm:$0xff]   ;;  %v13759_v2 = vld [vmem:[#allocation2 + $0xca0] ss:$16 sps:$4 sm:$0xff]  }
  0xc3   :  { %9828 = vmatpush1.bf16.msra.mxu0 %v13693_v3  ;;  %v13762_v3 = vld [vmem:[#allocation2 + $0xea0] ss:$16 sps:$4 sm:$0xff]  }
  0xc4   :  { %9869 = vmatpush1.bf16.msra.mxu1 %v13696_v4  ;;  %9829 = vmatprep.subr.bf16.mxu0 %v13701_v5  ;;  %v13767_v4 = vld [vmem:[#allocation2 + $0xc84] ss:$16 sps:$4 sm:$0xff]  }
  0xc5   :  { %9870 = vmatprep.subr.bf16.mxu1 %v13704_v7  ;;  %v13770_v5 = vld [vmem:[#allocation2 + $0xe84] ss:$16 sps:$4 sm:$0xff]   ;;  %v13765_v7 = vld [vmem:[#allocation2 + $0xc80] ss:$16 sps:$4 sm:$0xff]  }
  0xc7   :  { %9830 = vmatpush2.bf16.msra.mxu0 %v13699_v8  ;;  %v13768_v8 = vld [vmem:[#allocation2 + $0xe80] ss:$16 sps:$4 sm:$0xff]  }
  0xc8   :  { %9871 = vmatpush2.bf16.msra.mxu1 %v13702_v9  ;;  %9831 = vmatprep.subr.bf16.mxu0 %v13707_v10  ;;  %v13773_v9 = vld [vmem:[#allocation2 + $0xc64] ss:$16 sps:$4 sm:$0xff]  }
  0xc9   :  { %9872 = vmatprep.subr.bf16.mxu1 %v13710_v11  ;;  %v13776_v10 = vld [vmem:[#allocation2 + $0xe64] ss:$16 sps:$4 sm:$0xff]   ;;  %v13771_v11 = vld [vmem:[#allocation2 + $0xc60] ss:$16 sps:$4 sm:$0xff]  }
  0xcb   :  { %9832 = vmatpush2.bf16.msra.mxu0 %v13705_v12  ;;  %v13774_v12 = vld [vmem:[#allocation2 + $0xe60] ss:$16 sps:$4 sm:$0xff]  }
  0xcc   :  { %9873 = vmatpush2.bf16.msra.mxu1 %v13708_v14  ;;  %9833 = vmatprep.subr.bf16.mxu0 %v13713_v15  ;;  %v13779_v14 = vld [vmem:[#allocation2 + $0xc44] ss:$16 sps:$4 sm:$0xff]  }
  0xcd   :  { %9874 = vmatprep.subr.bf16.mxu1 %v13716_v16  ;;  %v13782_v15 = vld [vmem:[#allocation2 + $0xe44] ss:$16 sps:$4 sm:$0xff]   ;;  %v13777_v16 = vld [vmem:[#allocation2 + $0xc40] ss:$16 sps:$4 sm:$0xff]  }
  0xcf   :  { %9834 = vmatpush2.bf16.msra.mxu0 %v13711_v19  ;;  %v13780_v19 = vld [vmem:[#allocation2 + $0xe40] ss:$16 sps:$4 sm:$0xff]  }
  0xd0   :  { %9875 = vmatpush2.bf16.msra.mxu1 %v13714_v20  ;;  %9835 = vmatprep.subr.bf16.mxu0 %v13719_v21  ;;  %v13785_v20 = vld [vmem:[#allocation2 + $0xc24] ss:$16 sps:$4 sm:$0xff]  }
  0xd1   :  { %9876 = vmatprep.subr.bf16.mxu1 %v13722_v22  ;;  %v13788_v21 = vld [vmem:[#allocation2 + $0xe24] ss:$16 sps:$4 sm:$0xff]   ;;  %v13783_v22 = vld [vmem:[#allocation2 + $0xc20] ss:$16 sps:$4 sm:$0xff]  }
  0xd3   :  { %9836 = vmatpush2.bf16.msra.mxu0 %v13717_v24  ;;  %v13786_v24 = vld [vmem:[#allocation2 + $0xe20] ss:$16 sps:$4 sm:$0xff]  }
  0xd4   :  { %9877 = vmatpush2.bf16.msra.mxu1 %v13720_v25  ;;  %9837 = vmatprep.subr.bf16.mxu0 %v13725_v27  ;;  %v13791_v25 = vld [vmem:[#allocation2 + $0xc04] ss:$16 sps:$4 sm:$0xff]  }
  0xd5   :  { %9878 = vmatprep.subr.bf16.mxu1 %v13728_v28  ;;  %v13794_v27 = vld [vmem:[#allocation2 + $0xe04] ss:$16 sps:$4 sm:$0xff]   ;;  %v13789_v28 = vld [vmem:[#allocation2 + $0xc00] ss:$16 sps:$4 sm:$0xff]  }
  0xd7   :  { %9838 = vmatpush2.bf16.msra.mxu0 %v13723_v29  ;;  %v13792_v29 = vld [vmem:[#allocation2 + $0xe00] ss:$16 sps:$4 sm:$0xff]  }
  0xd8   :  { %9879 = vmatpush2.bf16.msra.mxu1 %v13726_v31  ;;  %9839 = vmatprep.subr.bf16.mxu0 %v13731_v32  ;;  %v13797_v31 = vld [vmem:[#allocation2 + $0xde4] ss:$16 sps:$4 sm:$0xff]  }
  0xd9   :  { %9880 = vmatprep.subr.bf16.mxu1 %v13734_v33  ;;  %v13800_v32 = vld [vmem:[#allocation2 + $0xfe4] ss:$16 sps:$4 sm:$0xff]   ;;  %v13795_v33 = vld [vmem:[#allocation2 + $0xde0] ss:$16 sps:$4 sm:$0xff]  }
  0xdb   :  { %9840 = vmatpush2.bf16.msra.mxu0 %v13729_v36  ;;  %v13803_v36 = vld [vmem:[#allocation2 + $0xdc4] ss:$16 sps:$4 sm:$0xff]  }
  0xdc   :  { %9881 = vmatpush2.bf16.msra.mxu1 %v13732_v37  ;;  %9841 = vmatprep.subr.bf16.mxu0 %v13737_v38  ;;  %v13806_v37 = vld [vmem:[#allocation2 + $0xfc4] ss:$16 sps:$4 sm:$0xff]   ;;  %v13801_v38 = vld [vmem:[#allocation2 + $0xdc0] ss:$16 sps:$4 sm:$0xff]  }
  0xdd   :  { %9882 = vmatprep.subr.bf16.mxu1 %v13740_v39  ;;  %v13804_v39 = vld [vmem:[#allocation2 + $0xfc0] ss:$16 sps:$4 sm:$0xff]  }
  0xdf   :  { %9842 = vmatpush2.bf16.msra.mxu0 %v13735_v44  ;;  %v13809_v44 = vld [vmem:[#allocation2 + $0xda4] ss:$16 sps:$4 sm:$0xff]  }
  0xe0   :  { %9883 = vmatpush2.bf16.msra.mxu1 %v13738_v45  ;;  %9843 = vmatprep.subr.bf16.mxu0 %v13743_v46  ;;  %v13812_v45 = vld [vmem:[#allocation2 + $0xfa4] ss:$16 sps:$4 sm:$0xff]   ;;  %v13807_v46 = vld [vmem:[#allocation2 + $0xda0] ss:$16 sps:$4 sm:$0xff]  }
  0xe1   :  { %9884 = vmatprep.subr.bf16.mxu1 %v13746_v47  ;;  %v13810_v47 = vld [vmem:[#allocation2 + $0xfa0] ss:$16 sps:$4 sm:$0xff]  }
  0xe3   :  { %9844 = vmatpush2.bf16.msra.mxu0 %v13741_v48  ;;  %v13818_v48 = vld [vmem:[#allocation2 + $0xf84] ss:$16 sps:$4 sm:$0xff]  }
  0xe4   :  { %9885 = vmatpush2.bf16.msra.mxu1 %v13744_v51  ;;  %9895 = vmatprep.subr.bf16.mxu0 %v13749_v52  ;;  %v13813_v51 = vld [vmem:[#allocation2 + $0xd80] ss:$16 sps:$4 sm:$0xff]  }
  0xe5   :  { %9936 = vmatprep.subr.bf16.mxu1 %v13752_v53  ;;  %v13816_v52 = vld [vmem:[#allocation2 + $0xf80] ss:$16 sps:$4 sm:$0xff]   ;;  %v13821_v53 = vld [vmem:[#allocation2 + $0xd64] ss:$16 sps:$4 sm:$0xff]  }
  0xe6   :  { %9846 = vmatmul.mubr.bf16.vlgmr.msra.gmra.mxu0 %v15962_v50 }
  0xe7   :  { %9887 = vmatmul.mubr.bf16.vlgmr.msra.gmra.mxu1 %v15969_v55  ;;  %9896 = vmatpush1.bf16.msra.mxu0 %v13747_v56  ;;  %v13824_v56 = vld [vmem:[#allocation2 + $0xf64] ss:$16 sps:$4 sm:$0xff]  }
  0xe8   :  { %9937 = vmatpush1.bf16.msra.mxu1 %v13750_v57  ;;  %9897 = vmatprep.subr.bf16.mxu0 %v13755_v35  ;;  %v13819_v57 = vld [vmem:[#allocation2 + $0xd60] ss:$16 sps:$4 sm:$0xff]  }
  0xe9   :  { %9938 = vmatprep.subr.bf16.mxu1 %v13758_v58  ;;  %9927 = vmatprep.mubr.bf16.mxu0 %v15965_v54  ;;  %v13822_v35 = vld [vmem:[#allocation2 + $0xf60] ss:$16 sps:$4 sm:$0xff]   ;;  %v13827_v58 = vld [vmem:[#allocation2 + $0xd44] ss:$16 sps:$4 sm:$0xff]  }
  0xea   :  { %9968 = vmatprep.mubr.bf16.mxu1 %v15973_v59 }
  0xeb   :  { %9898 = vmatpush1.bf16.msra.mxu0 %v13753_v61  ;;  %v13830_v61 = vld [vmem:[#allocation2 + $0xf44] ss:$16 sps:$4 sm:$0xff]  }
  0xec   :  { %9939 = vmatpush1.bf16.msra.mxu1 %v13756_v62  ;;  %9899 = vmatprep.subr.bf16.mxu0 %v13761_v63  ;;  %v13825_v62 = vld [vmem:[#allocation2 + $0xd40] ss:$16 sps:$4 sm:$0xff]  }
  0xed   :  { %9940 = vmatprep.subr.bf16.mxu1 %v13764_v1  ;;  %v13828_v63 = vld [vmem:[#allocation2 + $0xf40] ss:$16 sps:$4 sm:$0xff]  }
  0xee   :  { %v15982_v1 = vld [vmem:[%s16586_s0 + $0x10] sm:$0xff] }
  0xef   :  { %9900 = vmatpush1.bf16.msra.mxu0 %v13759_v2  ;;  %v13833_v2 = vld [vmem:[#allocation2 + $0xd24] ss:$16 sps:$4 sm:$0xff]  }
  0xf0   :  { %9941 = vmatpush1.bf16.msra.mxu1 %v13762_v3  ;;  %9901 = vmatprep.subr.bf16.mxu0 %v13767_v4  ;;  %v13836_v3 = vld [vmem:[#allocation2 + $0xf24] ss:$16 sps:$4 sm:$0xff]   ;;  %v15986_v4 = vrot.slane %v15982_v1, %v15885_v49 }
  0xf1   :  { %9942 = vmatprep.subr.bf16.mxu1 %v13770_v5  ;;  %v13831_v5 = vld [vmem:[#allocation2 + $0xd20] ss:$16 sps:$4 sm:$0xff]  }
  0xf3   :  { %9902 = vmatpush1.bf16.msra.mxu0 %v13765_v7  ;;  %v13834_v7 = vld [vmem:[#allocation2 + $0xf20] ss:$16 sps:$4 sm:$0xff]  }
  0xf4   :  { %9943 = vmatpush1.bf16.msra.mxu1 %v13768_v8  ;;  %9903 = vmatprep.subr.bf16.mxu0 %v13773_v9  ;;  %v13839_v8 = vld [vmem:[#allocation2 + $0xd04] ss:$16 sps:$4 sm:$0xff]  }
  0xf5   :  { %9944 = vmatprep.subr.bf16.mxu1 %v13776_v10  ;;  %v13842_v9 = vld [vmem:[#allocation2 + $0xf04] ss:$16 sps:$4 sm:$0xff]   ;;  %v13837_v10 = vld [vmem:[#allocation2 + $0xd00] ss:$16 sps:$4 sm:$0xff]  }
  0xf7   :  { %9904 = vmatpush1.bf16.msra.mxu0 %v13771_v11  ;;  %v1719_v11 = vcombine.high %v15986_v4, %v15986_v4 }
  0xf8   :  { %9945 = vmatpush1.bf16.msra.mxu1 %v13774_v12  ;;  %9905 = vmatprep.subr.bf16.mxu0 %v13779_v14  ;;  %v13840_v12 = vld [vmem:[#allocation2 + $0xf00] ss:$16 sps:$4 sm:$0xff]  }
  0xf9   :  { %9946 = vmatprep.subr.bf16.mxu1 %v13782_v15  ;;  %v1599_v14 = vld [vmem:[#allocation4] sm:$0xf]  ;;  %v15992_v15 = vrot.slane %v15956_v40, %v15885_v49 }
  0xfa   :  { %v13847_v40 = vld [vmem:[#allocation2 + $0x12e0] ss:$16 sps:$4 sm:$0xff]  }
  0xfb   :  { %9906 = vmatpush1.bf16.msra.mxu0 %v13777_v16  ;;  %v9631_v16 = vsub.s32 0, %v15882_v43 }
  0xfc   :  { %9947 = vmatpush1.bf16.msra.mxu1 %v13780_v19  ;;  %9907 = vmatprep.subr.bf16.mxu0 %v13785_v20  ;;  %v13846_v19 = vld [vmem:[#allocation2 + $0x10e4] ss:$16 sps:$4 sm:$0xff]  }
  0xfd   :  { %9948 = vmatprep.subr.bf16.mxu1 %v13788_v21  ;;  %v13849_v20 = vld [vmem:[#allocation2 + $0x12e4] ss:$16 sps:$4 sm:$0xff]   ;;  %v9635_v21 = vsub.s32 1, %v15882_v43 }
  0xff   :  { %9908 = vmatpush1.bf16.msra.mxu0 %v13783_v22  ;;  %v15997_v22 = vrot.slane %v1719_v11, %v15885_v49  ;;  %v13877_v11 = vld [vmem:[#allocation2 + $0x1240] ss:$16 sps:$4 sm:$0xff]  }
 0x100   :  { %9949 = vmatpush1.bf16.msra.mxu1 %v13786_v24  ;;  %9909 = vmatprep.subr.bf16.mxu0 %v13791_v25  ;;  %v16001_v24 = vcombine.high %v15992_v15, %v15992_v15  ;;  %v13844_v25 = vld [vmem:[#allocation2 + $0x10e0] ss:$16 sps:$4 sm:$0xff]  }
 0x101   :  { %9950 = vmatprep.subr.bf16.mxu1 %v13794_v27  ;;  %v9632_v27 = vrot.slane %v1599_v14, %v9631_v16  ;;  %v13880_v16 = vld [vmem:[#allocation2 + $0x1020] ss:$16 sps:$4 sm:$0xff]  }
 0x103   :  { %9910 = vmatpush1.bf16.msra.mxu0 %v13789_v28  ;;  %v13852_v28 = vld [vmem:[#allocation2 + $0x10c4] ss:$16 sps:$4 sm:$0xff]  }
 0x104   :  { %9951 = vmatpush1.bf16.msra.mxu1 %v13792_v29  ;;  %9911 = vmatprep.subr.bf16.mxu0 %v13797_v31  ;;  %v13855_v29 = vld [vmem:[#allocation2 + $0x12c4] ss:$16 sps:$4 sm:$0xff]   ;;  %v9636_v31 = vrot.slane %v1599_v14, %v9635_v21 }
 0x105   :  { %9952 = vmatprep.subr.bf16.mxu1 %v13800_v32  ;;  %v16005_v32 = vcombine.high %v15997_v22, %v15997_v22  ;;  %v13885_v14 = vld [vmem:[#allocation2 + $0x1224] ss:$16 sps:$4 sm:$0xff]  }
 0x106   :  { %v13891_v21 = vld [vmem:[#allocation2 + $0x1204] ss:$16 sps:$4 sm:$0xff]  }
 0x107   :  { %9912 = vmatpush2.bf16.msra.mxu0 %v13795_v33 }
 0x108   :  { %9953 = vmatpush2.bf16.msra.mxu1 %v13798_v34  ;;  %9913 = vmatprep.subr.bf16.mxu0 %v13803_v36  ;;  %v13850_v36 = vld [vmem:[#allocation2 + $0x10c0] ss:$16 sps:$4 sm:$0xff]  }
 0x109   :  { %9954 = vmatprep.subr.bf16.mxu1 %v13806_v37  ;;  %v13853_v37 = vld [vmem:[#allocation2 + $0x12c0] ss:$16 sps:$4 sm:$0xff]  }
 0x10b   :  { %9914 = vmatpush2.bf16.msra.mxu0 %v13801_v38 }
 0x10c   :  { %9955 = vmatpush2.bf16.msra.mxu1 %v13804_v39  ;;  %9915 = vmatprep.subr.bf16.mxu0 %v13809_v44 }
 0x10d   :  { %9956 = vmatprep.subr.bf16.mxu1 %v13812_v45  ;;  %v13858_v45 = vld [vmem:[#allocation2 + $0x10a4] ss:$16 sps:$4 sm:$0xff]  }
 0x10f   :  { %9916 = vmatpush2.bf16.msra.mxu0 %v13807_v46  ;;  %v13861_v46 = vld [vmem:[#allocation2 + $0x12a4] ss:$16 sps:$4 sm:$0xff]  }
 0x110   :  { %9957 = vmatpush2.bf16.msra.mxu1 %v13810_v47  ;;  %9917 = vmatprep.subr.bf16.mxu0 %v13815_v6 }
 0x111   :  { %9958 = vmatprep.subr.bf16.mxu1 %v13818_v48  ;;  %v13856_v48 = vld [vmem:[#allocation2 + $0x10a0] ss:$16 sps:$4 sm:$0xff]  }
 0x113   :  { %9918 = vmatpush2.bf16.msra.mxu0 %v13813_v51  ;;  %v13859_v51 = vld [vmem:[#allocation2 + $0x12a0] ss:$16 sps:$4 sm:$0xff]  }
 0x114   :  { %9959 = vmatpush2.bf16.msra.mxu1 %v13816_v52  ;;  %9919 = vmatprep.subr.bf16.mxu0 %v13821_v53 }
 0x115   :  { %9960 = vmatprep.subr.bf16.mxu1 %v13824_v56 }
 0x117   :  { %9920 = vmatpush2.bf16.msra.mxu0 %v13819_v57 }
 0x118   :  { %9961 = vmatpush2.bf16.msra.mxu1 %v13822_v35  ;;  %9921 = vmatprep.subr.bf16.mxu0 %v13827_v58  ;;  %v13864_v58 = vld [vmem:[#allocation2 + $0x1084] ss:$16 sps:$4 sm:$0xff]  }
 0x119   :  { %9962 = vmatprep.subr.bf16.mxu1 %v13830_v61  ;;  %v13867_v61 = vld [vmem:[#allocation2 + $0x1284] ss:$16 sps:$4 sm:$0xff]  }
 0x11b   :  { %9922 = vmatpush2.bf16.msra.mxu0 %v13825_v62  ;;  %v13862_v62 = vld [vmem:[#allocation2 + $0x1080] ss:$16 sps:$4 sm:$0xff]  }
 0x11c   :  { %9963 = vmatpush2.bf16.msra.mxu1 %v13828_v63  ;;  %9923 = vmatprep.subr.bf16.mxu0 %v13833_v2  ;;  %v13865_v63 = vld [vmem:[#allocation2 + $0x1280] ss:$16 sps:$4 sm:$0xff]   ;;  %v13870_v2 = vld [vmem:[#allocation2 + $0x1064] ss:$16 sps:$4 sm:$0xff]  }
 0x11d   :  { %9964 = vmatprep.subr.bf16.mxu1 %v13836_v3  ;;  %v13873_v3 = vld [vmem:[#allocation2 + $0x1264] ss:$16 sps:$4 sm:$0xff]  }
 0x11f   :  { %9924 = vmatpush2.bf16.msra.mxu0 %v13831_v5  ;;  %v13868_v5 = vld [vmem:[#allocation2 + $0x1060] ss:$16 sps:$4 sm:$0xff]  }
 0x120   :  { %9965 = vmatpush2.bf16.msra.mxu1 %v13834_v7  ;;  %9925 = vmatprep.subr.bf16.mxu0 %v13839_v8  ;;  %v13871_v7 = vld [vmem:[#allocation2 + $0x1260] ss:$16 sps:$4 sm:$0xff]   ;;  %v13876_v8 = vld [vmem:[#allocation2 + $0x1044] ss:$16 sps:$4 sm:$0xff]  }
 0x121   :  { %9966 = vmatprep.subr.bf16.mxu1 %v13842_v9  ;;  %v13879_v9 = vld [vmem:[#allocation2 + $0x1244] ss:$16 sps:$4 sm:$0xff]  }
 0x123   :  { %9926 = vmatpush2.bf16.msra.mxu0 %v13837_v10  ;;  %v13874_v10 = vld [vmem:[#allocation2 + $0x1040] ss:$16 sps:$4 sm:$0xff]  }
 0x124   :  { %9967 = vmatpush2.bf16.msra.mxu1 %v13840_v12  ;;  %9977 = vmatprep.subr.bf16.mxu0 %v13846_v19  ;;  %v13882_v12 = vld [vmem:[#allocation2 + $0x1024] ss:$16 sps:$4 sm:$0xff]   ;;  %v13883_v19 = vld [vmem:[#allocation2 + $0x1220] ss:$16 sps:$4 sm:$0xff]  }
 0x125   :  { %10018 = vmatprep.subr.bf16.mxu1 %v13849_v20  ;;  %v13888_v20 = vld [vmem:[#allocation2 + $0x1004] ss:$16 sps:$4 sm:$0xff]  }
 0x126   :  { %v9683_v33 = vpop.f32.mrf.mxu0  ;;  %9928 = vmatmul.mubr.bf16.vlgmr.msra.gmra.mxu0 %v15992_v15 }
 0x127   :  { %v9724_v34 = vpop.f32.mrf.mxu1  ;;  %9969 = vmatmul.mubr.bf16.vlgmr.msra.gmra.mxu1 %v16001_v24  ;;  %v9684_v38 = vadd.f32 %v9683_v33, %v9632_v27  ;;  %9978 = vmatpush1.bf16.msra.mxu0 %v13844_v25  ;;  %v13886_v25 = vld [vmem:[#allocation2 + $0x1000] ss:$16 sps:$4 sm:$0xff]   ;;  %v13894_v27 = vld [vmem:[#allocation2 + $0x11e4] ss:$16 sps:$4 sm:$0xff]  }
 0x128   :  { %10019 = vmatpush1.bf16.msra.mxu1 %v13847_v40  ;;  %v9685_v39 = vpop.f32.mrf.mxu0  ;;  %9979 = vmatprep.subr.bf16.mxu0 %v13852_v28  ;;  %v13889_v40 = vld [vmem:[#allocation2 + $0x1200] ss:$16 sps:$4 sm:$0xff]   ;;  %v13897_v28 = vld [vmem:[#allocation2 + $0x13e4] ss:$16 sps:$4 sm:$0xff]  }
 0x129   :  { %v9726_v44 = vpop.f32.mrf.mxu1  ;;  %10020 = vmatprep.subr.bf16.mxu1 %v13855_v29  ;;  %v16009_v47 = vadd.f32 %v9724_v34, %v9684_v38  ;;  %v9686_v6 = vadd.f32 %v9685_v39, %v9636_v31  ;;  %10009 = vmatprep.mubr.bf16.mxu0 %v15997_v22  ;;  %v13892_v29 = vld [vmem:[#allocation2 + $0x11e0] ss:$16 sps:$4 sm:$0xff]   ;;  %v13900_v33 = vld [vmem:[#allocation2 + $0x11c4] ss:$16 sps:$4 sm:$0xff]  }
 0x12a   :  { %10050 = vmatprep.mubr.bf16.mxu1 %v16005_v32  ;;  %v9687_v52 = vpop.f32.mrf.mxu0  ;;  %v13895_v31 = vld [vmem:[#allocation2 + $0x13e0] ss:$16 sps:$4 sm:$0xff]   ;;  %v13903_v34 = vld [vmem:[#allocation2 + $0x13c4] ss:$16 sps:$4 sm:$0xff]  }
 0x12b   :  { %v9728_v53 = vpop.f32.mrf.mxu1  ;;  %v16013_v56 = vadd.f32 %v9726_v44, %v9686_v6  ;;  %9980 = vmatpush1.bf16.msra.mxu0 %v13850_v36  ;;  %v13898_v36 = vld [vmem:[#allocation2 + $0x11c0] ss:$16 sps:$4 sm:$0xff]   ;;  %v13906_v38 = vld [vmem:[#allocation2 + $0x11a4] ss:$16 sps:$4 sm:$0xff]  }
 0x12c   :  { %10021 = vmatpush1.bf16.msra.mxu1 %v13853_v37  ;;  %v9688_v57 = vpop.f32.mrf.mxu0  ;;  %9981 = vmatprep.subr.bf16.mxu0 %v13858_v45  ;;  %v13901_v37 = vld [vmem:[#allocation2 + $0x13c0] ss:$16 sps:$4 sm:$0xff]   ;;  %v13909_v39 = vld [vmem:[#allocation2 + $0x13a4] ss:$16 sps:$4 sm:$0xff]  }
 0x12d   :  { %v9729_v35 = vpop.f32.mrf.mxu1  ;;  %10022 = vmatprep.subr.bf16.mxu1 %v13861_v46  ;;  %v13904_v44 = vld [vmem:[#allocation2 + $0x11a0] ss:$16 sps:$4 sm:$0xff]   ;;  %v13912_v46 = vld [vmem:[#allocation2 + $0x1184] ss:$16 sps:$4 sm:$0xff]  }
 0x12e   :  { %v13907_v45 = vld [vmem:[#allocation2 + $0x13a0] ss:$16 sps:$4 sm:$0xff]   ;;  %v13915_v6 = vld [vmem:[#allocation2 + $0x1384] ss:$16 sps:$4 sm:$0xff]  }
 0x12f   :  { %9982 = vmatpush1.bf16.msra.mxu0 %v13856_v48  ;;  %v13910_v48 = vld [vmem:[#allocation2 + $0x1180] ss:$16 sps:$4 sm:$0xff]   ;;  %v13918_v52 = vld [vmem:[#allocation2 + $0x1164] ss:$16 sps:$4 sm:$0xff]  }
 0x130   :  { %10023 = vmatpush1.bf16.msra.mxu1 %v13859_v51  ;;  %9983 = vmatprep.subr.bf16.mxu0 %v13864_v58  ;;  %v13913_v51 = vld [vmem:[#allocation2 + $0x1380] ss:$16 sps:$4 sm:$0xff]   ;;  %v13921_v53 = vld [vmem:[#allocation2 + $0x1364] ss:$16 sps:$4 sm:$0xff]  }
 0x131   :  { %10024 = vmatprep.subr.bf16.mxu1 %v13867_v61  ;;  %v13916_v57 = vld [vmem:[#allocation2 + $0x1160] ss:$16 sps:$4 sm:$0xff]   ;;  %v13924_v58 = vld [vmem:[#allocation2 + $0x1144] ss:$16 sps:$4 sm:$0xff]  }
 0x132   :  { %v13919_v35 = vld [vmem:[#allocation2 + $0x1360] ss:$16 sps:$4 sm:$0xff]   ;;  %v13927_v61 = vld [vmem:[#allocation2 + $0x1344] ss:$16 sps:$4 sm:$0xff]  }
 0x133   :  { %9984 = vmatpush1.bf16.msra.mxu0 %v13862_v62  ;;  %v1704_v62 = vcombine.high %v15982_v1, %v15982_v1 }
 0x134   :  { %10025 = vmatpush1.bf16.msra.mxu1 %v13865_v63  ;;  %9985 = vmatprep.subr.bf16.mxu0 %v13870_v2  ;;  %v13922_v63 = vld [vmem:[#allocation2 + $0x1140] ss:$16 sps:$4 sm:$0xff]  }
 0x135   :  { %10026 = vmatprep.subr.bf16.mxu1 %v13873_v3  ;;  %v13925_v2 = vld [vmem:[#allocation2 + $0x1340] ss:$16 sps:$4 sm:$0xff]   ;;  %v13930_v3 = vld [vmem:[#allocation2 + $0x1124] ss:$16 sps:$4 sm:$0xff]  }
 0x137   :  { %9986 = vmatpush1.bf16.msra.mxu0 %v13868_v5  ;;  %v13933_v5 = vld [vmem:[#allocation2 + $0x1324] ss:$16 sps:$4 sm:$0xff]  }
 0x138   :  { %10027 = vmatpush1.bf16.msra.mxu1 %v13871_v7  ;;  %9987 = vmatprep.subr.bf16.mxu0 %v13876_v8  ;;  %v16018_v7 = vrot.slane %v1704_v62, %v15885_v49  ;;  %v13928_v8 = vld [vmem:[#allocation2 + $0x1120] ss:$16 sps:$4 sm:$0xff]  }
 0x139   :  { %10028 = vmatprep.subr.bf16.mxu1 %v13879_v9  ;;  %v13931_v9 = vld [vmem:[#allocation2 + $0x1320] ss:$16 sps:$4 sm:$0xff]  }
 0x13a   :  { %v1720_v1 = vcombine.high %v16018_v7, %v16018_v7  ;;  %v13961_v62 = vld [vmem:[#allocation2 + $0x1680] ss:$16 sps:$4 sm:$0xff]  }
 0x13b   :  { %9988 = vmatpush1.bf16.msra.mxu0 %v13874_v10  ;;  %v13936_v10 = vld [vmem:[#allocation2 + $0x1104] ss:$16 sps:$4 sm:$0xff]  }
 0x13c   :  { %10029 = vmatpush1.bf16.msra.mxu1 %v13877_v11  ;;  %9989 = vmatprep.subr.bf16.mxu0 %v13882_v12  ;;  %v13939_v11 = vld [vmem:[#allocation2 + $0x1304] ss:$16 sps:$4 sm:$0xff]   ;;  %v16024_v12 = vrot.slane %v15986_v4, %v15885_v49 }
 0x13d   :  { %10030 = vmatprep.subr.bf16.mxu1 %v13885_v14  ;;  %v13934_v14 = vld [vmem:[#allocation2 + $0x1100] ss:$16 sps:$4 sm:$0xff]   ;;  %v13948_v4 = vld [vmem:[#allocation2 + $0x14c4] ss:$16 sps:$4 sm:$0xff]  }
 0x13f   :  { %9990 = vmatpush1.bf16.msra.mxu0 %v13880_v16  ;;  %v13937_v16 = vld [vmem:[#allocation2 + $0x1300] ss:$16 sps:$4 sm:$0xff]  }
 0x140   :  { %10031 = vmatpush1.bf16.msra.mxu1 %v13883_v19  ;;  %9991 = vmatprep.subr.bf16.mxu0 %v13888_v20  ;;  %v13942_v19 = vld [vmem:[#allocation2 + $0x14e4] ss:$16 sps:$4 sm:$0xff]  }
 0x141   :  { %10032 = vmatprep.subr.bf16.mxu1 %v13891_v21  ;;  %v13945_v20 = vld [vmem:[#allocation2 + $0x16e4] ss:$16 sps:$4 sm:$0xff]   ;;  %v13940_v21 = vld [vmem:[#allocation2 + $0x14e0] ss:$16 sps:$4 sm:$0xff]  }
 0x143   :  { %9992 = vmatpush1.bf16.msra.mxu0 %v13886_v25  ;;  %v13943_v25 = vld [vmem:[#allocation2 + $0x16e0] ss:$16 sps:$4 sm:$0xff]  }
 0x144   :  { %10033 = vmatpush1.bf16.msra.mxu1 %v13889_v40  ;;  %9993 = vmatprep.subr.bf16.mxu0 %v13894_v27  ;;  %v16027_v40 = vrot.slane %v1720_v1, %v15885_v49  ;;  %v16031_v27 = vcombine.high %v16024_v12, %v16024_v12  ;;  %v13978_v1 = vld [vmem:[#allocation2 + $0x1424] ss:$16 sps:$4 sm:$0xff]  }
 0x145   :  { %10034 = vmatprep.subr.bf16.mxu1 %v13897_v28  ;;  %v13951_v28 = vld [vmem:[#allocation2 + $0x16c4] ss:$16 sps:$4 sm:$0xff]  }
 0x147   :  { %9994 = vmatpush2.bf16.msra.mxu0 %v13892_v29  ;;  %v13946_v29 = vld [vmem:[#allocation2 + $0x14c0] ss:$16 sps:$4 sm:$0xff]  }
 0x148   :  { %10035 = vmatpush2.bf16.msra.mxu1 %v13895_v31  ;;  %9995 = vmatprep.subr.bf16.mxu0 %v13900_v33  ;;  %v13949_v31 = vld [vmem:[#allocation2 + $0x16c0] ss:$16 sps:$4 sm:$0xff]   ;;  %v16035_v33 = vcombine.high %v16027_v40, %v16027_v40 }
 0x149   :  { %10036 = vmatprep.subr.bf16.mxu1 %v13903_v34 }
 0x14b   :  { %9996 = vmatpush2.bf16.msra.mxu0 %v13898_v36 }
 0x14c   :  { %10037 = vmatpush2.bf16.msra.mxu1 %v13901_v37  ;;  %9997 = vmatprep.subr.bf16.mxu0 %v13906_v38 }
 0x14d   :  { %10038 = vmatprep.subr.bf16.mxu1 %v13909_v39 }
 0x14f   :  { %9998 = vmatpush2.bf16.msra.mxu0 %v13904_v44  ;;  %v13954_v44 = vld [vmem:[#allocation2 + $0x14a4] ss:$16 sps:$4 sm:$0xff]  }
 0x150   :  { %10039 = vmatpush2.bf16.msra.mxu1 %v13907_v45  ;;  %9999 = vmatprep.subr.bf16.mxu0 %v13912_v46  ;;  %v13957_v45 = vld [vmem:[#allocation2 + $0x16a4] ss:$16 sps:$4 sm:$0xff]  }
 0x151   :  { %10040 = vmatprep.subr.bf16.mxu1 %v13915_v6 }
 0x153   :  { %10000 = vmatpush2.bf16.msra.mxu0 %v13910_v48  ;;  %v13952_v48 = vld [vmem:[#allocation2 + $0x14a0] ss:$16 sps:$4 sm:$0xff]  }
 0x154   :  { %10041 = vmatpush2.bf16.msra.mxu1 %v13913_v51  ;;  %10001 = vmatprep.subr.bf16.mxu0 %v13918_v52  ;;  %v13955_v51 = vld [vmem:[#allocation2 + $0x16a0] ss:$16 sps:$4 sm:$0xff]  }
 0x155   :  { %10042 = vmatprep.subr.bf16.mxu1 %v13921_v53 }
 0x157   :  { %10002 = vmatpush2.bf16.msra.mxu0 %v13916_v57 }
 0x158   :  { %10043 = vmatpush2.bf16.msra.mxu1 %v13919_v35  ;;  %10003 = vmatprep.subr.bf16.mxu0 %v13924_v58  ;;  %v13960_v58 = vld [vmem:[#allocation2 + $0x1484] ss:$16 sps:$4 sm:$0xff]  }
 0x159   :  { %10044 = vmatprep.subr.bf16.mxu1 %v13927_v61  ;;  %v13963_v61 = vld [vmem:[#allocation2 + $0x1684] ss:$16 sps:$4 sm:$0xff]  }
 0x15b   :  { %10004 = vmatpush2.bf16.msra.mxu0 %v13922_v63  ;;  %v13966_v63 = vld [vmem:[#allocation2 + $0x1464] ss:$16 sps:$4 sm:$0xff]  }
 0x15c   :  { %10045 = vmatpush2.bf16.msra.mxu1 %v13925_v2  ;;  %10005 = vmatprep.subr.bf16.mxu0 %v13930_v3  ;;  %v13969_v2 = vld [vmem:[#allocation2 + $0x1664] ss:$16 sps:$4 sm:$0xff]   ;;  %v13964_v3 = vld [vmem:[#allocation2 + $0x1460] ss:$16 sps:$4 sm:$0xff]  }
 0x15d   :  { %10046 = vmatprep.subr.bf16.mxu1 %v13933_v5  ;;  %v13967_v5 = vld [vmem:[#allocation2 + $0x1660] ss:$16 sps:$4 sm:$0xff]  }
 0x15f   :  { %10006 = vmatpush2.bf16.msra.mxu0 %v13928_v8  ;;  %v13972_v8 = vld [vmem:[#allocation2 + $0x1444] ss:$16 sps:$4 sm:$0xff]  }
 0x160   :  { %10047 = vmatpush2.bf16.msra.mxu1 %v13931_v9  ;;  %10007 = vmatprep.subr.bf16.mxu0 %v13936_v10  ;;  %v13975_v9 = vld [vmem:[#allocation2 + $0x1644] ss:$16 sps:$4 sm:$0xff]   ;;  %v13970_v10 = vld [vmem:[#allocation2 + $0x1440] ss:$16 sps:$4 sm:$0xff]  }
 0x161   :  { %10048 = vmatprep.subr.bf16.mxu1 %v13939_v11  ;;  %v13973_v11 = vld [vmem:[#allocation2 + $0x1640] ss:$16 sps:$4 sm:$0xff]  }
 0x163   :  { %10008 = vmatpush2.bf16.msra.mxu0 %v13934_v14  ;;  %v13981_v14 = vld [vmem:[#allocation2 + $0x1624] ss:$16 sps:$4 sm:$0xff]  }
 0x164   :  { %10049 = vmatpush2.bf16.msra.mxu1 %v13937_v16  ;;  %10059 = vmatprep.subr.bf16.mxu0 %v13942_v19  ;;  %v13976_v16 = vld [vmem:[#allocation2 + $0x1420] ss:$16 sps:$4 sm:$0xff]  }
 0x165   :  { %10100 = vmatprep.subr.bf16.mxu1 %v13945_v20  ;;  %v13979_v19 = vld [vmem:[#allocation2 + $0x1620] ss:$16 sps:$4 sm:$0xff]   ;;  %v13984_v20 = vld [vmem:[#allocation2 + $0x1404] ss:$16 sps:$4 sm:$0xff]  }
 0x166   :  { %v9765_v34 = vpop.f32.mrf.mxu0  ;;  %10010 = vmatmul.mubr.bf16.vlgmr.msra.gmra.mxu0 %v16024_v12 }
 0x167   :  { %v9806_v36 = vpop.f32.mrf.mxu1  ;;  %10051 = vmatmul.mubr.bf16.vlgmr.msra.gmra.mxu1 %v16031_v27  ;;  %v9766_v37 = vadd.f32 %v9765_v34, %v16009_v47  ;;  %10060 = vmatpush1.bf16.msra.mxu0 %v13940_v21  ;;  %v13987_v21 = vld [vmem:[#allocation2 + $0x1604] ss:$16 sps:$4 sm:$0xff]   ;;  %v13991_v34 = vld [vmem:[#allocation2 + $0x17e0] ss:$16 sps:$4 sm:$0xff]  }
 0x168   :  { %10101 = vmatpush1.bf16.msra.mxu1 %v13943_v25  ;;  %v9767_v38 = vpop.f32.mrf.mxu0  ;;  %10061 = vmatprep.subr.bf16.mxu0 %v13948_v4  ;;  %v13982_v25 = vld [vmem:[#allocation2 + $0x1400] ss:$16 sps:$4 sm:$0xff]  }
 0x169   :  { %v9808_v39 = vpop.f32.mrf.mxu1  ;;  %10102 = vmatprep.subr.bf16.mxu1 %v13951_v28  ;;  %v16040_v46 = vadd.f32 %v9806_v36, %v9766_v37  ;;  %v9768_v6 = vadd.f32 %v9767_v38, %v16013_v56  ;;  %10091 = vmatprep.mubr.bf16.mxu0 %v16027_v40  ;;  %v13958_v56 = vld [vmem:[#allocation2 + $0x1480] ss:$16 sps:$4 sm:$0xff]   ;;  %v13990_v28 = vld [vmem:[#allocation2 + $0x15e4] ss:$16 sps:$4 sm:$0xff]  }
 0x16a   :  { %10132 = vmatprep.mubr.bf16.mxu1 %v16035_v33  ;;  %v9769_v52 = vpop.f32.mrf.mxu0  ;;  %v13985_v4 = vld [vmem:[#allocation2 + $0x1600] ss:$16 sps:$4 sm:$0xff]   ;;  %v13996_v36 = vld [vmem:[#allocation2 + $0x15c4] ss:$16 sps:$4 sm:$0xff]  }
 0x16b   :  { %v9810_v47 = vpop.f32.mrf.mxu1  ;;  %v16045_v53 = vadd.f32 %v9808_v39, %v9768_v6  ;;  %10062 = vmatpush1.bf16.msra.mxu0 %v13946_v29  ;;  %v13993_v29 = vld [vmem:[#allocation2 + $0x17e4] ss:$16 sps:$4 sm:$0xff]   ;;  %v13994_v38 = vld [vmem:[#allocation2 + $0x15c0] ss:$16 sps:$4 sm:$0xff]  }
 0x16c   :  { %10103 = vmatpush1.bf16.msra.mxu1 %v13949_v31  ;;  %v9770_v57 = vpop.f32.mrf.mxu0  ;;  %10063 = vmatprep.subr.bf16.mxu0 %v13954_v44  ;;  %v13988_v31 = vld [vmem:[#allocation2 + $0x15e0] ss:$16 sps:$4 sm:$0xff]   ;;  %v13999_v37 = vld [vmem:[#allocation2 + $0x17c4] ss:$16 sps:$4 sm:$0xff]  }
 0x16d   :  { %v9811_v35 = vpop.f32.mrf.mxu1  ;;  %10104 = vmatprep.subr.bf16.mxu1 %v13957_v45  ;;  %v13997_v39 = vld [vmem:[#allocation2 + $0x17c0] ss:$16 sps:$4 sm:$0xff]   ;;  %v14002_v44 = vld [vmem:[#allocation2 + $0x15a4] ss:$16 sps:$4 sm:$0xff]  }
 0x16e   :  { %v14005_v45 = vld [vmem:[#allocation2 + $0x17a4] ss:$16 sps:$4 sm:$0xff]   ;;  %v14000_v6 = vld [vmem:[#allocation2 + $0x15a0] ss:$16 sps:$4 sm:$0xff]  }
 0x16f   :  { %10064 = vmatpush1.bf16.msra.mxu0 %v13952_v48  ;;  %v14003_v48 = vld [vmem:[#allocation2 + $0x17a0] ss:$16 sps:$4 sm:$0xff]   ;;  %v14011_v52 = vld [vmem:[#allocation2 + $0x1784] ss:$16 sps:$4 sm:$0xff]  }
 0x170   :  { %10105 = vmatpush1.bf16.msra.mxu1 %v13955_v51  ;;  %10065 = vmatprep.subr.bf16.mxu0 %v13960_v58  ;;  %v14008_v51 = vld [vmem:[#allocation2 + $0x1584] ss:$16 sps:$4 sm:$0xff]   ;;  %v14006_v47 = vld [vmem:[#allocation2 + $0x1580] ss:$16 sps:$4 sm:$0xff]  }
 0x171   :  { %10106 = vmatprep.subr.bf16.mxu1 %v13963_v61  ;;  %v14009_v57 = vld [vmem:[#allocation2 + $0x1780] ss:$16 sps:$4 sm:$0xff]   ;;  %v14014_v35 = vld [vmem:[#allocation2 + $0x1564] ss:$16 sps:$4 sm:$0xff]  }
 0x172   :  { %v14017_v58 = vld [vmem:[#allocation2 + $0x1764] ss:$16 sps:$4 sm:$0xff]   ;;  %v14012_v61 = vld [vmem:[#allocation2 + $0x1560] ss:$16 sps:$4 sm:$0xff]  }
 0x173   :  { %10066 = vmatpush1.bf16.msra.mxu0 %v13958_v56  ;;  %v14015_v56 = vld [vmem:[#allocation2 + $0x1760] ss:$16 sps:$4 sm:$0xff]  }
 0x174   :  { %10107 = vmatpush1.bf16.msra.mxu1 %v13961_v62  ;;  %10067 = vmatprep.subr.bf16.mxu0 %v13966_v63  ;;  %v14020_v62 = vld [vmem:[#allocation2 + $0x1544] ss:$16 sps:$4 sm:$0xff]  }
 0x175   :  { %10108 = vmatprep.subr.bf16.mxu1 %v13969_v2  ;;  %v14023_v63 = vld [vmem:[#allocation2 + $0x1744] ss:$16 sps:$4 sm:$0xff]   ;;  %v16050_v2 = vld [vmem:[%s16586_s0 + $0x18] sm:$0xff] }
 0x177   :  { %10068 = vmatpush1.bf16.msra.mxu0 %v13964_v3  ;;  %v14018_v3 = vld [vmem:[#allocation2 + $0x1540] ss:$16 sps:$4 sm:$0xff]  }
 0x178   :  { %10109 = vmatpush1.bf16.msra.mxu1 %v13967_v5  ;;  %10069 = vmatprep.subr.bf16.mxu0 %v13972_v8  ;;  %v14021_v5 = vld [vmem:[#allocation2 + $0x1740] ss:$16 sps:$4 sm:$0xff]   ;;  %v14026_v8 = vld [vmem:[#allocation2 + $0x1524] ss:$16 sps:$4 sm:$0xff]  }
 0x179   :  { %10110 = vmatprep.subr.bf16.mxu1 %v13975_v9  ;;  %v14029_v9 = vld [vmem:[#allocation2 + $0x1724] ss:$16 sps:$4 sm:$0xff]  }
 0x17b   :  { %10070 = vmatpush1.bf16.msra.mxu0 %v13970_v10  ;;  %v16054_v10 = vrot.slane %v16050_v2, %v15885_v49 }
 0x17c   :  { %10111 = vmatpush1.bf16.msra.mxu1 %v13973_v11  ;;  %10071 = vmatprep.subr.bf16.mxu0 %v13978_v1  ;;  %v14024_v11 = vld [vmem:[#allocation2 + $0x1520] ss:$16 sps:$4 sm:$0xff]  }
 0x17d   :  { %10112 = vmatprep.subr.bf16.mxu1 %v13981_v14  ;;  %v14027_v1 = vld [vmem:[#allocation2 + $0x1720] ss:$16 sps:$4 sm:$0xff]   ;;  %v14032_v14 = vld [vmem:[#allocation2 + $0x1504] ss:$16 sps:$4 sm:$0xff]  }
 0x17f   :  { %10072 = vmatpush1.bf16.msra.mxu0 %v13976_v16  ;;  %v14035_v16 = vld [vmem:[#allocation2 + $0x1704] ss:$16 sps:$4 sm:$0xff]  }
 0x180   :  { %10113 = vmatpush1.bf16.msra.mxu1 %v13979_v19  ;;  %10073 = vmatprep.subr.bf16.mxu0 %v13984_v20  ;;  %v1768_v19 = vcombine.high %v16054_v10, %v16054_v10  ;;  %v16060_v20 = vrot.slane %v16018_v7, %v15885_v49  ;;  %v14045_v7 = vld [vmem:[#allocation2 + $0x18c4] ss:$16 sps:$4 sm:$0xff]  }
 0x181   :  { %10114 = vmatprep.subr.bf16.mxu1 %v13987_v21  ;;  %v14030_v21 = vld [vmem:[#allocation2 + $0x1500] ss:$16 sps:$4 sm:$0xff]  }
 0x183   :  { %10074 = vmatpush1.bf16.msra.mxu0 %v13982_v25  ;;  %v14033_v25 = vld [vmem:[#allocation2 + $0x1700] ss:$16 sps:$4 sm:$0xff]  }
 0x184   :  { %10115 = vmatpush1.bf16.msra.mxu1 %v13985_v4  ;;  %10075 = vmatprep.subr.bf16.mxu0 %v13990_v28  ;;  %v14039_v4 = vld [vmem:[#allocation2 + $0x18e4] ss:$16 sps:$4 sm:$0xff]  }
 0x185   :  { %10116 = vmatprep.subr.bf16.mxu1 %v13993_v29  ;;  %v14042_v28 = vld [vmem:[#allocation2 + $0x1ae4] ss:$16 sps:$4 sm:$0xff]   ;;  %v14037_v29 = vld [vmem:[#allocation2 + $0x18e0] ss:$16 sps:$4 sm:$0xff]  }
 0x187   :  { %10076 = vmatpush2.bf16.msra.mxu0 %v13988_v31  ;;  %v14040_v31 = vld [vmem:[#allocation2 + $0x1ae0] ss:$16 sps:$4 sm:$0xff]  }
 0x188   :  { %10117 = vmatpush2.bf16.msra.mxu1 %v13991_v34  ;;  %10077 = vmatprep.subr.bf16.mxu0 %v13996_v36  ;;  %v16063_v34 = vrot.slane %v1768_v19, %v15885_v49  ;;  %v16067_v36 = vcombine.high %v16060_v20, %v16060_v20  ;;  %v14064_v19 = vld [vmem:[#allocation2 + $0x1a60] ss:$16 sps:$4 sm:$0xff]  }
 0x189   :  { %10118 = vmatprep.subr.bf16.mxu1 %v13999_v37  ;;  %v14048_v37 = vld [vmem:[#allocation2 + $0x1ac4] ss:$16 sps:$4 sm:$0xff]  }
 0x18b   :  { %10078 = vmatpush2.bf16.msra.mxu0 %v13994_v38  ;;  %v14043_v38 = vld [vmem:[#allocation2 + $0x18c0] ss:$16 sps:$4 sm:$0xff]  }
 0x18c   :  { %10119 = vmatpush2.bf16.msra.mxu1 %v13997_v39  ;;  %10079 = vmatprep.subr.bf16.mxu0 %v14002_v44  ;;  %v14046_v39 = vld [vmem:[#allocation2 + $0x1ac0] ss:$16 sps:$4 sm:$0xff]   ;;  %v16071_v44 = vcombine.high %v16063_v34, %v16063_v34 }
 0x18d   :  { %10120 = vmatprep.subr.bf16.mxu1 %v14005_v45 }
 0x18f   :  { %10080 = vmatpush2.bf16.msra.mxu0 %v14000_v6 }
 0x190   :  { %10121 = vmatpush2.bf16.msra.mxu1 %v14003_v48  ;;  %10081 = vmatprep.subr.bf16.mxu0 %v14008_v51 }
 0x191   :  { %10122 = vmatprep.subr.bf16.mxu1 %v14011_v52 }
 0x193   :  { %10082 = vmatpush2.bf16.msra.mxu0 %v14006_v47  ;;  %v14051_v47 = vld [vmem:[#allocation2 + $0x18a4] ss:$16 sps:$4 sm:$0xff]  }
 0x194   :  { %10123 = vmatpush2.bf16.msra.mxu1 %v14009_v57  ;;  %10083 = vmatprep.subr.bf16.mxu0 %v14014_v35  ;;  %v14054_v57 = vld [vmem:[#allocation2 + $0x1aa4] ss:$16 sps:$4 sm:$0xff]  }
 0x195   :  { %10124 = vmatprep.subr.bf16.mxu1 %v14017_v58 }
 0x197   :  { %10084 = vmatpush2.bf16.msra.mxu0 %v14012_v61  ;;  %v14049_v61 = vld [vmem:[#allocation2 + $0x18a0] ss:$16 sps:$4 sm:$0xff]  }
 0x198   :  { %10125 = vmatpush2.bf16.msra.mxu1 %v14015_v56  ;;  %10085 = vmatprep.subr.bf16.mxu0 %v14020_v62  ;;  %v14052_v56 = vld [vmem:[#allocation2 + $0x1aa0] ss:$16 sps:$4 sm:$0xff]  }
 0x199   :  { %10126 = vmatprep.subr.bf16.mxu1 %v14023_v63 }
 0x19b   :  { %10086 = vmatpush2.bf16.msra.mxu0 %v14018_v3 }
 0x19c   :  { %10127 = vmatpush2.bf16.msra.mxu1 %v14021_v5  ;;  %10087 = vmatprep.subr.bf16.mxu0 %v14026_v8  ;;  %v14057_v8 = vld [vmem:[#allocation2 + $0x1884] ss:$16 sps:$4 sm:$0xff]  }
 0x19d   :  { %10128 = vmatprep.subr.bf16.mxu1 %v14029_v9  ;;  %v14060_v9 = vld [vmem:[#allocation2 + $0x1a84] ss:$16 sps:$4 sm:$0xff]  }
 0x19f   :  { %10088 = vmatpush2.bf16.msra.mxu0 %v14024_v11  ;;  %v14058_v11 = vld [vmem:[#allocation2 + $0x1a80] ss:$16 sps:$4 sm:$0xff]  }
 0x1a0   :  { %10129 = vmatpush2.bf16.msra.mxu1 %v14027_v1  ;;  %10089 = vmatprep.subr.bf16.mxu0 %v14032_v14  ;;  %v14063_v1 = vld [vmem:[#allocation2 + $0x1864] ss:$16 sps:$4 sm:$0xff]  }
 0x1a1   :  { %10130 = vmatprep.subr.bf16.mxu1 %v14035_v16  ;;  %v14066_v14 = vld [vmem:[#allocation2 + $0x1a64] ss:$16 sps:$4 sm:$0xff]   ;;  %v14061_v16 = vld [vmem:[#allocation2 + $0x1860] ss:$16 sps:$4 sm:$0xff]  }
 0x1a3   :  { %10090 = vmatpush2.bf16.msra.mxu0 %v14030_v21  ;;  %v14069_v21 = vld [vmem:[#allocation2 + $0x1844] ss:$16 sps:$4 sm:$0xff]  }
 0x1a4   :  { %10131 = vmatpush2.bf16.msra.mxu1 %v14033_v25  ;;  %10141 = vmatprep.subr.bf16.mxu0 %v14039_v4  ;;  %v14072_v25 = vld [vmem:[#allocation2 + $0x1a44] ss:$16 sps:$4 sm:$0xff]   ;;  %v14067_v4 = vld [vmem:[#allocation2 + $0x1840] ss:$16 sps:$4 sm:$0xff]  }
 0x1a5   :  { %10182 = vmatprep.subr.bf16.mxu1 %v14042_v28  ;;  %v14070_v28 = vld [vmem:[#allocation2 + $0x1a40] ss:$16 sps:$4 sm:$0xff]  }
 0x1a6   :  { %v9847_v45 = vpop.f32.mrf.mxu0  ;;  %10092 = vmatmul.mubr.bf16.vlgmr.msra.gmra.mxu0 %v16060_v20 }
 0x1a7   :  { %v9888_v6 = vpop.f32.mrf.mxu1  ;;  %10133 = vmatmul.mubr.bf16.vlgmr.msra.gmra.mxu1 %v16067_v36  ;;  %v9848_v48 = vadd.f32 %v9847_v45, %v16040_v46  ;;  %10142 = vmatpush1.bf16.msra.mxu0 %v14037_v29  ;;  %v14075_v29 = vld [vmem:[#allocation2 + $0x1824] ss:$16 sps:$4 sm:$0xff]   ;;  %v14079_v45 = vld [vmem:[#allocation2 + $0x1800] ss:$16 sps:$4 sm:$0xff]  }
 0x1a8   :  { %10183 = vmatpush1.bf16.msra.mxu1 %v14040_v31  ;;  %v9849_v51 = vpop.f32.mrf.mxu0  ;;  %10143 = vmatprep.subr.bf16.mxu0 %v14045_v7  ;;  %v14078_v31 = vld [vmem:[#allocation2 + $0x1a24] ss:$16 sps:$4 sm:$0xff]   ;;  %v14073_v7 = vld [vmem:[#allocation2 + $0x1820] ss:$16 sps:$4 sm:$0xff]  }
 0x1a9   :  { %v9890_v52 = vpop.f32.mrf.mxu1  ;;  %10184 = vmatprep.subr.bf16.mxu1 %v14048_v37  ;;  %v16076_v35 = vadd.f32 %v9888_v6, %v9848_v48  ;;  %v9850_v58 = vadd.f32 %v9849_v51, %v16045_v53  ;;  %10173 = vmatprep.mubr.bf16.mxu0 %v16063_v34  ;;  %v14055_v53 = vld [vmem:[#allocation2 + $0x1880] ss:$16 sps:$4 sm:$0xff]   ;;  %v14087_v48 = vld [vmem:[#allocation2 + $0x19e4] ss:$16 sps:$4 sm:$0xff]  }
 0x1aa   :  { %10214 = vmatprep.mubr.bf16.mxu1 %v16071_v44  ;;  %v9851_v62 = vpop.f32.mrf.mxu0  ;;  %v14076_v37 = vld [vmem:[#allocation2 + $0x1a20] ss:$16 sps:$4 sm:$0xff]   ;;  %v14090_v51 = vld [vmem:[#allocation2 + $0x1be4] ss:$16 sps:$4 sm:$0xff]  }
 0x1ab   :  { %v9892_v46 = vpop.f32.mrf.mxu1  ;;  %v16081_v63 = vadd.f32 %v9890_v52, %v9850_v58  ;;  %10144 = vmatpush1.bf16.msra.mxu0 %v14043_v38  ;;  %v14081_v38 = vld [vmem:[#allocation2 + $0x1804] ss:$16 sps:$4 sm:$0xff]   ;;  %v14082_v6 = vld [vmem:[#allocation2 + $0x1a00] ss:$16 sps:$4 sm:$0xff]  }
 0x1ac   :  { %10185 = vmatpush1.bf16.msra.mxu1 %v14046_v39  ;;  %v9852_v3 = vpop.f32.mrf.mxu0  ;;  %10145 = vmatprep.subr.bf16.mxu0 %v14051_v47  ;;  %v14084_v39 = vld [vmem:[#allocation2 + $0x1a04] ss:$16 sps:$4 sm:$0xff]   ;;  %v14085_v52 = vld [vmem:[#allocation2 + $0x19e0] ss:$16 sps:$4 sm:$0xff]  }
 0x1ad   :  { %v9893_v5 = vpop.f32.mrf.mxu1  ;;  %10186 = vmatprep.subr.bf16.mxu1 %v14054_v57  ;;  %v14088_v47 = vld [vmem:[#allocation2 + $0x1be0] ss:$16 sps:$4 sm:$0xff]   ;;  %v14093_v57 = vld [vmem:[#allocation2 + $0x19c4] ss:$16 sps:$4 sm:$0xff]  }
 0x1ae   :  { %v14096_v58 = vld [vmem:[#allocation2 + $0x1bc4] ss:$16 sps:$4 sm:$0xff]   ;;  %v14097_v3 = vld [vmem:[#allocation2 + $0x19a0] ss:$16 sps:$4 sm:$0xff]  }
 0x1af   :  { %10146 = vmatpush1.bf16.msra.mxu0 %v14049_v61  ;;  %v14091_v61 = vld [vmem:[#allocation2 + $0x19c0] ss:$16 sps:$4 sm:$0xff]   ;;  %v14099_v62 = vld [vmem:[#allocation2 + $0x19a4] ss:$16 sps:$4 sm:$0xff]  }
 0x1b0   :  { %10187 = vmatpush1.bf16.msra.mxu1 %v14052_v56  ;;  %10147 = vmatprep.subr.bf16.mxu0 %v14057_v8  ;;  %v14094_v56 = vld [vmem:[#allocation2 + $0x1bc0] ss:$16 sps:$4 sm:$0xff]   ;;  %v14102_v46 = vld [vmem:[#allocation2 + $0x1ba4] ss:$16 sps:$4 sm:$0xff]  }
 0x1b1   :  { %10188 = vmatprep.subr.bf16.mxu1 %v14060_v9  ;;  %v14100_v5 = vld [vmem:[#allocation2 + $0x1ba0] ss:$16 sps:$4 sm:$0xff]   ;;  %v14105_v8 = vld [vmem:[#allocation2 + $0x1984] ss:$16 sps:$4 sm:$0xff]  }
 0x1b2   :  { %v14108_v9 = vld [vmem:[#allocation2 + $0x1b84] ss:$16 sps:$4 sm:$0xff]  }
 0x1b3   :  { %10148 = vmatpush1.bf16.msra.mxu0 %v14055_v53  ;;  %v14103_v53 = vld [vmem:[#allocation2 + $0x1980] ss:$16 sps:$4 sm:$0xff]  }
 0x1b4   :  { %10189 = vmatpush1.bf16.msra.mxu1 %v14058_v11  ;;  %10149 = vmatprep.subr.bf16.mxu0 %v14063_v1  ;;  %v14106_v11 = vld [vmem:[#allocation2 + $0x1b80] ss:$16 sps:$4 sm:$0xff]   ;;  %v14111_v1 = vld [vmem:[#allocation2 + $0x1964] ss:$16 sps:$4 sm:$0xff]  }
 0x1b5   :  { %10190 = vmatprep.subr.bf16.mxu1 %v14066_v14  ;;  %v14114_v14 = vld [vmem:[#allocation2 + $0x1b64] ss:$16 sps:$4 sm:$0xff]  }
 0x1b7   :  { %10150 = vmatpush1.bf16.msra.mxu0 %v14061_v16  ;;  %v14109_v16 = vld [vmem:[#allocation2 + $0x1960] ss:$16 sps:$4 sm:$0xff]  }
 0x1b8   :  { %10191 = vmatpush1.bf16.msra.mxu1 %v14064_v19  ;;  %10151 = vmatprep.subr.bf16.mxu0 %v14069_v21  ;;  %v14112_v19 = vld [vmem:[#allocation2 + $0x1b60] ss:$16 sps:$4 sm:$0xff]   ;;  %v14117_v21 = vld [vmem:[#allocation2 + $0x1944] ss:$16 sps:$4 sm:$0xff]  }
 0x1b9   :  { %10192 = vmatprep.subr.bf16.mxu1 %v14072_v25  ;;  %v14120_v25 = vld [vmem:[#allocation2 + $0x1b44] ss:$16 sps:$4 sm:$0xff]  }
 0x1bb   :  { %10152 = vmatpush1.bf16.msra.mxu0 %v14067_v4  ;;  %v1753_v4 = vcombine.high %v16050_v2, %v16050_v2 }
 0x1bc   :  { %10193 = vmatpush1.bf16.msra.mxu1 %v14070_v28  ;;  %10153 = vmatprep.subr.bf16.mxu0 %v14075_v29  ;;  %v14115_v28 = vld [vmem:[#allocation2 + $0x1940] ss:$16 sps:$4 sm:$0xff]  }
 0x1bd   :  { %10194 = vmatprep.subr.bf16.mxu1 %v14078_v31  ;;  %v14118_v29 = vld [vmem:[#allocation2 + $0x1b40] ss:$16 sps:$4 sm:$0xff]   ;;  %v14123_v31 = vld [vmem:[#allocation2 + $0x1924] ss:$16 sps:$4 sm:$0xff]  }
 0x1bf   :  { %10154 = vmatpush1.bf16.msra.mxu0 %v14073_v7  ;;  %v14126_v7 = vld [vmem:[#allocation2 + $0x1b24] ss:$16 sps:$4 sm:$0xff]  }
 0x1c0   :  { %10195 = vmatpush1.bf16.msra.mxu1 %v14076_v37  ;;  %10155 = vmatprep.subr.bf16.mxu0 %v14081_v38  ;;  %v16086_v37 = vrot.slane %v1753_v4, %v15885_v49  ;;  %v14121_v38 = vld [vmem:[#allocation2 + $0x1920] ss:$16 sps:$4 sm:$0xff]  }
 0x1c1   :  { %10196 = vmatprep.subr.bf16.mxu1 %v14084_v39  ;;  %v14124_v39 = vld [vmem:[#allocation2 + $0x1b20] ss:$16 sps:$4 sm:$0xff]  }
 0x1c2   :  { %v1769_v2 = vcombine.high %v16086_v37, %v16086_v37  ;;  %v14145_v4 = vld [vmem:[#allocation2 + $0x1ca0] ss:$16 sps:$4 sm:$0xff]  }
 0x1c3   :  { %10156 = vmatpush1.bf16.msra.mxu0 %v14079_v45  ;;  %v14129_v45 = vld [vmem:[#allocation2 + $0x1904] ss:$16 sps:$4 sm:$0xff]  }
 0x1c4   :  { %10197 = vmatpush1.bf16.msra.mxu1 %v14082_v6  ;;  %10157 = vmatprep.subr.bf16.mxu0 %v14087_v48  ;;  %v14132_v6 = vld [vmem:[#allocation2 + $0x1b04] ss:$16 sps:$4 sm:$0xff]   ;;  %v16092_v48 = vrot.slane %v16054_v10, %v15885_v49 }
 0x1c5   :  { %10198 = vmatprep.subr.bf16.mxu1 %v14090_v51  ;;  %v14127_v51 = vld [vmem:[#allocation2 + $0x1900] ss:$16 sps:$4 sm:$0xff]   ;;  %v14141_v10 = vld [vmem:[#allocation2 + $0x1cc4] ss:$16 sps:$4 sm:$0xff]  }
 0x1c7   :  { %10158 = vmatpush2.bf16.msra.mxu0 %v14085_v52  ;;  %v14130_v52 = vld [vmem:[#allocation2 + $0x1b00] ss:$16 sps:$4 sm:$0xff]  }
 0x1c8   :  { %10199 = vmatpush2.bf16.msra.mxu1 %v14088_v47  ;;  %10159 = vmatprep.subr.bf16.mxu0 %v14093_v57  ;;  %v14135_v47 = vld [vmem:[#allocation2 + $0x1ce4] ss:$16 sps:$4 sm:$0xff]  }
 0x1c9   :  { %10200 = vmatprep.subr.bf16.mxu1 %v14096_v58  ;;  %v14138_v57 = vld [vmem:[#allocation2 + $0x1ee4] ss:$16 sps:$4 sm:$0xff]   ;;  %v14133_v58 = vld [vmem:[#allocation2 + $0x1ce0] ss:$16 sps:$4 sm:$0xff]  }
 0x1cb   :  { %10160 = vmatpush2.bf16.msra.mxu0 %v14091_v61  ;;  %v14136_v61 = vld [vmem:[#allocation2 + $0x1ee0] ss:$16 sps:$4 sm:$0xff]  }
 0x1cc   :  { %10201 = vmatpush2.bf16.msra.mxu1 %v14094_v56  ;;  %10161 = vmatprep.subr.bf16.mxu0 %v14099_v62  ;;  %v16095_v56 = vrot.slane %v1769_v2, %v15885_v49  ;;  %v16099_v62 = vcombine.high %v16092_v48, %v16092_v48  ;;  %v14159_v2 = vld [vmem:[#allocation2 + $0x1c64] ss:$16 sps:$4 sm:$0xff]  }
 0x1cd   :  { %10202 = vmatprep.subr.bf16.mxu1 %v14102_v46  ;;  %v14144_v46 = vld [vmem:[#allocation2 + $0x1ec4] ss:$16 sps:$4 sm:$0xff]  }
 0x1cf   :  { %10162 = vmatpush2.bf16.msra.mxu0 %v14097_v3  ;;  %v14139_v3 = vld [vmem:[#allocation2 + $0x1cc0] ss:$16 sps:$4 sm:$0xff]  }
 0x1d0   :  { %10203 = vmatpush2.bf16.msra.mxu1 %v14100_v5  ;;  %10163 = vmatprep.subr.bf16.mxu0 %v14105_v8  ;;  %v14142_v5 = vld [vmem:[#allocation2 + $0x1ec0] ss:$16 sps:$4 sm:$0xff]   ;;  %v16103_v8 = vcombine.high %v16095_v56, %v16095_v56 }
 0x1d1   :  { %10204 = vmatprep.subr.bf16.mxu1 %v14108_v9 }
 0x1d3   :  { %10164 = vmatpush2.bf16.msra.mxu0 %v14103_v53 }
 0x1d4   :  { %10205 = vmatpush2.bf16.msra.mxu1 %v14106_v11  ;;  %10165 = vmatprep.subr.bf16.mxu0 %v14111_v1 }
 0x1d5   :  { %10206 = vmatprep.subr.bf16.mxu1 %v14114_v14 }
 0x1d7   :  { %10166 = vmatpush2.bf16.msra.mxu0 %v14109_v16  ;;  %v14147_v16 = vld [vmem:[#allocation2 + $0x1ca4] ss:$16 sps:$4 sm:$0xff]  }
 0x1d8   :  { %10207 = vmatpush2.bf16.msra.mxu1 %v14112_v19  ;;  %10167 = vmatprep.subr.bf16.mxu0 %v14117_v21  ;;  %v14150_v19 = vld [vmem:[#allocation2 + $0x1ea4] ss:$16 sps:$4 sm:$0xff]  }
 0x1d9   :  { %10208 = vmatprep.subr.bf16.mxu1 %v14120_v25 }
 0x1db   :  { %10168 = vmatpush2.bf16.msra.mxu0 %v14115_v28  ;;  %v14148_v28 = vld [vmem:[#allocation2 + $0x1ea0] ss:$16 sps:$4 sm:$0xff]  }
 0x1dc   :  { %10209 = vmatpush2.bf16.msra.mxu1 %v14118_v29  ;;  %10169 = vmatprep.subr.bf16.mxu0 %v14123_v31 }
 0x1dd   :  { %10210 = vmatprep.subr.bf16.mxu1 %v14126_v7 }
 0x1df   :  { %10170 = vmatpush2.bf16.msra.mxu0 %v14121_v38 }
 0x1e0   :  { %10211 = vmatpush2.bf16.msra.mxu1 %v14124_v39  ;;  %10171 = vmatprep.subr.bf16.mxu0 %v14129_v45  ;;  %v14153_v39 = vld [vmem:[#allocation2 + $0x1c84] ss:$16 sps:$4 sm:$0xff]  }
 0x1e1   :  { %10212 = vmatprep.subr.bf16.mxu1 %v14132_v6  ;;  %v14156_v45 = vld [vmem:[#allocation2 + $0x1e84] ss:$16 sps:$4 sm:$0xff]   ;;  %v14154_v6 = vld [vmem:[#allocation2 + $0x1e80] ss:$16 sps:$4 sm:$0xff]  }
 0x1e3   :  { %10172 = vmatpush2.bf16.msra.mxu0 %v14127_v51  ;;  %v14162_v51 = vld [vmem:[#allocation2 + $0x1e64] ss:$16 sps:$4 sm:$0xff]  }
 0x1e4   :  { %10213 = vmatpush2.bf16.msra.mxu1 %v14130_v52  ;;  %10223 = vmatprep.subr.bf16.mxu0 %v14135_v47  ;;  %v14157_v52 = vld [vmem:[#allocation2 + $0x1c60] ss:$16 sps:$4 sm:$0xff]  }
 0x1e5   :  { %10264 = vmatprep.subr.bf16.mxu1 %v14138_v57  ;;  %v14160_v47 = vld [vmem:[#allocation2 + $0x1e60] ss:$16 sps:$4 sm:$0xff]   ;;  %v14165_v57 = vld [vmem:[#allocation2 + $0x1c44] ss:$16 sps:$4 sm:$0xff]  }
 0x1e6   :  { %v9929_v9 = vpop.f32.mrf.mxu0  ;;  %10174 = vmatmul.mubr.bf16.vlgmr.msra.gmra.mxu0 %v16092_v48 }
 0x1e7   :  { %v9970_v53 = vpop.f32.mrf.mxu1  ;;  %10215 = vmatmul.mubr.bf16.vlgmr.msra.gmra.mxu1 %v16099_v62  ;;  %v9930_v11 = vadd.f32 %v9929_v9, %v16076_v35  ;;  %10224 = vmatpush1.bf16.msra.mxu0 %v14133_v58  ;;  %v14168_v58 = vld [vmem:[#allocation2 + $0x1e44] ss:$16 sps:$4 sm:$0xff]   ;;  %v14172_v9 = vld [vmem:[#allocation2 + $0x1e20] ss:$16 sps:$4 sm:$0xff]  }
 0x1e8   :  { %10265 = vmatpush1.bf16.msra.mxu1 %v14136_v61  ;;  %v9931_v1 = vpop.f32.mrf.mxu0  ;;  %10225 = vmatprep.subr.bf16.mxu0 %v14141_v10  ;;  %v14163_v61 = vld [vmem:[#allocation2 + $0x1c40] ss:$16 sps:$4 sm:$0xff]  }
 0x1e9   :  { %v9972_v14 = vpop.f32.mrf.mxu1  ;;  %10266 = vmatprep.subr.bf16.mxu1 %v14144_v46  ;;  %v16108_v21 = vadd.f32 %v9970_v53, %v9930_v11  ;;  %v9932_v25 = vadd.f32 %v9931_v1, %v16081_v63  ;;  %10255 = vmatprep.mubr.bf16.mxu0 %v16095_v56  ;;  %v14151_v63 = vld [vmem:[#allocation2 + $0x1c80] ss:$16 sps:$4 sm:$0xff]   ;;  %v14171_v46 = vld [vmem:[#allocation2 + $0x1c24] ss:$16 sps:$4 sm:$0xff]  }
 0x1ea   :  { %10296 = vmatprep.mubr.bf16.mxu1 %v16103_v8  ;;  %v9933_v29 = vpop.f32.mrf.mxu0  ;;  %v14166_v10 = vld [vmem:[#allocation2 + $0x1e40] ss:$16 sps:$4 sm:$0xff]   ;;  %v14177_v53 = vld [vmem:[#allocation2 + $0x1c04] ss:$16 sps:$4 sm:$0xff]  }
 0x1eb   :  { %v9974_v35 = vpop.f32.mrf.mxu1  ;;  %v16113_v31 = vadd.f32 %v9972_v14, %v9932_v25  ;;  %10226 = vmatpush1.bf16.msra.mxu0 %v14139_v3  ;;  %v14174_v3 = vld [vmem:[#allocation2 + $0x1e24] ss:$16 sps:$4 sm:$0xff]   ;;  %v14175_v1 = vld [vmem:[#allocation2 + $0x1c00] ss:$16 sps:$4 sm:$0xff]  }
 0x1ec   :  { %10267 = vmatpush1.bf16.msra.mxu1 %v14142_v5  ;;  %v9934_v7 = vpop.f32.mrf.mxu0  ;;  %10227 = vmatprep.subr.bf16.mxu0 %v14147_v16  ;;  %v14169_v5 = vld [vmem:[#allocation2 + $0x1c20] ss:$16 sps:$4 sm:$0xff]   ;;  %v14180_v11 = vld [vmem:[#allocation2 + $0x1e04] ss:$16 sps:$4 sm:$0xff]  }
 0x1ed   :  { %v9975_v38 = vpop.f32.mrf.mxu1  ;;  %10268 = vmatprep.subr.bf16.mxu1 %v14150_v19  ;;  %v14178_v14 = vld [vmem:[#allocation2 + $0x1e00] ss:$16 sps:$4 sm:$0xff]   ;;  %v14183_v16 = vld [vmem:[#allocation2 + $0x1de4] ss:$16 sps:$4 sm:$0xff]  }
 0x1ee   :  { %v14186_v19 = vld [vmem:[#allocation2 + $0x1fe4] ss:$16 sps:$4 sm:$0xff]   ;;  %v14181_v25 = vld [vmem:[#allocation2 + $0x1de0] ss:$16 sps:$4 sm:$0xff]  }
 0x1ef   :  { %10228 = vmatpush1.bf16.msra.mxu0 %v14145_v4  ;;  %v14184_v4 = vld [vmem:[#allocation2 + $0x1fe0] ss:$16 sps:$4 sm:$0xff]   ;;  %v14192_v29 = vld [vmem:[#allocation2 + $0x1fc4] ss:$16 sps:$4 sm:$0xff]  }
 0x1f0   :  { %10269 = vmatpush1.bf16.msra.mxu1 %v14148_v28  ;;  %10229 = vmatprep.subr.bf16.mxu0 %v14153_v39  ;;  %v14189_v28 = vld [vmem:[#allocation2 + $0x1dc4] ss:$16 sps:$4 sm:$0xff]   ;;  %v14187_v35 = vld [vmem:[#allocation2 + $0x1dc0] ss:$16 sps:$4 sm:$0xff]  }
 0x1f1   :  { %10270 = vmatprep.subr.bf16.mxu1 %v14156_v45  ;;  %v14190_v7 = vld [vmem:[#allocation2 + $0x1fc0] ss:$16 sps:$4 sm:$0xff]   ;;  %v14195_v38 = vld [vmem:[#allocation2 + $0x1da4] ss:$16 sps:$4 sm:$0xff]  }
 0x1f2   :  { %v14198_v39 = vld [vmem:[#allocation2 + $0x1fa4] ss:$16 sps:$4 sm:$0xff]   ;;  %v14193_v45 = vld [vmem:[#allocation2 + $0x1da0] ss:$16 sps:$4 sm:$0xff]  }
 0x1f3   :  { %10230 = vmatpush1.bf16.msra.mxu0 %v14151_v63  ;;  %v14196_v63 = vld [vmem:[#allocation2 + $0x1fa0] ss:$16 sps:$4 sm:$0xff]  }
 0x1f4   :  { %10271 = vmatpush1.bf16.msra.mxu1 %v14154_v6  ;;  %10231 = vmatprep.subr.bf16.mxu0 %v14159_v2  ;;  %v14201_v6 = vld [vmem:[#allocation2 + $0x1d84] ss:$16 sps:$4 sm:$0xff]  }
 0x1f5   :  { %10272 = vmatprep.subr.bf16.mxu1 %v14162_v51  ;;  %v14204_v2 = vld [vmem:[#allocation2 + $0x1f84] ss:$16 sps:$4 sm:$0xff]   ;;  %v14199_v51 = vld [vmem:[#allocation2 + $0x1d80] ss:$16 sps:$4 sm:$0xff]  }
 0x1f7   :  { %10232 = vmatpush1.bf16.msra.mxu0 %v14157_v52  ;;  %v14202_v52 = vld [vmem:[#allocation2 + $0x1f80] ss:$16 sps:$4 sm:$0xff]  }
 0x1f8   :  { %10273 = vmatpush1.bf16.msra.mxu1 %v14160_v47  ;;  %10233 = vmatprep.subr.bf16.mxu0 %v14165_v57  ;;  %v14207_v47 = vld [vmem:[#allocation2 + $0x1d64] ss:$16 sps:$4 sm:$0xff]  }
 0x1f9   :  { %10274 = vmatprep.subr.bf16.mxu1 %v14168_v58  ;;  %v14210_v57 = vld [vmem:[#allocation2 + $0x1f64] ss:$16 sps:$4 sm:$0xff]   ;;  %v14205_v58 = vld [vmem:[#allocation2 + $0x1d60] ss:$16 sps:$4 sm:$0xff]  }
 0x1fb   :  { %10234 = vmatpush1.bf16.msra.mxu0 %v14163_v61  ;;  %v14208_v61 = vld [vmem:[#allocation2 + $0x1f60] ss:$16 sps:$4 sm:$0xff]  }
 0x1fc   :  { %10275 = vmatpush1.bf16.msra.mxu1 %v14166_v10  ;;  %10235 = vmatprep.subr.bf16.mxu0 %v14171_v46  ;;  %v14213_v10 = vld [vmem:[#allocation2 + $0x1d44] ss:$16 sps:$4 sm:$0xff]  }
 0x1fd   :  { %10276 = vmatprep.subr.bf16.mxu1 %v14174_v3  ;;  %v14216_v46 = vld [vmem:[#allocation2 + $0x1f44] ss:$16 sps:$4 sm:$0xff]  }
 0x1fe   :  { %v16118_v3 = vld [vmem:[%s16586_s0 + $0x20] sm:$0xff] }
 0x1ff   :  { %10236 = vmatpush1.bf16.msra.mxu0 %v14169_v5  ;;  %v14211_v5 = vld [vmem:[#allocation2 + $0x1d40] ss:$16 sps:$4 sm:$0xff]  }
 0x200   :  { %10277 = vmatpush1.bf16.msra.mxu1 %v14172_v9  ;;  %10237 = vmatprep.subr.bf16.mxu0 %v14177_v53  ;;  %v14214_v9 = vld [vmem:[#allocation2 + $0x1f40] ss:$16 sps:$4 sm:$0xff]   ;;  %v14219_v53 = vld [vmem:[#allocation2 + $0x1d24] ss:$16 sps:$4 sm:$0xff]  }
 0x201   :  { %10278 = vmatprep.subr.bf16.mxu1 %v14180_v11  ;;  %v14222_v11 = vld [vmem:[#allocation2 + $0x1f24] ss:$16 sps:$4 sm:$0xff]  }
 0x203   :  { %10238 = vmatpush1.bf16.msra.mxu0 %v14175_v1  ;;  %v16122_v1 = vrot.slane %v16118_v3, %v15885_v49 }
 0x204   :  { %10279 = vmatpush1.bf16.msra.mxu1 %v14178_v14  ;;  %10239 = vmatprep.subr.bf16.mxu0 %v14183_v16  ;;  %v14217_v14 = vld [vmem:[#allocation2 + $0x1d20] ss:$16 sps:$4 sm:$0xff]  }
 0x205   :  { %10280 = vmatprep.subr.bf16.mxu1 %v14186_v19  ;;  %v14220_v16 = vld [vmem:[#allocation2 + $0x1f20] ss:$16 sps:$4 sm:$0xff]   ;;  %v14225_v19 = vld [vmem:[#allocation2 + $0x1d04] ss:$16 sps:$4 sm:$0xff]  }
 0x207   :  { %10240 = vmatpush2.bf16.msra.mxu0 %v14181_v25  ;;  %v14228_v25 = vld [vmem:[#allocation2 + $0x1f04] ss:$16 sps:$4 sm:$0xff]  }
 0x208   :  { %10281 = vmatpush2.bf16.msra.mxu1 %v14184_v4  ;;  %10241 = vmatprep.subr.bf16.mxu0 %v14189_v28  ;;  %v1817_v4 = vcombine.high %v16122_v1, %v16122_v1  ;;  %v16128_v28 = vrot.slane %v16086_v37, %v15885_v49  ;;  %v14238_v37 = vld [vmem:[#allocation2 + $0x20c4] ss:$16 sps:$4 sm:$0xff]  }
 0x209   :  { %10282 = vmatprep.subr.bf16.mxu1 %v14192_v29  ;;  %v14223_v29 = vld [vmem:[#allocation2 + $0x1d00] ss:$16 sps:$4 sm:$0xff]  }
 0x20b   :  { %10242 = vmatpush2.bf16.msra.mxu0 %v14187_v35  ;;  %v14226_v35 = vld [vmem:[#allocation2 + $0x1f00] ss:$16 sps:$4 sm:$0xff]  }
 0x20c   :  { %10283 = vmatpush2.bf16.msra.mxu1 %v14190_v7  ;;  %10243 = vmatprep.subr.bf16.mxu0 %v14195_v38  ;;  %v14232_v7 = vld [vmem:[#allocation2 + $0x20e4] ss:$16 sps:$4 sm:$0xff]  }
 0x20d   :  { %10284 = vmatprep.subr.bf16.mxu1 %v14198_v39  ;;  %v14235_v38 = vld [vmem:[#allocation2 + $0x22e4] ss:$16 sps:$4 sm:$0xff]   ;;  %v14230_v39 = vld [vmem:[#allocation2 + $0x20e0] ss:$16 sps:$4 sm:$0xff]  }
 0x20f   :  { %10244 = vmatpush2.bf16.msra.mxu0 %v14193_v45  ;;  %v14233_v45 = vld [vmem:[#allocation2 + $0x22e0] ss:$16 sps:$4 sm:$0xff]  }
 0x210   :  { %10285 = vmatpush2.bf16.msra.mxu1 %v14196_v63  ;;  %10245 = vmatprep.subr.bf16.mxu0 %v14201_v6  ;;  %v16131_v63 = vrot.slane %v1817_v4, %v15885_v49  ;;  %v16135_v6 = vcombine.high %v16128_v28, %v16128_v28 }
 0x211   :  { %10286 = vmatprep.subr.bf16.mxu1 %v14204_v2  ;;  %v14241_v2 = vld [vmem:[#allocation2 + $0x22c4] ss:$16 sps:$4 sm:$0xff]  }
 0x213   :  { %10246 = vmatpush2.bf16.msra.mxu0 %v14199_v51  ;;  %v14236_v51 = vld [vmem:[#allocation2 + $0x20c0] ss:$16 sps:$4 sm:$0xff]  }
 0x214   :  { %10287 = vmatpush2.bf16.msra.mxu1 %v14202_v52  ;;  %10247 = vmatprep.subr.bf16.mxu0 %v14207_v47  ;;  %v14239_v52 = vld [vmem:[#allocation2 + $0x22c0] ss:$16 sps:$4 sm:$0xff]   ;;  %v16139_v47 = vcombine.high %v16131_v63, %v16131_v63 }
 0x215   :  { %10288 = vmatprep.subr.bf16.mxu1 %v14210_v57 }
 0x217   :  { %10248 = vmatpush2.bf16.msra.mxu0 %v14205_v58 }
 0x218   :  { %10289 = vmatpush2.bf16.msra.mxu1 %v14208_v61  ;;  %10249 = vmatprep.subr.bf16.mxu0 %v14213_v10 }
 0x219   :  { %10290 = vmatprep.subr.bf16.mxu1 %v14216_v46 }
 0x21b   :  { %10250 = vmatpush2.bf16.msra.mxu0 %v14211_v5  ;;  %v14244_v5 = vld [vmem:[#allocation2 + $0x20a4] ss:$16 sps:$4 sm:$0xff]  }
 0x21c   :  { %10291 = vmatpush2.bf16.msra.mxu1 %v14214_v9  ;;  %10251 = vmatprep.subr.bf16.mxu0 %v14219_v53  ;;  %v14247_v9 = vld [vmem:[#allocation2 + $0x22a4] ss:$16 sps:$4 sm:$0xff]  }
 0x21d   :  { %10292 = vmatprep.subr.bf16.mxu1 %v14222_v11 }
 0x21f   :  { %10252 = vmatpush2.bf16.msra.mxu0 %v14217_v14  ;;  %v14242_v14 = vld [vmem:[#allocation2 + $0x20a0] ss:$16 sps:$4 sm:$0xff]  }
 0x220   :  { %10293 = vmatpush2.bf16.msra.mxu1 %v14220_v16  ;;  %10253 = vmatprep.subr.bf16.mxu0 %v14225_v19  ;;  %v14245_v16 = vld [vmem:[#allocation2 + $0x22a0] ss:$16 sps:$4 sm:$0xff]  }
 0x221   :  { %10294 = vmatprep.subr.bf16.mxu1 %v14228_v25 }
 0x223   :  { %10254 = vmatpush2.bf16.msra.mxu0 %v14223_v29 }
 0x224   :  { %10295 = vmatpush2.bf16.msra.mxu1 %v14226_v35  ;;  %10305 = vmatprep.subr.bf16.mxu0 %v14232_v7  ;;  %v14250_v35 = vld [vmem:[#allocation2 + $0x2084] ss:$16 sps:$4 sm:$0xff]  }
 0x225   :  { %10346 = vmatprep.subr.bf16.mxu1 %v14235_v38  ;;  %v14253_v7 = vld [vmem:[#allocation2 + $0x2284] ss:$16 sps:$4 sm:$0xff]   ;;  %v14251_v38 = vld [vmem:[#allocation2 + $0x2280] ss:$16 sps:$4 sm:$0xff]  }
 0x226   :  { %v10011_v57 = vpop.f32.mrf.mxu0  ;;  %10256 = vmatmul.mubr.bf16.vlgmr.msra.gmra.mxu0 %v16128_v28 }
 0x227   :  { %v10052_v58 = vpop.f32.mrf.mxu1  ;;  %10297 = vmatmul.mubr.bf16.vlgmr.msra.gmra.mxu1 %v16135_v6  ;;  %v10012_v61 = vadd.f32 %v10011_v57, %v16108_v21  ;;  %10306 = vmatpush1.bf16.msra.mxu0 %v14230_v39  ;;  %v14256_v39 = vld [vmem:[#allocation2 + $0x2064] ss:$16 sps:$4 sm:$0xff]   ;;  %v14260_v57 = vld [vmem:[#allocation2 + $0x2040] ss:$16 sps:$4 sm:$0xff]  }
 0x228   :  { %10347 = vmatpush1.bf16.msra.mxu1 %v14233_v45  ;;  %v10013_v10 = vpop.f32.mrf.mxu0  ;;  %10307 = vmatprep.subr.bf16.mxu0 %v14238_v37  ;;  %v14259_v45 = vld [vmem:[#allocation2 + $0x2264] ss:$16 sps:$4 sm:$0xff]   ;;  %v14254_v37 = vld [vmem:[#allocation2 + $0x2060] ss:$16 sps:$4 sm:$0xff]  }
 0x229   :  { %v10054_v46 = vpop.f32.mrf.mxu1  ;;  %10348 = vmatprep.subr.bf16.mxu1 %v14241_v2  ;;  %v16144_v53 = vadd.f32 %v10052_v58, %v10012_v61  ;;  %v10014_v11 = vadd.f32 %v10013_v10, %v16113_v31  ;;  %10337 = vmatprep.mubr.bf16.mxu0 %v16131_v63  ;;  %v14248_v31 = vld [vmem:[#allocation2 + $0x2080] ss:$16 sps:$4 sm:$0xff]   ;;  %v14268_v61 = vld [vmem:[#allocation2 + $0x2024] ss:$16 sps:$4 sm:$0xff]  }
 0x22a   :  { %10378 = vmatprep.mubr.bf16.mxu1 %v16139_v47  ;;  %v10015_v19 = vpop.f32.mrf.mxu0  ;;  %v14257_v2 = vld [vmem:[#allocation2 + $0x2260] ss:$16 sps:$4 sm:$0xff]   ;;  %v14271_v10 = vld [vmem:[#allocation2 + $0x2224] ss:$16 sps:$4 sm:$0xff]  }
 0x22b   :  { %v10056_v21 = vpop.f32.mrf.mxu1  ;;  %v16149_v25 = vadd.f32 %v10054_v46, %v10014_v11  ;;  %10308 = vmatpush1.bf16.msra.mxu0 %v14236_v51  ;;  %v14262_v51 = vld [vmem:[#allocation2 + $0x2044] ss:$16 sps:$4 sm:$0xff]   ;;  %v14263_v58 = vld [vmem:[#allocation2 + $0x2240] ss:$16 sps:$4 sm:$0xff]  }
 0x22c   :  { %10349 = vmatpush1.bf16.msra.mxu1 %v14239_v52  ;;  %v10016_v4 = vpop.f32.mrf.mxu0  ;;  %10309 = vmatprep.subr.bf16.mxu0 %v14244_v5  ;;  %v14265_v52 = vld [vmem:[#allocation2 + $0x2244] ss:$16 sps:$4 sm:$0xff]   ;;  %v14266_v46 = vld [vmem:[#allocation2 + $0x2020] ss:$16 sps:$4 sm:$0xff]  }
 0x22d   :  { %v10057_v29 = vpop.f32.mrf.mxu1  ;;  %10350 = vmatprep.subr.bf16.mxu1 %v14247_v9  ;;  %v14269_v5 = vld [vmem:[#allocation2 + $0x2220] ss:$16 sps:$4 sm:$0xff]   ;;  %v14274_v9 = vld [vmem:[#allocation2 + $0x2004] ss:$16 sps:$4 sm:$0xff]  }
 0x22e   :  { %v14277_v11 = vld [vmem:[#allocation2 + $0x2204] ss:$16 sps:$4 sm:$0xff]   ;;  %v14278_v4 = vld [vmem:[#allocation2 + $0x21e0] ss:$16 sps:$4 sm:$0xff]  }
 0x22f   :  { %10310 = vmatpush1.bf16.msra.mxu0 %v14242_v14  ;;  %v14272_v14 = vld [vmem:[#allocation2 + $0x2000] ss:$16 sps:$4 sm:$0xff]   ;;  %v14280_v19 = vld [vmem:[#allocation2 + $0x21e4] ss:$16 sps:$4 sm:$0xff]  }
 0x230   :  { %10351 = vmatpush1.bf16.msra.mxu1 %v14245_v16  ;;  %10311 = vmatprep.subr.bf16.mxu0 %v14250_v35  ;;  %v14275_v16 = vld [vmem:[#allocation2 + $0x2200] ss:$16 sps:$4 sm:$0xff]   ;;  %v14283_v21 = vld [vmem:[#allocation2 + $0x23e4] ss:$16 sps:$4 sm:$0xff]  }
 0x231   :  { %10352 = vmatprep.subr.bf16.mxu1 %v14253_v7  ;;  %v14281_v29 = vld [vmem:[#allocation2 + $0x23e0] ss:$16 sps:$4 sm:$0xff]   ;;  %v14286_v35 = vld [vmem:[#allocation2 + $0x21c4] ss:$16 sps:$4 sm:$0xff]  }
 0x232   :  { %v14289_v7 = vld [vmem:[#allocation2 + $0x23c4] ss:$16 sps:$4 sm:$0xff]  }
 0x233   :  { %10312 = vmatpush1.bf16.msra.mxu0 %v14248_v31  ;;  %v14284_v31 = vld [vmem:[#allocation2 + $0x21c0] ss:$16 sps:$4 sm:$0xff]  }
 0x234   :  { %10353 = vmatpush1.bf16.msra.mxu1 %v14251_v38  ;;  %10313 = vmatprep.subr.bf16.mxu0 %v14256_v39  ;;  %v14287_v38 = vld [vmem:[#allocation2 + $0x23c0] ss:$16 sps:$4 sm:$0xff]   ;;  %v14292_v39 = vld [vmem:[#allocation2 + $0x21a4] ss:$16 sps:$4 sm:$0xff]  }
 0x235   :  { %10354 = vmatprep.subr.bf16.mxu1 %v14259_v45  ;;  %v14295_v45 = vld [vmem:[#allocation2 + $0x23a4] ss:$16 sps:$4 sm:$0xff]  }
 0x237   :  { %10314 = vmatpush1.bf16.msra.mxu0 %v14254_v37  ;;  %v14290_v37 = vld [vmem:[#allocation2 + $0x21a0] ss:$16 sps:$4 sm:$0xff]  }
 0x238   :  { %10355 = vmatpush1.bf16.msra.mxu1 %v14257_v2  ;;  %10315 = vmatprep.subr.bf16.mxu0 %v14262_v51  ;;  %v14293_v2 = vld [vmem:[#allocation2 + $0x23a0] ss:$16 sps:$4 sm:$0xff]   ;;  %v14298_v51 = vld [vmem:[#allocation2 + $0x2184] ss:$16 sps:$4 sm:$0xff]  }
 0x239   :  { %10356 = vmatprep.subr.bf16.mxu1 %v14265_v52  ;;  %v14301_v52 = vld [vmem:[#allocation2 + $0x2384] ss:$16 sps:$4 sm:$0xff]  }
 0x23b   :  { %10316 = vmatpush1.bf16.msra.mxu0 %v14260_v57  ;;  %v14296_v57 = vld [vmem:[#allocation2 + $0x2180] ss:$16 sps:$4 sm:$0xff]  }
 0x23c   :  { %10357 = vmatpush1.bf16.msra.mxu1 %v14263_v58  ;;  %10317 = vmatprep.subr.bf16.mxu0 %v14268_v61  ;;  %v14299_v58 = vld [vmem:[#allocation2 + $0x2380] ss:$16 sps:$4 sm:$0xff]   ;;  %v14304_v61 = vld [vmem:[#allocation2 + $0x2164] ss:$16 sps:$4 sm:$0xff]  }
 0x23d   :  { %10358 = vmatprep.subr.bf16.mxu1 %v14271_v10  ;;  %v14307_v10 = vld [vmem:[#allocation2 + $0x2364] ss:$16 sps:$4 sm:$0xff]  }
 0x23f   :  { %10318 = vmatpush1.bf16.msra.mxu0 %v14266_v46  ;;  %v14302_v46 = vld [vmem:[#allocation2 + $0x2160] ss:$16 sps:$4 sm:$0xff]  }
 0x240   :  { %10359 = vmatpush1.bf16.msra.mxu1 %v14269_v5  ;;  %10319 = vmatprep.subr.bf16.mxu0 %v14274_v9  ;;  %v14305_v5 = vld [vmem:[#allocation2 + $0x2360] ss:$16 sps:$4 sm:$0xff]   ;;  %v14310_v9 = vld [vmem:[#allocation2 + $0x2144] ss:$16 sps:$4 sm:$0xff]  }
 0x241   :  { %10360 = vmatprep.subr.bf16.mxu1 %v14277_v11  ;;  %v14313_v11 = vld [vmem:[#allocation2 + $0x2344] ss:$16 sps:$4 sm:$0xff]  }
 0x243   :  { %10320 = vmatpush1.bf16.msra.mxu0 %v14272_v14  ;;  %v1802_v14 = vcombine.high %v16118_v3, %v16118_v3 }
 0x244   :  { %10361 = vmatpush1.bf16.msra.mxu1 %v14275_v16  ;;  %10321 = vmatprep.subr.bf16.mxu0 %v14280_v19  ;;  %v14308_v16 = vld [vmem:[#allocation2 + $0x2140] ss:$16 sps:$4 sm:$0xff]  }
 0x245   :  { %10362 = vmatprep.subr.bf16.mxu1 %v14283_v21  ;;  %v14311_v19 = vld [vmem:[#allocation2 + $0x2340] ss:$16 sps:$4 sm:$0xff]   ;;  %v14316_v21 = vld [vmem:[#allocation2 + $0x2124] ss:$16 sps:$4 sm:$0xff]  }
 0x247   :  { %10322 = vmatpush2.bf16.msra.mxu0 %v14278_v4  ;;  %v14319_v4 = vld [vmem:[#allocation2 + $0x2324] ss:$16 sps:$4 sm:$0xff]  }
 0x248   :  { %10363 = vmatpush2.bf16.msra.mxu1 %v14281_v29  ;;  %10323 = vmatprep.subr.bf16.mxu0 %v14286_v35  ;;  %v16154_v29 = vrot.slane %v1802_v14, %v15885_v49  ;;  %v14314_v35 = vld [vmem:[#allocation2 + $0x2120] ss:$16 sps:$4 sm:$0xff]  }
 0x249   :  { %10364 = vmatprep.subr.bf16.mxu1 %v14289_v7  ;;  %v14317_v7 = vld [vmem:[#allocation2 + $0x2320] ss:$16 sps:$4 sm:$0xff]  }
 0x24a   :  { %v1818_v3 = vcombine.high %v16154_v29, %v16154_v29 }
 0x24b   :  { %10324 = vmatpush2.bf16.msra.mxu0 %v14284_v31  ;;  %v14322_v31 = vld [vmem:[#allocation2 + $0x2104] ss:$16 sps:$4 sm:$0xff]  }
 0x24c   :  { %10365 = vmatpush2.bf16.msra.mxu1 %v14287_v38  ;;  %10325 = vmatprep.subr.bf16.mxu0 %v14292_v39  ;;  %v14325_v38 = vld [vmem:[#allocation2 + $0x2304] ss:$16 sps:$4 sm:$0xff]   ;;  %v16160_v39 = vrot.slane %v16122_v1, %v15885_v49 }
 0x24d   :  { %10366 = vmatprep.subr.bf16.mxu1 %v14295_v45  ;;  %v14320_v45 = vld [vmem:[#allocation2 + $0x2100] ss:$16 sps:$4 sm:$0xff]   ;;  %v14334_v1 = vld [vmem:[#allocation2 + $0x24c4] ss:$16 sps:$4 sm:$0xff]  }
 0x24f   :  { %10326 = vmatpush2.bf16.msra.mxu0 %v14290_v37  ;;  %v14323_v37 = vld [vmem:[#allocation2 + $0x2300] ss:$16 sps:$4 sm:$0xff]  }
 0x250   :  { %10367 = vmatpush2.bf16.msra.mxu1 %v14293_v2  ;;  %10327 = vmatprep.subr.bf16.mxu0 %v14298_v51  ;;  %v14328_v2 = vld [vmem:[#allocation2 + $0x24e4] ss:$16 sps:$4 sm:$0xff]  }
 0x251   :  { %10368 = vmatprep.subr.bf16.mxu1 %v14301_v52  ;;  %v14331_v51 = vld [vmem:[#allocation2 + $0x26e4] ss:$16 sps:$4 sm:$0xff]   ;;  %v14326_v52 = vld [vmem:[#allocation2 + $0x24e0] ss:$16 sps:$4 sm:$0xff]  }
 0x253   :  { %10328 = vmatpush2.bf16.msra.mxu0 %v14296_v57  ;;  %v14329_v57 = vld [vmem:[#allocation2 + $0x26e0] ss:$16 sps:$4 sm:$0xff]  }
 0x254   :  { %10369 = vmatpush2.bf16.msra.mxu1 %v14299_v58  ;;  %10329 = vmatprep.subr.bf16.mxu0 %v14304_v61  ;;  %v16163_v58 = vrot.slane %v1818_v3, %v15885_v49  ;;  %v16167_v61 = vcombine.high %v16160_v39, %v16160_v39  ;;  %v14341_v3 = vld [vmem:[#allocation2 + $0x26a0] ss:$16 sps:$4 sm:$0xff]  }
 0x255   :  { %10370 = vmatprep.subr.bf16.mxu1 %v14307_v10  ;;  %v14337_v10 = vld [vmem:[#allocation2 + $0x26c4] ss:$16 sps:$4 sm:$0xff]  }
 0x257   :  { %10330 = vmatpush2.bf16.msra.mxu0 %v14302_v46  ;;  %v14332_v46 = vld [vmem:[#allocation2 + $0x24c0] ss:$16 sps:$4 sm:$0xff]  }
 0x258   :  { %10371 = vmatpush2.bf16.msra.mxu1 %v14305_v5  ;;  %10331 = vmatprep.subr.bf16.mxu0 %v14310_v9  ;;  %v14335_v5 = vld [vmem:[#allocation2 + $0x26c0] ss:$16 sps:$4 sm:$0xff]   ;;  %v16171_v9 = vcombine.high %v16163_v58, %v16163_v58 }
 0x259   :  { %10372 = vmatprep.subr.bf16.mxu1 %v14313_v11 }
 0x25a   :  { %16597 = vst [vmem:[#allocation9_spill] sm:$0xff] %v16171_v9 }
 0x25b   :  { %10332 = vmatpush2.bf16.msra.mxu0 %v14308_v16 }
 0x25c   :  { %10373 = vmatpush2.bf16.msra.mxu1 %v14311_v19  ;;  %10333 = vmatprep.subr.bf16.mxu0 %v14316_v21 }
 0x25d   :  { %10374 = vmatprep.subr.bf16.mxu1 %v14319_v4  ;;  %v14340_v4 = vld [vmem:[#allocation2 + $0x24a4] ss:$16 sps:$4 sm:$0xff]  }
 0x25f   :  { %10334 = vmatpush2.bf16.msra.mxu0 %v14314_v35  ;;  %v14343_v35 = vld [vmem:[#allocation2 + $0x26a4] ss:$16 sps:$4 sm:$0xff]  }
 0x260   :  { %10375 = vmatpush2.bf16.msra.mxu1 %v14317_v7  ;;  %10335 = vmatprep.subr.bf16.mxu0 %v14322_v31 }
 0x261   :  { %10376 = vmatprep.subr.bf16.mxu1 %v14325_v38  ;;  %v14338_v38 = vld [vmem:[#allocation2 + $0x24a0] ss:$16 sps:$4 sm:$0xff]  }
 0x263   :  { %10336 = vmatpush2.bf16.msra.mxu0 %v14320_v45 }
 0x264   :  { %10377 = vmatpush2.bf16.msra.mxu1 %v14323_v37  ;;  %10387 = vmatprep.subr.bf16.mxu0 %v14328_v2 }
 0x265   :  { %10428 = vmatprep.subr.bf16.mxu1 %v14331_v51 }
 0x266   :  { %v10093_v11 = vpop.f32.mrf.mxu0  ;;  %10338 = vmatmul.mubr.bf16.vlgmr.msra.gmra.mxu0 %v16160_v39 }
 0x267   :  { %v10134_v14 = vpop.f32.mrf.mxu1  ;;  %10379 = vmatmul.mubr.bf16.vlgmr.msra.gmra.mxu1 %v16167_v61  ;;  %v10094_v16 = vadd.f32 %v10093_v11, %v16144_v53  ;;  %10388 = vmatpush1.bf16.msra.mxu0 %v14326_v52  ;;  %v14346_v52 = vld [vmem:[#allocation2 + $0x2484] ss:$16 sps:$4 sm:$0xff]  }
 0x268   :  { %10429 = vmatpush1.bf16.msra.mxu1 %v14329_v57  ;;  %v10095_v19 = vpop.f32.mrf.mxu0  ;;  %10389 = vmatprep.subr.bf16.mxu0 %v14334_v1  ;;  %v14349_v57 = vld [vmem:[#allocation2 + $0x2684] ss:$16 sps:$4 sm:$0xff]   ;;  %v14347_v1 = vld [vmem:[#allocation2 + $0x2680] ss:$16 sps:$4 sm:$0xff]  }
 0x269   :  { %v10136_v21 = vpop.f32.mrf.mxu1  ;;  %10430 = vmatprep.subr.bf16.mxu1 %v14337_v10  ;;  %v16176_v7 = vadd.f32 %v10134_v14, %v10094_v16  ;;  %v10096_v31 = vadd.f32 %v10095_v19, %v16149_v25  ;;  %10419 = vmatprep.mubr.bf16.mxu0 %v16163_v58  ;;  %v14344_v25 = vld [vmem:[#allocation2 + $0x2480] ss:$16 sps:$4 sm:$0xff]   ;;  %v14352_v10 = vld [vmem:[#allocation2 + $0x2464] ss:$16 sps:$4 sm:$0xff]  }
 0x26a   :  { %10460 = vmatprep.mubr.bf16.mxu1 %v16171_v9  ;;  %v10097_v45 = vpop.f32.mrf.mxu0  ;;  %v14355_v11 = vld [vmem:[#allocation2 + $0x2664] ss:$16 sps:$4 sm:$0xff]   ;;  %v14350_v14 = vld [vmem:[#allocation2 + $0x2460] ss:$16 sps:$4 sm:$0xff]  }
 0x26b   :  { %v10138_v53 = vpop.f32.mrf.mxu1  ;;  %v16181_v37 = vadd.f32 %v10136_v21, %v10096_v31  ;;  %10390 = vmatpush1.bf16.msra.mxu0 %v14332_v46  ;;  %v14353_v16 = vld [vmem:[#allocation2 + $0x2660] ss:$16 sps:$4 sm:$0xff]   ;;  %v14358_v46 = vld [vmem:[#allocation2 + $0x2444] ss:$16 sps:$4 sm:$0xff]  }
 0x26c   :  { %10431 = vmatpush1.bf16.msra.mxu1 %v14335_v5  ;;  %v10098_v2 = vpop.f32.mrf.mxu0  ;;  %10391 = vmatprep.subr.bf16.mxu0 %v14340_v4  ;;  %v14361_v5 = vld [vmem:[#allocation2 + $0x2644] ss:$16 sps:$4 sm:$0xff]   ;;  %v14356_v19 = vld [vmem:[#allocation2 + $0x2440] ss:$16 sps:$4 sm:$0xff]  }
 0x26d   :  { %v10139_v51 = vpop.f32.mrf.mxu1  ;;  %10432 = vmatprep.subr.bf16.mxu1 %v14343_v35  ;;  %v14359_v21 = vld [vmem:[#allocation2 + $0x2640] ss:$16 sps:$4 sm:$0xff]   ;;  %v14364_v4 = vld [vmem:[#allocation2 + $0x2424] ss:$16 sps:$4 sm:$0xff]  }
 0x26e   :  { %v14367_v35 = vld [vmem:[#allocation2 + $0x2624] ss:$16 sps:$4 sm:$0xff]   ;;  %v14362_v31 = vld [vmem:[#allocation2 + $0x2420] ss:$16 sps:$4 sm:$0xff]  }
 0x26f   :  { %10392 = vmatpush1.bf16.msra.mxu0 %v14338_v38  ;;  %v14365_v38 = vld [vmem:[#allocation2 + $0x2620] ss:$16 sps:$4 sm:$0xff]   ;;  %v14373_v45 = vld [vmem:[#allocation2 + $0x2604] ss:$16 sps:$4 sm:$0xff]  }
 0x270   :  { %10433 = vmatpush1.bf16.msra.mxu1 %v14341_v3  ;;  %10393 = vmatprep.subr.bf16.mxu0 %v14346_v52  ;;  %v14370_v3 = vld [vmem:[#allocation2 + $0x2404] ss:$16 sps:$4 sm:$0xff]   ;;  %v14368_v53 = vld [vmem:[#allocation2 + $0x2400] ss:$16 sps:$4 sm:$0xff]  }
 0x271   :  { %10434 = vmatprep.subr.bf16.mxu1 %v14349_v57  ;;  %v14371_v2 = vld [vmem:[#allocation2 + $0x2600] ss:$16 sps:$4 sm:$0xff]   ;;  %v14376_v51 = vld [vmem:[#allocation2 + $0x25e4] ss:$16 sps:$4 sm:$0xff]  }
 0x272   :  { %v14379_v52 = vld [vmem:[#allocation2 + $0x27e4] ss:$16 sps:$4 sm:$0xff]   ;;  %v14374_v57 = vld [vmem:[#allocation2 + $0x25e0] ss:$16 sps:$4 sm:$0xff]  }
 0x273   :  { %10394 = vmatpush1.bf16.msra.mxu0 %v14344_v25  ;;  %v14377_v25 = vld [vmem:[#allocation2 + $0x27e0] ss:$16 sps:$4 sm:$0xff]  }
 0x274   :  { %10435 = vmatpush1.bf16.msra.mxu1 %v14347_v1  ;;  %10395 = vmatprep.subr.bf16.mxu0 %v14352_v10  ;;  %v14382_v1 = vld [vmem:[#allocation2 + $0x25c4] ss:$16 sps:$4 sm:$0xff]   ;;  %v14438_v9 = vld [vmem:[#allocation2 + $0x2aa0] ss:$16 sps:$4 sm:$0xff]  }
 0x275   :  { %10436 = vmatprep.subr.bf16.mxu1 %v14355_v11  ;;  %v14385_v10 = vld [vmem:[#allocation2 + $0x27c4] ss:$16 sps:$4 sm:$0xff]   ;;  %v14380_v11 = vld [vmem:[#allocation2 + $0x25c0] ss:$16 sps:$4 sm:$0xff]  }
 0x277   :  { %10396 = vmatpush1.bf16.msra.mxu0 %v14350_v14  ;;  %v14383_v14 = vld [vmem:[#allocation2 + $0x27c0] ss:$16 sps:$4 sm:$0xff]  }
 0x278   :  { %10437 = vmatpush1.bf16.msra.mxu1 %v14353_v16  ;;  %10397 = vmatprep.subr.bf16.mxu0 %v14358_v46  ;;  %v14388_v16 = vld [vmem:[#allocation2 + $0x25a4] ss:$16 sps:$4 sm:$0xff]  }
 0x279   :  { %10438 = vmatprep.subr.bf16.mxu1 %v14361_v5  ;;  %v14391_v46 = vld [vmem:[#allocation2 + $0x27a4] ss:$16 sps:$4 sm:$0xff]   ;;  %v14386_v5 = vld [vmem:[#allocation2 + $0x25a0] ss:$16 sps:$4 sm:$0xff]  }
 0x27b   :  { %10398 = vmatpush1.bf16.msra.mxu0 %v14356_v19  ;;  %v14389_v19 = vld [vmem:[#allocation2 + $0x27a0] ss:$16 sps:$4 sm:$0xff]  }
 0x27c   :  { %10439 = vmatpush1.bf16.msra.mxu1 %v14359_v21  ;;  %10399 = vmatprep.subr.bf16.mxu0 %v14364_v4  ;;  %v14394_v21 = vld [vmem:[#allocation2 + $0x2584] ss:$16 sps:$4 sm:$0xff]  }
 0x27d   :  { %10440 = vmatprep.subr.bf16.mxu1 %v14367_v35  ;;  %v14397_v4 = vld [vmem:[#allocation2 + $0x2784] ss:$16 sps:$4 sm:$0xff]   ;;  %v14392_v35 = vld [vmem:[#allocation2 + $0x2580] ss:$16 sps:$4 sm:$0xff]  }
 0x27f   :  { %10400 = vmatpush1.bf16.msra.mxu0 %v14362_v31  ;;  %v14395_v31 = vld [vmem:[#allocation2 + $0x2780] ss:$16 sps:$4 sm:$0xff]  }
 0x280   :  { %10441 = vmatpush1.bf16.msra.mxu1 %v14365_v38  ;;  %10401 = vmatprep.subr.bf16.mxu0 %v14370_v3  ;;  %v14400_v38 = vld [vmem:[#allocation2 + $0x2564] ss:$16 sps:$4 sm:$0xff]  }
 0x281   :  { %10442 = vmatprep.subr.bf16.mxu1 %v14373_v45  ;;  %v14403_v3 = vld [vmem:[#allocation2 + $0x2764] ss:$16 sps:$4 sm:$0xff]   ;;  %v14398_v45 = vld [vmem:[#allocation2 + $0x2560] ss:$16 sps:$4 sm:$0xff]  }
 0x283   :  { %10402 = vmatpush1.bf16.msra.mxu0 %v14368_v53  ;;  %v14401_v53 = vld [vmem:[#allocation2 + $0x2760] ss:$16 sps:$4 sm:$0xff]  }
 0x284   :  { %10443 = vmatpush1.bf16.msra.mxu1 %v14371_v2  ;;  %10403 = vmatprep.subr.bf16.mxu0 %v14376_v51  ;;  %v14406_v2 = vld [vmem:[#allocation2 + $0x2544] ss:$16 sps:$4 sm:$0xff]  }
 0x285   :  { %10444 = vmatprep.subr.bf16.mxu1 %v14379_v52  ;;  %v14409_v51 = vld [vmem:[#allocation2 + $0x2744] ss:$16 sps:$4 sm:$0xff]   ;;  %v16186_v52 = vld [vmem:[%s16586_s0 + $0x28] sm:$0xff] }
 0x287   :  { %10404 = vmatpush2.bf16.msra.mxu0 %v14374_v57  ;;  %v14404_v57 = vld [vmem:[#allocation2 + $0x2540] ss:$16 sps:$4 sm:$0xff]  }
 0x288   :  { %10445 = vmatpush2.bf16.msra.mxu1 %v14377_v25  ;;  %10405 = vmatprep.subr.bf16.mxu0 %v14382_v1  ;;  %v14407_v25 = vld [vmem:[#allocation2 + $0x2740] ss:$16 sps:$4 sm:$0xff]   ;;  %v14412_v1 = vld [vmem:[#allocation2 + $0x2524] ss:$16 sps:$4 sm:$0xff]  }
 0x289   :  { %10446 = vmatprep.subr.bf16.mxu1 %v14385_v10  ;;  %v14415_v10 = vld [vmem:[#allocation2 + $0x2724] ss:$16 sps:$4 sm:$0xff]  }
 0x28b   :  { %10406 = vmatpush2.bf16.msra.mxu0 %v14380_v11  ;;  %v16190_v11 = vrot.slane %v16186_v52, %v15885_v49 }
 0x28c   :  { %10447 = vmatpush2.bf16.msra.mxu1 %v14383_v14  ;;  %10407 = vmatprep.subr.bf16.mxu0 %v14388_v16  ;;  %v14410_v14 = vld [vmem:[#allocation2 + $0x2520] ss:$16 sps:$4 sm:$0xff]  }
 0x28d   :  { %10448 = vmatprep.subr.bf16.mxu1 %v14391_v46  ;;  %v14413_v16 = vld [vmem:[#allocation2 + $0x2720] ss:$16 sps:$4 sm:$0xff]   ;;  %v14418_v46 = vld [vmem:[#allocation2 + $0x2504] ss:$16 sps:$4 sm:$0xff]  }
 0x28f   :  { %10408 = vmatpush2.bf16.msra.mxu0 %v14386_v5  ;;  %v14421_v5 = vld [vmem:[#allocation2 + $0x2704] ss:$16 sps:$4 sm:$0xff]  }
 0x290   :  { %10449 = vmatpush2.bf16.msra.mxu1 %v14389_v19  ;;  %10409 = vmatprep.subr.bf16.mxu0 %v14394_v21  ;;  %v1866_v19 = vcombine.high %v16190_v11, %v16190_v11  ;;  %v16196_v21 = vrot.slane %v16154_v29, %v15885_v49  ;;  %v14431_v29 = vld [vmem:[#allocation2 + $0x28c4] ss:$16 sps:$4 sm:$0xff]  }
 0x291   :  { %10450 = vmatprep.subr.bf16.mxu1 %v14397_v4  ;;  %v14416_v4 = vld [vmem:[#allocation2 + $0x2500] ss:$16 sps:$4 sm:$0xff]  }
 0x293   :  { %10410 = vmatpush2.bf16.msra.mxu0 %v14392_v35  ;;  %v14419_v35 = vld [vmem:[#allocation2 + $0x2700] ss:$16 sps:$4 sm:$0xff]  }
 0x294   :  { %10451 = vmatpush2.bf16.msra.mxu1 %v14395_v31  ;;  %10411 = vmatprep.subr.bf16.mxu0 %v14400_v38  ;;  %v14425_v31 = vld [vmem:[#allocation2 + $0x28e4] ss:$16 sps:$4 sm:$0xff]  }
 0x295   :  { %10452 = vmatprep.subr.bf16.mxu1 %v14403_v3  ;;  %v14428_v38 = vld [vmem:[#allocation2 + $0x2ae4] ss:$16 sps:$4 sm:$0xff]   ;;  %v14423_v3 = vld [vmem:[#allocation2 + $0x28e0] ss:$16 sps:$4 sm:$0xff]  }
 0x297   :  { %10412 = vmatpush2.bf16.msra.mxu0 %v14398_v45  ;;  %v14426_v45 = vld [vmem:[#allocation2 + $0x2ae0] ss:$16 sps:$4 sm:$0xff]  }
 0x298   :  { %10453 = vmatpush2.bf16.msra.mxu1 %v14401_v53  ;;  %10413 = vmatprep.subr.bf16.mxu0 %v14406_v2  ;;  %v16199_v53 = vrot.slane %v1866_v19, %v15885_v49  ;;  %v16203_v2 = vcombine.high %v16196_v21, %v16196_v21  ;;  %v14437_v19 = vld [vmem:[#allocation2 + $0x28a4] ss:$16 sps:$4 sm:$0xff]  }
 0x299   :  { %10454 = vmatprep.subr.bf16.mxu1 %v14409_v51  ;;  %v14434_v51 = vld [vmem:[#allocation2 + $0x2ac4] ss:$16 sps:$4 sm:$0xff]  }
 0x29a   :  { %16598 = vst [vmem:[#allocation10_spill] sm:$0xff] %v16199_v53  ;;  %16599 = vst [vmem:[#allocation11_spill] sm:$0xff] %v16203_v2 }
 0x29b   :  { %10414 = vmatpush2.bf16.msra.mxu0 %v14404_v57  ;;  %v14429_v57 = vld [vmem:[#allocation2 + $0x28c0] ss:$16 sps:$4 sm:$0xff]  }
 0x29c   :  { %10455 = vmatpush2.bf16.msra.mxu1 %v14407_v25  ;;  %10415 = vmatprep.subr.bf16.mxu0 %v14412_v1  ;;  %v14432_v25 = vld [vmem:[#allocation2 + $0x2ac0] ss:$16 sps:$4 sm:$0xff]   ;;  %v16207_v1 = vcombine.high %v16199_v53, %v16199_v53 }
 0x29d   :  { %10456 = vmatprep.subr.bf16.mxu1 %v14415_v10 }
 0x29e   :  { %16600 = vst [vmem:[#allocation12_spill] sm:$0xff] %v16207_v1 }
 0x29f   :  { %10416 = vmatpush2.bf16.msra.mxu0 %v14410_v14 }
 0x2a0   :  { %10457 = vmatpush2.bf16.msra.mxu1 %v14413_v16  ;;  %10417 = vmatprep.subr.bf16.mxu0 %v14418_v46 }
 0x2a1   :  { %10458 = vmatprep.subr.bf16.mxu1 %v14421_v5 }
 0x2a3   :  { %10418 = vmatpush2.bf16.msra.mxu0 %v14416_v4  ;;  %v14440_v4 = vld [vmem:[#allocation2 + $0x2aa4] ss:$16 sps:$4 sm:$0xff]  }
 0x2a4   :  { %10459 = vmatpush2.bf16.msra.mxu1 %v14419_v35  ;;  %10469 = vmatprep.subr.bf16.mxu0 %v14425_v31 }
 0x2a5   :  { %10510 = vmatprep.subr.bf16.mxu1 %v14428_v38  ;;  %v14435_v38 = vld [vmem:[#allocation2 + $0x28a0] ss:$16 sps:$4 sm:$0xff]  }
 0x2a6   :  { %v10175_v10 = vpop.f32.mrf.mxu0  ;;  %10420 = vmatmul.mubr.bf16.vlgmr.msra.gmra.mxu0 %v16196_v21 }
 0x2a7   :  { %v10216_v14 = vpop.f32.mrf.mxu1  ;;  %10461 = vmatmul.mubr.bf16.vlgmr.msra.gmra.mxu1 %v16203_v2  ;;  %v10176_v16 = vadd.f32 %v10175_v10, %v16176_v7  ;;  %10470 = vmatpush1.bf16.msra.mxu0 %v14423_v3  ;;  %v14446_v10 = vld [vmem:[#allocation2 + $0x2a84] ss:$16 sps:$4 sm:$0xff]  }
 0x2a8   :  { %10511 = vmatpush1.bf16.msra.mxu1 %v14426_v45  ;;  %v10177_v46 = vpop.f32.mrf.mxu0  ;;  %10471 = vmatprep.subr.bf16.mxu0 %v14431_v29 }
 0x2a9   :  { %v10218_v5 = vpop.f32.mrf.mxu1  ;;  %10512 = vmatprep.subr.bf16.mxu1 %v14434_v51  ;;  %v16212_v35 = vadd.f32 %v10216_v14, %v10176_v16  ;;  %v10178_v31 = vadd.f32 %v10177_v46, %v16181_v37  ;;  %10501 = vmatprep.mubr.bf16.mxu0 %v16199_v53  ;;  %v14443_v51 = vld [vmem:[#allocation2 + $0x2884] ss:$16 sps:$4 sm:$0xff]   ;;  %v14441_v37 = vld [vmem:[#allocation2 + $0x2880] ss:$16 sps:$4 sm:$0xff]  }
 0x2aa   :  { %10542 = vmatprep.mubr.bf16.mxu1 %v16207_v1  ;;  %v10179_v2 = vpop.f32.mrf.mxu0  ;;  %v14444_v14 = vld [vmem:[#allocation2 + $0x2a80] ss:$16 sps:$4 sm:$0xff]   ;;  %v14449_v16 = vld [vmem:[#allocation2 + $0x2864] ss:$16 sps:$4 sm:$0xff]  }
 0x2ab   :  { %v10220_v7 = vpop.f32.mrf.mxu1  ;;  %v16217_v3 = vadd.f32 %v10218_v5, %v10178_v31  ;;  %10472 = vmatpush1.bf16.msra.mxu0 %v14429_v57  ;;  %v14452_v46 = vld [vmem:[#allocation2 + $0x2a64] ss:$16 sps:$4 sm:$0xff]   ;;  %v14447_v2 = vld [vmem:[#allocation2 + $0x2860] ss:$16 sps:$4 sm:$0xff]  }
 0x2ac   :  { %10513 = vmatpush1.bf16.msra.mxu1 %v14432_v25  ;;  %v10180_v45 = vpop.f32.mrf.mxu0  ;;  %10473 = vmatprep.subr.bf16.mxu0 %v14437_v19  ;;  %v14450_v5 = vld [vmem:[#allocation2 + $0x2a60] ss:$16 sps:$4 sm:$0xff]   ;;  %v14455_v57 = vld [vmem:[#allocation2 + $0x2844] ss:$16 sps:$4 sm:$0xff]  }
 0x2ad   :  { %v10221_v29 = vpop.f32.mrf.mxu1  ;;  %10514 = vmatprep.subr.bf16.mxu1 %v14440_v4  ;;  %v14458_v25 = vld [vmem:[#allocation2 + $0x2a44] ss:$16 sps:$4 sm:$0xff]   ;;  %v14453_v19 = vld [vmem:[#allocation2 + $0x2840] ss:$16 sps:$4 sm:$0xff]  }
 0x2ae   :  { %v14456_v4 = vld [vmem:[#allocation2 + $0x2a40] ss:$16 sps:$4 sm:$0xff]   ;;  %v14464_v31 = vld [vmem:[#allocation2 + $0x2a24] ss:$16 sps:$4 sm:$0xff]  }
 0x2af   :  { %10474 = vmatpush1.bf16.msra.mxu0 %v14435_v38  ;;  %v14459_v38 = vld [vmem:[#allocation2 + $0x2820] ss:$16 sps:$4 sm:$0xff]   ;;  %v14467_v45 = vld [vmem:[#allocation2 + $0x2804] ss:$16 sps:$4 sm:$0xff]  }
 0x2b0   :  { %10515 = vmatpush1.bf16.msra.mxu1 %v14438_v9  ;;  %10475 = vmatprep.subr.bf16.mxu0 %v14443_v51  ;;  %v14461_v9 = vld [vmem:[#allocation2 + $0x2824] ss:$16 sps:$4 sm:$0xff]   ;;  %v14462_v7 = vld [vmem:[#allocation2 + $0x2a20] ss:$16 sps:$4 sm:$0xff]  }
 0x2b1   :  { %10516 = vmatprep.subr.bf16.mxu1 %v14446_v10  ;;  %v14470_v29 = vld [vmem:[#allocation2 + $0x2a04] ss:$16 sps:$4 sm:$0xff]   ;;  %v14465_v51 = vld [vmem:[#allocation2 + $0x2800] ss:$16 sps:$4 sm:$0xff]  }
 0x2b2   :  { %v14468_v10 = vld [vmem:[#allocation2 + $0x2a00] ss:$16 sps:$4 sm:$0xff]  }
 0x2b3   :  { %10476 = vmatpush1.bf16.msra.mxu0 %v14441_v37  ;;  %v14473_v37 = vld [vmem:[#allocation2 + $0x29e4] ss:$16 sps:$4 sm:$0xff]   ;;  %v14531_v1 = vld [vmem:[#allocation2 + $0x2ca0] ss:$16 sps:$4 sm:$0xff]  }
 0x2b4   :  { %10517 = vmatpush1.bf16.msra.mxu1 %v14444_v14  ;;  %10477 = vmatprep.subr.bf16.mxu0 %v14449_v16  ;;  %v14476_v14 = vld [vmem:[#allocation2 + $0x2be4] ss:$16 sps:$4 sm:$0xff]   ;;  %v14471_v16 = vld [vmem:[#allocation2 + $0x29e0] ss:$16 sps:$4 sm:$0xff]  }
 0x2b5   :  { %10518 = vmatprep.subr.bf16.mxu1 %v14452_v46  ;;  %v14474_v46 = vld [vmem:[#allocation2 + $0x2be0] ss:$16 sps:$4 sm:$0xff]  }
 0x2b6   :  { %v14534_v53 = vld [vmem:[#allocation2 + $0x2ea0] ss:$16 sps:$4 sm:$0xff]  }
 0x2b7   :  { %10478 = vmatpush1.bf16.msra.mxu0 %v14447_v2  ;;  %v14479_v2 = vld [vmem:[#allocation2 + $0x29c4] ss:$16 sps:$4 sm:$0xff]  }
 0x2b8   :  { %10519 = vmatpush1.bf16.msra.mxu1 %v14450_v5  ;;  %10479 = vmatprep.subr.bf16.mxu0 %v14455_v57  ;;  %v14482_v5 = vld [vmem:[#allocation2 + $0x2bc4] ss:$16 sps:$4 sm:$0xff]   ;;  %v14477_v57 = vld [vmem:[#allocation2 + $0x29c0] ss:$16 sps:$4 sm:$0xff]  }
 0x2b9   :  { %10520 = vmatprep.subr.bf16.mxu1 %v14458_v25  ;;  %v14480_v25 = vld [vmem:[#allocation2 + $0x2bc0] ss:$16 sps:$4 sm:$0xff]  }
 0x2bb   :  { %10480 = vmatpush1.bf16.msra.mxu0 %v14453_v19  ;;  %v14485_v19 = vld [vmem:[#allocation2 + $0x29a4] ss:$16 sps:$4 sm:$0xff]  }
 0x2bc   :  { %10521 = vmatpush1.bf16.msra.mxu1 %v14456_v4  ;;  %10481 = vmatprep.subr.bf16.mxu0 %v14461_v9  ;;  %v14488_v4 = vld [vmem:[#allocation2 + $0x2ba4] ss:$16 sps:$4 sm:$0xff]   ;;  %v14483_v9 = vld [vmem:[#allocation2 + $0x29a0] ss:$16 sps:$4 sm:$0xff]  }
 0x2bd   :  { %10522 = vmatprep.subr.bf16.mxu1 %v14464_v31  ;;  %v14486_v31 = vld [vmem:[#allocation2 + $0x2ba0] ss:$16 sps:$4 sm:$0xff]  }
 0x2bf   :  { %10482 = vmatpush1.bf16.msra.mxu0 %v14459_v38  ;;  %v14491_v38 = vld [vmem:[#allocation2 + $0x2984] ss:$16 sps:$4 sm:$0xff]  }
 0x2c0   :  { %10523 = vmatpush1.bf16.msra.mxu1 %v14462_v7  ;;  %10483 = vmatprep.subr.bf16.mxu0 %v14467_v45  ;;  %v14494_v7 = vld [vmem:[#allocation2 + $0x2b84] ss:$16 sps:$4 sm:$0xff]   ;;  %v14489_v45 = vld [vmem:[#allocation2 + $0x2980] ss:$16 sps:$4 sm:$0xff]  }
 0x2c1   :  { %10524 = vmatprep.subr.bf16.mxu1 %v14470_v29  ;;  %v14492_v29 = vld [vmem:[#allocation2 + $0x2b80] ss:$16 sps:$4 sm:$0xff]  }
 0x2c3   :  { %10484 = vmatpush1.bf16.msra.mxu0 %v14465_v51  ;;  %v14497_v51 = vld [vmem:[#allocation2 + $0x2964] ss:$16 sps:$4 sm:$0xff]  }
 0x2c4   :  { %10525 = vmatpush1.bf16.msra.mxu1 %v14468_v10  ;;  %10485 = vmatprep.subr.bf16.mxu0 %v14473_v37  ;;  %v14500_v10 = vld [vmem:[#allocation2 + $0x2b64] ss:$16 sps:$4 sm:$0xff]   ;;  %v14495_v37 = vld [vmem:[#allocation2 + $0x2960] ss:$16 sps:$4 sm:$0xff]  }
 0x2c5   :  { %10526 = vmatprep.subr.bf16.mxu1 %v14476_v14  ;;  %v14498_v14 = vld [vmem:[#allocation2 + $0x2b60] ss:$16 sps:$4 sm:$0xff]  }
 0x2c7   :  { %10486 = vmatpush2.bf16.msra.mxu0 %v14471_v16  ;;  %v14503_v16 = vld [vmem:[#allocation2 + $0x2944] ss:$16 sps:$4 sm:$0xff]  }
 0x2c8   :  { %10527 = vmatpush2.bf16.msra.mxu1 %v14474_v46  ;;  %10487 = vmatprep.subr.bf16.mxu0 %v14479_v2  ;;  %v14506_v46 = vld [vmem:[#allocation2 + $0x2b44] ss:$16 sps:$4 sm:$0xff]   ;;  %v1851_v2 = vcombine.high %v16186_v52, %v16186_v52 }
 0x2c9   :  { %10528 = vmatprep.subr.bf16.mxu1 %v14482_v5  ;;  %v14501_v5 = vld [vmem:[#allocation2 + $0x2940] ss:$16 sps:$4 sm:$0xff]  }
 0x2cb   :  { %10488 = vmatpush2.bf16.msra.mxu0 %v14477_v57  ;;  %v14504_v57 = vld [vmem:[#allocation2 + $0x2b40] ss:$16 sps:$4 sm:$0xff]  }
 0x2cc   :  { %10529 = vmatpush2.bf16.msra.mxu1 %v14480_v25  ;;  %10489 = vmatprep.subr.bf16.mxu0 %v14485_v19  ;;  %v14509_v25 = vld [vmem:[#allocation2 + $0x2924] ss:$16 sps:$4 sm:$0xff]  }
 0x2cd   :  { %10530 = vmatprep.subr.bf16.mxu1 %v14488_v4  ;;  %v14512_v19 = vld [vmem:[#allocation2 + $0x2b24] ss:$16 sps:$4 sm:$0xff]   ;;  %v16222_v4 = vrot.slane %v1851_v2, %v15885_v49 }
 0x2cf   :  { %10490 = vmatpush2.bf16.msra.mxu0 %v14483_v9  ;;  %v14507_v9 = vld [vmem:[#allocation2 + $0x2920] ss:$16 sps:$4 sm:$0xff]   ;;  %v1867_v52 = vcombine.high %v16222_v4, %v16222_v4 }
 0x2d0   :  { %10531 = vmatpush2.bf16.msra.mxu1 %v14486_v31  ;;  %10491 = vmatprep.subr.bf16.mxu0 %v14491_v38  ;;  %v14510_v31 = vld [vmem:[#allocation2 + $0x2b20] ss:$16 sps:$4 sm:$0xff]   ;;  %v14515_v38 = vld [vmem:[#allocation2 + $0x2904] ss:$16 sps:$4 sm:$0xff]  }
 0x2d1   :  { %10532 = vmatprep.subr.bf16.mxu1 %v14494_v7  ;;  %v14518_v7 = vld [vmem:[#allocation2 + $0x2b04] ss:$16 sps:$4 sm:$0xff]  }
 0x2d3   :  { %10492 = vmatpush2.bf16.msra.mxu0 %v14489_v45  ;;  %v16228_v45 = vrot.slane %v16190_v11, %v15885_v49  ;;  %v14527_v11 = vld [vmem:[#allocation2 + $0x2cc4] ss:$16 sps:$4 sm:$0xff]  }
 0x2d4   :  { %10533 = vmatpush2.bf16.msra.mxu1 %v14492_v29  ;;  %10493 = vmatprep.subr.bf16.mxu0 %v14497_v51  ;;  %v14513_v29 = vld [vmem:[#allocation2 + $0x2900] ss:$16 sps:$4 sm:$0xff]  }
 0x2d5   :  { %10534 = vmatprep.subr.bf16.mxu1 %v14500_v10  ;;  %v14516_v51 = vld [vmem:[#allocation2 + $0x2b00] ss:$16 sps:$4 sm:$0xff]   ;;  %v14521_v10 = vld [vmem:[#allocation2 + $0x2ce4] ss:$16 sps:$4 sm:$0xff]   ;;  %v16235_v2 = vcombine.high %v16228_v45, %v16228_v45 }
 0x2d7   :  { %10494 = vmatpush2.bf16.msra.mxu0 %v14495_v37  ;;  %v14524_v37 = vld [vmem:[#allocation2 + $0x2ee4] ss:$16 sps:$4 sm:$0xff]   ;;  %16601 = vst [vmem:[#allocation13_spill] sm:$0xff] %v16235_v2 }
 0x2d8   :  { %10535 = vmatpush2.bf16.msra.mxu1 %v14498_v14  ;;  %10495 = vmatprep.subr.bf16.mxu0 %v14503_v16  ;;  %v14519_v14 = vld [vmem:[#allocation2 + $0x2ce0] ss:$16 sps:$4 sm:$0xff]  }
 0x2d9   :  { %10536 = vmatprep.subr.bf16.mxu1 %v14506_v46  ;;  %v14522_v16 = vld [vmem:[#allocation2 + $0x2ee0] ss:$16 sps:$4 sm:$0xff]   ;;  %v16231_v46 = vrot.slane %v1867_v52, %v15885_v49 }
 0x2db   :  { %10496 = vmatpush2.bf16.msra.mxu0 %v14501_v5  ;;  %v14530_v5 = vld [vmem:[#allocation2 + $0x2ec4] ss:$16 sps:$4 sm:$0xff]  }
 0x2dc   :  { %10537 = vmatpush2.bf16.msra.mxu1 %v14504_v57  ;;  %10497 = vmatprep.subr.bf16.mxu0 %v14509_v25  ;;  %v14525_v57 = vld [vmem:[#allocation2 + $0x2cc0] ss:$16 sps:$4 sm:$0xff]  }
 0x2dd   :  { %10538 = vmatprep.subr.bf16.mxu1 %v14512_v19  ;;  %v14528_v25 = vld [vmem:[#allocation2 + $0x2ec0] ss:$16 sps:$4 sm:$0xff]   ;;  %v16239_v19 = vcombine.high %v16231_v46, %v16231_v46 }
 0x2df   :  { %10498 = vmatpush2.bf16.msra.mxu0 %v14507_v9 }
 0x2e0   :  { %10539 = vmatpush2.bf16.msra.mxu1 %v14510_v31  ;;  %10499 = vmatprep.subr.bf16.mxu0 %v14515_v38 }
 0x2e1   :  { %10540 = vmatprep.subr.bf16.mxu1 %v14518_v7 }
 0x2e3   :  { %10500 = vmatpush2.bf16.msra.mxu0 %v14513_v29  ;;  %v14533_v29 = vld [vmem:[#allocation2 + $0x2ca4] ss:$16 sps:$4 sm:$0xff]  }
 0x2e4   :  { %10541 = vmatpush2.bf16.msra.mxu1 %v14516_v51  ;;  %10551 = vmatprep.subr.bf16.mxu0 %v14521_v10  ;;  %v14536_v51 = vld [vmem:[#allocation2 + $0x2ea4] ss:$16 sps:$4 sm:$0xff]  }
 0x2e5   :  { %10592 = vmatprep.subr.bf16.mxu1 %v14524_v37 }
 0x2e6   :  { %v10257_v9 = vpop.f32.mrf.mxu0  ;;  %10502 = vmatmul.mubr.bf16.vlgmr.msra.gmra.mxu0 %v16228_v45 }
 0x2e7   :  { %v10298_v31 = vpop.f32.mrf.mxu1  ;;  %10543 = vmatmul.mubr.bf16.vlgmr.msra.gmra.mxu1 %v16235_v2  ;;  %v10258_v38 = vadd.f32 %v10257_v9, %v16212_v35  ;;  %10552 = vmatpush1.bf16.msra.mxu0 %v14519_v14  ;;  %v14542_v9 = vld [vmem:[#allocation2 + $0x2e84] ss:$16 sps:$4 sm:$0xff]  }
 0x2e8   :  { %10593 = vmatpush1.bf16.msra.mxu1 %v14522_v16  ;;  %v10259_v7 = vpop.f32.mrf.mxu0  ;;  %10553 = vmatprep.subr.bf16.mxu0 %v14527_v11 }
 0x2e9   :  { %v10300_v52 = vpop.f32.mrf.mxu1  ;;  %10594 = vmatprep.subr.bf16.mxu1 %v14530_v5  ;;  %v16244_v10 = vadd.f32 %v10298_v31, %v10258_v38  ;;  %v10260_v37 = vadd.f32 %v10259_v7, %v16217_v3  ;;  %10583 = vmatprep.mubr.bf16.mxu0 %v16231_v46  ;;  %v14539_v5 = vld [vmem:[#allocation2 + $0x2c84] ss:$16 sps:$4 sm:$0xff]   ;;  %v14537_v3 = vld [vmem:[#allocation2 + $0x2c80] ss:$16 sps:$4 sm:$0xff]  }
 0x2ea   :  { %10624 = vmatprep.mubr.bf16.mxu1 %v16239_v19  ;;  %v10261_v2 = vpop.f32.mrf.mxu0  ;;  %v14540_v31 = vld [vmem:[#allocation2 + $0x2e80] ss:$16 sps:$4 sm:$0xff]   ;;  %v14545_v38 = vld [vmem:[#allocation2 + $0x2c64] ss:$16 sps:$4 sm:$0xff]  }
 0x2eb   :  { %v10302_v35 = vpop.f32.mrf.mxu1  ;;  %v16249_v14 = vadd.f32 %v10300_v52, %v10260_v37  ;;  %10554 = vmatpush1.bf16.msra.mxu0 %v14525_v57  ;;  %v14548_v7 = vld [vmem:[#allocation2 + $0x2e64] ss:$16 sps:$4 sm:$0xff]   ;;  %v14543_v2 = vld [vmem:[#allocation2 + $0x2c60] ss:$16 sps:$4 sm:$0xff]  }
 0x2ec   :  { %10595 = vmatpush1.bf16.msra.mxu1 %v14528_v25  ;;  %v10262_v16 = vpop.f32.mrf.mxu0  ;;  %10555 = vmatprep.subr.bf16.mxu0 %v14533_v29  ;;  %v14546_v52 = vld [vmem:[#allocation2 + $0x2e60] ss:$16 sps:$4 sm:$0xff]   ;;  %v14551_v57 = vld [vmem:[#allocation2 + $0x2c44] ss:$16 sps:$4 sm:$0xff]  }
 0x2ed   :  { %v10303_v11 = vpop.f32.mrf.mxu1  ;;  %10596 = vmatprep.subr.bf16.mxu1 %v14536_v51  ;;  %v14554_v25 = vld [vmem:[#allocation2 + $0x2e44] ss:$16 sps:$4 sm:$0xff]   ;;  %v14549_v29 = vld [vmem:[#allocation2 + $0x2c40] ss:$16 sps:$4 sm:$0xff]  }
 0x2ee   :  { %v14552_v51 = vld [vmem:[#allocation2 + $0x2e40] ss:$16 sps:$4 sm:$0xff]   ;;  %v14563_v16 = vld [vmem:[#allocation2 + $0x2c04] ss:$16 sps:$4 sm:$0xff]  }
 0x2ef   :  { %10556 = vmatpush1.bf16.msra.mxu0 %v14531_v1  ;;  %v14560_v1 = vld [vmem:[#allocation2 + $0x2e24] ss:$16 sps:$4 sm:$0xff]   ;;  %v14555_v37 = vld [vmem:[#allocation2 + $0x2c20] ss:$16 sps:$4 sm:$0xff]  }
 0x2f0   :  { %10597 = vmatpush1.bf16.msra.mxu1 %v14534_v53  ;;  %10557 = vmatprep.subr.bf16.mxu0 %v14539_v5  ;;  %v14557_v53 = vld [vmem:[#allocation2 + $0x2c24] ss:$16 sps:$4 sm:$0xff]   ;;  %v14558_v35 = vld [vmem:[#allocation2 + $0x2e20] ss:$16 sps:$4 sm:$0xff]  }
 0x2f1   :  { %10598 = vmatprep.subr.bf16.mxu1 %v14542_v9  ;;  %v14566_v11 = vld [vmem:[#allocation2 + $0x2e04] ss:$16 sps:$4 sm:$0xff]   ;;  %v14561_v5 = vld [vmem:[#allocation2 + $0x2c00] ss:$16 sps:$4 sm:$0xff]  }
 0x2f2   :  { %v14564_v9 = vld [vmem:[#allocation2 + $0x2e00] ss:$16 sps:$4 sm:$0xff]  }
 0x2f3   :  { %10558 = vmatpush1.bf16.msra.mxu0 %v14537_v3  ;;  %v14569_v3 = vld [vmem:[#allocation2 + $0x2de4] ss:$16 sps:$4 sm:$0xff]  }
 0x2f4   :  { %10599 = vmatpush1.bf16.msra.mxu1 %v14540_v31  ;;  %10559 = vmatprep.subr.bf16.mxu0 %v14545_v38  ;;  %v14572_v31 = vld [vmem:[#allocation2 + $0x2fe4] ss:$16 sps:$4 sm:$0xff]   ;;  %v14567_v38 = vld [vmem:[#allocation2 + $0x2de0] ss:$16 sps:$4 sm:$0xff]  }
 0x2f5   :  { %10600 = vmatprep.subr.bf16.mxu1 %v14548_v7  ;;  %v14570_v7 = vld [vmem:[#allocation2 + $0x2fe0] ss:$16 sps:$4 sm:$0xff]  }
 0x2f7   :  { %10560 = vmatpush1.bf16.msra.mxu0 %v14543_v2  ;;  %v14575_v2 = vld [vmem:[#allocation2 + $0x2dc4] ss:$16 sps:$4 sm:$0xff]  }
 0x2f8   :  { %10601 = vmatpush1.bf16.msra.mxu1 %v14546_v52  ;;  %10561 = vmatprep.subr.bf16.mxu0 %v14551_v57  ;;  %v14578_v52 = vld [vmem:[#allocation2 + $0x2fc4] ss:$16 sps:$4 sm:$0xff]   ;;  %v14573_v57 = vld [vmem:[#allocation2 + $0x2dc0] ss:$16 sps:$4 sm:$0xff]  }
 0x2f9   :  { %10602 = vmatprep.subr.bf16.mxu1 %v14554_v25  ;;  %v14576_v25 = vld [vmem:[#allocation2 + $0x2fc0] ss:$16 sps:$4 sm:$0xff]  }
 0x2fb   :  { %10562 = vmatpush1.bf16.msra.mxu0 %v14549_v29  ;;  %v14581_v29 = vld [vmem:[#allocation2 + $0x2da4] ss:$16 sps:$4 sm:$0xff]  }
 0x2fc   :  { %10603 = vmatpush1.bf16.msra.mxu1 %v14552_v51  ;;  %10563 = vmatprep.subr.bf16.mxu0 %v14557_v53  ;;  %v14584_v51 = vld [vmem:[#allocation2 + $0x2fa4] ss:$16 sps:$4 sm:$0xff]   ;;  %v14579_v53 = vld [vmem:[#allocation2 + $0x2da0] ss:$16 sps:$4 sm:$0xff]  }
 0x2fd   :  { %10604 = vmatprep.subr.bf16.mxu1 %v14560_v1  ;;  %v14582_v1 = vld [vmem:[#allocation2 + $0x2fa0] ss:$16 sps:$4 sm:$0xff]  }
 0x2ff   :  { %10564 = vmatpush1.bf16.msra.mxu0 %v14555_v37  ;;  %v14587_v37 = vld [vmem:[#allocation2 + $0x2d84] ss:$16 sps:$4 sm:$0xff]  }
 0x300   :  { %10605 = vmatpush1.bf16.msra.mxu1 %v14558_v35  ;;  %10565 = vmatprep.subr.bf16.mxu0 %v14563_v16  ;;  %v14590_v35 = vld [vmem:[#allocation2 + $0x2f84] ss:$16 sps:$4 sm:$0xff]   ;;  %v14585_v16 = vld [vmem:[#allocation2 + $0x2d80] ss:$16 sps:$4 sm:$0xff]  }
 0x301   :  { %10606 = vmatprep.subr.bf16.mxu1 %v14566_v11  ;;  %v14588_v11 = vld [vmem:[#allocation2 + $0x2f80] ss:$16 sps:$4 sm:$0xff]  }
 0x303   :  { %10566 = vmatpush1.bf16.msra.mxu0 %v14561_v5  ;;  %v14593_v5 = vld [vmem:[#allocation2 + $0x2d64] ss:$16 sps:$4 sm:$0xff]  }
 0x304   :  { %10607 = vmatpush1.bf16.msra.mxu1 %v14564_v9  ;;  %10567 = vmatprep.subr.bf16.mxu0 %v14569_v3  ;;  %v14596_v9 = vld [vmem:[#allocation2 + $0x2f64] ss:$16 sps:$4 sm:$0xff]   ;;  %v14591_v3 = vld [vmem:[#allocation2 + $0x2d60] ss:$16 sps:$4 sm:$0xff]  }
 0x305   :  { %10608 = vmatprep.subr.bf16.mxu1 %v14572_v31  ;;  %v14594_v31 = vld [vmem:[#allocation2 + $0x2f60] ss:$16 sps:$4 sm:$0xff]  }
 0x307   :  { %10568 = vmatpush2.bf16.msra.mxu0 %v14567_v38  ;;  %v14599_v38 = vld [vmem:[#allocation2 + $0x2d44] ss:$16 sps:$4 sm:$0xff]  }
 0x308   :  { %10609 = vmatpush2.bf16.msra.mxu1 %v14570_v7  ;;  %10569 = vmatprep.subr.bf16.mxu0 %v14575_v2  ;;  %v14602_v7 = vld [vmem:[#allocation2 + $0x2f44] ss:$16 sps:$4 sm:$0xff]   ;;  %v14597_v2 = vld [vmem:[#allocation2 + $0x2d40] ss:$16 sps:$4 sm:$0xff]  }
 0x309   :  { %10610 = vmatprep.subr.bf16.mxu1 %v14578_v52  ;;  %v14600_v52 = vld [vmem:[#allocation2 + $0x2f40] ss:$16 sps:$4 sm:$0xff]  }
 0x30b   :  { %10570 = vmatpush2.bf16.msra.mxu0 %v14573_v57  ;;  %v14605_v57 = vld [vmem:[#allocation2 + $0x2d24] ss:$16 sps:$4 sm:$0xff]  }
 0x30c   :  { %10611 = vmatpush2.bf16.msra.mxu1 %v14576_v25  ;;  %10571 = vmatprep.subr.bf16.mxu0 %v14581_v29  ;;  %v14608_v25 = vld [vmem:[#allocation2 + $0x2f24] ss:$16 sps:$4 sm:$0xff]   ;;  %v14603_v29 = vld [vmem:[#allocation2 + $0x2d20] ss:$16 sps:$4 sm:$0xff]  }
 0x30d   :  { %10612 = vmatprep.subr.bf16.mxu1 %v14584_v51  ;;  %v14606_v51 = vld [vmem:[#allocation2 + $0x2f20] ss:$16 sps:$4 sm:$0xff]  }
 0x30f   :  { %10572 = vmatpush2.bf16.msra.mxu0 %v14579_v53  ;;  %v14611_v53 = vld [vmem:[#allocation2 + $0x2d04] ss:$16 sps:$4 sm:$0xff]  }
 0x310   :  { %10613 = vmatpush2.bf16.msra.mxu1 %v14582_v1  ;;  %10573 = vmatprep.subr.bf16.mxu0 %v14587_v37  ;;  %v14614_v1 = vld [vmem:[#allocation2 + $0x2f04] ss:$16 sps:$4 sm:$0xff]   ;;  %v16253_v37 = vrot.slane %v16222_v4, %v15885_v49  ;;  %v14624_v49 = vld [vmem:[#allocation2 + $0xcc] ss:$16 sps:$4 sm:$0xff]  }
 0x311   :  { %10614 = vmatprep.subr.bf16.mxu1 %v14590_v35  ;;  %v14609_v35 = vld [vmem:[#allocation2 + $0x2d00] ss:$16 sps:$4 sm:$0xff]   ;;  %v14627_v4 = vld [vmem:[#allocation2 + $0x2cc] ss:$16 sps:$4 sm:$0xff]  }
 0x313   :  { %10574 = vmatpush2.bf16.msra.mxu0 %v14585_v16  ;;  %v14612_v16 = vld [vmem:[#allocation2 + $0x2f00] ss:$16 sps:$4 sm:$0xff]  }
 0x314   :  { %10615 = vmatpush2.bf16.msra.mxu1 %v14588_v11  ;;  %10575 = vmatprep.subr.bf16.mxu0 %v14593_v5  ;;  %v14618_v11 = vld [vmem:[#allocation2 + $0xec] ss:$16 sps:$4 sm:$0xff]  }
 0x315   :  { %10616 = vmatprep.subr.bf16.mxu1 %v14596_v9  ;;  %v14621_v5 = vld [vmem:[#allocation2 + $0x2ec] ss:$16 sps:$4 sm:$0xff]   ;;  %v14616_v9 = vld [vmem:[#allocation2 + $0xe8] ss:$16 sps:$4 sm:$0xff]  }
 0x317   :  { %10576 = vmatpush2.bf16.msra.mxu0 %v14591_v3  ;;  %v14619_v3 = vld [vmem:[#allocation2 + $0x2e8] ss:$16 sps:$4 sm:$0xff]  }
 0x318   :  { %10617 = vmatpush2.bf16.msra.mxu1 %v14594_v31  ;;  %10577 = vmatprep.subr.bf16.mxu0 %v14599_v38  ;;  %v16257_v31 = vcombine.high %v16253_v37, %v16253_v37  ;;  %v14622_v38 = vld [vmem:[#allocation2 + $0xc8] ss:$16 sps:$4 sm:$0xff]  }
 0x319   :  { %10618 = vmatprep.subr.bf16.mxu1 %v14602_v7  ;;  %v14625_v7 = vld [vmem:[#allocation2 + $0x2c8] ss:$16 sps:$4 sm:$0xff]  }
 0x31b   :  { %10578 = vmatpush2.bf16.msra.mxu0 %v14597_v2 }
 0x31c   :  { %10619 = vmatpush2.bf16.msra.mxu1 %v14600_v52  ;;  %10579 = vmatprep.subr.bf16.mxu0 %v14605_v57 }
 0x31d   :  { %10620 = vmatprep.subr.bf16.mxu1 %v14608_v25 }
 0x31f   :  { %10580 = vmatpush2.bf16.msra.mxu0 %v14603_v29 }
 0x320   :  { %10621 = vmatpush2.bf16.msra.mxu1 %v14606_v51  ;;  %10581 = vmatprep.subr.bf16.mxu0 %v14611_v53  ;;  %v14630_v51 = vld [vmem:[#allocation2 + $0xac] ss:$16 sps:$4 sm:$0xff]  }
 0x321   :  { %10622 = vmatprep.subr.bf16.mxu1 %v14614_v1  ;;  %v14633_v53 = vld [vmem:[#allocation2 + $0x2ac] ss:$16 sps:$4 sm:$0xff]  }
 0x323   :  { %10582 = vmatpush2.bf16.msra.mxu0 %v14609_v35 }
 0x324   :  { %10623 = vmatpush2.bf16.msra.mxu1 %v14612_v16  ;;  %10633 = vmatprep.subr.bf16.mxu0 %v14618_v11  ;;  %v14628_v16 = vld [vmem:[#allocation2 + $0xa8] ss:$16 sps:$4 sm:$0xff]  }
 0x325   :  { %10674 = vmatprep.subr.bf16.mxu1 %v14621_v5  ;;  %v14631_v11 = vld [vmem:[#allocation2 + $0x2a8] ss:$16 sps:$4 sm:$0xff]  }
 0x326   :  { %v10339_v2 = vpop.f32.mrf.mxu0  ;;  %10584 = vmatmul.mubr.bf16.vlgmr.msra.gmra.mxu0 %v16253_v37 }
 0x327   :  { %v10380_v52 = vpop.f32.mrf.mxu1  ;;  %10625 = vmatmul.mubr.bf16.vlgmr.msra.gmra.mxu1 %v16257_v31  ;;  %v10340_v57 = vadd.f32 %v10339_v2, %v16244_v10  ;;  %10634 = vmatpush1.bf16.msra.mxu0 %v14616_v9  ;;  %v14639_v2 = vld [vmem:[#allocation2 + $0x28c] ss:$16 sps:$4 sm:$0xff]  }
 0x328   :  { %10675 = vmatpush1.bf16.msra.mxu1 %v14619_v3  ;;  %v10341_v25 = vpop.f32.mrf.mxu0  ;;  %10635 = vmatprep.subr.bf16.mxu0 %v14624_v49 }
 0x329   :  { %v10382_v29 = vpop.f32.mrf.mxu1  ;;  %10676 = vmatprep.subr.bf16.mxu1 %v14627_v4  ;;  %v16262_v1 = vadd.f32 %v10380_v52, %v10340_v57  ;;  %v10342_v35 = vadd.f32 %v10341_v25, %v16249_v14  ;;  %10665 = vmatprep.mubr.bf16.mxu0 %v15892_v60  ;;  %v14636_v4 = vld [vmem:[#allocation2 + $0x8c] ss:$16 sps:$4 sm:$0xff]   ;;  %v14634_v14 = vld [vmem:[#allocation2 + $0x88] ss:$16 sps:$4 sm:$0xff]  }
 0x32a   :  { %10706 = vmatprep.mubr.bf16.mxu1 %v15896_v0  ;;  %v10343_v5 = vpop.f32.mrf.mxu0  ;;  %v14637_v52 = vld [vmem:[#allocation2 + $0x288] ss:$16 sps:$4 sm:$0xff]   ;;  %v14642_v60 = vld [vmem:[#allocation2 + $0x6c] ss:$16 sps:$4 sm:$0xff]  }
 0x32b   :  { %v10384_v10 = vpop.f32.mrf.mxu1  ;;  %v16267_v9 = vadd.f32 %v10382_v29, %v10342_v35  ;;  %10636 = vmatpush1.bf16.msra.mxu0 %v14622_v38  ;;  %v14645_v0 = vld [vmem:[#allocation2 + $0x26c] ss:$16 sps:$4 sm:$0xff]   ;;  %v14640_v57 = vld [vmem:[#allocation2 + $0x68] ss:$16 sps:$4 sm:$0xff]  }
 0x32c   :  { %10677 = vmatpush1.bf16.msra.mxu1 %v14625_v7  ;;  %v10344_v3 = vpop.f32.mrf.mxu0  ;;  %10637 = vmatprep.subr.bf16.mxu0 %v14630_v51  ;;  %v14643_v25 = vld [vmem:[#allocation2 + $0x268] ss:$16 sps:$4 sm:$0xff]   ;;  %v14648_v38 = vld [vmem:[#allocation2 + $0x4c] ss:$16 sps:$4 sm:$0xff]  }
 0x32d   :  { %v10385_v49 = vpop.f32.mrf.mxu1  ;;  %10678 = vmatprep.subr.bf16.mxu1 %v14633_v53  ;;  %v14651_v7 = vld [vmem:[#allocation2 + $0x24c] ss:$16 sps:$4 sm:$0xff]   ;;  %v14646_v29 = vld [vmem:[#allocation2 + $0x48] ss:$16 sps:$4 sm:$0xff]  }
 0x32e   :  { %v14649_v51 = vld [vmem:[#allocation2 + $0x248] ss:$16 sps:$4 sm:$0xff]   ;;  %v14654_v53 = vld [vmem:[#allocation2 + $0x2c] ss:$16 sps:$4 sm:$0xff]  }
 0x32f   :  { %10638 = vmatpush1.bf16.msra.mxu0 %v14628_v16  ;;  %v14657_v35 = vld [vmem:[#allocation2 + $0x22c] ss:$16 sps:$4 sm:$0xff]   ;;  %v14652_v16 = vld [vmem:[#allocation2 + $0x28] ss:$16 sps:$4 sm:$0xff]  }
 0x330   :  { %10679 = vmatpush1.bf16.msra.mxu1 %v14631_v11  ;;  %10639 = vmatprep.subr.bf16.mxu0 %v14636_v4  ;;  %v14655_v11 = vld [vmem:[#allocation2 + $0x228] ss:$16 sps:$4 sm:$0xff]   ;;  %v14660_v5 = vld [vmem:[#allocation2 + $0xc] ss:$16 sps:$4 sm:$0xff]  }
 0x331   :  { %10680 = vmatprep.subr.bf16.mxu1 %v14639_v2  ;;  %v14663_v10 = vld [vmem:[#allocation2 + $0x20c] ss:$16 sps:$4 sm:$0xff]   ;;  %v14658_v3 = vld [vmem:[#allocation2 + $0x8] ss:$16 sps:$4 sm:$0xff]  }
 0x332   :  { %v14661_v49 = vld [vmem:[#allocation2 + $0x208] ss:$16 sps:$4 sm:$0xff]   ;;  %v14666_v4 = vld [vmem:[#allocation2 + $0x1ec] ss:$16 sps:$4 sm:$0xff]  }
 0x333   :  { %10640 = vmatpush1.bf16.msra.mxu0 %v14634_v14  ;;  %v14669_v2 = vld [vmem:[#allocation2 + $0x3ec] ss:$16 sps:$4 sm:$0xff]   ;;  %v14664_v14 = vld [vmem:[#allocation2 + $0x1e8] ss:$16 sps:$4 sm:$0xff]  }
 0x334   :  { %10681 = vmatpush1.bf16.msra.mxu1 %v14637_v52  ;;  %10641 = vmatprep.subr.bf16.mxu0 %v14642_v60  ;;  %v14667_v52 = vld [vmem:[#allocation2 + $0x3e8] ss:$16 sps:$4 sm:$0xff]   ;;  %v14672_v60 = vld [vmem:[#allocation2 + $0x1cc] ss:$16 sps:$4 sm:$0xff]  }
 0x335   :  { %10682 = vmatprep.subr.bf16.mxu1 %v14645_v0  ;;  %v14675_v0 = vld [vmem:[#allocation2 + $0x3cc] ss:$16 sps:$4 sm:$0xff]  }
 0x337   :  { %10642 = vmatpush1.bf16.msra.mxu0 %v14640_v57  ;;  %v14670_v57 = vld [vmem:[#allocation2 + $0x1c8] ss:$16 sps:$4 sm:$0xff]  }
 0x338   :  { %10683 = vmatpush1.bf16.msra.mxu1 %v14643_v25  ;;  %10643 = vmatprep.subr.bf16.mxu0 %v14648_v38  ;;  %v14673_v25 = vld [vmem:[#allocation2 + $0x3c8] ss:$16 sps:$4 sm:$0xff]   ;;  %v14678_v38 = vld [vmem:[#allocation2 + $0x1ac] ss:$16 sps:$4 sm:$0xff]  }
 0x339   :  { %10684 = vmatprep.subr.bf16.mxu1 %v14651_v7  ;;  %v14681_v7 = vld [vmem:[#allocation2 + $0x3ac] ss:$16 sps:$4 sm:$0xff]  }
 0x33b   :  { %10644 = vmatpush1.bf16.msra.mxu0 %v14646_v29  ;;  %v14676_v29 = vld [vmem:[#allocation2 + $0x1a8] ss:$16 sps:$4 sm:$0xff]  }
 0x33c   :  { %10685 = vmatpush1.bf16.msra.mxu1 %v14649_v51  ;;  %10645 = vmatprep.subr.bf16.mxu0 %v14654_v53  ;;  %v14679_v51 = vld [vmem:[#allocation2 + $0x3a8] ss:$16 sps:$4 sm:$0xff]   ;;  %v14684_v53 = vld [vmem:[#allocation2 + $0x18c] ss:$16 sps:$4 sm:$0xff]  }
 0x33d   :  { %10686 = vmatprep.subr.bf16.mxu1 %v14657_v35  ;;  %v14687_v35 = vld [vmem:[#allocation2 + $0x38c] ss:$16 sps:$4 sm:$0xff]  }
 0x33f   :  { %10646 = vmatpush1.bf16.msra.mxu0 %v14652_v16  ;;  %v14682_v16 = vld [vmem:[#allocation2 + $0x188] ss:$16 sps:$4 sm:$0xff]  }
 0x340   :  { %10687 = vmatpush1.bf16.msra.mxu1 %v14655_v11  ;;  %10647 = vmatprep.subr.bf16.mxu0 %v14660_v5  ;;  %v14685_v11 = vld [vmem:[#allocation2 + $0x388] ss:$16 sps:$4 sm:$0xff]   ;;  %v14690_v5 = vld [vmem:[#allocation2 + $0x16c] ss:$16 sps:$4 sm:$0xff]  }
 0x341   :  { %10688 = vmatprep.subr.bf16.mxu1 %v14663_v10  ;;  %v14693_v10 = vld [vmem:[#allocation2 + $0x36c] ss:$16 sps:$4 sm:$0xff]  }
 0x343   :  { %10648 = vmatpush1.bf16.msra.mxu0 %v14658_v3  ;;  %v14688_v3 = vld [vmem:[#allocation2 + $0x168] ss:$16 sps:$4 sm:$0xff]  }
 0x344   :  { %10689 = vmatpush1.bf16.msra.mxu1 %v14661_v49  ;;  %10649 = vmatprep.subr.bf16.mxu0 %v14666_v4  ;;  %v14691_v49 = vld [vmem:[#allocation2 + $0x368] ss:$16 sps:$4 sm:$0xff]   ;;  %v14696_v4 = vld [vmem:[#allocation2 + $0x14c] ss:$16 sps:$4 sm:$0xff]  }
 0x345   :  { %10690 = vmatprep.subr.bf16.mxu1 %v14669_v2  ;;  %v14699_v2 = vld [vmem:[#allocation2 + $0x34c] ss:$16 sps:$4 sm:$0xff]  }
 0x347   :  { %10650 = vmatpush2.bf16.msra.mxu0 %v14664_v14  ;;  %v14694_v14 = vld [vmem:[#allocation2 + $0x148] ss:$16 sps:$4 sm:$0xff]  }
 0x348   :  { %10691 = vmatpush2.bf16.msra.mxu1 %v14667_v52  ;;  %10651 = vmatprep.subr.bf16.mxu0 %v14672_v60  ;;  %v14697_v52 = vld [vmem:[#allocation2 + $0x348] ss:$16 sps:$4 sm:$0xff]   ;;  %v14702_v60 = vld [vmem:[#allocation2 + $0x12c] ss:$16 sps:$4 sm:$0xff]  }
 0x349   :  { %10692 = vmatprep.subr.bf16.mxu1 %v14675_v0  ;;  %v14705_v0 = vld [vmem:[#allocation2 + $0x32c] ss:$16 sps:$4 sm:$0xff]  }
 0x34b   :  { %10652 = vmatpush2.bf16.msra.mxu0 %v14670_v57  ;;  %v14700_v57 = vld [vmem:[#allocation2 + $0x128] ss:$16 sps:$4 sm:$0xff]  }
 0x34c   :  { %10693 = vmatpush2.bf16.msra.mxu1 %v14673_v25  ;;  %10653 = vmatprep.subr.bf16.mxu0 %v14678_v38  ;;  %v14703_v25 = vld [vmem:[#allocation2 + $0x328] ss:$16 sps:$4 sm:$0xff]   ;;  %v14708_v38 = vld [vmem:[#allocation2 + $0x10c] ss:$16 sps:$4 sm:$0xff]  }
 0x34d   :  { %10694 = vmatprep.subr.bf16.mxu1 %v14681_v7  ;;  %v14711_v7 = vld [vmem:[#allocation2 + $0x30c] ss:$16 sps:$4 sm:$0xff]  }
 0x34f   :  { %10654 = vmatpush2.bf16.msra.mxu0 %v14676_v29  ;;  %v14706_v29 = vld [vmem:[#allocation2 + $0x108] ss:$16 sps:$4 sm:$0xff]  }
 0x350   :  { %10695 = vmatpush2.bf16.msra.mxu1 %v14679_v51  ;;  %10655 = vmatprep.subr.bf16.mxu0 %v14684_v53  ;;  %v14709_v51 = vld [vmem:[#allocation2 + $0x308] ss:$16 sps:$4 sm:$0xff]   ;;  %v14714_v53 = vld [vmem:[#allocation2 + $0x4ec] ss:$16 sps:$4 sm:$0xff]  }
 0x351   :  { %10696 = vmatprep.subr.bf16.mxu1 %v14687_v35  ;;  %v14717_v35 = vld [vmem:[#allocation2 + $0x6ec] ss:$16 sps:$4 sm:$0xff]  }
 0x353   :  { %10656 = vmatpush2.bf16.msra.mxu0 %v14682_v16  ;;  %v14712_v16 = vld [vmem:[#allocation2 + $0x4e8] ss:$16 sps:$4 sm:$0xff]  }
 0x354   :  { %10697 = vmatpush2.bf16.msra.mxu1 %v14685_v11  ;;  %10657 = vmatprep.subr.bf16.mxu0 %v14690_v5  ;;  %v14715_v11 = vld [vmem:[#allocation2 + $0x6e8] ss:$16 sps:$4 sm:$0xff]   ;;  %v14720_v5 = vld [vmem:[#allocation2 + $0x4cc] ss:$16 sps:$4 sm:$0xff]  }
 0x355   :  { %10698 = vmatprep.subr.bf16.mxu1 %v14693_v10  ;;  %v14723_v10 = vld [vmem:[#allocation2 + $0x6cc] ss:$16 sps:$4 sm:$0xff]  }
 0x357   :  { %10658 = vmatpush2.bf16.msra.mxu0 %v14688_v3 }
 0x358   :  { %10699 = vmatpush2.bf16.msra.mxu1 %v14691_v49  ;;  %10659 = vmatprep.subr.bf16.mxu0 %v14696_v4 }
 0x359   :  { %10700 = vmatprep.subr.bf16.mxu1 %v14699_v2  ;;  %v14718_v2 = vld [vmem:[#allocation2 + $0x4c8] ss:$16 sps:$4 sm:$0xff]  }
 0x35b   :  { %10660 = vmatpush2.bf16.msra.mxu0 %v14694_v14  ;;  %v14721_v14 = vld [vmem:[#allocation2 + $0x6c8] ss:$16 sps:$4 sm:$0xff]  }
 0x35c   :  { %10701 = vmatpush2.bf16.msra.mxu1 %v14697_v52  ;;  %10661 = vmatprep.subr.bf16.mxu0 %v14702_v60 }
 0x35d   :  { %10702 = vmatprep.subr.bf16.mxu1 %v14705_v0  ;;  %v14726_v0 = vld [vmem:[#allocation2 + $0x4ac] ss:$16 sps:$4 sm:$0xff]  }
 0x35f   :  { %10662 = vmatpush2.bf16.msra.mxu0 %v14700_v57  ;;  %v14729_v57 = vld [vmem:[#allocation2 + $0x6ac] ss:$16 sps:$4 sm:$0xff]  }
 0x360   :  { %10703 = vmatpush2.bf16.msra.mxu1 %v14703_v25  ;;  %10663 = vmatprep.subr.bf16.mxu0 %v14708_v38 }
 0x361   :  { %10704 = vmatprep.subr.bf16.mxu1 %v14711_v7  ;;  %v14724_v7 = vld [vmem:[#allocation2 + $0x4a8] ss:$16 sps:$4 sm:$0xff]  }
 0x363   :  { %10664 = vmatpush2.bf16.msra.mxu0 %v14706_v29  ;;  %v14727_v29 = vld [vmem:[#allocation2 + $0x6a8] ss:$16 sps:$4 sm:$0xff]  }
 0x364   :  { %10705 = vmatpush2.bf16.msra.mxu1 %v14709_v51  ;;  %10715 = vmatprep.subr.bf16.mxu0 %v14714_v53 }
 0x365   :  { %10756 = vmatprep.subr.bf16.mxu1 %v14717_v35  ;;  %v14732_v35 = vld [vmem:[#allocation2 + $0x48c] ss:$16 sps:$4 sm:$0xff]  }
 0x366   :  { %v10421_v3 = vpop.f32.mrf.mxu0  ;;  %10666 = vmatmul.mubr.bf16.vlgmr.msra.gmra.mxu0 %v15906_v13 }
 0x367   :  { %v10462_v49 = vpop.f32.mrf.mxu1  ;;  %10707 = vmatmul.mubr.bf16.vlgmr.msra.gmra.mxu1 %v15913_v18  ;;  %v10422_v4 = vadd.f32 %v10421_v3, %v16262_v1  ;;  %10716 = vmatpush1.bf16.msra.mxu0 %v14712_v16  ;;  %v14735_v16 = vld [vmem:[#allocation2 + $0x68c] ss:$16 sps:$4 sm:$0xff]  }
 0x368   :  { %10757 = vmatpush1.bf16.msra.mxu1 %v14715_v11  ;;  %v10423_v52 = vpop.f32.mrf.mxu0  ;;  %10717 = vmatprep.subr.bf16.mxu0 %v14720_v5  ;;  %v14741_v11 = vld [vmem:[#allocation2 + $0x66c] ss:$16 sps:$4 sm:$0xff]   ;;  %v14736_v5 = vld [vmem:[#allocation2 + $0x468] ss:$16 sps:$4 sm:$0xff]  }
 0x369   :  { %v10464_v60 = vpop.f32.mrf.mxu1  ;;  %10758 = vmatprep.subr.bf16.mxu1 %v14723_v10  ;;  %v16272_v25 = vadd.f32 %v10462_v49, %v10422_v4  ;;  %v10424_v38 = vadd.f32 %v10423_v52, %v16267_v9  ;;  %10747 = vmatprep.mubr.bf16.mxu0 %v15909_v17  ;;  %v14730_v9 = vld [vmem:[#allocation2 + $0x488] ss:$16 sps:$4 sm:$0xff]   ;;  %v14744_v3 = vld [vmem:[#allocation2 + $0x44c] ss:$16 sps:$4 sm:$0xff]  }
 0x36a   :  { %10788 = vmatprep.mubr.bf16.mxu1 %v15917_v23  ;;  %v10425_v13 = vpop.f32.mrf.mxu0  ;;  %v14733_v17 = vld [vmem:[#allocation2 + $0x688] ss:$16 sps:$4 sm:$0xff]   ;;  %v14738_v23 = vld [vmem:[#allocation2 + $0x46c] ss:$16 sps:$4 sm:$0xff]  }
 0x36b   :  { %v10466_v18 = vpop.f32.mrf.mxu1  ;;  %v16277_v1 = vadd.f32 %v10464_v60, %v10424_v38  ;;  %10718 = vmatpush1.bf16.msra.mxu0 %v14718_v2  ;;  %v14739_v10 = vld [vmem:[#allocation2 + $0x668] ss:$16 sps:$4 sm:$0xff]   ;;  %v14747_v49 = vld [vmem:[#allocation2 + $0x64c] ss:$16 sps:$4 sm:$0xff]  }
 0x36c   :  { %10759 = vmatpush1.bf16.msra.mxu1 %v14721_v14  ;;  %v10426_v51 = vpop.f32.mrf.mxu0  ;;  %10719 = vmatprep.subr.bf16.mxu0 %v14726_v0  ;;  %v14742_v4 = vld [vmem:[#allocation2 + $0x448] ss:$16 sps:$4 sm:$0xff]   ;;  %v14750_v14 = vld [vmem:[#allocation2 + $0x42c] ss:$16 sps:$4 sm:$0xff]  }
 0x36d   :  { %v10467_v53 = vpop.f32.mrf.mxu1  ;;  %10760 = vmatprep.subr.bf16.mxu1 %v14729_v57  ;;  %v14745_v2 = vld [vmem:[#allocation2 + $0x648] ss:$16 sps:$4 sm:$0xff]   ;;  %v14753_v52 = vld [vmem:[#allocation2 + $0x62c] ss:$16 sps:$4 sm:$0xff]  }
 0x36e   :  { %v14748_v60 = vld [vmem:[#allocation2 + $0x428] ss:$16 sps:$4 sm:$0xff]   ;;  %v14756_v57 = vld [vmem:[#allocation2 + $0x40c] ss:$16 sps:$4 sm:$0xff]  }
 0x36f   :  { %10720 = vmatpush1.bf16.msra.mxu0 %v14724_v7  ;;  %v14751_v0 = vld [vmem:[#allocation2 + $0x628] ss:$16 sps:$4 sm:$0xff]   ;;  %v14759_v38 = vld [vmem:[#allocation2 + $0x60c] ss:$16 sps:$4 sm:$0xff]  }
 0x370   :  { %10761 = vmatpush1.bf16.msra.mxu1 %v14727_v29  ;;  %10721 = vmatprep.subr.bf16.mxu0 %v14732_v35  ;;  %v14754_v13 = vld [vmem:[#allocation2 + $0x408] ss:$16 sps:$4 sm:$0xff]   ;;  %v14762_v7 = vld [vmem:[#allocation2 + $0x5ec] ss:$16 sps:$4 sm:$0xff]  }
 0x371   :  { %10762 = vmatprep.subr.bf16.mxu1 %v14735_v16  ;;  %v14757_v18 = vld [vmem:[#allocation2 + $0x608] ss:$16 sps:$4 sm:$0xff]   ;;  %v14765_v29 = vld [vmem:[#allocation2 + $0x7ec] ss:$16 sps:$4 sm:$0xff]  }
 0x372   :  { %v14760_v51 = vld [vmem:[#allocation2 + $0x5e8] ss:$16 sps:$4 sm:$0xff]   ;;  %v14768_v35 = vld [vmem:[#allocation2 + $0x5cc] ss:$16 sps:$4 sm:$0xff]  }
 0x373   :  { %10722 = vmatpush1.bf16.msra.mxu0 %v14730_v9  ;;  %v14763_v53 = vld [vmem:[#allocation2 + $0x7e8] ss:$16 sps:$4 sm:$0xff]   ;;  %v14771_v16 = vld [vmem:[#allocation2 + $0x7cc] ss:$16 sps:$4 sm:$0xff]  }
 0x374   :  { %10763 = vmatpush1.bf16.msra.mxu1 %v14733_v17  ;;  %10723 = vmatprep.subr.bf16.mxu0 %v14738_v23  ;;  %v14766_v9 = vld [vmem:[#allocation2 + $0x5c8] ss:$16 sps:$4 sm:$0xff]   ;;  %v14774_v23 = vld [vmem:[#allocation2 + $0x5ac] ss:$16 sps:$4 sm:$0xff]  }
 0x375   :  { %10764 = vmatprep.subr.bf16.mxu1 %v14741_v11  ;;  %v14769_v17 = vld [vmem:[#allocation2 + $0x7c8] ss:$16 sps:$4 sm:$0xff]   ;;  %v14777_v11 = vld [vmem:[#allocation2 + $0x7ac] ss:$16 sps:$4 sm:$0xff]  }
 0x377   :  { %10724 = vmatpush1.bf16.msra.mxu0 %v14736_v5  ;;  %v14772_v5 = vld [vmem:[#allocation2 + $0x5a8] ss:$16 sps:$4 sm:$0xff]  }
 0x378   :  { %10765 = vmatpush1.bf16.msra.mxu1 %v14739_v10  ;;  %10725 = vmatprep.subr.bf16.mxu0 %v14744_v3  ;;  %v14775_v10 = vld [vmem:[#allocation2 + $0x7a8] ss:$16 sps:$4 sm:$0xff]   ;;  %v14780_v3 = vld [vmem:[#allocation2 + $0x58c] ss:$16 sps:$4 sm:$0xff]  }
 0x379   :  { %10766 = vmatprep.subr.bf16.mxu1 %v14747_v49  ;;  %v14783_v49 = vld [vmem:[#allocation2 + $0x78c] ss:$16 sps:$4 sm:$0xff]  }
 0x37b   :  { %10726 = vmatpush1.bf16.msra.mxu0 %v14742_v4  ;;  %v14778_v4 = vld [vmem:[#allocation2 + $0x588] ss:$16 sps:$4 sm:$0xff]  }
 0x37c   :  { %10767 = vmatpush1.bf16.msra.mxu1 %v14745_v2  ;;  %10727 = vmatprep.subr.bf16.mxu0 %v14750_v14  ;;  %v14781_v2 = vld [vmem:[#allocation2 + $0x788] ss:$16 sps:$4 sm:$0xff]   ;;  %v14786_v14 = vld [vmem:[#allocation2 + $0x56c] ss:$16 sps:$4 sm:$0xff]  }
 0x37d   :  { %10768 = vmatprep.subr.bf16.mxu1 %v14753_v52  ;;  %v14789_v52 = vld [vmem:[#allocation2 + $0x76c] ss:$16 sps:$4 sm:$0xff]  }
 0x37f   :  { %10728 = vmatpush1.bf16.msra.mxu0 %v14748_v60  ;;  %v14784_v60 = vld [vmem:[#allocation2 + $0x568] ss:$16 sps:$4 sm:$0xff]  }
 0x380   :  { %10769 = vmatpush1.bf16.msra.mxu1 %v14751_v0  ;;  %10729 = vmatprep.subr.bf16.mxu0 %v14756_v57  ;;  %v14787_v0 = vld [vmem:[#allocation2 + $0x768] ss:$16 sps:$4 sm:$0xff]   ;;  %v14792_v57 = vld [vmem:[#allocation2 + $0x54c] ss:$16 sps:$4 sm:$0xff]  }
 0x381   :  { %10770 = vmatprep.subr.bf16.mxu1 %v14759_v38  ;;  %v14795_v38 = vld [vmem:[#allocation2 + $0x74c] ss:$16 sps:$4 sm:$0xff]  }
 0x383   :  { %10730 = vmatpush1.bf16.msra.mxu0 %v14754_v13  ;;  %v14790_v13 = vld [vmem:[#allocation2 + $0x548] ss:$16 sps:$4 sm:$0xff]  }
 0x384   :  { %10771 = vmatpush1.bf16.msra.mxu1 %v14757_v18  ;;  %10731 = vmatprep.subr.bf16.mxu0 %v14762_v7  ;;  %v14793_v18 = vld [vmem:[#allocation2 + $0x748] ss:$16 sps:$4 sm:$0xff]   ;;  %v14798_v7 = vld [vmem:[#allocation2 + $0x52c] ss:$16 sps:$4 sm:$0xff]  }
 0x385   :  { %10772 = vmatprep.subr.bf16.mxu1 %v14765_v29  ;;  %v14801_v29 = vld [vmem:[#allocation2 + $0x72c] ss:$16 sps:$4 sm:$0xff]  }
 0x387   :  { %10732 = vmatpush2.bf16.msra.mxu0 %v14760_v51  ;;  %v14796_v51 = vld [vmem:[#allocation2 + $0x528] ss:$16 sps:$4 sm:$0xff]  }
 0x388   :  { %10773 = vmatpush2.bf16.msra.mxu1 %v14763_v53  ;;  %10733 = vmatprep.subr.bf16.mxu0 %v14768_v35  ;;  %v14799_v53 = vld [vmem:[#allocation2 + $0x728] ss:$16 sps:$4 sm:$0xff]   ;;  %v14804_v35 = vld [vmem:[#allocation2 + $0x50c] ss:$16 sps:$4 sm:$0xff]  }
 0x389   :  { %10774 = vmatprep.subr.bf16.mxu1 %v14771_v16  ;;  %v14807_v16 = vld [vmem:[#allocation2 + $0x70c] ss:$16 sps:$4 sm:$0xff]  }
 0x38b   :  { %10734 = vmatpush2.bf16.msra.mxu0 %v14766_v9  ;;  %v14802_v9 = vld [vmem:[#allocation2 + $0x508] ss:$16 sps:$4 sm:$0xff]  }
 0x38c   :  { %10775 = vmatpush2.bf16.msra.mxu1 %v14769_v17  ;;  %10735 = vmatprep.subr.bf16.mxu0 %v14774_v23  ;;  %v14805_v17 = vld [vmem:[#allocation2 + $0x708] ss:$16 sps:$4 sm:$0xff]   ;;  %v14810_v23 = vld [vmem:[#allocation2 + $0x8ec] ss:$16 sps:$4 sm:$0xff]  }
 0x38d   :  { %10776 = vmatprep.subr.bf16.mxu1 %v14777_v11  ;;  %v14813_v11 = vld [vmem:[#allocation2 + $0xaec] ss:$16 sps:$4 sm:$0xff]  }
 0x38f   :  { %10736 = vmatpush2.bf16.msra.mxu0 %v14772_v5  ;;  %v14808_v5 = vld [vmem:[#allocation2 + $0x8e8] ss:$16 sps:$4 sm:$0xff]  }
 0x390   :  { %10777 = vmatpush2.bf16.msra.mxu1 %v14775_v10  ;;  %10737 = vmatprep.subr.bf16.mxu0 %v14780_v3  ;;  %v14811_v10 = vld [vmem:[#allocation2 + $0xae8] ss:$16 sps:$4 sm:$0xff]   ;;  %v14816_v3 = vld [vmem:[#allocation2 + $0x8cc] ss:$16 sps:$4 sm:$0xff]  }
 0x391   :  { %10778 = vmatprep.subr.bf16.mxu1 %v14783_v49  ;;  %v14819_v49 = vld [vmem:[#allocation2 + $0xacc] ss:$16 sps:$4 sm:$0xff]  }
 0x393   :  { %10738 = vmatpush2.bf16.msra.mxu0 %v14778_v4 }
 0x394   :  { %10779 = vmatpush2.bf16.msra.mxu1 %v14781_v2  ;;  %10739 = vmatprep.subr.bf16.mxu0 %v14786_v14 }
 0x395   :  { %10780 = vmatprep.subr.bf16.mxu1 %v14789_v52  ;;  %v14814_v52 = vld [vmem:[#allocation2 + $0x8c8] ss:$16 sps:$4 sm:$0xff]  }
 0x397   :  { %10740 = vmatpush2.bf16.msra.mxu0 %v14784_v60  ;;  %v14817_v60 = vld [vmem:[#allocation2 + $0xac8] ss:$16 sps:$4 sm:$0xff]  }
 0x398   :  { %10781 = vmatpush2.bf16.msra.mxu1 %v14787_v0  ;;  %10741 = vmatprep.subr.bf16.mxu0 %v14792_v57 }
 0x399   :  { %10782 = vmatprep.subr.bf16.mxu1 %v14795_v38  ;;  %v14822_v38 = vld [vmem:[#allocation2 + $0x8ac] ss:$16 sps:$4 sm:$0xff]  }
 0x39b   :  { %10742 = vmatpush2.bf16.msra.mxu0 %v14790_v13  ;;  %v14825_v13 = vld [vmem:[#allocation2 + $0xaac] ss:$16 sps:$4 sm:$0xff]  }
 0x39c   :  { %10783 = vmatpush2.bf16.msra.mxu1 %v14793_v18  ;;  %10743 = vmatprep.subr.bf16.mxu0 %v14798_v7 }
 0x39d   :  { %10784 = vmatprep.subr.bf16.mxu1 %v14801_v29  ;;  %v14820_v29 = vld [vmem:[#allocation2 + $0x8a8] ss:$16 sps:$4 sm:$0xff]  }
 0x39f   :  { %10744 = vmatpush2.bf16.msra.mxu0 %v14796_v51  ;;  %v14823_v51 = vld [vmem:[#allocation2 + $0xaa8] ss:$16 sps:$4 sm:$0xff]  }
 0x3a0   :  { %10785 = vmatpush2.bf16.msra.mxu1 %v14799_v53  ;;  %10745 = vmatprep.subr.bf16.mxu0 %v14804_v35 }
 0x3a1   :  { %10786 = vmatprep.subr.bf16.mxu1 %v14807_v16  ;;  %v14828_v16 = vld [vmem:[#allocation2 + $0x88c] ss:$16 sps:$4 sm:$0xff]  }
 0x3a3   :  { %10746 = vmatpush2.bf16.msra.mxu0 %v14802_v9  ;;  %v14831_v9 = vld [vmem:[#allocation2 + $0xa8c] ss:$16 sps:$4 sm:$0xff]  }
 0x3a4   :  { %10787 = vmatpush2.bf16.msra.mxu1 %v14805_v17  ;;  %10797 = vmatprep.subr.bf16.mxu0 %v14810_v23  ;;  %v14837_v17 = vld [vmem:[#allocation2 + $0xa6c] ss:$16 sps:$4 sm:$0xff]   ;;  %v14832_v23 = vld [vmem:[#allocation2 + $0x868] ss:$16 sps:$4 sm:$0xff]  }
 0x3a5   :  { %10838 = vmatprep.subr.bf16.mxu1 %v14813_v11  ;;  %v14835_v11 = vld [vmem:[#allocation2 + $0xa68] ss:$16 sps:$4 sm:$0xff]  }
 0x3a6   :  { %v10503_v4 = vpop.f32.mrf.mxu0  ;;  %10748 = vmatmul.mubr.bf16.vlgmr.msra.gmra.mxu0 %v15925_v26 }
 0x3a7   :  { %v10544_v2 = vpop.f32.mrf.mxu1  ;;  %10789 = vmatmul.mubr.bf16.vlgmr.msra.gmra.mxu1 %v15929_v30  ;;  %v10504_v14 = vadd.f32 %v10503_v4, %v16272_v25  ;;  %10798 = vmatpush1.bf16.msra.mxu0 %v14808_v5  ;;  %v14840_v5 = vld [vmem:[#allocation2 + $0x84c] ss:$16 sps:$4 sm:$0xff]  }
 0x3a8   :  { %10839 = vmatpush1.bf16.msra.mxu1 %v14811_v10  ;;  %v10505_v0 = vpop.f32.mrf.mxu0  ;;  %10799 = vmatprep.subr.bf16.mxu0 %v14816_v3  ;;  %v14843_v10 = vld [vmem:[#allocation2 + $0xa4c] ss:$16 sps:$4 sm:$0xff]   ;;  %v14838_v3 = vld [vmem:[#allocation2 + $0x848] ss:$16 sps:$4 sm:$0xff]  }
 0x3a9   :  { %v10546_v57 = vpop.f32.mrf.mxu1  ;;  %10840 = vmatprep.subr.bf16.mxu1 %v14819_v49  ;;  %v16282_v18 = vadd.f32 %v10544_v2, %v10504_v14  ;;  %v10506_v7 = vadd.f32 %v10505_v0, %v16277_v1  ;;  %10829 = vmatprep.mubr.bf16.mxu0 %v15945_v41  ;;  %v14826_v1 = vld [vmem:[#allocation2 + $0x888] ss:$16 sps:$4 sm:$0xff]   ;;  %v14846_v4 = vld [vmem:[#allocation2 + $0x82c] ss:$16 sps:$4 sm:$0xff]  }
 0x3aa   :  { %10870 = vmatprep.mubr.bf16.mxu1 %v15950_v42  ;;  %v10507_v26 = vpop.f32.mrf.mxu0  ;;  %v14829_v41 = vld [vmem:[#allocation2 + $0xa88] ss:$16 sps:$4 sm:$0xff]   ;;  %v14834_v42 = vld [vmem:[#allocation2 + $0x86c] ss:$16 sps:$4 sm:$0xff]  }
 0x3ab   :  { %v10548_v30 = vpop.f32.mrf.mxu1  ;;  %v16287_v25 = vadd.f32 %v10546_v57, %v10506_v7  ;;  %10800 = vmatpush1.bf16.msra.mxu0 %v14814_v52  ;;  %v14841_v49 = vld [vmem:[#allocation2 + $0xa48] ss:$16 sps:$4 sm:$0xff]   ;;  %v14849_v2 = vld [vmem:[#allocation2 + $0xa2c] ss:$16 sps:$4 sm:$0xff]  }
 0x3ac   :  { %10841 = vmatpush1.bf16.msra.mxu1 %v14817_v60  ;;  %v10508_v53 = vpop.f32.mrf.mxu0  ;;  %10801 = vmatprep.subr.bf16.mxu0 %v14822_v38  ;;  %v14844_v14 = vld [vmem:[#allocation2 + $0x828] ss:$16 sps:$4 sm:$0xff]   ;;  %v14852_v60 = vld [vmem:[#allocation2 + $0x80c] ss:$16 sps:$4 sm:$0xff]  }
 0x3ad   :  { %v10549_v35 = vpop.f32.mrf.mxu1  ;;  %10842 = vmatprep.subr.bf16.mxu1 %v14825_v13  ;;  %v14847_v52 = vld [vmem:[#allocation2 + $0xa28] ss:$16 sps:$4 sm:$0xff]   ;;  %v14855_v0 = vld [vmem:[#allocation2 + $0xa0c] ss:$16 sps:$4 sm:$0xff]  }
 0x3ae   :  { %v14850_v57 = vld [vmem:[#allocation2 + $0x808] ss:$16 sps:$4 sm:$0xff]   ;;  %v14858_v13 = vld [vmem:[#allocation2 + $0x9ec] ss:$16 sps:$4 sm:$0xff]  }
 0x3af   :  { %10802 = vmatpush1.bf16.msra.mxu0 %v14820_v29  ;;  %v14853_v38 = vld [vmem:[#allocation2 + $0xa08] ss:$16 sps:$4 sm:$0xff]   ;;  %v14861_v7 = vld [vmem:[#allocation2 + $0xbec] ss:$16 sps:$4 sm:$0xff]  }
 0x3b0   :  { %10843 = vmatpush1.bf16.msra.mxu1 %v14823_v51  ;;  %10803 = vmatprep.subr.bf16.mxu0 %v14828_v16  ;;  %v14856_v26 = vld [vmem:[#allocation2 + $0x9e8] ss:$16 sps:$4 sm:$0xff]   ;;  %v14864_v29 = vld [vmem:[#allocation2 + $0x9cc] ss:$16 sps:$4 sm:$0xff]  }
 0x3b1   :  { %10844 = vmatprep.subr.bf16.mxu1 %v14831_v9  ;;  %v14859_v30 = vld [vmem:[#allocation2 + $0xbe8] ss:$16 sps:$4 sm:$0xff]   ;;  %v14867_v51 = vld [vmem:[#allocation2 + $0xbcc] ss:$16 sps:$4 sm:$0xff]  }
 0x3b2   :  { %v14862_v53 = vld [vmem:[#allocation2 + $0x9c8] ss:$16 sps:$4 sm:$0xff]   ;;  %v14870_v16 = vld [vmem:[#allocation2 + $0x9ac] ss:$16 sps:$4 sm:$0xff]  }
 0x3b3   :  { %10804 = vmatpush1.bf16.msra.mxu0 %v14826_v1  ;;  %v14865_v35 = vld [vmem:[#allocation2 + $0xbc8] ss:$16 sps:$4 sm:$0xff]   ;;  %v14873_v9 = vld [vmem:[#allocation2 + $0xbac] ss:$16 sps:$4 sm:$0xff]  }
 0x3b4   :  { %10845 = vmatpush1.bf16.msra.mxu1 %v14829_v41  ;;  %10805 = vmatprep.subr.bf16.mxu0 %v14834_v42  ;;  %v14868_v1 = vld [vmem:[#allocation2 + $0x9a8] ss:$16 sps:$4 sm:$0xff]   ;;  %v14876_v42 = vld [vmem:[#allocation2 + $0x98c] ss:$16 sps:$4 sm:$0xff]  }
 0x3b5   :  { %10846 = vmatprep.subr.bf16.mxu1 %v14837_v17  ;;  %v14871_v41 = vld [vmem:[#allocation2 + $0xba8] ss:$16 sps:$4 sm:$0xff]   ;;  %v14879_v17 = vld [vmem:[#allocation2 + $0xb8c] ss:$16 sps:$4 sm:$0xff]  }
 0x3b7   :  { %10806 = vmatpush1.bf16.msra.mxu0 %v14832_v23  ;;  %v14874_v23 = vld [vmem:[#allocation2 + $0x988] ss:$16 sps:$4 sm:$0xff]  }
 0x3b8   :  { %10847 = vmatpush1.bf16.msra.mxu1 %v14835_v11  ;;  %10807 = vmatprep.subr.bf16.mxu0 %v14840_v5  ;;  %v14877_v11 = vld [vmem:[#allocation2 + $0xb88] ss:$16 sps:$4 sm:$0xff]   ;;  %v14882_v5 = vld [vmem:[#allocation2 + $0x96c] ss:$16 sps:$4 sm:$0xff]  }
 0x3b9   :  { %10848 = vmatprep.subr.bf16.mxu1 %v14843_v10  ;;  %v14885_v10 = vld [vmem:[#allocation2 + $0xb6c] ss:$16 sps:$4 sm:$0xff]  }
 0x3bb   :  { %10808 = vmatpush1.bf16.msra.mxu0 %v14838_v3  ;;  %v14880_v3 = vld [vmem:[#allocation2 + $0x968] ss:$16 sps:$4 sm:$0xff]  }
 0x3bc   :  { %10849 = vmatpush1.bf16.msra.mxu1 %v14841_v49  ;;  %10809 = vmatprep.subr.bf16.mxu0 %v14846_v4  ;;  %v14883_v49 = vld [vmem:[#allocation2 + $0xb68] ss:$16 sps:$4 sm:$0xff]   ;;  %v14888_v4 = vld [vmem:[#allocation2 + $0x94c] ss:$16 sps:$4 sm:$0xff]  }
 0x3bd   :  { %10850 = vmatprep.subr.bf16.mxu1 %v14849_v2  ;;  %v14891_v2 = vld [vmem:[#allocation2 + $0xb4c] ss:$16 sps:$4 sm:$0xff]  }
 0x3bf   :  { %10810 = vmatpush1.bf16.msra.mxu0 %v14844_v14  ;;  %v14886_v14 = vld [vmem:[#allocation2 + $0x948] ss:$16 sps:$4 sm:$0xff]  }
 0x3c0   :  { %10851 = vmatpush1.bf16.msra.mxu1 %v14847_v52  ;;  %10811 = vmatprep.subr.bf16.mxu0 %v14852_v60  ;;  %v14889_v52 = vld [vmem:[#allocation2 + $0xb48] ss:$16 sps:$4 sm:$0xff]   ;;  %v14894_v60 = vld [vmem:[#allocation2 + $0x92c] ss:$16 sps:$4 sm:$0xff]  }
 0x3c1   :  { %10852 = vmatprep.subr.bf16.mxu1 %v14855_v0  ;;  %v14897_v0 = vld [vmem:[#allocation2 + $0xb2c] ss:$16 sps:$4 sm:$0xff]  }
 0x3c3   :  { %10812 = vmatpush1.bf16.msra.mxu0 %v14850_v57  ;;  %v14892_v57 = vld [vmem:[#allocation2 + $0x928] ss:$16 sps:$4 sm:$0xff]  }
 0x3c4   :  { %10853 = vmatpush1.bf16.msra.mxu1 %v14853_v38  ;;  %10813 = vmatprep.subr.bf16.mxu0 %v14858_v13  ;;  %v14895_v38 = vld [vmem:[#allocation2 + $0xb28] ss:$16 sps:$4 sm:$0xff]   ;;  %v14900_v13 = vld [vmem:[#allocation2 + $0x90c] ss:$16 sps:$4 sm:$0xff]  }
 0x3c5   :  { %10854 = vmatprep.subr.bf16.mxu1 %v14861_v7  ;;  %v14903_v7 = vld [vmem:[#allocation2 + $0xb0c] ss:$16 sps:$4 sm:$0xff]  }
 0x3c7   :  { %10814 = vmatpush2.bf16.msra.mxu0 %v14856_v26  ;;  %v14898_v26 = vld [vmem:[#allocation2 + $0x908] ss:$16 sps:$4 sm:$0xff]  }
 0x3c8   :  { %10855 = vmatpush2.bf16.msra.mxu1 %v14859_v30  ;;  %10815 = vmatprep.subr.bf16.mxu0 %v14864_v29  ;;  %v14901_v30 = vld [vmem:[#allocation2 + $0xb08] ss:$16 sps:$4 sm:$0xff]   ;;  %v14906_v29 = vld [vmem:[#allocation2 + $0xcec] ss:$16 sps:$4 sm:$0xff]  }
 0x3c9   :  { %10856 = vmatprep.subr.bf16.mxu1 %v14867_v51  ;;  %v14909_v51 = vld [vmem:[#allocation2 + $0xeec] ss:$16 sps:$4 sm:$0xff]  }
 0x3cb   :  { %10816 = vmatpush2.bf16.msra.mxu0 %v14862_v53  ;;  %v14904_v53 = vld [vmem:[#allocation2 + $0xce8] ss:$16 sps:$4 sm:$0xff]  }
 0x3cc   :  { %10857 = vmatpush2.bf16.msra.mxu1 %v14865_v35  ;;  %10817 = vmatprep.subr.bf16.mxu0 %v14870_v16  ;;  %v14907_v35 = vld [vmem:[#allocation2 + $0xee8] ss:$16 sps:$4 sm:$0xff]   ;;  %v14912_v16 = vld [vmem:[#allocation2 + $0xccc] ss:$16 sps:$4 sm:$0xff]  }
 0x3cd   :  { %10858 = vmatprep.subr.bf16.mxu1 %v14873_v9  ;;  %v14915_v9 = vld [vmem:[#allocation2 + $0xecc] ss:$16 sps:$4 sm:$0xff]  }
 0x3cf   :  { %10818 = vmatpush2.bf16.msra.mxu0 %v14868_v1 }
 0x3d0   :  { %10859 = vmatpush2.bf16.msra.mxu1 %v14871_v41  ;;  %10819 = vmatprep.subr.bf16.mxu0 %v14876_v42 }
 0x3d1   :  { %10860 = vmatprep.subr.bf16.mxu1 %v14879_v17  ;;  %v14910_v17 = vld [vmem:[#allocation2 + $0xcc8] ss:$16 sps:$4 sm:$0xff]  }
 0x3d3   :  { %10820 = vmatpush2.bf16.msra.mxu0 %v14874_v23  ;;  %v14913_v23 = vld [vmem:[#allocation2 + $0xec8] ss:$16 sps:$4 sm:$0xff]  }
 0x3d4   :  { %10861 = vmatpush2.bf16.msra.mxu1 %v14877_v11  ;;  %10821 = vmatprep.subr.bf16.mxu0 %v14882_v5 }
 0x3d5   :  { %10862 = vmatprep.subr.bf16.mxu1 %v14885_v10  ;;  %v14918_v10 = vld [vmem:[#allocation2 + $0xcac] ss:$16 sps:$4 sm:$0xff]  }
 0x3d7   :  { %10822 = vmatpush2.bf16.msra.mxu0 %v14880_v3  ;;  %v14921_v3 = vld [vmem:[#allocation2 + $0xeac] ss:$16 sps:$4 sm:$0xff]  }
 0x3d8   :  { %10863 = vmatpush2.bf16.msra.mxu1 %v14883_v49  ;;  %10823 = vmatprep.subr.bf16.mxu0 %v14888_v4 }
 0x3d9   :  { %10864 = vmatprep.subr.bf16.mxu1 %v14891_v2  ;;  %v14916_v2 = vld [vmem:[#allocation2 + $0xca8] ss:$16 sps:$4 sm:$0xff]  }
 0x3db   :  { %10824 = vmatpush2.bf16.msra.mxu0 %v14886_v14  ;;  %v14919_v14 = vld [vmem:[#allocation2 + $0xea8] ss:$16 sps:$4 sm:$0xff]  }
 0x3dc   :  { %10865 = vmatpush2.bf16.msra.mxu1 %v14889_v52  ;;  %10825 = vmatprep.subr.bf16.mxu0 %v14894_v60 }
 0x3dd   :  { %10866 = vmatprep.subr.bf16.mxu1 %v14897_v0  ;;  %v14924_v0 = vld [vmem:[#allocation2 + $0xc8c] ss:$16 sps:$4 sm:$0xff]  }
 0x3df   :  { %10826 = vmatpush2.bf16.msra.mxu0 %v14892_v57  ;;  %v14927_v57 = vld [vmem:[#allocation2 + $0xe8c] ss:$16 sps:$4 sm:$0xff]  }
 0x3e0   :  { %10867 = vmatpush2.bf16.msra.mxu1 %v14895_v38  ;;  %10827 = vmatprep.subr.bf16.mxu0 %v14900_v13  ;;  %v14933_v38 = vld [vmem:[#allocation2 + $0xe6c] ss:$16 sps:$4 sm:$0xff]   ;;  %v14928_v13 = vld [vmem:[#allocation2 + $0xc68] ss:$16 sps:$4 sm:$0xff]  }
 0x3e1   :  { %10868 = vmatprep.subr.bf16.mxu1 %v14903_v7  ;;  %v14931_v7 = vld [vmem:[#allocation2 + $0xe68] ss:$16 sps:$4 sm:$0xff]  }
 0x3e3   :  { %10828 = vmatpush2.bf16.msra.mxu0 %v14898_v26  ;;  %v14936_v26 = vld [vmem:[#allocation2 + $0xc4c] ss:$16 sps:$4 sm:$0xff]  }
 0x3e4   :  { %10869 = vmatpush2.bf16.msra.mxu1 %v14901_v30  ;;  %10879 = vmatprep.subr.bf16.mxu0 %v14906_v29  ;;  %v14939_v30 = vld [vmem:[#allocation2 + $0xe4c] ss:$16 sps:$4 sm:$0xff]   ;;  %v14934_v29 = vld [vmem:[#allocation2 + $0xc48] ss:$16 sps:$4 sm:$0xff]  }
 0x3e5   :  { %10920 = vmatprep.subr.bf16.mxu1 %v14909_v51  ;;  %v14937_v51 = vld [vmem:[#allocation2 + $0xe48] ss:$16 sps:$4 sm:$0xff]  }
 0x3e6   :  { %v10585_v1 = vpop.f32.mrf.mxu0  ;;  %10830 = vmatmul.mubr.bf16.vlgmr.msra.gmra.mxu0 %v15962_v50 }
 0x3e7   :  { %v10626_v41 = vpop.f32.mrf.mxu1  ;;  %10871 = vmatmul.mubr.bf16.vlgmr.msra.gmra.mxu1 %v15969_v55  ;;  %v10586_v42 = vadd.f32 %v10585_v1, %v16282_v18  ;;  %10880 = vmatpush1.bf16.msra.mxu0 %v14904_v53  ;;  %v14942_v53 = vld [vmem:[#allocation2 + $0xc2c] ss:$16 sps:$4 sm:$0xff]  }
 0x3e8   :  { %10921 = vmatpush1.bf16.msra.mxu1 %v14907_v35  ;;  %v10587_v11 = vpop.f32.mrf.mxu0  ;;  %10881 = vmatprep.subr.bf16.mxu0 %v14912_v16  ;;  %v14945_v35 = vld [vmem:[#allocation2 + $0xe2c] ss:$16 sps:$4 sm:$0xff]   ;;  %v14940_v16 = vld [vmem:[#allocation2 + $0xc28] ss:$16 sps:$4 sm:$0xff]  }
 0x3e9   :  { %v10628_v5 = vpop.f32.mrf.mxu1  ;;  %10922 = vmatprep.subr.bf16.mxu1 %v14915_v9  ;;  %v16292_v49 = vadd.f32 %v10626_v41, %v10586_v42  ;;  %v10588_v4 = vadd.f32 %v10587_v11, %v16287_v25  ;;  %10911 = vmatprep.mubr.bf16.mxu0 %v15965_v54  ;;  %v14922_v25 = vld [vmem:[#allocation2 + $0xc88] ss:$16 sps:$4 sm:$0xff]   ;;  %v14948_v1 = vld [vmem:[#allocation2 + $0xc0c] ss:$16 sps:$4 sm:$0xff]  }
 0x3ea   :  { %10952 = vmatprep.mubr.bf16.mxu1 %v15973_v59  ;;  %v10589_v50 = vpop.f32.mrf.mxu0  ;;  %v14925_v54 = vld [vmem:[#allocation2 + $0xe88] ss:$16 sps:$4 sm:$0xff]   ;;  %v14930_v59 = vld [vmem:[#allocation2 + $0xc6c] ss:$16 sps:$4 sm:$0xff]  }
 0x3eb   :  { %v10630_v55 = vpop.f32.mrf.mxu1  ;;  %v16297_v18 = vadd.f32 %v10628_v5, %v10588_v4  ;;  %10882 = vmatpush1.bf16.msra.mxu0 %v14910_v17  ;;  %v14943_v9 = vld [vmem:[#allocation2 + $0xe28] ss:$16 sps:$4 sm:$0xff]   ;;  %v14951_v41 = vld [vmem:[#allocation2 + $0xe0c] ss:$16 sps:$4 sm:$0xff]  }
 0x3ec   :  { %10923 = vmatpush1.bf16.msra.mxu1 %v14913_v23  ;;  %v10590_v52 = vpop.f32.mrf.mxu0  ;;  %10883 = vmatprep.subr.bf16.mxu0 %v14918_v10  ;;  %v14946_v42 = vld [vmem:[#allocation2 + $0xc08] ss:$16 sps:$4 sm:$0xff]   ;;  %v14954_v23 = vld [vmem:[#allocation2 + $0xdec] ss:$16 sps:$4 sm:$0xff]  }
 0x3ed   :  { %v10631_v60 = vpop.f32.mrf.mxu1  ;;  %10924 = vmatprep.subr.bf16.mxu1 %v14921_v3  ;;  %v14949_v17 = vld [vmem:[#allocation2 + $0xe08] ss:$16 sps:$4 sm:$0xff]   ;;  %v14957_v11 = vld [vmem:[#allocation2 + $0xfec] ss:$16 sps:$4 sm:$0xff]  }
 0x3ee   :  { %v14952_v5 = vld [vmem:[#allocation2 + $0xde8] ss:$16 sps:$4 sm:$0xff]   ;;  %v14960_v3 = vld [vmem:[#allocation2 + $0xdcc] ss:$16 sps:$4 sm:$0xff]  }
 0x3ef   :  { %10884 = vmatpush1.bf16.msra.mxu0 %v14916_v2  ;;  %v14955_v10 = vld [vmem:[#allocation2 + $0xfe8] ss:$16 sps:$4 sm:$0xff]   ;;  %v14963_v4 = vld [vmem:[#allocation2 + $0xfcc] ss:$16 sps:$4 sm:$0xff]  }
 0x3f0   :  { %10925 = vmatpush1.bf16.msra.mxu1 %v14919_v14  ;;  %10885 = vmatprep.subr.bf16.mxu0 %v14924_v0  ;;  %v14958_v50 = vld [vmem:[#allocation2 + $0xdc8] ss:$16 sps:$4 sm:$0xff]   ;;  %v14966_v2 = vld [vmem:[#allocation2 + $0xdac] ss:$16 sps:$4 sm:$0xff]  }
 0x3f1   :  { %10926 = vmatprep.subr.bf16.mxu1 %v14927_v57  ;;  %v14961_v55 = vld [vmem:[#allocation2 + $0xfc8] ss:$16 sps:$4 sm:$0xff]   ;;  %v14969_v14 = vld [vmem:[#allocation2 + $0xfac] ss:$16 sps:$4 sm:$0xff]  }
 0x3f2   :  { %v14964_v52 = vld [vmem:[#allocation2 + $0xda8] ss:$16 sps:$4 sm:$0xff]   ;;  %v14972_v0 = vld [vmem:[#allocation2 + $0xd8c] ss:$16 sps:$4 sm:$0xff]  }
 0x3f3   :  { %10886 = vmatpush1.bf16.msra.mxu0 %v14922_v25  ;;  %v14967_v60 = vld [vmem:[#allocation2 + $0xfa8] ss:$16 sps:$4 sm:$0xff]   ;;  %v14975_v57 = vld [vmem:[#allocation2 + $0xf8c] ss:$16 sps:$4 sm:$0xff]  }
 0x3f4   :  { %10927 = vmatpush1.bf16.msra.mxu1 %v14925_v54  ;;  %10887 = vmatprep.subr.bf16.mxu0 %v14930_v59  ;;  %v14970_v25 = vld [vmem:[#allocation2 + $0xd88] ss:$16 sps:$4 sm:$0xff]   ;;  %v14978_v59 = vld [vmem:[#allocation2 + $0xd6c] ss:$16 sps:$4 sm:$0xff]  }
 0x3f5   :  { %10928 = vmatprep.subr.bf16.mxu1 %v14933_v38  ;;  %v14973_v54 = vld [vmem:[#allocation2 + $0xf88] ss:$16 sps:$4 sm:$0xff]   ;;  %v14981_v38 = vld [vmem:[#allocation2 + $0xf6c] ss:$16 sps:$4 sm:$0xff]  }
 0x3f7   :  { %10888 = vmatpush1.bf16.msra.mxu0 %v14928_v13  ;;  %v14976_v13 = vld [vmem:[#allocation2 + $0xd68] ss:$16 sps:$4 sm:$0xff]  }
 0x3f8   :  { %10929 = vmatpush1.bf16.msra.mxu1 %v14931_v7  ;;  %10889 = vmatprep.subr.bf16.mxu0 %v14936_v26  ;;  %v14979_v7 = vld [vmem:[#allocation2 + $0xf68] ss:$16 sps:$4 sm:$0xff]   ;;  %v14984_v26 = vld [vmem:[#allocation2 + $0xd4c] ss:$16 sps:$4 sm:$0xff]  }
 0x3f9   :  { %10930 = vmatprep.subr.bf16.mxu1 %v14939_v30  ;;  %v14987_v30 = vld [vmem:[#allocation2 + $0xf4c] ss:$16 sps:$4 sm:$0xff]  }
 0x3fb   :  { %10890 = vmatpush1.bf16.msra.mxu0 %v14934_v29  ;;  %v14982_v29 = vld [vmem:[#allocation2 + $0xd48] ss:$16 sps:$4 sm:$0xff]  }
 0x3fc   :  { %10931 = vmatpush1.bf16.msra.mxu1 %v14937_v51  ;;  %10891 = vmatprep.subr.bf16.mxu0 %v14942_v53  ;;  %v14985_v51 = vld [vmem:[#allocation2 + $0xf48] ss:$16 sps:$4 sm:$0xff]   ;;  %v14990_v53 = vld [vmem:[#allocation2 + $0xd2c] ss:$16 sps:$4 sm:$0xff]  }
 0x3fd   :  { %10932 = vmatprep.subr.bf16.mxu1 %v14945_v35  ;;  %v14993_v35 = vld [vmem:[#allocation2 + $0xf2c] ss:$16 sps:$4 sm:$0xff]  }
 0x3ff   :  { %10892 = vmatpush1.bf16.msra.mxu0 %v14940_v16  ;;  %v14988_v16 = vld [vmem:[#allocation2 + $0xd28] ss:$16 sps:$4 sm:$0xff]  }
 0x400   :  { %10933 = vmatpush1.bf16.msra.mxu1 %v14943_v9  ;;  %10893 = vmatprep.subr.bf16.mxu0 %v14948_v1  ;;  %v14991_v9 = vld [vmem:[#allocation2 + $0xf28] ss:$16 sps:$4 sm:$0xff]   ;;  %v14996_v1 = vld [vmem:[#allocation2 + $0xd0c] ss:$16 sps:$4 sm:$0xff]  }
 0x401   :  { %10934 = vmatprep.subr.bf16.mxu1 %v14951_v41  ;;  %v14999_v41 = vld [vmem:[#allocation2 + $0xf0c] ss:$16 sps:$4 sm:$0xff]  }
 0x403   :  { %10894 = vmatpush1.bf16.msra.mxu0 %v14946_v42  ;;  %v14994_v42 = vld [vmem:[#allocation2 + $0xd08] ss:$16 sps:$4 sm:$0xff]  }
 0x404   :  { %10935 = vmatpush1.bf16.msra.mxu1 %v14949_v17  ;;  %10895 = vmatprep.subr.bf16.mxu0 %v14954_v23  ;;  %v14997_v17 = vld [vmem:[#allocation2 + $0xf08] ss:$16 sps:$4 sm:$0xff]   ;;  %v9639_v23 = vsub.s32 2, %v15882_v43 }
 0x405   :  { %10936 = vmatprep.subr.bf16.mxu1 %v14957_v11  ;;  %v15002_v11 = vld [vmem:[#allocation2 + $0x10ec] ss:$16 sps:$4 sm:$0xff]  }
 0x407   :  { %10896 = vmatpush2.bf16.msra.mxu0 %v14952_v5  ;;  %v15005_v5 = vld [vmem:[#allocation2 + $0x12ec] ss:$16 sps:$4 sm:$0xff]  }
 0x408   :  { %10937 = vmatpush2.bf16.msra.mxu1 %v14955_v10  ;;  %10897 = vmatprep.subr.bf16.mxu0 %v14960_v3  ;;  %v9643_v10 = vsub.s32 3, %v15882_v43  ;;  %v15772_v3 = vld [vmem:[#allocation4] sm:$0xf]  ;;  %v15006_v43 = vld [vmem:[#allocation2 + $0x10c8] ss:$16 sps:$4 sm:$0xff]  }
 0x409   :  { %10938 = vmatprep.subr.bf16.mxu1 %v14963_v4  ;;  %v9640_v4 = vrot.slane %v15772_v3, %v9639_v23  ;;  %v15032_v23 = vld [vmem:[#allocation2 + $0x104c] ss:$16 sps:$4 sm:$0xff]  }
 0x40b   :  { %10898 = vmatpush2.bf16.msra.mxu0 %v14958_v50  ;;  %v15000_v50 = vld [vmem:[#allocation2 + $0x10e8] ss:$16 sps:$4 sm:$0xff]  }
 0x40c   :  { %10939 = vmatpush2.bf16.msra.mxu1 %v14961_v55  ;;  %10899 = vmatprep.subr.bf16.mxu0 %v14966_v2  ;;  %v15003_v55 = vld [vmem:[#allocation2 + $0x12e8] ss:$16 sps:$4 sm:$0xff]   ;;  %v15008_v2 = vld [vmem:[#allocation2 + $0x10cc] ss:$16 sps:$4 sm:$0xff]  }
 0x40d   :  { %10940 = vmatprep.subr.bf16.mxu1 %v14969_v14  ;;  %v15011_v14 = vld [vmem:[#allocation2 + $0x12cc] ss:$16 sps:$4 sm:$0xff]  }
 0x40f   :  { %10900 = vmatpush2.bf16.msra.mxu0 %v14964_v52  ;;  %v9644_v52 = vrot.slane %v15772_v3, %v9643_v10  ;;  %v15033_v10 = vld [vmem:[#allocation2 + $0x1248] ss:$16 sps:$4 sm:$0xff]   ;;  %v15038_v3 = vld [vmem:[#allocation2 + $0x102c] ss:$16 sps:$4 sm:$0xff]  }
 0x410   :  { %10941 = vmatpush2.bf16.msra.mxu1 %v14967_v60  ;;  %10901 = vmatprep.subr.bf16.mxu0 %v14972_v0 }
 0x411   :  { %10942 = vmatprep.subr.bf16.mxu1 %v14975_v57 }
 0x413   :  { %10902 = vmatpush2.bf16.msra.mxu0 %v14970_v25  ;;  %v15009_v25 = vld [vmem:[#allocation2 + $0x12c8] ss:$16 sps:$4 sm:$0xff]  }
 0x414   :  { %10943 = vmatpush2.bf16.msra.mxu1 %v14973_v54  ;;  %10903 = vmatprep.subr.bf16.mxu0 %v14978_v59 }
 0x415   :  { %10944 = vmatprep.subr.bf16.mxu1 %v14981_v38  ;;  %v15014_v38 = vld [vmem:[#allocation2 + $0x10ac] ss:$16 sps:$4 sm:$0xff]  }
 0x417   :  { %10904 = vmatpush2.bf16.msra.mxu0 %v14976_v13  ;;  %v15017_v13 = vld [vmem:[#allocation2 + $0x12ac] ss:$16 sps:$4 sm:$0xff]  }
 0x418   :  { %10945 = vmatpush2.bf16.msra.mxu1 %v14979_v7  ;;  %10905 = vmatprep.subr.bf16.mxu0 %v14984_v26 }
 0x419   :  { %10946 = vmatprep.subr.bf16.mxu1 %v14987_v30 }
 0x41b   :  { %10906 = vmatpush2.bf16.msra.mxu0 %v14982_v29  ;;  %v15012_v29 = vld [vmem:[#allocation2 + $0x10a8] ss:$16 sps:$4 sm:$0xff]  }
 0x41c   :  { %10947 = vmatpush2.bf16.msra.mxu1 %v14985_v51  ;;  %10907 = vmatprep.subr.bf16.mxu0 %v14990_v53  ;;  %v15015_v51 = vld [vmem:[#allocation2 + $0x12a8] ss:$16 sps:$4 sm:$0xff]  }
 0x41d   :  { %10948 = vmatprep.subr.bf16.mxu1 %v14993_v35 }
 0x41f   :  { %10908 = vmatpush2.bf16.msra.mxu0 %v14988_v16  ;;  %v15020_v16 = vld [vmem:[#allocation2 + $0x108c] ss:$16 sps:$4 sm:$0xff]  }
 0x420   :  { %10949 = vmatpush2.bf16.msra.mxu1 %v14991_v9  ;;  %10909 = vmatprep.subr.bf16.mxu0 %v14996_v1  ;;  %v15023_v9 = vld [vmem:[#allocation2 + $0x128c] ss:$16 sps:$4 sm:$0xff]   ;;  %v15018_v1 = vld [vmem:[#allocation2 + $0x1088] ss:$16 sps:$4 sm:$0xff]  }
 0x421   :  { %10950 = vmatprep.subr.bf16.mxu1 %v14999_v41  ;;  %v15029_v41 = vld [vmem:[#allocation2 + $0x126c] ss:$16 sps:$4 sm:$0xff]  }
 0x423   :  { %10910 = vmatpush2.bf16.msra.mxu0 %v14994_v42  ;;  %v15024_v42 = vld [vmem:[#allocation2 + $0x1068] ss:$16 sps:$4 sm:$0xff]  }
 0x424   :  { %10951 = vmatpush2.bf16.msra.mxu1 %v14997_v17  ;;  %10961 = vmatprep.subr.bf16.mxu0 %v15002_v11  ;;  %v15027_v17 = vld [vmem:[#allocation2 + $0x1268] ss:$16 sps:$4 sm:$0xff]   ;;  %v15035_v11 = vld [vmem:[#allocation2 + $0x124c] ss:$16 sps:$4 sm:$0xff]  }
 0x425   :  { %11002 = vmatprep.subr.bf16.mxu1 %v15005_v5  ;;  %v15030_v5 = vld [vmem:[#allocation2 + $0x1048] ss:$16 sps:$4 sm:$0xff]  }
 0x426   :  { %v10667_v60 = vpop.f32.mrf.mxu0  ;;  %10912 = vmatmul.mubr.bf16.vlgmr.msra.gmra.mxu0 %v15992_v15 }
 0x427   :  { %v10708_v0 = vpop.f32.mrf.mxu1  ;;  %10953 = vmatmul.mubr.bf16.vlgmr.msra.gmra.mxu1 %v16001_v24  ;;  %v10668_v57 = vadd.f32 %v10667_v60, %v9640_v4  ;;  %10962 = vmatpush1.bf16.msra.mxu0 %v15000_v50  ;;  %v15041_v4 = vld [vmem:[#allocation2 + $0x122c] ss:$16 sps:$4 sm:$0xff]   ;;  %v15036_v50 = vld [vmem:[#allocation2 + $0x1028] ss:$16 sps:$4 sm:$0xff]  }
 0x428   :  { %11003 = vmatpush1.bf16.msra.mxu1 %v15003_v55  ;;  %v10669_v54 = vpop.f32.mrf.mxu0  ;;  %10963 = vmatprep.subr.bf16.mxu0 %v15008_v2  ;;  %v15039_v55 = vld [vmem:[#allocation2 + $0x1228] ss:$16 sps:$4 sm:$0xff]   ;;  %v15044_v2 = vld [vmem:[#allocation2 + $0x100c] ss:$16 sps:$4 sm:$0xff]  }
 0x429   :  { %v10710_v59 = vpop.f32.mrf.mxu1  ;;  %11004 = vmatprep.subr.bf16.mxu1 %v15011_v14  ;;  %v16303_v7 = vadd.f32 %v10708_v0, %v10668_v57  ;;  %v10670_v26 = vadd.f32 %v10669_v54, %v9644_v52  ;;  %10993 = vmatprep.mubr.bf16.mxu0 %v15997_v22  ;;  %v15021_v22 = vld [vmem:[#allocation2 + $0x1288] ss:$16 sps:$4 sm:$0xff]   ;;  %v15047_v14 = vld [vmem:[#allocation2 + $0x120c] ss:$16 sps:$4 sm:$0xff]  }
 0x42a   :  { %11034 = vmatprep.mubr.bf16.mxu1 %v16005_v32  ;;  %v10671_v15 = vpop.f32.mrf.mxu0  ;;  %v15026_v32 = vld [vmem:[#allocation2 + $0x106c] ss:$16 sps:$4 sm:$0xff]   ;;  %v15042_v52 = vld [vmem:[#allocation2 + $0x1008] ss:$16 sps:$4 sm:$0xff]  }
 0x42b   :  { %v10712_v24 = vpop.f32.mrf.mxu1  ;;  %v16307_v30 = vadd.f32 %v10710_v59, %v10670_v26  ;;  %10964 = vmatpush1.bf16.msra.mxu0 %v15006_v43  ;;  %v15045_v60 = vld [vmem:[#allocation2 + $0x1208] ss:$16 sps:$4 sm:$0xff]   ;;  %v15050_v0 = vld [vmem:[#allocation2 + $0x11ec] ss:$16 sps:$4 sm:$0xff]  }
 0x42c   :  { %11005 = vmatpush1.bf16.msra.mxu1 %v15009_v25  ;;  %v10672_v53 = vpop.f32.mrf.mxu0  ;;  %10965 = vmatprep.subr.bf16.mxu0 %v15014_v38  ;;  %v15053_v57 = vld [vmem:[#allocation2 + $0x13ec] ss:$16 sps:$4 sm:$0xff]   ;;  %v15048_v43 = vld [vmem:[#allocation2 + $0x11e8] ss:$16 sps:$4 sm:$0xff]  }
 0x42d   :  { %v10713_v35 = vpop.f32.mrf.mxu1  ;;  %11006 = vmatprep.subr.bf16.mxu1 %v15017_v13  ;;  %v15051_v25 = vld [vmem:[#allocation2 + $0x13e8] ss:$16 sps:$4 sm:$0xff]   ;;  %v15056_v54 = vld [vmem:[#allocation2 + $0x11cc] ss:$16 sps:$4 sm:$0xff]  }
 0x42e   :  { %v15059_v59 = vld [vmem:[#allocation2 + $0x13cc] ss:$16 sps:$4 sm:$0xff]   ;;  %v15054_v38 = vld [vmem:[#allocation2 + $0x11c8] ss:$16 sps:$4 sm:$0xff]  }
 0x42f   :  { %10966 = vmatpush1.bf16.msra.mxu0 %v15012_v29  ;;  %v15057_v13 = vld [vmem:[#allocation2 + $0x13c8] ss:$16 sps:$4 sm:$0xff]   ;;  %v15062_v26 = vld [vmem:[#allocation2 + $0x11ac] ss:$16 sps:$4 sm:$0xff]  }
 0x430   :  { %11007 = vmatpush1.bf16.msra.mxu1 %v15015_v51  ;;  %10967 = vmatprep.subr.bf16.mxu0 %v15020_v16  ;;  %v15065_v15 = vld [vmem:[#allocation2 + $0x13ac] ss:$16 sps:$4 sm:$0xff]   ;;  %v15060_v24 = vld [vmem:[#allocation2 + $0x11a8] ss:$16 sps:$4 sm:$0xff]  }
 0x431   :  { %11008 = vmatprep.subr.bf16.mxu1 %v15023_v9  ;;  %v15063_v29 = vld [vmem:[#allocation2 + $0x13a8] ss:$16 sps:$4 sm:$0xff]   ;;  %v15068_v51 = vld [vmem:[#allocation2 + $0x118c] ss:$16 sps:$4 sm:$0xff]  }
 0x432   :  { %v15071_v53 = vld [vmem:[#allocation2 + $0x138c] ss:$16 sps:$4 sm:$0xff]   ;;  %v15066_v35 = vld [vmem:[#allocation2 + $0x1188] ss:$16 sps:$4 sm:$0xff]  }
 0x433   :  { %10968 = vmatpush1.bf16.msra.mxu0 %v15018_v1  ;;  %v15069_v16 = vld [vmem:[#allocation2 + $0x1388] ss:$16 sps:$4 sm:$0xff]   ;;  %v15074_v9 = vld [vmem:[#allocation2 + $0x116c] ss:$16 sps:$4 sm:$0xff]  }
 0x434   :  { %11009 = vmatpush1.bf16.msra.mxu1 %v15021_v22  ;;  %10969 = vmatprep.subr.bf16.mxu0 %v15026_v32  ;;  %v15077_v1 = vld [vmem:[#allocation2 + $0x136c] ss:$16 sps:$4 sm:$0xff]   ;;  %v15072_v22 = vld [vmem:[#allocation2 + $0x1168] ss:$16 sps:$4 sm:$0xff]  }
 0x435   :  { %11010 = vmatprep.subr.bf16.mxu1 %v15029_v41  ;;  %v15075_v32 = vld [vmem:[#allocation2 + $0x1368] ss:$16 sps:$4 sm:$0xff]   ;;  %v15080_v41 = vld [vmem:[#allocation2 + $0x114c] ss:$16 sps:$4 sm:$0xff]  }
 0x437   :  { %10970 = vmatpush1.bf16.msra.mxu0 %v15024_v42  ;;  %v15083_v42 = vld [vmem:[#allocation2 + $0x134c] ss:$16 sps:$4 sm:$0xff]  }
 0x438   :  { %11011 = vmatpush1.bf16.msra.mxu1 %v15027_v17  ;;  %10971 = vmatprep.subr.bf16.mxu0 %v15032_v23  ;;  %v15078_v17 = vld [vmem:[#allocation2 + $0x1148] ss:$16 sps:$4 sm:$0xff]  }
 0x439   :  { %11012 = vmatprep.subr.bf16.mxu1 %v15035_v11  ;;  %v15081_v23 = vld [vmem:[#allocation2 + $0x1348] ss:$16 sps:$4 sm:$0xff]   ;;  %v15086_v11 = vld [vmem:[#allocation2 + $0x112c] ss:$16 sps:$4 sm:$0xff]  }
 0x43b   :  { %10972 = vmatpush1.bf16.msra.mxu0 %v15030_v5  ;;  %v15089_v5 = vld [vmem:[#allocation2 + $0x132c] ss:$16 sps:$4 sm:$0xff]  }
 0x43c   :  { %11013 = vmatpush1.bf16.msra.mxu1 %v15033_v10  ;;  %10973 = vmatprep.subr.bf16.mxu0 %v15038_v3  ;;  %v15084_v10 = vld [vmem:[#allocation2 + $0x1128] ss:$16 sps:$4 sm:$0xff]  }
 0x43d   :  { %11014 = vmatprep.subr.bf16.mxu1 %v15041_v4  ;;  %v15087_v3 = vld [vmem:[#allocation2 + $0x1328] ss:$16 sps:$4 sm:$0xff]   ;;  %v15092_v4 = vld [vmem:[#allocation2 + $0x110c] ss:$16 sps:$4 sm:$0xff]  }
 0x43f   :  { %10974 = vmatpush1.bf16.msra.mxu0 %v15036_v50  ;;  %v15095_v50 = vld [vmem:[#allocation2 + $0x130c] ss:$16 sps:$4 sm:$0xff]  }
 0x440   :  { %11015 = vmatpush1.bf16.msra.mxu1 %v15039_v55  ;;  %10975 = vmatprep.subr.bf16.mxu0 %v15044_v2  ;;  %v15090_v55 = vld [vmem:[#allocation2 + $0x1108] ss:$16 sps:$4 sm:$0xff]  }
 0x441   :  { %11016 = vmatprep.subr.bf16.mxu1 %v15047_v14  ;;  %v15093_v2 = vld [vmem:[#allocation2 + $0x1308] ss:$16 sps:$4 sm:$0xff]   ;;  %v15098_v14 = vld [vmem:[#allocation2 + $0x14ec] ss:$16 sps:$4 sm:$0xff]  }
 0x443   :  { %10976 = vmatpush1.bf16.msra.mxu0 %v15042_v52  ;;  %v15101_v52 = vld [vmem:[#allocation2 + $0x16ec] ss:$16 sps:$4 sm:$0xff]  }
 0x444   :  { %11017 = vmatpush1.bf16.msra.mxu1 %v15045_v60  ;;  %10977 = vmatprep.subr.bf16.mxu0 %v15050_v0  ;;  %v15096_v60 = vld [vmem:[#allocation2 + $0x14e8] ss:$16 sps:$4 sm:$0xff]  }
 0x445   :  { %11018 = vmatprep.subr.bf16.mxu1 %v15053_v57  ;;  %v15099_v0 = vld [vmem:[#allocation2 + $0x16e8] ss:$16 sps:$4 sm:$0xff]   ;;  %v15104_v57 = vld [vmem:[#allocation2 + $0x14cc] ss:$16 sps:$4 sm:$0xff]  }
 0x447   :  { %10978 = vmatpush2.bf16.msra.mxu0 %v15048_v43  ;;  %v15107_v43 = vld [vmem:[#allocation2 + $0x16cc] ss:$16 sps:$4 sm:$0xff]  }
 0x448   :  { %11019 = vmatpush2.bf16.msra.mxu1 %v15051_v25  ;;  %10979 = vmatprep.subr.bf16.mxu0 %v15056_v54 }
 0x449   :  { %11020 = vmatprep.subr.bf16.mxu1 %v15059_v59 }
 0x44b   :  { %10980 = vmatpush2.bf16.msra.mxu0 %v15054_v38  ;;  %v15102_v38 = vld [vmem:[#allocation2 + $0x14c8] ss:$16 sps:$4 sm:$0xff]  }
 0x44c   :  { %11021 = vmatpush2.bf16.msra.mxu1 %v15057_v13  ;;  %10981 = vmatprep.subr.bf16.mxu0 %v15062_v26  ;;  %v15105_v13 = vld [vmem:[#allocation2 + $0x16c8] ss:$16 sps:$4 sm:$0xff]  }
 0x44d   :  { %11022 = vmatprep.subr.bf16.mxu1 %v15065_v15 }
 0x44f   :  { %10982 = vmatpush2.bf16.msra.mxu0 %v15060_v24  ;;  %v15110_v24 = vld [vmem:[#allocation2 + $0x14ac] ss:$16 sps:$4 sm:$0xff]  }
 0x450   :  { %11023 = vmatpush2.bf16.msra.mxu1 %v15063_v29  ;;  %10983 = vmatprep.subr.bf16.mxu0 %v15068_v51  ;;  %v15113_v29 = vld [vmem:[#allocation2 + $0x16ac] ss:$16 sps:$4 sm:$0xff]  }
 0x451   :  { %11024 = vmatprep.subr.bf16.mxu1 %v15071_v53 }
 0x453   :  { %10984 = vmatpush2.bf16.msra.mxu0 %v15066_v35  ;;  %v15108_v35 = vld [vmem:[#allocation2 + $0x14a8] ss:$16 sps:$4 sm:$0xff]  }
 0x454   :  { %11025 = vmatpush2.bf16.msra.mxu1 %v15069_v16  ;;  %10985 = vmatprep.subr.bf16.mxu0 %v15074_v9  ;;  %v15111_v16 = vld [vmem:[#allocation2 + $0x16a8] ss:$16 sps:$4 sm:$0xff]  }
 0x455   :  { %11026 = vmatprep.subr.bf16.mxu1 %v15077_v1 }
 0x457   :  { %10986 = vmatpush2.bf16.msra.mxu0 %v15072_v22  ;;  %v15116_v22 = vld [vmem:[#allocation2 + $0x148c] ss:$16 sps:$4 sm:$0xff]  }
 0x458   :  { %11027 = vmatpush2.bf16.msra.mxu1 %v15075_v32  ;;  %10987 = vmatprep.subr.bf16.mxu0 %v15080_v41  ;;  %v15119_v32 = vld [vmem:[#allocation2 + $0x168c] ss:$16 sps:$4 sm:$0xff]  }
 0x459   :  { %11028 = vmatprep.subr.bf16.mxu1 %v15083_v42  ;;  %v15125_v41 = vld [vmem:[#allocation2 + $0x166c] ss:$16 sps:$4 sm:$0xff]   ;;  %v15120_v42 = vld [vmem:[#allocation2 + $0x1468] ss:$16 sps:$4 sm:$0xff]  }
 0x45b   :  { %10988 = vmatpush2.bf16.msra.mxu0 %v15078_v17  ;;  %v15123_v17 = vld [vmem:[#allocation2 + $0x1668] ss:$16 sps:$4 sm:$0xff]  }
 0x45c   :  { %11029 = vmatpush2.bf16.msra.mxu1 %v15081_v23  ;;  %10989 = vmatprep.subr.bf16.mxu0 %v15086_v11  ;;  %v15128_v23 = vld [vmem:[#allocation2 + $0x144c] ss:$16 sps:$4 sm:$0xff]  }
 0x45d   :  { %11030 = vmatprep.subr.bf16.mxu1 %v15089_v5  ;;  %v15131_v11 = vld [vmem:[#allocation2 + $0x164c] ss:$16 sps:$4 sm:$0xff]   ;;  %v15126_v5 = vld [vmem:[#allocation2 + $0x1448] ss:$16 sps:$4 sm:$0xff]  }
 0x45f   :  { %10990 = vmatpush2.bf16.msra.mxu0 %v15084_v10  ;;  %v15129_v10 = vld [vmem:[#allocation2 + $0x1648] ss:$16 sps:$4 sm:$0xff]  }
 0x460   :  { %11031 = vmatpush2.bf16.msra.mxu1 %v15087_v3  ;;  %10991 = vmatprep.subr.bf16.mxu0 %v15092_v4  ;;  %v15134_v3 = vld [vmem:[#allocation2 + $0x142c] ss:$16 sps:$4 sm:$0xff]  }
 0x461   :  { %11032 = vmatprep.subr.bf16.mxu1 %v15095_v50  ;;  %v15137_v4 = vld [vmem:[#allocation2 + $0x162c] ss:$16 sps:$4 sm:$0xff]   ;;  %v15132_v50 = vld [vmem:[#allocation2 + $0x1428] ss:$16 sps:$4 sm:$0xff]  }
 0x463   :  { %10992 = vmatpush2.bf16.msra.mxu0 %v15090_v55  ;;  %v15135_v55 = vld [vmem:[#allocation2 + $0x1628] ss:$16 sps:$4 sm:$0xff]  }
 0x464   :  { %11033 = vmatpush2.bf16.msra.mxu1 %v15093_v2  ;;  %11043 = vmatprep.subr.bf16.mxu0 %v15098_v14  ;;  %v15140_v2 = vld [vmem:[#allocation2 + $0x140c] ss:$16 sps:$4 sm:$0xff]  }
 0x465   :  { %11084 = vmatprep.subr.bf16.mxu1 %v15101_v52  ;;  %v15143_v14 = vld [vmem:[#allocation2 + $0x160c] ss:$16 sps:$4 sm:$0xff]   ;;  %v15138_v52 = vld [vmem:[#allocation2 + $0x1408] ss:$16 sps:$4 sm:$0xff]  }
 0x466   :  { %v10749_v25 = vpop.f32.mrf.mxu0  ;;  %10994 = vmatmul.mubr.bf16.vlgmr.msra.gmra.mxu0 %v16024_v12 }
 0x467   :  { %v10790_v54 = vpop.f32.mrf.mxu1  ;;  %11035 = vmatmul.mubr.bf16.vlgmr.msra.gmra.mxu1 %v16031_v27  ;;  %v10750_v59 = vadd.f32 %v10749_v25, %v16303_v7  ;;  %11044 = vmatpush1.bf16.msra.mxu0 %v15096_v60  ;;  %v15141_v60 = vld [vmem:[#allocation2 + $0x1608] ss:$16 sps:$4 sm:$0xff]  }
 0x468   :  { %11085 = vmatpush1.bf16.msra.mxu1 %v15099_v0  ;;  %v10751_v26 = vpop.f32.mrf.mxu0  ;;  %11045 = vmatprep.subr.bf16.mxu0 %v15104_v57  ;;  %v15146_v0 = vld [vmem:[#allocation2 + $0x15ec] ss:$16 sps:$4 sm:$0xff]   ;;  %v15147_v25 = vld [vmem:[#allocation2 + $0x17e8] ss:$16 sps:$4 sm:$0xff]  }
 0x469   :  { %v10792_v15 = vpop.f32.mrf.mxu1  ;;  %11086 = vmatprep.subr.bf16.mxu1 %v15107_v43  ;;  %v16312_v51 = vadd.f32 %v10790_v54, %v10750_v59  ;;  %v10752_v53 = vadd.f32 %v10751_v26, %v16307_v30  ;;  %11075 = vmatprep.mubr.bf16.mxu0 %v16027_v40  ;;  %v15114_v30 = vld [vmem:[#allocation2 + $0x1488] ss:$16 sps:$4 sm:$0xff]   ;;  %v15149_v57 = vld [vmem:[#allocation2 + $0x17ec] ss:$16 sps:$4 sm:$0xff]  }
 0x46a   :  { %11116 = vmatprep.mubr.bf16.mxu1 %v16035_v33  ;;  %v10753_v12 = vpop.f32.mrf.mxu0  ;;  %v15117_v40 = vld [vmem:[#allocation2 + $0x1688] ss:$16 sps:$4 sm:$0xff]   ;;  %v15122_v33 = vld [vmem:[#allocation2 + $0x146c] ss:$16 sps:$4 sm:$0xff]  }
 0x46b   :  { %v10794_v27 = vpop.f32.mrf.mxu1  ;;  %v16317_v7 = vadd.f32 %v10792_v15, %v10752_v53  ;;  %11046 = vmatpush1.bf16.msra.mxu0 %v15102_v38  ;;  %v15144_v43 = vld [vmem:[#allocation2 + $0x15e8] ss:$16 sps:$4 sm:$0xff]   ;;  %v15152_v54 = vld [vmem:[#allocation2 + $0x15cc] ss:$16 sps:$4 sm:$0xff]  }
 0x46c   :  { %11087 = vmatpush1.bf16.msra.mxu1 %v15105_v13  ;;  %v10754_v9 = vpop.f32.mrf.mxu0  ;;  %11047 = vmatprep.subr.bf16.mxu0 %v15110_v24  ;;  %v15155_v59 = vld [vmem:[#allocation2 + $0x17cc] ss:$16 sps:$4 sm:$0xff]   ;;  %v15150_v38 = vld [vmem:[#allocation2 + $0x15c8] ss:$16 sps:$4 sm:$0xff]  }
 0x46d   :  { %v10795_v1 = vpop.f32.mrf.mxu1  ;;  %11088 = vmatprep.subr.bf16.mxu1 %v15113_v29  ;;  %v15153_v13 = vld [vmem:[#allocation2 + $0x17c8] ss:$16 sps:$4 sm:$0xff]   ;;  %v15158_v26 = vld [vmem:[#allocation2 + $0x15ac] ss:$16 sps:$4 sm:$0xff]  }
 0x46e   :  { %v15161_v15 = vld [vmem:[#allocation2 + $0x17ac] ss:$16 sps:$4 sm:$0xff]   ;;  %v15156_v24 = vld [vmem:[#allocation2 + $0x15a8] ss:$16 sps:$4 sm:$0xff]  }
 0x46f   :  { %11048 = vmatpush1.bf16.msra.mxu0 %v15108_v35  ;;  %v15159_v29 = vld [vmem:[#allocation2 + $0x17a8] ss:$16 sps:$4 sm:$0xff]   ;;  %v15164_v53 = vld [vmem:[#allocation2 + $0x158c] ss:$16 sps:$4 sm:$0xff]  }
 0x470   :  { %11089 = vmatpush1.bf16.msra.mxu1 %v15111_v16  ;;  %11049 = vmatprep.subr.bf16.mxu0 %v15116_v22  ;;  %v15167_v12 = vld [vmem:[#allocation2 + $0x178c] ss:$16 sps:$4 sm:$0xff]   ;;  %v15162_v27 = vld [vmem:[#allocation2 + $0x1588] ss:$16 sps:$4 sm:$0xff]  }
 0x471   :  { %11090 = vmatprep.subr.bf16.mxu1 %v15119_v32  ;;  %v15165_v35 = vld [vmem:[#allocation2 + $0x1788] ss:$16 sps:$4 sm:$0xff]   ;;  %v15170_v16 = vld [vmem:[#allocation2 + $0x156c] ss:$16 sps:$4 sm:$0xff]  }
 0x472   :  { %v15173_v9 = vld [vmem:[#allocation2 + $0x176c] ss:$16 sps:$4 sm:$0xff]   ;;  %v15168_v1 = vld [vmem:[#allocation2 + $0x1568] ss:$16 sps:$4 sm:$0xff]  }
 0x473   :  { %11050 = vmatpush1.bf16.msra.mxu0 %v15114_v30  ;;  %v15171_v22 = vld [vmem:[#allocation2 + $0x1768] ss:$16 sps:$4 sm:$0xff]   ;;  %v15176_v32 = vld [vmem:[#allocation2 + $0x154c] ss:$16 sps:$4 sm:$0xff]  }
 0x474   :  { %11091 = vmatpush1.bf16.msra.mxu1 %v15117_v40  ;;  %11051 = vmatprep.subr.bf16.mxu0 %v15122_v33  ;;  %v15179_v30 = vld [vmem:[#allocation2 + $0x174c] ss:$16 sps:$4 sm:$0xff]   ;;  %v15174_v40 = vld [vmem:[#allocation2 + $0x1548] ss:$16 sps:$4 sm:$0xff]  }
 0x475   :  { %11092 = vmatprep.subr.bf16.mxu1 %v15125_v41  ;;  %v15177_v33 = vld [vmem:[#allocation2 + $0x1748] ss:$16 sps:$4 sm:$0xff]   ;;  %v15182_v41 = vld [vmem:[#allocation2 + $0x152c] ss:$16 sps:$4 sm:$0xff]  }
 0x477   :  { %11052 = vmatpush1.bf16.msra.mxu0 %v15120_v42  ;;  %v15185_v42 = vld [vmem:[#allocation2 + $0x172c] ss:$16 sps:$4 sm:$0xff]  }
 0x478   :  { %11093 = vmatpush1.bf16.msra.mxu1 %v15123_v17  ;;  %11053 = vmatprep.subr.bf16.mxu0 %v15128_v23  ;;  %v15180_v17 = vld [vmem:[#allocation2 + $0x1528] ss:$16 sps:$4 sm:$0xff]  }
 0x479   :  { %11094 = vmatprep.subr.bf16.mxu1 %v15131_v11  ;;  %v15183_v23 = vld [vmem:[#allocation2 + $0x1728] ss:$16 sps:$4 sm:$0xff]   ;;  %v15188_v11 = vld [vmem:[#allocation2 + $0x150c] ss:$16 sps:$4 sm:$0xff]  }
 0x47b   :  { %11054 = vmatpush1.bf16.msra.mxu0 %v15126_v5  ;;  %v15191_v5 = vld [vmem:[#allocation2 + $0x170c] ss:$16 sps:$4 sm:$0xff]  }
 0x47c   :  { %11095 = vmatpush1.bf16.msra.mxu1 %v15129_v10  ;;  %11055 = vmatprep.subr.bf16.mxu0 %v15134_v3  ;;  %v15186_v10 = vld [vmem:[#allocation2 + $0x1508] ss:$16 sps:$4 sm:$0xff]  }
 0x47d   :  { %11096 = vmatprep.subr.bf16.mxu1 %v15137_v4  ;;  %v15189_v3 = vld [vmem:[#allocation2 + $0x1708] ss:$16 sps:$4 sm:$0xff]   ;;  %v15194_v4 = vld [vmem:[#allocation2 + $0x18ec] ss:$16 sps:$4 sm:$0xff]  }
 0x47f   :  { %11056 = vmatpush1.bf16.msra.mxu0 %v15132_v50  ;;  %v15197_v50 = vld [vmem:[#allocation2 + $0x1aec] ss:$16 sps:$4 sm:$0xff]  }
 0x480   :  { %11097 = vmatpush1.bf16.msra.mxu1 %v15135_v55  ;;  %11057 = vmatprep.subr.bf16.mxu0 %v15140_v2  ;;  %v15192_v55 = vld [vmem:[#allocation2 + $0x18e8] ss:$16 sps:$4 sm:$0xff]  }
 0x481   :  { %11098 = vmatprep.subr.bf16.mxu1 %v15143_v14  ;;  %v15195_v2 = vld [vmem:[#allocation2 + $0x1ae8] ss:$16 sps:$4 sm:$0xff]   ;;  %v15200_v14 = vld [vmem:[#allocation2 + $0x18cc] ss:$16 sps:$4 sm:$0xff]  }
 0x483   :  { %11058 = vmatpush1.bf16.msra.mxu0 %v15138_v52  ;;  %v15203_v52 = vld [vmem:[#allocation2 + $0x1acc] ss:$16 sps:$4 sm:$0xff]  }
 0x484   :  { %11099 = vmatpush1.bf16.msra.mxu1 %v15141_v60  ;;  %11059 = vmatprep.subr.bf16.mxu0 %v15146_v0 }
 0x485   :  { %11100 = vmatprep.subr.bf16.mxu1 %v15149_v57 }
 0x487   :  { %11060 = vmatpush2.bf16.msra.mxu0 %v15144_v43  ;;  %v15198_v43 = vld [vmem:[#allocation2 + $0x18c8] ss:$16 sps:$4 sm:$0xff]  }
 0x488   :  { %11101 = vmatpush2.bf16.msra.mxu1 %v15147_v25  ;;  %11061 = vmatprep.subr.bf16.mxu0 %v15152_v54  ;;  %v15201_v25 = vld [vmem:[#allocation2 + $0x1ac8] ss:$16 sps:$4 sm:$0xff]  }
 0x489   :  { %11102 = vmatprep.subr.bf16.mxu1 %v15155_v59 }
 0x48b   :  { %11062 = vmatpush2.bf16.msra.mxu0 %v15150_v38  ;;  %v15206_v38 = vld [vmem:[#allocation2 + $0x18ac] ss:$16 sps:$4 sm:$0xff]  }
 0x48c   :  { %11103 = vmatpush2.bf16.msra.mxu1 %v15153_v13  ;;  %11063 = vmatprep.subr.bf16.mxu0 %v15158_v26  ;;  %v15209_v13 = vld [vmem:[#allocation2 + $0x1aac] ss:$16 sps:$4 sm:$0xff]  }
 0x48d   :  { %11104 = vmatprep.subr.bf16.mxu1 %v15161_v15 }
 0x48f   :  { %11064 = vmatpush2.bf16.msra.mxu0 %v15156_v24  ;;  %v15204_v24 = vld [vmem:[#allocation2 + $0x18a8] ss:$16 sps:$4 sm:$0xff]  }
 0x490   :  { %11105 = vmatpush2.bf16.msra.mxu1 %v15159_v29  ;;  %11065 = vmatprep.subr.bf16.mxu0 %v15164_v53  ;;  %v15207_v29 = vld [vmem:[#allocation2 + $0x1aa8] ss:$16 sps:$4 sm:$0xff]  }
 0x491   :  { %11106 = vmatprep.subr.bf16.mxu1 %v15167_v12 }
 0x493   :  { %11066 = vmatpush2.bf16.msra.mxu0 %v15162_v27  ;;  %v15212_v27 = vld [vmem:[#allocation2 + $0x188c] ss:$16 sps:$4 sm:$0xff]  }
 0x494   :  { %11107 = vmatpush2.bf16.msra.mxu1 %v15165_v35  ;;  %11067 = vmatprep.subr.bf16.mxu0 %v15170_v16  ;;  %v15215_v35 = vld [vmem:[#allocation2 + $0x1a8c] ss:$16 sps:$4 sm:$0xff]  }
 0x495   :  { %11108 = vmatprep.subr.bf16.mxu1 %v15173_v9  ;;  %v15221_v16 = vld [vmem:[#allocation2 + $0x1a6c] ss:$16 sps:$4 sm:$0xff]   ;;  %v15216_v9 = vld [vmem:[#allocation2 + $0x1868] ss:$16 sps:$4 sm:$0xff]  }
 0x497   :  { %11068 = vmatpush2.bf16.msra.mxu0 %v15168_v1  ;;  %v15219_v1 = vld [vmem:[#allocation2 + $0x1a68] ss:$16 sps:$4 sm:$0xff]  }
 0x498   :  { %11109 = vmatpush2.bf16.msra.mxu1 %v15171_v22  ;;  %11069 = vmatprep.subr.bf16.mxu0 %v15176_v32  ;;  %v15224_v22 = vld [vmem:[#allocation2 + $0x184c] ss:$16 sps:$4 sm:$0xff]  }
 0x499   :  { %11110 = vmatprep.subr.bf16.mxu1 %v15179_v30  ;;  %v15227_v32 = vld [vmem:[#allocation2 + $0x1a4c] ss:$16 sps:$4 sm:$0xff]   ;;  %v15222_v30 = vld [vmem:[#allocation2 + $0x1848] ss:$16 sps:$4 sm:$0xff]  }
 0x49b   :  { %11070 = vmatpush2.bf16.msra.mxu0 %v15174_v40  ;;  %v15225_v40 = vld [vmem:[#allocation2 + $0x1a48] ss:$16 sps:$4 sm:$0xff]  }
 0x49c   :  { %11111 = vmatpush2.bf16.msra.mxu1 %v15177_v33  ;;  %11071 = vmatprep.subr.bf16.mxu0 %v15182_v41  ;;  %v15230_v33 = vld [vmem:[#allocation2 + $0x182c] ss:$16 sps:$4 sm:$0xff]  }
 0x49d   :  { %11112 = vmatprep.subr.bf16.mxu1 %v15185_v42  ;;  %v15233_v41 = vld [vmem:[#allocation2 + $0x1a2c] ss:$16 sps:$4 sm:$0xff]   ;;  %v15228_v42 = vld [vmem:[#allocation2 + $0x1828] ss:$16 sps:$4 sm:$0xff]  }
 0x49f   :  { %11072 = vmatpush2.bf16.msra.mxu0 %v15180_v17  ;;  %v15231_v17 = vld [vmem:[#allocation2 + $0x1a28] ss:$16 sps:$4 sm:$0xff]  }
 0x4a0   :  { %11113 = vmatpush2.bf16.msra.mxu1 %v15183_v23  ;;  %11073 = vmatprep.subr.bf16.mxu0 %v15188_v11  ;;  %v15236_v23 = vld [vmem:[#allocation2 + $0x180c] ss:$16 sps:$4 sm:$0xff]  }
 0x4a1   :  { %11114 = vmatprep.subr.bf16.mxu1 %v15191_v5  ;;  %v15239_v11 = vld [vmem:[#allocation2 + $0x1a0c] ss:$16 sps:$4 sm:$0xff]   ;;  %v15234_v5 = vld [vmem:[#allocation2 + $0x1808] ss:$16 sps:$4 sm:$0xff]  }
 0x4a3   :  { %11074 = vmatpush2.bf16.msra.mxu0 %v15186_v10  ;;  %v15237_v10 = vld [vmem:[#allocation2 + $0x1a08] ss:$16 sps:$4 sm:$0xff]  }
 0x4a4   :  { %11115 = vmatpush2.bf16.msra.mxu1 %v15189_v3  ;;  %11125 = vmatprep.subr.bf16.mxu0 %v15194_v4  ;;  %v15242_v3 = vld [vmem:[#allocation2 + $0x19ec] ss:$16 sps:$4 sm:$0xff]  }
 0x4a5   :  { %11166 = vmatprep.subr.bf16.mxu1 %v15197_v50  ;;  %v15245_v4 = vld [vmem:[#allocation2 + $0x1bec] ss:$16 sps:$4 sm:$0xff]   ;;  %v15240_v50 = vld [vmem:[#allocation2 + $0x19e8] ss:$16 sps:$4 sm:$0xff]  }
 0x4a6   :  { %v10831_v60 = vpop.f32.mrf.mxu0  ;;  %11076 = vmatmul.mubr.bf16.vlgmr.msra.gmra.mxu0 %v16060_v20 }
 0x4a7   :  { %v10872_v0 = vpop.f32.mrf.mxu1  ;;  %11117 = vmatmul.mubr.bf16.vlgmr.msra.gmra.mxu1 %v16067_v36  ;;  %v10832_v57 = vadd.f32 %v10831_v60, %v16312_v51  ;;  %11126 = vmatpush1.bf16.msra.mxu0 %v15192_v55  ;;  %v15243_v55 = vld [vmem:[#allocation2 + $0x1be8] ss:$16 sps:$4 sm:$0xff]  }
 0x4a8   :  { %11167 = vmatpush1.bf16.msra.mxu1 %v15195_v2  ;;  %v10833_v54 = vpop.f32.mrf.mxu0  ;;  %11127 = vmatprep.subr.bf16.mxu0 %v15200_v14  ;;  %v15248_v2 = vld [vmem:[#allocation2 + $0x19cc] ss:$16 sps:$4 sm:$0xff]   ;;  %v15249_v60 = vld [vmem:[#allocation2 + $0x1bc8] ss:$16 sps:$4 sm:$0xff]  }
 0x4a9   :  { %v10874_v59 = vpop.f32.mrf.mxu1  ;;  %11168 = vmatprep.subr.bf16.mxu1 %v15203_v52  ;;  %v16322_v26 = vadd.f32 %v10872_v0, %v10832_v57  ;;  %v10834_v15 = vadd.f32 %v10833_v54, %v16317_v7  ;;  %11157 = vmatprep.mubr.bf16.mxu0 %v16063_v34  ;;  %v15210_v7 = vld [vmem:[#allocation2 + $0x1888] ss:$16 sps:$4 sm:$0xff]   ;;  %v15251_v14 = vld [vmem:[#allocation2 + $0x1bcc] ss:$16 sps:$4 sm:$0xff]  }
 0x4aa   :  { %11198 = vmatprep.mubr.bf16.mxu1 %v16071_v44  ;;  %v10835_v20 = vpop.f32.mrf.mxu0  ;;  %v15213_v34 = vld [vmem:[#allocation2 + $0x1a88] ss:$16 sps:$4 sm:$0xff]   ;;  %v15218_v44 = vld [vmem:[#allocation2 + $0x186c] ss:$16 sps:$4 sm:$0xff]  }
 0x4ab   :  { %v10876_v36 = vpop.f32.mrf.mxu1  ;;  %v16327_v51 = vadd.f32 %v10874_v59, %v10834_v15  ;;  %11128 = vmatpush1.bf16.msra.mxu0 %v15198_v43  ;;  %v15246_v52 = vld [vmem:[#allocation2 + $0x19c8] ss:$16 sps:$4 sm:$0xff]   ;;  %v15254_v0 = vld [vmem:[#allocation2 + $0x19ac] ss:$16 sps:$4 sm:$0xff]  }
 0x4ac   :  { %11169 = vmatpush1.bf16.msra.mxu1 %v15201_v25  ;;  %v10836_v53 = vpop.f32.mrf.mxu0  ;;  %11129 = vmatprep.subr.bf16.mxu0 %v15206_v38  ;;  %v15257_v57 = vld [vmem:[#allocation2 + $0x1bac] ss:$16 sps:$4 sm:$0xff]   ;;  %v15252_v43 = vld [vmem:[#allocation2 + $0x19a8] ss:$16 sps:$4 sm:$0xff]  }
 0x4ad   :  { %v10877_v12 = vpop.f32.mrf.mxu1  ;;  %11170 = vmatprep.subr.bf16.mxu1 %v15209_v13  ;;  %v15255_v25 = vld [vmem:[#allocation2 + $0x1ba8] ss:$16 sps:$4 sm:$0xff]   ;;  %v15260_v54 = vld [vmem:[#allocation2 + $0x198c] ss:$16 sps:$4 sm:$0xff]  }
 0x4ae   :  { %v15263_v59 = vld [vmem:[#allocation2 + $0x1b8c] ss:$16 sps:$4 sm:$0xff]   ;;  %v15258_v38 = vld [vmem:[#allocation2 + $0x1988] ss:$16 sps:$4 sm:$0xff]  }
 0x4af   :  { %11130 = vmatpush1.bf16.msra.mxu0 %v15204_v24  ;;  %v15261_v13 = vld [vmem:[#allocation2 + $0x1b88] ss:$16 sps:$4 sm:$0xff]   ;;  %v15266_v15 = vld [vmem:[#allocation2 + $0x196c] ss:$16 sps:$4 sm:$0xff]  }
 0x4b0   :  { %11171 = vmatpush1.bf16.msra.mxu1 %v15207_v29  ;;  %11131 = vmatprep.subr.bf16.mxu0 %v15212_v27  ;;  %v15269_v20 = vld [vmem:[#allocation2 + $0x1b6c] ss:$16 sps:$4 sm:$0xff]   ;;  %v15264_v36 = vld [vmem:[#allocation2 + $0x1968] ss:$16 sps:$4 sm:$0xff]  }
 0x4b1   :  { %11172 = vmatprep.subr.bf16.mxu1 %v15215_v35  ;;  %v15267_v24 = vld [vmem:[#allocation2 + $0x1b68] ss:$16 sps:$4 sm:$0xff]   ;;  %v15272_v29 = vld [vmem:[#allocation2 + $0x194c] ss:$16 sps:$4 sm:$0xff]  }
 0x4b2   :  { %v15275_v53 = vld [vmem:[#allocation2 + $0x1b4c] ss:$16 sps:$4 sm:$0xff]   ;;  %v15270_v12 = vld [vmem:[#allocation2 + $0x1948] ss:$16 sps:$4 sm:$0xff]  }
 0x4b3   :  { %11132 = vmatpush1.bf16.msra.mxu0 %v15210_v7  ;;  %v15273_v27 = vld [vmem:[#allocation2 + $0x1b48] ss:$16 sps:$4 sm:$0xff]   ;;  %v15278_v35 = vld [vmem:[#allocation2 + $0x192c] ss:$16 sps:$4 sm:$0xff]  }
 0x4b4   :  { %11173 = vmatpush1.bf16.msra.mxu1 %v15213_v34  ;;  %11133 = vmatprep.subr.bf16.mxu0 %v15218_v44  ;;  %v15281_v7 = vld [vmem:[#allocation2 + $0x1b2c] ss:$16 sps:$4 sm:$0xff]   ;;  %v15276_v34 = vld [vmem:[#allocation2 + $0x1928] ss:$16 sps:$4 sm:$0xff]  }
 0x4b5   :  { %11174 = vmatprep.subr.bf16.mxu1 %v15221_v16  ;;  %v15279_v44 = vld [vmem:[#allocation2 + $0x1b28] ss:$16 sps:$4 sm:$0xff]   ;;  %v15284_v16 = vld [vmem:[#allocation2 + $0x190c] ss:$16 sps:$4 sm:$0xff]  }
 0x4b7   :  { %11134 = vmatpush1.bf16.msra.mxu0 %v15216_v9  ;;  %v15287_v9 = vld [vmem:[#allocation2 + $0x1b0c] ss:$16 sps:$4 sm:$0xff]  }
 0x4b8   :  { %11175 = vmatpush1.bf16.msra.mxu1 %v15219_v1  ;;  %11135 = vmatprep.subr.bf16.mxu0 %v15224_v22  ;;  %v15282_v1 = vld [vmem:[#allocation2 + $0x1908] ss:$16 sps:$4 sm:$0xff]  }
 0x4b9   :  { %11176 = vmatprep.subr.bf16.mxu1 %v15227_v32  ;;  %v15285_v22 = vld [vmem:[#allocation2 + $0x1b08] ss:$16 sps:$4 sm:$0xff]   ;;  %v15290_v32 = vld [vmem:[#allocation2 + $0x1cec] ss:$16 sps:$4 sm:$0xff]  }
 0x4bb   :  { %11136 = vmatpush1.bf16.msra.mxu0 %v15222_v30  ;;  %v15293_v30 = vld [vmem:[#allocation2 + $0x1eec] ss:$16 sps:$4 sm:$0xff]  }
 0x4bc   :  { %11177 = vmatpush1.bf16.msra.mxu1 %v15225_v40  ;;  %11137 = vmatprep.subr.bf16.mxu0 %v15230_v33  ;;  %v15288_v40 = vld [vmem:[#allocation2 + $0x1ce8] ss:$16 sps:$4 sm:$0xff]  }
 0x4bd   :  { %11178 = vmatprep.subr.bf16.mxu1 %v15233_v41  ;;  %v15291_v33 = vld [vmem:[#allocation2 + $0x1ee8] ss:$16 sps:$4 sm:$0xff]   ;;  %v15296_v41 = vld [vmem:[#allocation2 + $0x1ccc] ss:$16 sps:$4 sm:$0xff]  }
 0x4bf   :  { %11138 = vmatpush1.bf16.msra.mxu0 %v15228_v42  ;;  %v15299_v42 = vld [vmem:[#allocation2 + $0x1ecc] ss:$16 sps:$4 sm:$0xff]  }
 0x4c0   :  { %11179 = vmatpush1.bf16.msra.mxu1 %v15231_v17  ;;  %11139 = vmatprep.subr.bf16.mxu0 %v15236_v23 }
 0x4c1   :  { %11180 = vmatprep.subr.bf16.mxu1 %v15239_v11 }
 0x4c3   :  { %11140 = vmatpush1.bf16.msra.mxu0 %v15234_v5  ;;  %v15294_v5 = vld [vmem:[#allocation2 + $0x1cc8] ss:$16 sps:$4 sm:$0xff]  }
 0x4c4   :  { %11181 = vmatpush1.bf16.msra.mxu1 %v15237_v10  ;;  %11141 = vmatprep.subr.bf16.mxu0 %v15242_v3  ;;  %v15297_v10 = vld [vmem:[#allocation2 + $0x1ec8] ss:$16 sps:$4 sm:$0xff]  }
 0x4c5   :  { %11182 = vmatprep.subr.bf16.mxu1 %v15245_v4 }
 0x4c7   :  { %11142 = vmatpush2.bf16.msra.mxu0 %v15240_v50  ;;  %v15302_v50 = vld [vmem:[#allocation2 + $0x1cac] ss:$16 sps:$4 sm:$0xff]  }
 0x4c8   :  { %11183 = vmatpush2.bf16.msra.mxu1 %v15243_v55  ;;  %11143 = vmatprep.subr.bf16.mxu0 %v15248_v2  ;;  %v15305_v55 = vld [vmem:[#allocation2 + $0x1eac] ss:$16 sps:$4 sm:$0xff]  }
 0x4c9   :  { %11184 = vmatprep.subr.bf16.mxu1 %v15251_v14 }
 0x4cb   :  { %11144 = vmatpush2.bf16.msra.mxu0 %v15246_v52  ;;  %v15300_v52 = vld [vmem:[#allocation2 + $0x1ca8] ss:$16 sps:$4 sm:$0xff]  }
 0x4cc   :  { %11185 = vmatpush2.bf16.msra.mxu1 %v15249_v60  ;;  %11145 = vmatprep.subr.bf16.mxu0 %v15254_v0  ;;  %v15303_v60 = vld [vmem:[#allocation2 + $0x1ea8] ss:$16 sps:$4 sm:$0xff]  }
 0x4cd   :  { %11186 = vmatprep.subr.bf16.mxu1 %v15257_v57 }
 0x4cf   :  { %11146 = vmatpush2.bf16.msra.mxu0 %v15252_v43  ;;  %v15308_v43 = vld [vmem:[#allocation2 + $0x1c8c] ss:$16 sps:$4 sm:$0xff]  }
 0x4d0   :  { %11187 = vmatpush2.bf16.msra.mxu1 %v15255_v25  ;;  %11147 = vmatprep.subr.bf16.mxu0 %v15260_v54  ;;  %v15311_v25 = vld [vmem:[#allocation2 + $0x1e8c] ss:$16 sps:$4 sm:$0xff]  }
 0x4d1   :  { %11188 = vmatprep.subr.bf16.mxu1 %v15263_v59  ;;  %v15317_v54 = vld [vmem:[#allocation2 + $0x1e6c] ss:$16 sps:$4 sm:$0xff]   ;;  %v15312_v59 = vld [vmem:[#allocation2 + $0x1c68] ss:$16 sps:$4 sm:$0xff]  }
 0x4d3   :  { %11148 = vmatpush2.bf16.msra.mxu0 %v15258_v38  ;;  %v15315_v38 = vld [vmem:[#allocation2 + $0x1e68] ss:$16 sps:$4 sm:$0xff]  }
 0x4d4   :  { %11189 = vmatpush2.bf16.msra.mxu1 %v15261_v13  ;;  %11149 = vmatprep.subr.bf16.mxu0 %v15266_v15  ;;  %v15320_v13 = vld [vmem:[#allocation2 + $0x1c4c] ss:$16 sps:$4 sm:$0xff]  }
 0x4d5   :  { %11190 = vmatprep.subr.bf16.mxu1 %v15269_v20  ;;  %v15323_v15 = vld [vmem:[#allocation2 + $0x1e4c] ss:$16 sps:$4 sm:$0xff]   ;;  %v15318_v20 = vld [vmem:[#allocation2 + $0x1c48] ss:$16 sps:$4 sm:$0xff]  }
 0x4d7   :  { %11150 = vmatpush2.bf16.msra.mxu0 %v15264_v36  ;;  %v15321_v36 = vld [vmem:[#allocation2 + $0x1e48] ss:$16 sps:$4 sm:$0xff]  }
 0x4d8   :  { %11191 = vmatpush2.bf16.msra.mxu1 %v15267_v24  ;;  %11151 = vmatprep.subr.bf16.mxu0 %v15272_v29  ;;  %v15326_v24 = vld [vmem:[#allocation2 + $0x1c2c] ss:$16 sps:$4 sm:$0xff]  }
 0x4d9   :  { %11192 = vmatprep.subr.bf16.mxu1 %v15275_v53  ;;  %v15329_v29 = vld [vmem:[#allocation2 + $0x1e2c] ss:$16 sps:$4 sm:$0xff]   ;;  %v15324_v53 = vld [vmem:[#allocation2 + $0x1c28] ss:$16 sps:$4 sm:$0xff]  }
 0x4db   :  { %11152 = vmatpush2.bf16.msra.mxu0 %v15270_v12  ;;  %v15327_v12 = vld [vmem:[#allocation2 + $0x1e28] ss:$16 sps:$4 sm:$0xff]  }
 0x4dc   :  { %11193 = vmatpush2.bf16.msra.mxu1 %v15273_v27  ;;  %11153 = vmatprep.subr.bf16.mxu0 %v15278_v35  ;;  %v15332_v27 = vld [vmem:[#allocation2 + $0x1c0c] ss:$16 sps:$4 sm:$0xff]  }
 0x4dd   :  { %11194 = vmatprep.subr.bf16.mxu1 %v15281_v7  ;;  %v15335_v35 = vld [vmem:[#allocation2 + $0x1e0c] ss:$16 sps:$4 sm:$0xff]   ;;  %v15330_v7 = vld [vmem:[#allocation2 + $0x1c08] ss:$16 sps:$4 sm:$0xff]  }
 0x4df   :  { %11154 = vmatpush2.bf16.msra.mxu0 %v15276_v34  ;;  %v15333_v34 = vld [vmem:[#allocation2 + $0x1e08] ss:$16 sps:$4 sm:$0xff]  }
 0x4e0   :  { %11195 = vmatpush2.bf16.msra.mxu1 %v15279_v44  ;;  %11155 = vmatprep.subr.bf16.mxu0 %v15284_v16  ;;  %v15338_v44 = vld [vmem:[#allocation2 + $0x1dec] ss:$16 sps:$4 sm:$0xff]  }
 0x4e1   :  { %11196 = vmatprep.subr.bf16.mxu1 %v15287_v9  ;;  %v15341_v16 = vld [vmem:[#allocation2 + $0x1fec] ss:$16 sps:$4 sm:$0xff]   ;;  %v15336_v9 = vld [vmem:[#allocation2 + $0x1de8] ss:$16 sps:$4 sm:$0xff]  }
 0x4e3   :  { %11156 = vmatpush2.bf16.msra.mxu0 %v15282_v1  ;;  %v15339_v1 = vld [vmem:[#allocation2 + $0x1fe8] ss:$16 sps:$4 sm:$0xff]  }
 0x4e4   :  { %11197 = vmatpush2.bf16.msra.mxu1 %v15285_v22  ;;  %11207 = vmatprep.subr.bf16.mxu0 %v15290_v32  ;;  %v15344_v22 = vld [vmem:[#allocation2 + $0x1dcc] ss:$16 sps:$4 sm:$0xff]  }
 0x4e5   :  { %11248 = vmatprep.subr.bf16.mxu1 %v15293_v30  ;;  %v15347_v32 = vld [vmem:[#allocation2 + $0x1fcc] ss:$16 sps:$4 sm:$0xff]   ;;  %v15342_v30 = vld [vmem:[#allocation2 + $0x1dc8] ss:$16 sps:$4 sm:$0xff]  }
 0x4e6   :  { %v10913_v17 = vpop.f32.mrf.mxu0  ;;  %11158 = vmatmul.mubr.bf16.vlgmr.msra.gmra.mxu0 %v16092_v48 }
 0x4e7   :  { %v10954_v23 = vpop.f32.mrf.mxu1  ;;  %11199 = vmatmul.mubr.bf16.vlgmr.msra.gmra.mxu1 %v16099_v62  ;;  %v10914_v11 = vadd.f32 %v10913_v17, %v16322_v26  ;;  %11208 = vmatpush1.bf16.msra.mxu0 %v15288_v40  ;;  %v15345_v40 = vld [vmem:[#allocation2 + $0x1fc8] ss:$16 sps:$4 sm:$0xff]  }
 0x4e8   :  { %11249 = vmatpush1.bf16.msra.mxu1 %v15291_v33  ;;  %v10915_v3 = vpop.f32.mrf.mxu0  ;;  %11209 = vmatprep.subr.bf16.mxu0 %v15296_v41  ;;  %v15350_v33 = vld [vmem:[#allocation2 + $0x1dac] ss:$16 sps:$4 sm:$0xff]   ;;  %v15351_v17 = vld [vmem:[#allocation2 + $0x1fa8] ss:$16 sps:$4 sm:$0xff]  }
 0x4e9   :  { %v10956_v4 = vpop.f32.mrf.mxu1  ;;  %11250 = vmatprep.subr.bf16.mxu1 %v15299_v42  ;;  %v16332_v2 = vadd.f32 %v10954_v23, %v10914_v11  ;;  %v10916_v14 = vadd.f32 %v10915_v3, %v16327_v51  ;;  %11239 = vmatprep.mubr.bf16.mxu0 %v16095_v56  ;;  %v15306_v51 = vld [vmem:[#allocation2 + $0x1c88] ss:$16 sps:$4 sm:$0xff]   ;;  %v15353_v41 = vld [vmem:[#allocation2 + $0x1fac] ss:$16 sps:$4 sm:$0xff]  }
 0x4ea   :  { %11280 = vmatprep.mubr.bf16.mxu1 %v16103_v8  ;;  %v10917_v48 = vpop.f32.mrf.mxu0  ;;  %v15309_v56 = vld [vmem:[#allocation2 + $0x1e88] ss:$16 sps:$4 sm:$0xff]   ;;  %v15314_v8 = vld [vmem:[#allocation2 + $0x1c6c] ss:$16 sps:$4 sm:$0xff]  }
 0x4eb   :  { %v10958_v62 = vpop.f32.mrf.mxu1  ;;  %v16337_v26 = vadd.f32 %v10956_v4, %v10916_v14  ;;  %11210 = vmatpush1.bf16.msra.mxu0 %v15294_v5  ;;  %v15348_v42 = vld [vmem:[#allocation2 + $0x1da8] ss:$16 sps:$4 sm:$0xff]   ;;  %v15356_v23 = vld [vmem:[#allocation2 + $0x1d8c] ss:$16 sps:$4 sm:$0xff]  }
 0x4ec   :  { %11251 = vmatpush1.bf16.msra.mxu1 %v15297_v10  ;;  %v10918_v0 = vpop.f32.mrf.mxu0  ;;  %11211 = vmatprep.subr.bf16.mxu0 %v15302_v50  ;;  %v15359_v11 = vld [vmem:[#allocation2 + $0x1f8c] ss:$16 sps:$4 sm:$0xff]   ;;  %v15354_v5 = vld [vmem:[#allocation2 + $0x1d88] ss:$16 sps:$4 sm:$0xff]  }
 0x4ed   :  { %v10959_v57 = vpop.f32.mrf.mxu1  ;;  %11252 = vmatprep.subr.bf16.mxu1 %v15305_v55  ;;  %v15357_v10 = vld [vmem:[#allocation2 + $0x1f88] ss:$16 sps:$4 sm:$0xff]   ;;  %v15362_v3 = vld [vmem:[#allocation2 + $0x1d6c] ss:$16 sps:$4 sm:$0xff]  }
 0x4ee   :  { %v15365_v4 = vld [vmem:[#allocation2 + $0x1f6c] ss:$16 sps:$4 sm:$0xff]   ;;  %v15360_v50 = vld [vmem:[#allocation2 + $0x1d68] ss:$16 sps:$4 sm:$0xff]  }
 0x4ef   :  { %11212 = vmatpush1.bf16.msra.mxu0 %v15300_v52  ;;  %v15363_v55 = vld [vmem:[#allocation2 + $0x1f68] ss:$16 sps:$4 sm:$0xff]   ;;  %v15368_v14 = vld [vmem:[#allocation2 + $0x1d4c] ss:$16 sps:$4 sm:$0xff]  }
 0x4f0   :  { %11253 = vmatpush1.bf16.msra.mxu1 %v15303_v60  ;;  %11213 = vmatprep.subr.bf16.mxu0 %v15308_v43  ;;  %v15371_v48 = vld [vmem:[#allocation2 + $0x1f4c] ss:$16 sps:$4 sm:$0xff]   ;;  %v15366_v62 = vld [vmem:[#allocation2 + $0x1d48] ss:$16 sps:$4 sm:$0xff]  }
 0x4f1   :  { %11254 = vmatprep.subr.bf16.mxu1 %v15311_v25  ;;  %v15369_v52 = vld [vmem:[#allocation2 + $0x1f48] ss:$16 sps:$4 sm:$0xff]   ;;  %v15374_v60 = vld [vmem:[#allocation2 + $0x1d2c] ss:$16 sps:$4 sm:$0xff]  }
 0x4f2   :  { %v15377_v0 = vld [vmem:[#allocation2 + $0x1f2c] ss:$16 sps:$4 sm:$0xff]   ;;  %v15372_v57 = vld [vmem:[#allocation2 + $0x1d28] ss:$16 sps:$4 sm:$0xff]  }
 0x4f3   :  { %11214 = vmatpush1.bf16.msra.mxu0 %v15306_v51  ;;  %v15375_v43 = vld [vmem:[#allocation2 + $0x1f28] ss:$16 sps:$4 sm:$0xff]   ;;  %v15380_v25 = vld [vmem:[#allocation2 + $0x1d0c] ss:$16 sps:$4 sm:$0xff]  }
 0x4f4   :  { %11255 = vmatpush1.bf16.msra.mxu1 %v15309_v56  ;;  %11215 = vmatprep.subr.bf16.mxu0 %v15314_v8  ;;  %v15383_v51 = vld [vmem:[#allocation2 + $0x1f0c] ss:$16 sps:$4 sm:$0xff]   ;;  %v15378_v56 = vld [vmem:[#allocation2 + $0x1d08] ss:$16 sps:$4 sm:$0xff]  }
 0x4f5   :  { %11256 = vmatprep.subr.bf16.mxu1 %v15317_v54  ;;  %v15381_v8 = vld [vmem:[#allocation2 + $0x1f08] ss:$16 sps:$4 sm:$0xff]   ;;  %v15386_v54 = vld [vmem:[#allocation2 + $0x20ec] ss:$16 sps:$4 sm:$0xff]  }
 0x4f7   :  { %11216 = vmatpush1.bf16.msra.mxu0 %v15312_v59  ;;  %v15389_v59 = vld [vmem:[#allocation2 + $0x22ec] ss:$16 sps:$4 sm:$0xff]  }
 0x4f8   :  { %11257 = vmatpush1.bf16.msra.mxu1 %v15315_v38  ;;  %11217 = vmatprep.subr.bf16.mxu0 %v15320_v13  ;;  %v15384_v38 = vld [vmem:[#allocation2 + $0x20e8] ss:$16 sps:$4 sm:$0xff]  }
 0x4f9   :  { %11258 = vmatprep.subr.bf16.mxu1 %v15323_v15  ;;  %v15387_v13 = vld [vmem:[#allocation2 + $0x22e8] ss:$16 sps:$4 sm:$0xff]   ;;  %v15392_v15 = vld [vmem:[#allocation2 + $0x20cc] ss:$16 sps:$4 sm:$0xff]  }
 0x4fb   :  { %11218 = vmatpush1.bf16.msra.mxu0 %v15318_v20  ;;  %v15395_v20 = vld [vmem:[#allocation2 + $0x22cc] ss:$16 sps:$4 sm:$0xff]  }
 0x4fc   :  { %11259 = vmatpush1.bf16.msra.mxu1 %v15321_v36  ;;  %11219 = vmatprep.subr.bf16.mxu0 %v15326_v24 }
 0x4fd   :  { %11260 = vmatprep.subr.bf16.mxu1 %v15329_v29 }
 0x4ff   :  { %11220 = vmatpush1.bf16.msra.mxu0 %v15324_v53  ;;  %v15390_v53 = vld [vmem:[#allocation2 + $0x20c8] ss:$16 sps:$4 sm:$0xff]  }
 0x500   :  { %11261 = vmatpush1.bf16.msra.mxu1 %v15327_v12  ;;  %11221 = vmatprep.subr.bf16.mxu0 %v15332_v27  ;;  %v15393_v12 = vld [vmem:[#allocation2 + $0x22c8] ss:$16 sps:$4 sm:$0xff]  }
 0x501   :  { %11262 = vmatprep.subr.bf16.mxu1 %v15335_v35 }
 0x503   :  { %11222 = vmatpush1.bf16.msra.mxu0 %v15330_v7  ;;  %v15398_v7 = vld [vmem:[#allocation2 + $0x20ac] ss:$16 sps:$4 sm:$0xff]  }
 0x504   :  { %11263 = vmatpush1.bf16.msra.mxu1 %v15333_v34  ;;  %11223 = vmatprep.subr.bf16.mxu0 %v15338_v44  ;;  %v15401_v34 = vld [vmem:[#allocation2 + $0x22ac] ss:$16 sps:$4 sm:$0xff]  }
 0x505   :  { %11264 = vmatprep.subr.bf16.mxu1 %v15341_v16 }
 0x507   :  { %11224 = vmatpush2.bf16.msra.mxu0 %v15336_v9  ;;  %v15396_v9 = vld [vmem:[#allocation2 + $0x20a8] ss:$16 sps:$4 sm:$0xff]  }
 0x508   :  { %11265 = vmatpush2.bf16.msra.mxu1 %v15339_v1  ;;  %11225 = vmatprep.subr.bf16.mxu0 %v15344_v22  ;;  %v15399_v1 = vld [vmem:[#allocation2 + $0x22a8] ss:$16 sps:$4 sm:$0xff]  }
 0x509   :  { %11266 = vmatprep.subr.bf16.mxu1 %v15347_v32 }
 0x50b   :  { %11226 = vmatpush2.bf16.msra.mxu0 %v15342_v30  ;;  %v15404_v30 = vld [vmem:[#allocation2 + $0x208c] ss:$16 sps:$4 sm:$0xff]  }
 0x50c   :  { %11267 = vmatpush2.bf16.msra.mxu1 %v15345_v40  ;;  %11227 = vmatprep.subr.bf16.mxu0 %v15350_v33  ;;  %v15407_v40 = vld [vmem:[#allocation2 + $0x228c] ss:$16 sps:$4 sm:$0xff]  }
 0x50d   :  { %11268 = vmatprep.subr.bf16.mxu1 %v15353_v41  ;;  %v15413_v33 = vld [vmem:[#allocation2 + $0x226c] ss:$16 sps:$4 sm:$0xff]   ;;  %v15408_v41 = vld [vmem:[#allocation2 + $0x2068] ss:$16 sps:$4 sm:$0xff]  }
 0x50f   :  { %11228 = vmatpush2.bf16.msra.mxu0 %v15348_v42  ;;  %v15411_v42 = vld [vmem:[#allocation2 + $0x2268] ss:$16 sps:$4 sm:$0xff]  }
 0x510   :  { %11269 = vmatpush2.bf16.msra.mxu1 %v15351_v17  ;;  %11229 = vmatprep.subr.bf16.mxu0 %v15356_v23  ;;  %v15416_v17 = vld [vmem:[#allocation2 + $0x204c] ss:$16 sps:$4 sm:$0xff]  }
 0x511   :  { %11270 = vmatprep.subr.bf16.mxu1 %v15359_v11  ;;  %v15419_v23 = vld [vmem:[#allocation2 + $0x224c] ss:$16 sps:$4 sm:$0xff]   ;;  %v15414_v11 = vld [vmem:[#allocation2 + $0x2048] ss:$16 sps:$4 sm:$0xff]  }
 0x513   :  { %11230 = vmatpush2.bf16.msra.mxu0 %v15354_v5  ;;  %v15417_v5 = vld [vmem:[#allocation2 + $0x2248] ss:$16 sps:$4 sm:$0xff]  }
 0x514   :  { %11271 = vmatpush2.bf16.msra.mxu1 %v15357_v10  ;;  %11231 = vmatprep.subr.bf16.mxu0 %v15362_v3  ;;  %v15422_v10 = vld [vmem:[#allocation2 + $0x202c] ss:$16 sps:$4 sm:$0xff]  }
 0x515   :  { %11272 = vmatprep.subr.bf16.mxu1 %v15365_v4  ;;  %v15425_v3 = vld [vmem:[#allocation2 + $0x222c] ss:$16 sps:$4 sm:$0xff]   ;;  %v15420_v4 = vld [vmem:[#allocation2 + $0x2028] ss:$16 sps:$4 sm:$0xff]  }
 0x517   :  { %11232 = vmatpush2.bf16.msra.mxu0 %v15360_v50  ;;  %v15423_v50 = vld [vmem:[#allocation2 + $0x2228] ss:$16 sps:$4 sm:$0xff]  }
 0x518   :  { %11273 = vmatpush2.bf16.msra.mxu1 %v15363_v55  ;;  %11233 = vmatprep.subr.bf16.mxu0 %v15368_v14  ;;  %v15428_v55 = vld [vmem:[#allocation2 + $0x200c] ss:$16 sps:$4 sm:$0xff]  }
 0x519   :  { %11274 = vmatprep.subr.bf16.mxu1 %v15371_v48  ;;  %v15431_v14 = vld [vmem:[#allocation2 + $0x220c] ss:$16 sps:$4 sm:$0xff]   ;;  %v15426_v48 = vld [vmem:[#allocation2 + $0x2008] ss:$16 sps:$4 sm:$0xff]  }
 0x51b   :  { %11234 = vmatpush2.bf16.msra.mxu0 %v15366_v62  ;;  %v15429_v62 = vld [vmem:[#allocation2 + $0x2208] ss:$16 sps:$4 sm:$0xff]  }
 0x51c   :  { %11275 = vmatpush2.bf16.msra.mxu1 %v15369_v52  ;;  %11235 = vmatprep.subr.bf16.mxu0 %v15374_v60  ;;  %v15434_v52 = vld [vmem:[#allocation2 + $0x21ec] ss:$16 sps:$4 sm:$0xff]  }
 0x51d   :  { %11276 = vmatprep.subr.bf16.mxu1 %v15377_v0  ;;  %v15437_v60 = vld [vmem:[#allocation2 + $0x23ec] ss:$16 sps:$4 sm:$0xff]   ;;  %v15432_v0 = vld [vmem:[#allocation2 + $0x21e8] ss:$16 sps:$4 sm:$0xff]  }
 0x51f   :  { %11236 = vmatpush2.bf16.msra.mxu0 %v15372_v57  ;;  %v15435_v57 = vld [vmem:[#allocation2 + $0x23e8] ss:$16 sps:$4 sm:$0xff]  }
 0x520   :  { %11277 = vmatpush2.bf16.msra.mxu1 %v15375_v43  ;;  %11237 = vmatprep.subr.bf16.mxu0 %v15380_v25  ;;  %v15440_v43 = vld [vmem:[#allocation2 + $0x21cc] ss:$16 sps:$4 sm:$0xff]  }
 0x521   :  { %11278 = vmatprep.subr.bf16.mxu1 %v15383_v51  ;;  %v15443_v25 = vld [vmem:[#allocation2 + $0x23cc] ss:$16 sps:$4 sm:$0xff]   ;;  %v15438_v51 = vld [vmem:[#allocation2 + $0x21c8] ss:$16 sps:$4 sm:$0xff]  }
 0x523   :  { %11238 = vmatpush2.bf16.msra.mxu0 %v15378_v56  ;;  %v15441_v56 = vld [vmem:[#allocation2 + $0x23c8] ss:$16 sps:$4 sm:$0xff]  }
 0x524   :  { %11279 = vmatpush2.bf16.msra.mxu1 %v15381_v8  ;;  %11289 = vmatprep.subr.bf16.mxu0 %v15386_v54  ;;  %v15446_v8 = vld [vmem:[#allocation2 + $0x21ac] ss:$16 sps:$4 sm:$0xff]  }
 0x525   :  { %11330 = vmatprep.subr.bf16.mxu1 %v15389_v59  ;;  %v15449_v54 = vld [vmem:[#allocation2 + $0x23ac] ss:$16 sps:$4 sm:$0xff]   ;;  %v15444_v59 = vld [vmem:[#allocation2 + $0x21a8] ss:$16 sps:$4 sm:$0xff]  }
 0x526   :  { %v10995_v36 = vpop.f32.mrf.mxu0  ;;  %11240 = vmatmul.mubr.bf16.vlgmr.msra.gmra.mxu0 %v16128_v28 }
 0x527   :  { %v11036_v24 = vpop.f32.mrf.mxu1  ;;  %11281 = vmatmul.mubr.bf16.vlgmr.msra.gmra.mxu1 %v16135_v6  ;;  %v10996_v29 = vadd.f32 %v10995_v36, %v16332_v2  ;;  %11290 = vmatpush1.bf16.msra.mxu0 %v15384_v38  ;;  %v15447_v38 = vld [vmem:[#allocation2 + $0x23a8] ss:$16 sps:$4 sm:$0xff]  }
 0x528   :  { %11331 = vmatpush1.bf16.msra.mxu1 %v15387_v13  ;;  %v10997_v27 = vpop.f32.mrf.mxu0  ;;  %11291 = vmatprep.subr.bf16.mxu0 %v15392_v15  ;;  %v15452_v13 = vld [vmem:[#allocation2 + $0x218c] ss:$16 sps:$4 sm:$0xff]   ;;  %v15453_v36 = vld [vmem:[#allocation2 + $0x2388] ss:$16 sps:$4 sm:$0xff]  }
 0x529   :  { %v11038_v35 = vpop.f32.mrf.mxu1  ;;  %11332 = vmatprep.subr.bf16.mxu1 %v15395_v20  ;;  %v16342_v44 = vadd.f32 %v11036_v24, %v10996_v29  ;;  %v10998_v16 = vadd.f32 %v10997_v27, %v16337_v26  ;;  %11321 = vmatprep.mubr.bf16.mxu0 %v16131_v63  ;;  %v15402_v26 = vld [vmem:[#allocation2 + $0x2088] ss:$16 sps:$4 sm:$0xff]   ;;  %v15455_v15 = vld [vmem:[#allocation2 + $0x238c] ss:$16 sps:$4 sm:$0xff]  }
 0x52a   :  { %11362 = vmatprep.mubr.bf16.mxu1 %v16139_v47  ;;  %v10999_v28 = vpop.f32.mrf.mxu0  ;;  %v15405_v63 = vld [vmem:[#allocation2 + $0x2288] ss:$16 sps:$4 sm:$0xff]   ;;  %v15410_v47 = vld [vmem:[#allocation2 + $0x206c] ss:$16 sps:$4 sm:$0xff]  }
 0x52b   :  { %v11040_v6 = vpop.f32.mrf.mxu1  ;;  %v16347_v2 = vadd.f32 %v11038_v35, %v10998_v16  ;;  %11292 = vmatpush1.bf16.msra.mxu0 %v15390_v53  ;;  %v15450_v20 = vld [vmem:[#allocation2 + $0x2188] ss:$16 sps:$4 sm:$0xff]   ;;  %v15458_v24 = vld [vmem:[#allocation2 + $0x216c] ss:$16 sps:$4 sm:$0xff]  }
 0x52c   :  { %11333 = vmatpush1.bf16.msra.mxu1 %v15393_v12  ;;  %v11000_v22 = vpop.f32.mrf.mxu0  ;;  %11293 = vmatprep.subr.bf16.mxu0 %v15398_v7  ;;  %v15461_v29 = vld [vmem:[#allocation2 + $0x236c] ss:$16 sps:$4 sm:$0xff]   ;;  %v15456_v53 = vld [vmem:[#allocation2 + $0x2168] ss:$16 sps:$4 sm:$0xff]  }
 0x52d   :  { %v11041_v32 = vpop.f32.mrf.mxu1  ;;  %11334 = vmatprep.subr.bf16.mxu1 %v15401_v34  ;;  %v15459_v12 = vld [vmem:[#allocation2 + $0x2368] ss:$16 sps:$4 sm:$0xff]   ;;  %v15464_v27 = vld [vmem:[#allocation2 + $0x214c] ss:$16 sps:$4 sm:$0xff]  }
 0x52e   :  { %v15467_v35 = vld [vmem:[#allocation2 + $0x234c] ss:$16 sps:$4 sm:$0xff]   ;;  %v15462_v7 = vld [vmem:[#allocation2 + $0x2148] ss:$16 sps:$4 sm:$0xff]  }
 0x52f   :  { %11294 = vmatpush1.bf16.msra.mxu0 %v15396_v9  ;;  %v15465_v34 = vld [vmem:[#allocation2 + $0x2348] ss:$16 sps:$4 sm:$0xff]   ;;  %v15470_v16 = vld [vmem:[#allocation2 + $0x212c] ss:$16 sps:$4 sm:$0xff]  }
 0x530   :  { %11335 = vmatpush1.bf16.msra.mxu1 %v15399_v1  ;;  %11295 = vmatprep.subr.bf16.mxu0 %v15404_v30  ;;  %v15473_v28 = vld [vmem:[#allocation2 + $0x232c] ss:$16 sps:$4 sm:$0xff]   ;;  %v15468_v6 = vld [vmem:[#allocation2 + $0x2128] ss:$16 sps:$4 sm:$0xff]  }
 0x531   :  { %11336 = vmatprep.subr.bf16.mxu1 %v15407_v40  ;;  %v15471_v9 = vld [vmem:[#allocation2 + $0x2328] ss:$16 sps:$4 sm:$0xff]   ;;  %v15476_v1 = vld [vmem:[#allocation2 + $0x210c] ss:$16 sps:$4 sm:$0xff]  }
 0x532   :  { %v15479_v22 = vld [vmem:[#allocation2 + $0x230c] ss:$16 sps:$4 sm:$0xff]   ;;  %v15474_v32 = vld [vmem:[#allocation2 + $0x2108] ss:$16 sps:$4 sm:$0xff]  }
 0x533   :  { %11296 = vmatpush1.bf16.msra.mxu0 %v15402_v26  ;;  %v15477_v30 = vld [vmem:[#allocation2 + $0x2308] ss:$16 sps:$4 sm:$0xff]   ;;  %v15482_v40 = vld [vmem:[#allocation2 + $0x24ec] ss:$16 sps:$4 sm:$0xff]  }
 0x534   :  { %11337 = vmatpush1.bf16.msra.mxu1 %v15405_v63  ;;  %11297 = vmatprep.subr.bf16.mxu0 %v15410_v47  ;;  %v15485_v26 = vld [vmem:[#allocation2 + $0x26ec] ss:$16 sps:$4 sm:$0xff]   ;;  %v15480_v63 = vld [vmem:[#allocation2 + $0x24e8] ss:$16 sps:$4 sm:$0xff]  }
 0x535   :  { %11338 = vmatprep.subr.bf16.mxu1 %v15413_v33  ;;  %v15483_v47 = vld [vmem:[#allocation2 + $0x26e8] ss:$16 sps:$4 sm:$0xff]   ;;  %v15488_v33 = vld [vmem:[#allocation2 + $0x24cc] ss:$16 sps:$4 sm:$0xff]  }
 0x537   :  { %11298 = vmatpush1.bf16.msra.mxu0 %v15408_v41  ;;  %v15491_v41 = vld [vmem:[#allocation2 + $0x26cc] ss:$16 sps:$4 sm:$0xff]  }
 0x538   :  { %11339 = vmatpush1.bf16.msra.mxu1 %v15411_v42  ;;  %11299 = vmatprep.subr.bf16.mxu0 %v15416_v17 }
 0x539   :  { %11340 = vmatprep.subr.bf16.mxu1 %v15419_v23 }
 0x53b   :  { %11300 = vmatpush1.bf16.msra.mxu0 %v15414_v11  ;;  %v15486_v11 = vld [vmem:[#allocation2 + $0x24c8] ss:$16 sps:$4 sm:$0xff]  }
 0x53c   :  { %11341 = vmatpush1.bf16.msra.mxu1 %v15417_v5  ;;  %11301 = vmatprep.subr.bf16.mxu0 %v15422_v10  ;;  %v15489_v5 = vld [vmem:[#allocation2 + $0x26c8] ss:$16 sps:$4 sm:$0xff]  }
 0x53d   :  { %11342 = vmatprep.subr.bf16.mxu1 %v15425_v3 }
 0x53f   :  { %11302 = vmatpush1.bf16.msra.mxu0 %v15420_v4  ;;  %v15494_v4 = vld [vmem:[#allocation2 + $0x24ac] ss:$16 sps:$4 sm:$0xff]  }
 0x540   :  { %11343 = vmatpush1.bf16.msra.mxu1 %v15423_v50  ;;  %11303 = vmatprep.subr.bf16.mxu0 %v15428_v55  ;;  %v15497_v50 = vld [vmem:[#allocation2 + $0x26ac] ss:$16 sps:$4 sm:$0xff]  }
 0x541   :  { %11344 = vmatprep.subr.bf16.mxu1 %v15431_v14 }
 0x543   :  { %11304 = vmatpush1.bf16.msra.mxu0 %v15426_v48 }
 0x544   :  { %11345 = vmatpush1.bf16.msra.mxu1 %v15429_v62  ;;  %11305 = vmatprep.subr.bf16.mxu0 %v15434_v52  ;;  %v15492_v62 = vld [vmem:[#allocation2 + $0x24a8] ss:$16 sps:$4 sm:$0xff]  }
 0x545   :  { %11346 = vmatprep.subr.bf16.mxu1 %v15437_v60  ;;  %v15495_v52 = vld [vmem:[#allocation2 + $0x26a8] ss:$16 sps:$4 sm:$0xff]  }
 0x547   :  { %11306 = vmatpush2.bf16.msra.mxu0 %v15432_v0 }
 0x548   :  { %11347 = vmatpush2.bf16.msra.mxu1 %v15435_v57  ;;  %11307 = vmatprep.subr.bf16.mxu0 %v15440_v43  ;;  %v15500_v57 = vld [vmem:[#allocation2 + $0x248c] ss:$16 sps:$4 sm:$0xff]  }
 0x549   :  { %11348 = vmatprep.subr.bf16.mxu1 %v15443_v25  ;;  %v15503_v43 = vld [vmem:[#allocation2 + $0x268c] ss:$16 sps:$4 sm:$0xff]  }
 0x54a   :  { %v15506_v25 = vld [vmem:[#allocation2 + $0x246c] ss:$16 sps:$4 sm:$0xff]  }
 0x54b   :  { %11308 = vmatpush2.bf16.msra.mxu0 %v15438_v51  ;;  %v15509_v51 = vld [vmem:[#allocation2 + $0x266c] ss:$16 sps:$4 sm:$0xff]  }
 0x54c   :  { %11349 = vmatpush2.bf16.msra.mxu1 %v15441_v56  ;;  %11309 = vmatprep.subr.bf16.mxu0 %v15446_v8  ;;  %v15504_v56 = vld [vmem:[#allocation2 + $0x2468] ss:$16 sps:$4 sm:$0xff]  }
 0x54d   :  { %11350 = vmatprep.subr.bf16.mxu1 %v15449_v54  ;;  %v15507_v8 = vld [vmem:[#allocation2 + $0x2668] ss:$16 sps:$4 sm:$0xff]   ;;  %v15512_v54 = vld [vmem:[#allocation2 + $0x244c] ss:$16 sps:$4 sm:$0xff]  }
 0x54f   :  { %11310 = vmatpush2.bf16.msra.mxu0 %v15444_v59  ;;  %v15515_v59 = vld [vmem:[#allocation2 + $0x264c] ss:$16 sps:$4 sm:$0xff]  }
 0x550   :  { %11351 = vmatpush2.bf16.msra.mxu1 %v15447_v38  ;;  %11311 = vmatprep.subr.bf16.mxu0 %v15452_v13  ;;  %v15510_v38 = vld [vmem:[#allocation2 + $0x2448] ss:$16 sps:$4 sm:$0xff]  }
 0x551   :  { %11352 = vmatprep.subr.bf16.mxu1 %v15455_v15  ;;  %v15513_v13 = vld [vmem:[#allocation2 + $0x2648] ss:$16 sps:$4 sm:$0xff]   ;;  %v15518_v15 = vld [vmem:[#allocation2 + $0x242c] ss:$16 sps:$4 sm:$0xff]  }
 0x553   :  { %11312 = vmatpush2.bf16.msra.mxu0 %v15450_v20  ;;  %v15521_v20 = vld [vmem:[#allocation2 + $0x262c] ss:$16 sps:$4 sm:$0xff]  }
 0x554   :  { %11353 = vmatpush2.bf16.msra.mxu1 %v15453_v36  ;;  %11313 = vmatprep.subr.bf16.mxu0 %v15458_v24  ;;  %v15516_v36 = vld [vmem:[#allocation2 + $0x2428] ss:$16 sps:$4 sm:$0xff]  }
 0x555   :  { %11354 = vmatprep.subr.bf16.mxu1 %v15461_v29  ;;  %v15519_v24 = vld [vmem:[#allocation2 + $0x2628] ss:$16 sps:$4 sm:$0xff]   ;;  %v15524_v29 = vld [vmem:[#allocation2 + $0x240c] ss:$16 sps:$4 sm:$0xff]  }
 0x557   :  { %11314 = vmatpush2.bf16.msra.mxu0 %v15456_v53  ;;  %v15527_v53 = vld [vmem:[#allocation2 + $0x260c] ss:$16 sps:$4 sm:$0xff]  }
 0x558   :  { %11355 = vmatpush2.bf16.msra.mxu1 %v15459_v12  ;;  %11315 = vmatprep.subr.bf16.mxu0 %v15464_v27  ;;  %v15522_v12 = vld [vmem:[#allocation2 + $0x2408] ss:$16 sps:$4 sm:$0xff]  }
 0x559   :  { %11356 = vmatprep.subr.bf16.mxu1 %v15467_v35  ;;  %v15525_v27 = vld [vmem:[#allocation2 + $0x2608] ss:$16 sps:$4 sm:$0xff]   ;;  %v15530_v35 = vld [vmem:[#allocation2 + $0x25ec] ss:$16 sps:$4 sm:$0xff]  }
 0x55b   :  { %11316 = vmatpush2.bf16.msra.mxu0 %v15462_v7  ;;  %v15533_v7 = vld [vmem:[#allocation2 + $0x27ec] ss:$16 sps:$4 sm:$0xff]  }
 0x55c   :  { %11357 = vmatpush2.bf16.msra.mxu1 %v15465_v34  ;;  %11317 = vmatprep.subr.bf16.mxu0 %v15470_v16  ;;  %v15528_v34 = vld [vmem:[#allocation2 + $0x25e8] ss:$16 sps:$4 sm:$0xff]  }
 0x55d   :  { %11358 = vmatprep.subr.bf16.mxu1 %v15473_v28  ;;  %v15531_v16 = vld [vmem:[#allocation2 + $0x27e8] ss:$16 sps:$4 sm:$0xff]   ;;  %v15536_v28 = vld [vmem:[#allocation2 + $0x25cc] ss:$16 sps:$4 sm:$0xff]  }
 0x55f   :  { %11318 = vmatpush2.bf16.msra.mxu0 %v15468_v6  ;;  %v15539_v6 = vld [vmem:[#allocation2 + $0x27cc] ss:$16 sps:$4 sm:$0xff]  }
 0x560   :  { %11359 = vmatpush2.bf16.msra.mxu1 %v15471_v9  ;;  %11319 = vmatprep.subr.bf16.mxu0 %v15476_v1  ;;  %v15534_v9 = vld [vmem:[#allocation2 + $0x25c8] ss:$16 sps:$4 sm:$0xff]  }
 0x561   :  { %11360 = vmatprep.subr.bf16.mxu1 %v15479_v22  ;;  %v15537_v1 = vld [vmem:[#allocation2 + $0x27c8] ss:$16 sps:$4 sm:$0xff]   ;;  %v15542_v22 = vld [vmem:[#allocation2 + $0x25ac] ss:$16 sps:$4 sm:$0xff]  }
 0x563   :  { %11320 = vmatpush2.bf16.msra.mxu0 %v15474_v32  ;;  %v15545_v32 = vld [vmem:[#allocation2 + $0x27ac] ss:$16 sps:$4 sm:$0xff]  }
 0x564   :  { %11361 = vmatpush2.bf16.msra.mxu1 %v15477_v30  ;;  %11371 = vmatprep.subr.bf16.mxu0 %v15482_v40  ;;  %v15540_v30 = vld [vmem:[#allocation2 + $0x25a8] ss:$16 sps:$4 sm:$0xff]  }
 0x565   :  { %11412 = vmatprep.subr.bf16.mxu1 %v15485_v26  ;;  %v15543_v40 = vld [vmem:[#allocation2 + $0x27a8] ss:$16 sps:$4 sm:$0xff]   ;;  %v15548_v26 = vld [vmem:[#allocation2 + $0x258c] ss:$16 sps:$4 sm:$0xff]  }
 0x566   :  { %v11077_v42 = vpop.f32.mrf.mxu0  ;;  %11322 = vmatmul.mubr.bf16.vlgmr.msra.gmra.mxu0 %v16160_v39  ;;  %v16602_v39 = vld [vmem:[#allocation9_spill] sm:$0xff] }
 0x567   :  { %v11118_v17 = vpop.f32.mrf.mxu1  ;;  %11363 = vmatmul.mubr.bf16.vlgmr.msra.gmra.mxu1 %v16167_v61  ;;  %v11078_v23 = vadd.f32 %v11077_v42, %v16342_v44  ;;  %11372 = vmatpush1.bf16.msra.mxu0 %v15480_v63  ;;  %v15551_v63 = vld [vmem:[#allocation2 + $0x278c] ss:$16 sps:$4 sm:$0xff]  }
 0x568   :  { %11413 = vmatpush1.bf16.msra.mxu1 %v15483_v47  ;;  %v11079_v10 = vpop.f32.mrf.mxu0  ;;  %11373 = vmatprep.subr.bf16.mxu0 %v15488_v33  ;;  %v15546_v47 = vld [vmem:[#allocation2 + $0x2588] ss:$16 sps:$4 sm:$0xff]   ;;  %v15557_v42 = vld [vmem:[#allocation2 + $0x276c] ss:$16 sps:$4 sm:$0xff]  }
 0x569   :  { %v11120_v3 = vpop.f32.mrf.mxu1  ;;  %11414 = vmatprep.subr.bf16.mxu1 %v15491_v41  ;;  %v16352_v55 = vadd.f32 %v11118_v17, %v11078_v23  ;;  %v11080_v14 = vadd.f32 %v11079_v10, %v16347_v2  ;;  %11403 = vmatprep.mubr.bf16.mxu0 %v16163_v58  ;;  %v15498_v2 = vld [vmem:[#allocation2 + $0x2488] ss:$16 sps:$4 sm:$0xff]   ;;  %v15554_v41 = vld [vmem:[#allocation2 + $0x256c] ss:$16 sps:$4 sm:$0xff]  }
 0x56a   :  { %11444 = vmatprep.mubr.bf16.mxu1 %v16602_v39  ;;  %v11081_v61 = vpop.f32.mrf.mxu0  ;;  %v15501_v58 = vld [vmem:[#allocation2 + $0x2688] ss:$16 sps:$4 sm:$0xff]  }
 0x56b   :  { %v11122_v44 = vpop.f32.mrf.mxu1  ;;  %v16357_v48 = vadd.f32 %v11120_v3, %v11080_v14  ;;  %11374 = vmatpush1.bf16.msra.mxu0 %v15486_v11  ;;  %v15549_v33 = vld [vmem:[#allocation2 + $0x2788] ss:$16 sps:$4 sm:$0xff]   ;;  %v15560_v11 = vld [vmem:[#allocation2 + $0x254c] ss:$16 sps:$4 sm:$0xff]  }
 0x56c   :  { %11415 = vmatpush1.bf16.msra.mxu1 %v15489_v5  ;;  %v11082_v60 = vpop.f32.mrf.mxu0  ;;  %11375 = vmatprep.subr.bf16.mxu0 %v15494_v4  ;;  %v15552_v17 = vld [vmem:[#allocation2 + $0x2568] ss:$16 sps:$4 sm:$0xff]   ;;  %v15563_v5 = vld [vmem:[#allocation2 + $0x274c] ss:$16 sps:$4 sm:$0xff]  }
 0x56d   :  { %v11123_v0 = vpop.f32.mrf.mxu1  ;;  %11416 = vmatprep.subr.bf16.mxu1 %v15497_v50  ;;  %v15555_v23 = vld [vmem:[#allocation2 + $0x2768] ss:$16 sps:$4 sm:$0xff]   ;;  %v15566_v4 = vld [vmem:[#allocation2 + $0x252c] ss:$16 sps:$4 sm:$0xff]  }
 0x56e   :  { %v15558_v10 = vld [vmem:[#allocation2 + $0x2548] ss:$16 sps:$4 sm:$0xff]   ;;  %v15569_v50 = vld [vmem:[#allocation2 + $0x272c] ss:$16 sps:$4 sm:$0xff]  }
 0x56f   :  { %11376 = vmatpush1.bf16.msra.mxu0 %v15492_v62  ;;  %v15561_v3 = vld [vmem:[#allocation2 + $0x2748] ss:$16 sps:$4 sm:$0xff]   ;;  %v15572_v61 = vld [vmem:[#allocation2 + $0x250c] ss:$16 sps:$4 sm:$0xff]  }
 0x570   :  { %11417 = vmatpush1.bf16.msra.mxu1 %v15495_v52  ;;  %11377 = vmatprep.subr.bf16.mxu0 %v15500_v57  ;;  %v15564_v14 = vld [vmem:[#allocation2 + $0x2528] ss:$16 sps:$4 sm:$0xff]   ;;  %v15575_v44 = vld [vmem:[#allocation2 + $0x270c] ss:$16 sps:$4 sm:$0xff]  }
 0x571   :  { %11418 = vmatprep.subr.bf16.mxu1 %v15503_v43  ;;  %v15567_v39 = vld [vmem:[#allocation2 + $0x2728] ss:$16 sps:$4 sm:$0xff]   ;;  %v15578_v60 = vld [vmem:[#allocation2 + $0x28ec] ss:$16 sps:$4 sm:$0xff]  }
 0x572   :  { %v15570_v62 = vld [vmem:[#allocation2 + $0x2508] ss:$16 sps:$4 sm:$0xff]   ;;  %v15581_v0 = vld [vmem:[#allocation2 + $0x2aec] ss:$16 sps:$4 sm:$0xff]  }
 0x573   :  { %11378 = vmatpush1.bf16.msra.mxu0 %v15498_v2  ;;  %v15573_v52 = vld [vmem:[#allocation2 + $0x2708] ss:$16 sps:$4 sm:$0xff]   ;;  %v15584_v2 = vld [vmem:[#allocation2 + $0x28cc] ss:$16 sps:$4 sm:$0xff]  }
 0x574   :  { %11419 = vmatpush1.bf16.msra.mxu1 %v15501_v58  ;;  %11379 = vmatprep.subr.bf16.mxu0 %v15506_v25  ;;  %v15576_v57 = vld [vmem:[#allocation2 + $0x28e8] ss:$16 sps:$4 sm:$0xff]   ;;  %v15587_v58 = vld [vmem:[#allocation2 + $0x2acc] ss:$16 sps:$4 sm:$0xff]  }
 0x575   :  { %11420 = vmatprep.subr.bf16.mxu1 %v15509_v51  ;;  %v15579_v43 = vld [vmem:[#allocation2 + $0x2ae8] ss:$16 sps:$4 sm:$0xff]  }
 0x577   :  { %11380 = vmatpush1.bf16.msra.mxu0 %v15504_v56  ;;  %v16603_v56 = vld [vmem:[#allocation11_spill] sm:$0xff] }
 0x578   :  { %11421 = vmatpush1.bf16.msra.mxu1 %v15507_v8  ;;  %11381 = vmatprep.subr.bf16.mxu0 %v15512_v54  ;;  %v15582_v54 = vld [vmem:[#allocation2 + $0x28c8] ss:$16 sps:$4 sm:$0xff]  }
 0x579   :  { %11422 = vmatprep.subr.bf16.mxu1 %v15515_v59  ;;  %v15585_v59 = vld [vmem:[#allocation2 + $0x2ac8] ss:$16 sps:$4 sm:$0xff]  }
 0x57b   :  { %11382 = vmatpush1.bf16.msra.mxu0 %v15510_v38 }
 0x57c   :  { %11423 = vmatpush1.bf16.msra.mxu1 %v15513_v13  ;;  %11383 = vmatprep.subr.bf16.mxu0 %v15518_v15  ;;  %v15590_v15 = vld [vmem:[#allocation2 + $0x28ac] ss:$16 sps:$4 sm:$0xff]  }
 0x57d   :  { %11424 = vmatprep.subr.bf16.mxu1 %v15521_v20  ;;  %v15593_v20 = vld [vmem:[#allocation2 + $0x2aac] ss:$16 sps:$4 sm:$0xff]  }
 0x57f   :  { %11384 = vmatpush1.bf16.msra.mxu0 %v15516_v36 }
 0x580   :  { %11425 = vmatpush1.bf16.msra.mxu1 %v15519_v24  ;;  %11385 = vmatprep.subr.bf16.mxu0 %v15524_v29  ;;  %v16604_v29 = vld [vmem:[#allocation10_spill] sm:$0xff] }
 0x581   :  { %11426 = vmatprep.subr.bf16.mxu1 %v15527_v53 }
 0x583   :  { %11386 = vmatpush1.bf16.msra.mxu0 %v15522_v12 }
 0x584   :  { %11427 = vmatpush1.bf16.msra.mxu1 %v15525_v27  ;;  %11387 = vmatprep.subr.bf16.mxu0 %v15530_v35  ;;  %v15588_v27 = vld [vmem:[#allocation2 + $0x28a8] ss:$16 sps:$4 sm:$0xff]  }
 0x585   :  { %11428 = vmatprep.subr.bf16.mxu1 %v15533_v7  ;;  %v15591_v35 = vld [vmem:[#allocation2 + $0x2aa8] ss:$16 sps:$4 sm:$0xff]  }
 0x587   :  { %11388 = vmatpush2.bf16.msra.mxu0 %v15528_v34 }
 0x588   :  { %11429 = vmatpush2.bf16.msra.mxu1 %v15531_v16  ;;  %11389 = vmatprep.subr.bf16.mxu0 %v15536_v28  ;;  %v15596_v16 = vld [vmem:[#allocation2 + $0x288c] ss:$16 sps:$4 sm:$0xff]  }
 0x589   :  { %11430 = vmatprep.subr.bf16.mxu1 %v15539_v6  ;;  %v15599_v28 = vld [vmem:[#allocation2 + $0x2a8c] ss:$16 sps:$4 sm:$0xff]   ;;  %v15597_v6 = vld [vmem:[#allocation2 + $0x2a88] ss:$16 sps:$4 sm:$0xff]  }
 0x58b   :  { %11390 = vmatpush2.bf16.msra.mxu0 %v15534_v9  ;;  %v15602_v9 = vld [vmem:[#allocation2 + $0x286c] ss:$16 sps:$4 sm:$0xff]  }
 0x58c   :  { %11431 = vmatpush2.bf16.msra.mxu1 %v15537_v1  ;;  %11391 = vmatprep.subr.bf16.mxu0 %v15542_v22  ;;  %v15605_v1 = vld [vmem:[#allocation2 + $0x2a6c] ss:$16 sps:$4 sm:$0xff]   ;;  %v15600_v22 = vld [vmem:[#allocation2 + $0x2868] ss:$16 sps:$4 sm:$0xff]  }
 0x58d   :  { %11432 = vmatprep.subr.bf16.mxu1 %v15545_v32  ;;  %v15603_v32 = vld [vmem:[#allocation2 + $0x2a68] ss:$16 sps:$4 sm:$0xff]  }
 0x58f   :  { %11392 = vmatpush2.bf16.msra.mxu0 %v15540_v30  ;;  %v15608_v30 = vld [vmem:[#allocation2 + $0x284c] ss:$16 sps:$4 sm:$0xff]  }
 0x590   :  { %11433 = vmatpush2.bf16.msra.mxu1 %v15543_v40  ;;  %11393 = vmatprep.subr.bf16.mxu0 %v15548_v26  ;;  %v15611_v40 = vld [vmem:[#allocation2 + $0x2a4c] ss:$16 sps:$4 sm:$0xff]   ;;  %v15606_v26 = vld [vmem:[#allocation2 + $0x2848] ss:$16 sps:$4 sm:$0xff]  }
 0x591   :  { %11434 = vmatprep.subr.bf16.mxu1 %v15551_v63  ;;  %v15609_v63 = vld [vmem:[#allocation2 + $0x2a48] ss:$16 sps:$4 sm:$0xff]  }
 0x593   :  { %11394 = vmatpush2.bf16.msra.mxu0 %v15546_v47  ;;  %v15614_v47 = vld [vmem:[#allocation2 + $0x282c] ss:$16 sps:$4 sm:$0xff]  }
 0x594   :  { %11435 = vmatpush2.bf16.msra.mxu1 %v15549_v33  ;;  %11395 = vmatprep.subr.bf16.mxu0 %v15554_v41  ;;  %v15617_v33 = vld [vmem:[#allocation2 + $0x2a2c] ss:$16 sps:$4 sm:$0xff]   ;;  %v15612_v41 = vld [vmem:[#allocation2 + $0x2828] ss:$16 sps:$4 sm:$0xff]  }
 0x595   :  { %11436 = vmatprep.subr.bf16.mxu1 %v15557_v42  ;;  %v15615_v42 = vld [vmem:[#allocation2 + $0x2a28] ss:$16 sps:$4 sm:$0xff]  }
 0x597   :  { %11396 = vmatpush2.bf16.msra.mxu0 %v15552_v17  ;;  %v15620_v17 = vld [vmem:[#allocation2 + $0x280c] ss:$16 sps:$4 sm:$0xff]  }
 0x598   :  { %11437 = vmatpush2.bf16.msra.mxu1 %v15555_v23  ;;  %11397 = vmatprep.subr.bf16.mxu0 %v15560_v11  ;;  %v15623_v23 = vld [vmem:[#allocation2 + $0x2a0c] ss:$16 sps:$4 sm:$0xff]   ;;  %v15618_v11 = vld [vmem:[#allocation2 + $0x2808] ss:$16 sps:$4 sm:$0xff]  }
 0x599   :  { %11438 = vmatprep.subr.bf16.mxu1 %v15563_v5  ;;  %v15621_v5 = vld [vmem:[#allocation2 + $0x2a08] ss:$16 sps:$4 sm:$0xff]  }
 0x59b   :  { %11398 = vmatpush2.bf16.msra.mxu0 %v15558_v10  ;;  %v15626_v10 = vld [vmem:[#allocation2 + $0x29ec] ss:$16 sps:$4 sm:$0xff]  }
 0x59c   :  { %11439 = vmatpush2.bf16.msra.mxu1 %v15561_v3  ;;  %11399 = vmatprep.subr.bf16.mxu0 %v15566_v4  ;;  %v15629_v3 = vld [vmem:[#allocation2 + $0x2bec] ss:$16 sps:$4 sm:$0xff]   ;;  %v15624_v4 = vld [vmem:[#allocation2 + $0x29e8] ss:$16 sps:$4 sm:$0xff]  }
 0x59d   :  { %11440 = vmatprep.subr.bf16.mxu1 %v15569_v50  ;;  %v15627_v50 = vld [vmem:[#allocation2 + $0x2be8] ss:$16 sps:$4 sm:$0xff]  }
 0x59f   :  { %11400 = vmatpush2.bf16.msra.mxu0 %v15564_v14  ;;  %v15632_v14 = vld [vmem:[#allocation2 + $0x29cc] ss:$16 sps:$4 sm:$0xff]  }
 0x5a0   :  { %11441 = vmatpush2.bf16.msra.mxu1 %v15567_v39  ;;  %11401 = vmatprep.subr.bf16.mxu0 %v15572_v61  ;;  %v15635_v39 = vld [vmem:[#allocation2 + $0x2bcc] ss:$16 sps:$4 sm:$0xff]   ;;  %v15630_v61 = vld [vmem:[#allocation2 + $0x29c8] ss:$16 sps:$4 sm:$0xff]  }
 0x5a1   :  { %11442 = vmatprep.subr.bf16.mxu1 %v15575_v44  ;;  %v15633_v44 = vld [vmem:[#allocation2 + $0x2bc8] ss:$16 sps:$4 sm:$0xff]  }
 0x5a3   :  { %11402 = vmatpush2.bf16.msra.mxu0 %v15570_v62  ;;  %v15638_v62 = vld [vmem:[#allocation2 + $0x29ac] ss:$16 sps:$4 sm:$0xff]  }
 0x5a4   :  { %11443 = vmatpush2.bf16.msra.mxu1 %v15573_v52  ;;  %11453 = vmatprep.subr.bf16.mxu0 %v15578_v60  ;;  %v15641_v52 = vld [vmem:[#allocation2 + $0x2bac] ss:$16 sps:$4 sm:$0xff]   ;;  %v15636_v60 = vld [vmem:[#allocation2 + $0x29a8] ss:$16 sps:$4 sm:$0xff]  }
 0x5a5   :  { %11494 = vmatprep.subr.bf16.mxu1 %v15581_v0  ;;  %v15639_v0 = vld [vmem:[#allocation2 + $0x2ba8] ss:$16 sps:$4 sm:$0xff]  }
 0x5a6   :  { %v11159_v25 = vpop.f32.mrf.mxu0  ;;  %11404 = vmatmul.mubr.bf16.vlgmr.msra.gmra.mxu0 %v16196_v21  ;;  %v16605_v21 = vld [vmem:[#allocation12_spill] sm:$0xff] }
 0x5a7   :  { %v11200_v51 = vpop.f32.mrf.mxu1  ;;  %11445 = vmatmul.mubr.bf16.vlgmr.msra.gmra.mxu1 %v16603_v56  ;;  %v11160_v8 = vadd.f32 %v11159_v25, %v16352_v55  ;;  %11454 = vmatpush1.bf16.msra.mxu0 %v15576_v57  ;;  %v15644_v57 = vld [vmem:[#allocation2 + $0x298c] ss:$16 sps:$4 sm:$0xff]   ;;  %v15648_v56 = vld [vmem:[#allocation2 + $0x2968] ss:$16 sps:$4 sm:$0xff]  }
 0x5a8   :  { %11495 = vmatpush1.bf16.msra.mxu1 %v15579_v43  ;;  %v11161_v38 = vpop.f32.mrf.mxu0  ;;  %11455 = vmatprep.subr.bf16.mxu0 %v15584_v2  ;;  %v15647_v43 = vld [vmem:[#allocation2 + $0x2b8c] ss:$16 sps:$4 sm:$0xff]   ;;  %v15642_v2 = vld [vmem:[#allocation2 + $0x2988] ss:$16 sps:$4 sm:$0xff]  }
 0x5a9   :  { %v11202_v13 = vpop.f32.mrf.mxu1  ;;  %11496 = vmatprep.subr.bf16.mxu1 %v15587_v58  ;;  %v16362_v36 = vadd.f32 %v11200_v51, %v11160_v8  ;;  %v11162_v24 = vadd.f32 %v11161_v38, %v16357_v48  ;;  %11485 = vmatprep.mubr.bf16.mxu0 %v16604_v29  ;;  %v15594_v48 = vld [vmem:[#allocation2 + $0x2888] ss:$16 sps:$4 sm:$0xff]   ;;  %v15650_v25 = vld [vmem:[#allocation2 + $0x296c] ss:$16 sps:$4 sm:$0xff]  }
 0x5aa   :  { %11526 = vmatprep.mubr.bf16.mxu1 %v16605_v21  ;;  %v11163_v53 = vpop.f32.mrf.mxu0  ;;  %v15645_v58 = vld [vmem:[#allocation2 + $0x2b88] ss:$16 sps:$4 sm:$0xff]   ;;  %v15653_v51 = vld [vmem:[#allocation2 + $0x2b6c] ss:$16 sps:$4 sm:$0xff]  }
 0x5ab   :  { %v11204_v55 = vpop.f32.mrf.mxu1  ;;  %v16367_v12 = vadd.f32 %v11202_v13, %v11162_v24  ;;  %11456 = vmatpush1.bf16.msra.mxu0 %v15582_v54  ;;  %v15651_v8 = vld [vmem:[#allocation2 + $0x2b68] ss:$16 sps:$4 sm:$0xff]   ;;  %v15656_v54 = vld [vmem:[#allocation2 + $0x294c] ss:$16 sps:$4 sm:$0xff]  }
 0x5ac   :  { %11497 = vmatpush1.bf16.msra.mxu1 %v15585_v59  ;;  %v11164_v7 = vpop.f32.mrf.mxu0  ;;  %11457 = vmatprep.subr.bf16.mxu0 %v15590_v15  ;;  %v15659_v59 = vld [vmem:[#allocation2 + $0x2b4c] ss:$16 sps:$4 sm:$0xff]   ;;  %v15654_v38 = vld [vmem:[#allocation2 + $0x2948] ss:$16 sps:$4 sm:$0xff]  }
 0x5ad   :  { %v11205_v34 = vpop.f32.mrf.mxu1  ;;  %11498 = vmatprep.subr.bf16.mxu1 %v15593_v20  ;;  %v15657_v13 = vld [vmem:[#allocation2 + $0x2b48] ss:$16 sps:$4 sm:$0xff]   ;;  %v15662_v15 = vld [vmem:[#allocation2 + $0x292c] ss:$16 sps:$4 sm:$0xff]  }
 0x5ae   :  { %v15665_v20 = vld [vmem:[#allocation2 + $0x2b2c] ss:$16 sps:$4 sm:$0xff]   ;;  %v15660_v24 = vld [vmem:[#allocation2 + $0x2928] ss:$16 sps:$4 sm:$0xff]  }
 0x5af   :  { %11458 = vmatpush1.bf16.msra.mxu0 %v15588_v27  ;;  %v15663_v29 = vld [vmem:[#allocation2 + $0x2b28] ss:$16 sps:$4 sm:$0xff]   ;;  %v15668_v21 = vld [vmem:[#allocation2 + $0x290c] ss:$16 sps:$4 sm:$0xff]  }
 0x5b0   :  { %11499 = vmatpush1.bf16.msra.mxu1 %v15591_v35  ;;  %11459 = vmatprep.subr.bf16.mxu0 %v15596_v16  ;;  %v15671_v53 = vld [vmem:[#allocation2 + $0x2b0c] ss:$16 sps:$4 sm:$0xff]   ;;  %v15666_v55 = vld [vmem:[#allocation2 + $0x2908] ss:$16 sps:$4 sm:$0xff]  }
 0x5b1   :  { %11500 = vmatprep.subr.bf16.mxu1 %v15599_v28  ;;  %v15669_v27 = vld [vmem:[#allocation2 + $0x2b08] ss:$16 sps:$4 sm:$0xff]   ;;  %v15674_v35 = vld [vmem:[#allocation2 + $0x2cec] ss:$16 sps:$4 sm:$0xff]  }
 0x5b2   :  { %v15677_v7 = vld [vmem:[#allocation2 + $0x2eec] ss:$16 sps:$4 sm:$0xff]   ;;  %v15672_v34 = vld [vmem:[#allocation2 + $0x2ce8] ss:$16 sps:$4 sm:$0xff]  }
 0x5b3   :  { %11460 = vmatpush1.bf16.msra.mxu0 %v15594_v48  ;;  %v15675_v16 = vld [vmem:[#allocation2 + $0x2ee8] ss:$16 sps:$4 sm:$0xff]   ;;  %v15680_v28 = vld [vmem:[#allocation2 + $0x2ccc] ss:$16 sps:$4 sm:$0xff]  }
 0x5b4   :  { %11501 = vmatpush1.bf16.msra.mxu1 %v15597_v6  ;;  %11461 = vmatprep.subr.bf16.mxu0 %v15602_v9  ;;  %v15683_v48 = vld [vmem:[#allocation2 + $0x2ecc] ss:$16 sps:$4 sm:$0xff]  }
 0x5b5   :  { %11502 = vmatprep.subr.bf16.mxu1 %v15605_v1  ;;  %v16606_v1 = vld [vmem:[#allocation13_spill] sm:$0xff] }
 0x5b7   :  { %11462 = vmatpush1.bf16.msra.mxu0 %v15600_v22 }
 0x5b8   :  { %11503 = vmatpush1.bf16.msra.mxu1 %v15603_v32  ;;  %11463 = vmatprep.subr.bf16.mxu0 %v15608_v30  ;;  %v15678_v32 = vld [vmem:[#allocation2 + $0x2cc8] ss:$16 sps:$4 sm:$0xff]  }
 0x5b9   :  { %11504 = vmatprep.subr.bf16.mxu1 %v15611_v40  ;;  %v15681_v30 = vld [vmem:[#allocation2 + $0x2ec8] ss:$16 sps:$4 sm:$0xff]  }
 0x5bb   :  { %11464 = vmatpush1.bf16.msra.mxu0 %v15606_v26 }
 0x5bc   :  { %11505 = vmatpush1.bf16.msra.mxu1 %v15609_v63  ;;  %11465 = vmatprep.subr.bf16.mxu0 %v15614_v47  ;;  %v15686_v63 = vld [vmem:[#allocation2 + $0x2cac] ss:$16 sps:$4 sm:$0xff]  }
 0x5bd   :  { %11506 = vmatprep.subr.bf16.mxu1 %v15617_v33  ;;  %v15689_v47 = vld [vmem:[#allocation2 + $0x2eac] ss:$16 sps:$4 sm:$0xff]  }
 0x5bf   :  { %11466 = vmatpush1.bf16.msra.mxu0 %v15612_v41 }
 0x5c0   :  { %11507 = vmatpush1.bf16.msra.mxu1 %v15615_v42  ;;  %11467 = vmatprep.subr.bf16.mxu0 %v15620_v17  ;;  %v15684_v17 = vld [vmem:[#allocation2 + $0x2ca8] ss:$16 sps:$4 sm:$0xff]  }
 0x5c1   :  { %11508 = vmatprep.subr.bf16.mxu1 %v15623_v23  ;;  %v15687_v23 = vld [vmem:[#allocation2 + $0x2ea8] ss:$16 sps:$4 sm:$0xff]  }
 0x5c3   :  { %11468 = vmatpush1.bf16.msra.mxu0 %v15618_v11 }
 0x5c4   :  { %11509 = vmatpush1.bf16.msra.mxu1 %v15621_v5  ;;  %11469 = vmatprep.subr.bf16.mxu0 %v15626_v10  ;;  %v15692_v10 = vld [vmem:[#allocation2 + $0x2c8c] ss:$16 sps:$4 sm:$0xff]  }
 0x5c5   :  { %11510 = vmatprep.subr.bf16.mxu1 %v15629_v3  ;;  %v15695_v3 = vld [vmem:[#allocation2 + $0x2e8c] ss:$16 sps:$4 sm:$0xff]  }
 0x5c7   :  { %11470 = vmatpush2.bf16.msra.mxu0 %v15624_v4  ;;  %v15701_v4 = vld [vmem:[#allocation2 + $0x2e6c] ss:$16 sps:$4 sm:$0xff]  }
 0x5c8   :  { %11511 = vmatpush2.bf16.msra.mxu1 %v15627_v50  ;;  %11471 = vmatprep.subr.bf16.mxu0 %v15632_v14  ;;  %v15696_v50 = vld [vmem:[#allocation2 + $0x2c68] ss:$16 sps:$4 sm:$0xff]  }
 0x5c9   :  { %11512 = vmatprep.subr.bf16.mxu1 %v15635_v39  ;;  %v15699_v14 = vld [vmem:[#allocation2 + $0x2e68] ss:$16 sps:$4 sm:$0xff]   ;;  %v15704_v39 = vld [vmem:[#allocation2 + $0x2c4c] ss:$16 sps:$4 sm:$0xff]  }
 0x5cb   :  { %11472 = vmatpush2.bf16.msra.mxu0 %v15630_v61  ;;  %v15707_v61 = vld [vmem:[#allocation2 + $0x2e4c] ss:$16 sps:$4 sm:$0xff]  }
 0x5cc   :  { %11513 = vmatpush2.bf16.msra.mxu1 %v15633_v44  ;;  %11473 = vmatprep.subr.bf16.mxu0 %v15638_v62  ;;  %v15702_v44 = vld [vmem:[#allocation2 + $0x2c48] ss:$16 sps:$4 sm:$0xff]  }
 0x5cd   :  { %11514 = vmatprep.subr.bf16.mxu1 %v15641_v52  ;;  %v15705_v62 = vld [vmem:[#allocation2 + $0x2e48] ss:$16 sps:$4 sm:$0xff]   ;;  %v15710_v52 = vld [vmem:[#allocation2 + $0x2c2c] ss:$16 sps:$4 sm:$0xff]  }
 0x5cf   :  { %11474 = vmatpush2.bf16.msra.mxu0 %v15636_v60  ;;  %v15713_v60 = vld [vmem:[#allocation2 + $0x2e2c] ss:$16 sps:$4 sm:$0xff]  }
 0x5d0   :  { %11515 = vmatpush2.bf16.msra.mxu1 %v15639_v0  ;;  %11475 = vmatprep.subr.bf16.mxu0 %v15644_v57  ;;  %v15708_v0 = vld [vmem:[#allocation2 + $0x2c28] ss:$16 sps:$4 sm:$0xff]  }
 0x5d1   :  { %11516 = vmatprep.subr.bf16.mxu1 %v15647_v43  ;;  %v15711_v57 = vld [vmem:[#allocation2 + $0x2e28] ss:$16 sps:$4 sm:$0xff]   ;;  %v15716_v43 = vld [vmem:[#allocation2 + $0x2c0c] ss:$16 sps:$4 sm:$0xff]  }
 0x5d3   :  { %11476 = vmatpush2.bf16.msra.mxu0 %v15642_v2  ;;  %v15719_v2 = vld [vmem:[#allocation2 + $0x2e0c] ss:$16 sps:$4 sm:$0xff]  }
 0x5d4   :  { %11517 = vmatpush2.bf16.msra.mxu1 %v15645_v58  ;;  %11477 = vmatprep.subr.bf16.mxu0 %v15650_v25  ;;  %v15714_v58 = vld [vmem:[#allocation2 + $0x2c08] ss:$16 sps:$4 sm:$0xff]  }
 0x5d5   :  { %11518 = vmatprep.subr.bf16.mxu1 %v15653_v51  ;;  %v15717_v25 = vld [vmem:[#allocation2 + $0x2e08] ss:$16 sps:$4 sm:$0xff]   ;;  %v15722_v51 = vld [vmem:[#allocation2 + $0x2dec] ss:$16 sps:$4 sm:$0xff]  }
 0x5d7   :  { %11478 = vmatpush2.bf16.msra.mxu0 %v15648_v56  ;;  %v15725_v56 = vld [vmem:[#allocation2 + $0x2fec] ss:$16 sps:$4 sm:$0xff]  }
 0x5d8   :  { %11519 = vmatpush2.bf16.msra.mxu1 %v15651_v8  ;;  %11479 = vmatprep.subr.bf16.mxu0 %v15656_v54  ;;  %v15720_v8 = vld [vmem:[#allocation2 + $0x2de8] ss:$16 sps:$4 sm:$0xff]  }
 0x5d9   :  { %11520 = vmatprep.subr.bf16.mxu1 %v15659_v59  ;;  %v15723_v54 = vld [vmem:[#allocation2 + $0x2fe8] ss:$16 sps:$4 sm:$0xff]   ;;  %v15728_v59 = vld [vmem:[#allocation2 + $0x2dcc] ss:$16 sps:$4 sm:$0xff]  }
 0x5db   :  { %11480 = vmatpush2.bf16.msra.mxu0 %v15654_v38  ;;  %v15731_v38 = vld [vmem:[#allocation2 + $0x2fcc] ss:$16 sps:$4 sm:$0xff]  }
 0x5dc   :  { %11521 = vmatpush2.bf16.msra.mxu1 %v15657_v13  ;;  %11481 = vmatprep.subr.bf16.mxu0 %v15662_v15  ;;  %v15726_v13 = vld [vmem:[#allocation2 + $0x2dc8] ss:$16 sps:$4 sm:$0xff]  }
 0x5dd   :  { %11522 = vmatprep.subr.bf16.mxu1 %v15665_v20  ;;  %v15729_v15 = vld [vmem:[#allocation2 + $0x2fc8] ss:$16 sps:$4 sm:$0xff]   ;;  %v15734_v20 = vld [vmem:[#allocation2 + $0x2dac] ss:$16 sps:$4 sm:$0xff]  }
 0x5df   :  { %11482 = vmatpush2.bf16.msra.mxu0 %v15660_v24  ;;  %v15737_v24 = vld [vmem:[#allocation2 + $0x2fac] ss:$16 sps:$4 sm:$0xff]  }
 0x5e0   :  { %11523 = vmatpush2.bf16.msra.mxu1 %v15663_v29  ;;  %11483 = vmatprep.subr.bf16.mxu0 %v15668_v21  ;;  %v15732_v29 = vld [vmem:[#allocation2 + $0x2da8] ss:$16 sps:$4 sm:$0xff]  }
 0x5e1   :  { %11524 = vmatprep.subr.bf16.mxu1 %v15671_v53  ;;  %v15735_v21 = vld [vmem:[#allocation2 + $0x2fa8] ss:$16 sps:$4 sm:$0xff]   ;;  %v15740_v53 = vld [vmem:[#allocation2 + $0x2d8c] ss:$16 sps:$4 sm:$0xff]  }
 0x5e3   :  { %11484 = vmatpush2.bf16.msra.mxu0 %v15666_v55  ;;  %v15743_v55 = vld [vmem:[#allocation2 + $0x2f8c] ss:$16 sps:$4 sm:$0xff]  }
 0x5e4   :  { %11525 = vmatpush2.bf16.msra.mxu1 %v15669_v27  ;;  %11535 = vmatprep.subr.bf16.mxu0 %v15674_v35  ;;  %v15738_v27 = vld [vmem:[#allocation2 + $0x2d88] ss:$16 sps:$4 sm:$0xff]  }
 0x5e5   :  { %11576 = vmatprep.subr.bf16.mxu1 %v15677_v7  ;;  %v15741_v35 = vld [vmem:[#allocation2 + $0x2f88] ss:$16 sps:$4 sm:$0xff]   ;;  %v15746_v7 = vld [vmem:[#allocation2 + $0x2d6c] ss:$16 sps:$4 sm:$0xff]  }
 0x5e6   :  { %v11241_v6 = vpop.f32.mrf.mxu0  ;;  %11486 = vmatmul.mubr.bf16.vlgmr.msra.gmra.mxu0 %v16228_v45 }
 0x5e7   :  { %v11282_v9 = vpop.f32.mrf.mxu1  ;;  %11527 = vmatmul.mubr.bf16.vlgmr.msra.gmra.mxu1 %v16606_v1  ;;  %v11242_v22 = vadd.f32 %v11241_v6, %v16362_v36  ;;  %11536 = vmatpush1.bf16.msra.mxu0 %v15672_v34  ;;  %v15749_v34 = vld [vmem:[#allocation2 + $0x2f6c] ss:$16 sps:$4 sm:$0xff]   ;;  %v15753_v1 = vld [vmem:[#allocation2 + $0x2f48] ss:$16 sps:$4 sm:$0xff]  }
 0x5e8   :  { %11577 = vmatpush1.bf16.msra.mxu1 %v15675_v16  ;;  %v11243_v40 = vpop.f32.mrf.mxu0  ;;  %11537 = vmatprep.subr.bf16.mxu0 %v15680_v28  ;;  %v15744_v16 = vld [vmem:[#allocation2 + $0x2d68] ss:$16 sps:$4 sm:$0xff]   ;;  %v15755_v6 = vld [vmem:[#allocation2 + $0x2f4c] ss:$16 sps:$4 sm:$0xff]  }
 0x5e9   :  { %v11284_v26 = vpop.f32.mrf.mxu1  ;;  %11578 = vmatprep.subr.bf16.mxu1 %v15683_v48  ;;  %v16372_v33 = vadd.f32 %v11282_v9, %v11242_v22  ;;  %v11244_v41 = vadd.f32 %v11243_v40, %v16367_v12  ;;  %11567 = vmatprep.mubr.bf16.mxu0 %v16231_v46  ;;  %v15690_v12 = vld [vmem:[#allocation2 + $0x2c88] ss:$16 sps:$4 sm:$0xff]   ;;  %v15752_v48 = vld [vmem:[#allocation2 + $0x2d4c] ss:$16 sps:$4 sm:$0xff]  }
 0x5ea   :  { %11608 = vmatprep.mubr.bf16.mxu1 %v16239_v19  ;;  %v11245_v45 = vpop.f32.mrf.mxu0  ;;  %v15693_v46 = vld [vmem:[#allocation2 + $0x2e88] ss:$16 sps:$4 sm:$0xff]   ;;  %v15698_v19 = vld [vmem:[#allocation2 + $0x2c6c] ss:$16 sps:$4 sm:$0xff]  }
 0x5eb   :  { %v11286_v36 = vpop.f32.mrf.mxu1  ;;  %v16377_v42 = vadd.f32 %v11284_v26, %v11244_v41  ;;  %11538 = vmatpush1.bf16.msra.mxu0 %v15678_v32  ;;  %v15747_v28 = vld [vmem:[#allocation2 + $0x2f68] ss:$16 sps:$4 sm:$0xff]   ;;  %v15758_v22 = vld [vmem:[#allocation2 + $0x2d2c] ss:$16 sps:$4 sm:$0xff]  }
 0x5ec   :  { %11579 = vmatpush1.bf16.msra.mxu1 %v15681_v30  ;;  %v11246_v11 = vpop.f32.mrf.mxu0  ;;  %11539 = vmatprep.subr.bf16.mxu0 %v15686_v63  ;;  %v15750_v9 = vld [vmem:[#allocation2 + $0x2d48] ss:$16 sps:$4 sm:$0xff]   ;;  %v15761_v32 = vld [vmem:[#allocation2 + $0x2f2c] ss:$16 sps:$4 sm:$0xff]  }
 0x5ed   :  { %v11287_v5 = vpop.f32.mrf.mxu1  ;;  %11580 = vmatprep.subr.bf16.mxu1 %v15689_v47  ;;  %v15756_v30 = vld [vmem:[#allocation2 + $0x2d28] ss:$16 sps:$4 sm:$0xff]   ;;  %v15764_v26 = vld [vmem:[#allocation2 + $0x2d0c] ss:$16 sps:$4 sm:$0xff]  }
 0x5ee   :  { %v15759_v40 = vld [vmem:[#allocation2 + $0x2f28] ss:$16 sps:$4 sm:$0xff]   ;;  %v15767_v63 = vld [vmem:[#allocation2 + $0x2f0c] ss:$16 sps:$4 sm:$0xff]  }
 0x5ef   :  { %11540 = vmatpush1.bf16.msra.mxu0 %v15684_v17  ;;  %v15762_v47 = vld [vmem:[#allocation2 + $0x2d08] ss:$16 sps:$4 sm:$0xff]   ;;  %v11618_v17 = vmax.f32 %v16297_v18, 0.0 }
 0x5f0   :  { %11581 = vmatpush1.bf16.msra.mxu1 %v15687_v23  ;;  %11541 = vmatprep.subr.bf16.mxu0 %v15692_v10  ;;  %v15765_v41 = vld [vmem:[#allocation2 + $0x2f08] ss:$16 sps:$4 sm:$0xff]   ;;  %v11651_v23 = vld [vmem:[%s16589_s3 + $0xf0] sm:$0xff] }
 0x5f1   :  { %11582 = vmatprep.subr.bf16.mxu1 %v15695_v3  ;;  %v11652_v45 = vld [vmem:[%s16589_s3 + $0xf8] sm:$0xff]  ;;  %v11635_v10 = vld [vmem:[%s16589_s3 + $0x70] sm:$0xff]  ;;  %v11650_v18 = vld [vmem:[%s16589_s3 + $0xe8] sm:$0xff] }
 0x5f2   :  { %v11636_v36 = vld [vmem:[%s16589_s3 + $0x78] sm:$0xff] }
 0x5f3   :  { %11542 = vmatpush1.bf16.msra.mxu0 %v15690_v12 }
 0x5f4   :  { %11583 = vmatpush1.bf16.msra.mxu1 %v15693_v46  ;;  %11543 = vmatprep.subr.bf16.mxu0 %v15698_v19 }
 0x5f5   :  { %11584 = vmatprep.subr.bf16.mxu1 %v15701_v4 }
 0x5f7   :  { %11544 = vmatpush1.bf16.msra.mxu0 %v15696_v50 }
 0x5f8   :  { %11585 = vmatpush1.bf16.msra.mxu1 %v15699_v14  ;;  %11545 = vmatprep.subr.bf16.mxu0 %v15704_v39  ;;  %v11633_v14 = vld [vmem:[%s16589_s3 + $0x60] sm:$0xff] }
 0x5f9   :  { %11586 = vmatprep.subr.bf16.mxu1 %v15707_v61  ;;  %v11648_v61 = vld [vmem:[%s16589_s3 + $0xd8] sm:$0xff] }
 0x5fb   :  { %11546 = vmatpush1.bf16.msra.mxu0 %v15702_v44 }
 0x5fc   :  { %11587 = vmatpush1.bf16.msra.mxu1 %v15705_v62  ;;  %11547 = vmatprep.subr.bf16.mxu0 %v15710_v52  ;;  %v11684_v52 = vld [vmem:[%s16589_s3 + $0x1f8] sm:$0xff] }
 0x5fd   :  { %11588 = vmatprep.subr.bf16.mxu1 %v15713_v60  ;;  %v11668_v60 = vld [vmem:[%s16589_s3 + $0x178] sm:$0xff] }
 0x5ff   :  { %11548 = vmatpush1.bf16.msra.mxu0 %v15708_v0  ;;  %v11683_v0 = vld [vmem:[%s16589_s3 + $0x1f0] sm:$0xff] }
 0x600   :  { %11589 = vmatpush1.bf16.msra.mxu1 %v15711_v57  ;;  %11549 = vmatprep.subr.bf16.mxu0 %v15716_v43  ;;  %v11647_v57 = vld [vmem:[%s16589_s3 + $0xd0] sm:$0xff] }
 0x601   :  { %11590 = vmatprep.subr.bf16.mxu1 %v15719_v2  ;;  %v11667_v43 = vld [vmem:[%s16589_s3 + $0x170] sm:$0xff] }
 0x602   :  { %v11631_v2 = vld [vmem:[%s16589_s3 + $0x50] sm:$0xff] }
 0x603   :  { %11550 = vmatpush1.bf16.msra.mxu0 %v15714_v58  ;;  %v11682_v58 = vld [vmem:[%s16589_s3 + $0x1e8] sm:$0xff] }
 0x604   :  { %11591 = vmatpush1.bf16.msra.mxu1 %v15717_v25  ;;  %11551 = vmatprep.subr.bf16.mxu0 %v15722_v51  ;;  %v11646_v25 = vld [vmem:[%s16589_s3 + $0xc8] sm:$0xff] }
 0x605   :  { %11592 = vmatprep.subr.bf16.mxu1 %v15725_v56  ;;  %v11666_v51 = vld [vmem:[%s16589_s3 + $0x168] sm:$0xff] }
 0x606   :  { %v11630_v56 = vld [vmem:[%s16589_s3 + $0x48] sm:$0xff] }
 0x607   :  { %11552 = vmatpush2.bf16.msra.mxu0 %v15720_v8  ;;  %v11681_v8 = vld [vmem:[%s16589_s3 + $0x1e0] sm:$0xff] }
 0x608   :  { %11593 = vmatpush2.bf16.msra.mxu1 %v15723_v54  ;;  %11553 = vmatprep.subr.bf16.mxu0 %v15728_v59  ;;  %v11645_v54 = vld [vmem:[%s16589_s3 + $0xc0] sm:$0xff] }
 0x609   :  { %11594 = vmatprep.subr.bf16.mxu1 %v15731_v38  ;;  %v11665_v59 = vld [vmem:[%s16589_s3 + $0x160] sm:$0xff] }
 0x60a   :  { %v11629_v38 = vld [vmem:[%s16589_s3 + $0x40] sm:$0xff] }
 0x60b   :  { %11554 = vmatpush2.bf16.msra.mxu0 %v15726_v13  ;;  %v11680_v13 = vld [vmem:[%s16589_s3 + $0x1d8] sm:$0xff] }
 0x60c   :  { %11595 = vmatpush2.bf16.msra.mxu1 %v15729_v15  ;;  %11555 = vmatprep.subr.bf16.mxu0 %v15734_v20  ;;  %v11644_v15 = vld [vmem:[%s16589_s3 + $0xb8] sm:$0xff] }
 0x60d   :  { %11596 = vmatprep.subr.bf16.mxu1 %v15737_v24  ;;  %v11664_v20 = vld [vmem:[%s16589_s3 + $0x158] sm:$0xff] }
 0x60e   :  { %v11628_v24 = vld [vmem:[%s16589_s3 + $0x38] sm:$0xff] }
 0x60f   :  { %11556 = vmatpush2.bf16.msra.mxu0 %v15732_v29  ;;  %v11679_v29 = vld [vmem:[%s16589_s3 + $0x1d0] sm:$0xff] }
 0x610   :  { %11597 = vmatpush2.bf16.msra.mxu1 %v15735_v21  ;;  %11557 = vmatprep.subr.bf16.mxu0 %v15740_v53  ;;  %v11643_v21 = vld [vmem:[%s16589_s3 + $0xb0] sm:$0xff] }
 0x611   :  { %11598 = vmatprep.subr.bf16.mxu1 %v15743_v55  ;;  %v11663_v53 = vld [vmem:[%s16589_s3 + $0x150] sm:$0xff] }
 0x612   :  { %v11627_v55 = vld [vmem:[%s16589_s3 + $0x30] sm:$0xff] }
 0x613   :  { %11558 = vmatpush2.bf16.msra.mxu0 %v15738_v27  ;;  %v11678_v27 = vld [vmem:[%s16589_s3 + $0x1c8] sm:$0xff] }
 0x614   :  { %11599 = vmatpush2.bf16.msra.mxu1 %v15741_v35  ;;  %11559 = vmatprep.subr.bf16.mxu0 %v15746_v7  ;;  %v11642_v35 = vld [vmem:[%s16589_s3 + $0xa8] sm:$0xff] }
 0x615   :  { %11600 = vmatprep.subr.bf16.mxu1 %v15749_v34  ;;  %v11662_v7 = vld [vmem:[%s16589_s3 + $0x148] sm:$0xff] }
 0x616   :  { %v11626_v34 = vld [vmem:[%s16589_s3 + $0x28] sm:$0xff] }
 0x617   :  { %11560 = vmatpush2.bf16.msra.mxu0 %v15744_v16  ;;  %v11677_v16 = vld [vmem:[%s16589_s3 + $0x1c0] sm:$0xff] }
 0x618   :  { %11601 = vmatpush2.bf16.msra.mxu1 %v15747_v28  ;;  %11561 = vmatprep.subr.bf16.mxu0 %v15752_v48  ;;  %v11641_v28 = vld [vmem:[%s16589_s3 + $0xa0] sm:$0xff] }
 0x619   :  { %11602 = vmatprep.subr.bf16.mxu1 %v15755_v6  ;;  %v11661_v48 = vld [vmem:[%s16589_s3 + $0x140] sm:$0xff] }
 0x61a   :  { %v11625_v6 = vld [vmem:[%s16589_s3 + $0x20] sm:$0xff] }
 0x61b   :  { %11562 = vmatpush2.bf16.msra.mxu0 %v15750_v9  ;;  %v11676_v9 = vld [vmem:[%s16589_s3 + $0x1b8] sm:$0xff] }
 0x61c   :  { %11603 = vmatpush2.bf16.msra.mxu1 %v15753_v1  ;;  %11563 = vmatprep.subr.bf16.mxu0 %v15758_v22  ;;  %v11640_v1 = vld [vmem:[%s16589_s3 + $0x98] sm:$0xff] }
 0x61d   :  { %11604 = vmatprep.subr.bf16.mxu1 %v15761_v32  ;;  %v11660_v22 = vld [vmem:[%s16589_s3 + $0x138] sm:$0xff] }
 0x61e   :  { %v11624_v32 = vld [vmem:[%s16589_s3 + $0x18] sm:$0xff] }
 0x61f   :  { %11564 = vmatpush2.bf16.msra.mxu0 %v15756_v30  ;;  %v11675_v30 = vld [vmem:[%s16589_s3 + $0x1b0] sm:$0xff] }
 0x620   :  { %11605 = vmatpush2.bf16.msra.mxu1 %v15759_v40  ;;  %11565 = vmatprep.subr.bf16.mxu0 %v15764_v26  ;;  %v11639_v40 = vld [vmem:[%s16589_s3 + $0x90] sm:$0xff] }
 0x621   :  { %11606 = vmatprep.subr.bf16.mxu1 %v15767_v63  ;;  %v11659_v26 = vld [vmem:[%s16589_s3 + $0x130] sm:$0xff] }
 0x622   :  { %v11623_v63 = vld [vmem:[%s16589_s3 + $0x10] sm:$0xff] }
 0x623   :  { %11566 = vmatpush2.bf16.msra.mxu0 %v15762_v47  ;;  %v11674_v47 = vld [vmem:[%s16589_s3 + $0x1a8] sm:$0xff] }
 0x624   :  { %11607 = vmatpush2.bf16.msra.mxu1 %v15765_v41  ;;  %13382 = vmatprep.subr.mxu0 %v11652_v45  ;;  %v11638_v41 = vld [vmem:[%s16589_s3 + $0x88] sm:$0xff] }
 0x625   :  { %13417 = vmatprep.subr.mxu1 %v11684_v52  ;;  %v11658_v45 = vld [vmem:[%s16589_s3 + $0x128] sm:$0xff] }
 0x626   :  { %v11323_v11 = vpop.f32.mrf.mxu0  ;;  %11568 = vmatmul.mubr.bf16.vlgmr.msra.gmra.mxu0 %v16253_v37  ;;  %v11634_v37 = vld [vmem:[%s16589_s3 + $0x68] sm:$0xff] }
 0x627   :  { %v11364_v5 = vpop.f32.mrf.mxu1  ;;  %11609 = vmatmul.mubr.bf16.vlgmr.msra.gmra.mxu1 %v16257_v31  ;;  %v11324_v3 = vadd.f32 %v11323_v11, %v16372_v33  ;;  %13383 = vmatpush3.msra.mxu0 %v11636_v36  ;;  %v11649_v33 = vld [vmem:[%s16589_s3 + $0xe0] sm:$0xff]  ;;  %v11622_v36 = vld [vmem:[%s16589_s3 + $0x8] sm:$0xff]  ;;  %v11617_v11 = vmax.f32 %v16292_v49, 0.0  ;;  %v11672_v49 = vld [vmem:[%s16589_s3 + $0x198] sm:$0xff] }
 0x628   :  { %11750 = vmatprep.mubr.f32.mxu0 %v11618_v17  ;;  %v11325_v12 = vpop.f32.mrf.mxu0  ;;  %13384 = vmatprep.subr.mxu0 %v11651_v23  ;;  %v11637_v17 = vld [vmem:[%s16589_s3 + $0x80] sm:$0xff]  ;;  %v11654_v52 = vld [vmem:[%s16589_s3 + $0x108] sm:$0xff] }
 0x629   :  { %v11366_v46 = vpop.f32.mrf.mxu1  ;;  %v16401_v31 = vadd.f32 %v11364_v5, %v11324_v3  ;;  %v11326_v19 = vadd.f32 %v11325_v12, %v16377_v42  ;;  %13385 = vmatpush3.msra.mxu0 %v11635_v10  ;;  %v11632_v42 = vld [vmem:[%s16589_s3 + $0x58] sm:$0xff]  ;;  %13418 = vmatpush3.msra.mxu1 %v11668_v60  ;;  %v11621_v23 = vld [vmem:[%s16589_s3] sm:$0xff] }
 0x62a   :  { %v11327_v4 = vpop.f32.mrf.mxu0  ;;  %13386 = vmatprep.subr.mxu0 %v11650_v18  ;;  %13419 = vmatprep.subr.mxu1 %v11683_v0  ;;  %v11673_v5 = vld [vmem:[%s16589_s3 + $0x1a0] sm:$0xff] }
 0x62b   :  { %v11368_v50 = vpop.f32.mrf.mxu1  ;;  %v16410_v39 = vadd.f32 %v11366_v46, %v11326_v19  ;;  %13387 = vmatpush3.msra.mxu0 %v11634_v37  ;;  %13420 = vmatpush3.msra.mxu1 %v11667_v43  ;;  %v11657_v18 = vld [vmem:[%s16589_s3 + $0x120] sm:$0xff]  ;;  %v11656_v19 = vld [vmem:[%s16589_s3 + $0x118] sm:$0xff] }
 0x62c   :  { %v11328_v44 = vpop.f32.mrf.mxu0  ;;  %13388 = vmatprep.subr.mxu0 %v11649_v33  ;;  %13421 = vmatprep.subr.mxu1 %v11682_v58  ;;  %v11669_v60 = vld [vmem:[%s16589_s3 + $0x180] sm:$0xff] }
 0x62d   :  { %v11369_v62 = vpop.f32.mrf.mxu1  ;;  %13389 = vmatpush3.msra.mxu0 %v11633_v14  ;;  %13422 = vmatpush3.msra.mxu1 %v11666_v51  ;;  %v11670_v44 = vld [vmem:[%s16589_s3 + $0x188] sm:$0xff]  ;;  %v11653_v0 = vld [vmem:[%s16589_s3 + $0x100] sm:$0xff] }
 0x62e   :  { %13390 = vmatprep.subr.mxu0 %v11648_v61  ;;  %13423 = vmatprep.subr.mxu1 %v11681_v8  ;;  %v11655_v61 = vld [vmem:[%s16589_s3 + $0x110] sm:$0xff] }
 0x62f   :  { %13391 = vmatpush3.msra.mxu0 %v11632_v42  ;;  %13424 = vmatpush3.msra.mxu1 %v11665_v59 }
 0x630   :  { %13392 = vmatprep.subr.mxu0 %v11647_v57  ;;  %13425 = vmatprep.subr.mxu1 %v11680_v13 }
 0x631   :  { %13393 = vmatpush3.msra.mxu0 %v11631_v2  ;;  %13426 = vmatpush3.msra.mxu1 %v11664_v20 }
 0x632   :  { %13394 = vmatprep.subr.mxu0 %v11646_v25  ;;  %13427 = vmatprep.subr.mxu1 %v11679_v29 }
 0x633   :  { %13395 = vmatpush3.msra.mxu0 %v11630_v56  ;;  %13428 = vmatpush3.msra.mxu1 %v11663_v53 }
 0x634   :  { %13396 = vmatprep.subr.mxu0 %v11645_v54  ;;  %13429 = vmatprep.subr.mxu1 %v11678_v27 }
 0x635   :  { %13397 = vmatpush3.msra.mxu0 %v11629_v38  ;;  %13430 = vmatpush3.msra.mxu1 %v11662_v7 }
 0x636   :  { %13398 = vmatprep.subr.mxu0 %v11644_v15  ;;  %13431 = vmatprep.subr.mxu1 %v11677_v16 }
 0x637   :  { %13399 = vmatpush3.msra.mxu0 %v11628_v24  ;;  %13432 = vmatpush3.msra.mxu1 %v11661_v48 }
 0x638   :  { %13400 = vmatprep.subr.mxu0 %v11643_v21  ;;  %13433 = vmatprep.subr.mxu1 %v11676_v9 }
 0x639   :  { %13401 = vmatpush3.msra.mxu0 %v11627_v55  ;;  %13434 = vmatpush3.msra.mxu1 %v11660_v22  ;;  %v11685_v22 = vld [vmem:[#allocation6] sm:$0x1] }
 0x63a   :  { %13402 = vmatprep.subr.mxu0 %v11642_v35  ;;  %13435 = vmatprep.subr.mxu1 %v11675_v30 }
 0x63b   :  { %13403 = vmatpush3.msra.mxu0 %v11626_v34  ;;  %13436 = vmatpush3.msra.mxu1 %v11659_v26 }
 0x63c   :  { %13404 = vmatprep.subr.mxu0 %v11641_v28  ;;  %13437 = vmatprep.subr.mxu1 %v11674_v47 }
 0x63d   :  { %13405 = vmatpush3.msra.mxu0 %v11625_v6  ;;  %13438 = vmatpush3.msra.mxu1 %v11658_v45 }
 0x63e   :  { %13406 = vmatprep.subr.mxu0 %v11640_v1  ;;  %13439 = vmatprep.subr.mxu1 %v11673_v5 }
 0x63f   :  { %13407 = vmatpush3.msra.mxu0 %v11624_v32  ;;  %13440 = vmatpush3.msra.mxu1 %v11657_v18 }
 0x640   :  { %13408 = vmatprep.subr.mxu0 %v11639_v40  ;;  %13441 = vmatprep.subr.mxu1 %v11672_v49 }
 0x641   :  { %13409 = vmatpush3.msra.mxu0 %v11623_v63  ;;  %13442 = vmatpush3.msra.mxu1 %v11656_v19 }
 0x642   :  { %13410 = vmatprep.subr.mxu0 %v11638_v41 }
 0x643   :  { %13411 = vmatpush3.msra.mxu0 %v11622_v36 }
 0x644   :  { %13412 = vmatprep.subr.mxu0 %v11637_v17 }
 0x645   :  { %13413 = vmatpush3.msra.mxu0 %v11621_v23 }
 0x646   :  { %11751 = vmatmul.mubr.f32.vlgmr.msra.gmra.mxu0 %v11617_v11 }
 0x666   :  { %v11405_v10 = vpop.f32.mrf.mxu0 }
 0x667   :  { %v11446_v3 = vpop.f32.mrf.mxu1  ;;  %v11406_v12 = vadd.f32 %v11405_v10, %v16401_v31  ;;  %v11671_v31 = vld [vmem:[%s16589_s3 + $0x190] sm:$0xff] }
 0x668   :  { %v11407_v46 = vpop.f32.mrf.mxu0  ;;  %13443 = vmatprep.subr.mxu1 %v11671_v31 }
 0x669   :  { %v11448_v37 = vpop.f32.mrf.mxu1  ;;  %v11447_v33 = vadd.f32 %v11446_v3, %v11406_v12  ;;  %v11408_v4 = vadd.f32 %v11407_v46, %v16410_v39  ;;  %13444 = vmatpush3.msra.mxu1 %v11655_v61 }
 0x66a   :  { %v11409_v50 = vpop.f32.mrf.mxu0  ;;  %13445 = vmatprep.subr.mxu1 %v11670_v44 }
 0x66b   :  { %v11450_v14 = vpop.f32.mrf.mxu1  ;;  %v11449_v42 = vadd.f32 %v11448_v37, %v11408_v4  ;;  %13446 = vmatpush3.msra.mxu1 %v11654_v52 }
 0x66c   :  { %v11410_v62 = vpop.f32.mrf.mxu0  ;;  %13447 = vmatprep.subr.mxu1 %v11669_v60 }
 0x66d   :  { %v11451_v39 = vpop.f32.mrf.mxu1  ;;  %13448 = vmatpush3.msra.mxu1 %v11653_v0 }
 0x6a6   :  { %v11487_v57 = vpop.f32.mrf.mxu0 }
 0x6a7   :  { %v11528_v43 = vpop.f32.mrf.mxu1  ;;  %v11488_v2 = vadd.f32 %v11487_v57, %v11447_v33 }
 0x6a8   :  { %v11489_v58 = vpop.f32.mrf.mxu0 }
 0x6a9   :  { %v11530_v25 = vpop.f32.mrf.mxu1  ;;  %v11529_v51 = vadd.f32 %v11528_v43, %v11488_v2  ;;  %v11490_v38 = vadd.f32 %v11489_v58, %v11449_v42 }
 0x6aa   :  { %v11491_v56 = vpop.f32.mrf.mxu0 }
 0x6ab   :  { %v11532_v8 = vpop.f32.mrf.mxu1  ;;  %v11531_v20 = vadd.f32 %v11530_v25, %v11490_v38 }
 0x6ac   :  { %v11492_v54 = vpop.f32.mrf.mxu0 }
 0x6ad   :  { %v11533_v59 = vpop.f32.mrf.mxu1 }
 0x6e6   :  { %v11569_v13 = vpop.f32.mrf.mxu0 }
 0x6e7   :  { %v11610_v15 = vpop.f32.mrf.mxu1  ;;  %v11570_v24 = vadd.f32 %v11569_v13, %v11529_v51 }
 0x6e8   :  { %v11571_v29 = vpop.f32.mrf.mxu0 }
 0x6e9   :  { %v11612_v21 = vpop.f32.mrf.mxu1  ;;  %v11572_v53 = vadd.f32 %v11571_v29, %v11531_v20  ;;  %v11611_v55 = vadd.f32 %v11610_v15, %v11570_v24 }
 0x6ea   :  { %v11573_v27 = vpop.f32.mrf.mxu0 }
 0x6eb   :  { %v11614_v35 = vpop.f32.mrf.mxu1  ;;  %v11613_v7 = vadd.f32 %v11612_v21, %v11572_v53  ;;  %v11619_v48 = vmax.f32 %v11611_v55, 0.0 }
 0x6ec   :  { %v11574_v34 = vpop.f32.mrf.mxu0 }
 0x6ed   :  { %v11615_v16 = vpop.f32.mrf.mxu1  ;;  %v11620_v28 = vmax.f32 %v11613_v7, 0.0 }
 0x6ef   :  { %11820 = vmatprep.mubr.f32.mxu1 %v11620_v28 }
 0x6f0   :  { %11821 = vmatmul.mubr.f32.vlgmr.msra.gmra.mxu1 %v11619_v48 }
 0x706   :  { %v13414_v6 = vpop.f32.mrf.mxu0 }
 0x708   :  { %v13415_v9 = vpop.f32.mrf.mxu0 }
 0x709   :  { %v13416_v1 = vadd.f32 %v13415_v9, %v13414_v6 }
 0x70b   :  { %v11753_v40 = vadd.f32 %v13416_v1, %v11685_v22 }
 0x7b0   :  { %v13449_v32 = vpop.f32.mrf.mxu1 }
 0x7b2   :  { %v13450_v30 = vpop.f32.mrf.mxu1 }
 0x7b3   :  { %v13451_v26 = vadd.f32 %v13450_v30, %v13449_v32 }
 0x7b5   :  { %v11823_v63 = vadd.f32 %v13451_v26, %v11753_v40 }
 0x7b7   :  { %v11826_v47 = vmax.f32 %v11823_v63, 0.0 }
 0x7b9   :  { %v11828_v41 = vsel %vm11827_vm0, %v11826_v47, -inf }
 0x7ba   :  { %11829 = vmax.xlane.f32.xlu0 %v11828_v41 }
 0x843   :  { %v11830_v45 = vpop.xlane.xlu0 %11829 }
 0x844   :  { %v11831_v36 = vsub.f32 %v11826_v47, %v11830_v45 }
 0x846   :  { %v11832_v17 = vmul.f32 1.442695, %v11831_v36 }
 0x848   :  { %15768 = vpow2.f32 %v11832_v17 }
 0x855   :  { %v15769_v23 = vpop.eup %15768 }
 0x856   :  { %v11834_v11 = vsel %vm11827_vm0, %v15769_v23, 0.0 }
 0x857   :  { %11835 = vadd.xlane.f32.xlu0 %v11834_v11 }
 0x8e0   :  { %v11836_v5 = vpop.xlane.xlu0 %11835 }
 0x8e1   :  { %15770 = vrcp.f32 %v11836_v5 }
 0x8ee   :  { %v15771_v10 = vpop.eup %15770 }
 0x8ef   :  { %v11838_v3 = vmul.f32 %v15771_v10, %v15769_v23 }
 0x8f1   :  { %11839 = vst.msk [vmem:[%s16591_s5] sm:$0x1] %vm11827_vm0, %v11838_v3 }
 0x8f2   :  { %11844 = vsyncpa [#allocation3], 1 }
 0x8f3   :  { %11845 = vsyncpa [#allocation5], 1 }

</bundles_post_ra>
